<compile_context>
chip_gen: v6e
topology: v6e:2x2x1
jax: 0.10.0
libtpu: 0.0.40
codegen_flags: <defaults>
</compile_context>

<pallas_src>
import numpy as np
import jax
import jax.numpy as jnp
from jax.experimental import pallas as pl
from jax.experimental.pallas import tpu as pltpu

H = W = 8
HW = H * W                  # 64
C1, C2 = 16, 32             # conv channel counts
HIDDEN, NCLS = 256, 3       # fc sizes
KH = KW = 3                 # conv kernel
NCLS_PAD = 128              # lane-dense padded class dim


def _shift_matrices():
    """GT[k][q, p] = 1 iff output pixel p reads input pixel q for 3x3 tap k.

    k = dy*3 + dx; output (h, w) reads input (h + dy - 1, w + dx - 1) with
    zero padding.  Flattening is row-major h*8 + w (matches NCHW).
    """
    gt = np.zeros((KH * KW, HW, HW), np.float32)
    for dy in range(KH):
        for dx in range(KW):
            k = dy * KW + dx
            for h in range(H):
                for w in range(W):
                    hh, ww = h + dy - 1, w + dx - 1
                    if 0 <= hh < H and 0 <= ww < W:
                        gt[k, hh * W + ww, h * W + w] = 1.0
    return gt


_GT = _shift_matrices()


def chess_cnn_kernel(x_ref, m1_ref, b1_ref, m2_ref, b2_ref,
                     wf1_ref, bf1_ref, wf2_ref, bf2_ref, out_ref):
    # x_ref: (TB, 64) -- TB boards, each an 8x8 board flattened row-major.
    x = x_ref[...]

    # conv1 (fused): (TB, 64) @ (64, 1024) -> (TB, C1*64), bias + ReLU
    h1 = jnp.maximum(
        jnp.dot(x, m1_ref[...], preferred_element_type=jnp.float32)
        + b1_ref[...], 0.0)

    # conv2 (fused): (TB, 1024) @ (1024, 2048) -> (TB, C2*64), bias + ReLU
    h2 = jnp.maximum(
        jnp.dot(h1, m2_ref[...], preferred_element_type=jnp.float32)
        + b2_ref[...], 0.0)

    # fc1: (TB, 2048) @ (2048, 256), bias + ReLU  (h2 is already NCHW-flat)
    z1 = jnp.maximum(
        jnp.dot(h2, wf1_ref[...], preferred_element_type=jnp.float32)
        + bf1_ref[...], 0.0)

    # fc2: (TB, 256) @ (256, 128-padded)  -- lane-dense, unmasked store
    out_ref[...] = (jnp.dot(z1, wf2_ref[...], preferred_element_type=jnp.float32)
                    + bf2_ref[...])


def chess_cnn_forward(x_nchw, params, *, max_tb=512):
    """x_nchw: (B, 1, 8, 8) float32; params in PyTorch shapes."""
    w1, b1, w2, b2, wf1, bf1, wf2, bf2 = params
    B = x_nchw.shape[0]

    def _round_up(a, m):
        return (a + m - 1) // m * m

    # Batch tile: multiple of 8 (sublane), capped so weights + activations
    # stay comfortably inside the per-core VMEM budget (also on v7x's 64 MiB).
    tb = min(max_tb, _round_up(B, 8))
    b_pad = _round_up(B, tb)

    # ---- host glue: inputs -------------------------------------------------
    x2d = x_nchw.reshape(B, HW).astype(jnp.float32)
    if b_pad != B:
        x2d = jnp.pad(x2d, ((0, b_pad - B), (0, 0)))

    gt = jnp.asarray(_GT)                                       # (9, 64, 64)

    # ---- host glue: fuse conv taps with shift matrices ---------------------
    # M1[q, c*64 + p]        = sum_k w1[c, 0, k] * GT[k][q, p]
    m1 = jnp.einsum('ck,kqp->qcp',
                    w1.reshape(C1, KH * KW), gt).reshape(HW, C1 * HW)
    b1k = jnp.repeat(b1, HW).reshape(1, C1 * HW)
    # M2[c1*64 + q, c2*64 + p] = sum_k w2[c2, c1, k] * GT[k][q, p]
    m2 = jnp.einsum('dck,kqp->cqdp',
                    w2.reshape(C2, C1, KH * KW), gt).reshape(C1 * HW, C2 * HW)
    b2k = jnp.repeat(b2, HW).reshape(1, C2 * HW)

    wf1k = wf1.T                                                # (2048, 256)
    bf1k = bf1.reshape(1, HIDDEN)
    wf2k = jnp.zeros((HIDDEN, NCLS_PAD), jnp.float32).at[:, :NCLS].set(wf2.T)
    bf2k = jnp.zeros((1, NCLS_PAD), jnp.float32).at[:, :NCLS].set(bf2)

    inv = lambda b: (0, 0)   # grid-invariant operands (weights/biases)

    out = pl.pallas_call(
        chess_cnn_kernel,
        out_shape=jax.ShapeDtypeStruct((b_pad, NCLS_PAD), jnp.float32),
        grid_spec=pltpu.PrefetchScalarGridSpec(
            num_scalar_prefetch=0,
            grid=(b_pad // tb,),
            in_specs=[
                pl.BlockSpec((tb, HW), lambda b: (b, 0)),          # x (batch tile)
                pl.BlockSpec((HW, C1 * HW), inv),                  # fused conv1 W
                pl.BlockSpec((1, C1 * HW), inv),                   # conv1 b
                pl.BlockSpec((C1 * HW, C2 * HW), inv),             # fused conv2 W
                pl.BlockSpec((1, C2 * HW), inv),                   # conv2 b
                pl.BlockSpec((C2 * HW, HIDDEN), inv),              # fc1 W
                pl.BlockSpec((1, HIDDEN), inv),                    # fc1 b
                pl.BlockSpec((HIDDEN, NCLS_PAD), inv),             # fc2 W (padded)
                pl.BlockSpec((1, NCLS_PAD), inv),                  # fc2 b (padded)
            ],
            out_specs=pl.BlockSpec((tb, NCLS_PAD), lambda b: (b, 0)),
        ),
        compiler_params=pltpu.CompilerParams(
            dimension_semantics=("parallel",),
            vmem_limit_bytes=48 * 1024 * 1024,
        ),
    )(x2d, m1, b1k, m2, b2k, wf1k, bf1k, wf2k, bf2k)

    return out[:B, :NCLS]


def reference(x_nchw, params):
    """Pure-JAX reference replicating the PyTorch forward (NCHW)."""
    w1, b1, w2, b2, wf1, bf1, wf2, bf2 = params
    dn = ("NCHW", "OIHW", "NCHW")
    y = jax.lax.conv_general_dilated(x_nchw, w1, (1, 1), ((1, 1), (1, 1)),
                                     dimension_numbers=dn)
    y = jax.nn.relu(y + b1[None, :, None, None])
    y = jax.lax.conv_general_dilated(y, w2, (1, 1), ((1, 1), (1, 1)),
                                     dimension_numbers=dn)
    y = jax.nn.relu(y + b2[None, :, None, None])
    y = y.reshape(y.shape[0], -1)
    y = jax.nn.relu(y @ wf1.T + bf1)
    return y @ wf2.T + bf2


if __name__ == "__main__":
    key = jax.random.PRNGKey(0)
    ks = jax.random.split(key, 9)
    B = 2

    x = jax.random.normal(ks[0], (B, 1, H, W), jnp.float32)

    # Deterministic synthetic parameters (PyTorch shapes).
    w1 = jax.random.normal(ks[1], (C1, 1, KH, KW), jnp.float32) * 0.2
    b1 = jax.random.normal(ks[2], (C1,), jnp.float32) * 0.1
    w2 = jax.random.normal(ks[3], (C2, C1, KH, KW), jnp.float32) * 0.1
    b2 = jax.random.normal(ks[4], (C2,), jnp.float32) * 0.1
    wf1 = jax.random.normal(ks[5], (HIDDEN, C2 * HW), jnp.float32) * 0.02
    bf1 = jax.random.normal(ks[6], (HIDDEN,), jnp.float32) * 0.1
    wf2 = jax.random.normal(ks[7], (NCLS, HIDDEN), jnp.float32) * 0.05
    bf2 = jax.random.normal(ks[8], (NCLS,), jnp.float32) * 0.1
    params = (w1, b1, w2, b2, wf1, bf1, wf2, bf2)

    out = jax.block_until_ready(chess_cnn_forward(x, params))
    ref = jax.block_until_ready(reference(x, params))
    np.testing.assert_allclose(np.asarray(out), np.asarray(ref),
                               rtol=1e-4, atol=1e-4)
    print("KERNEL_OK")
</pallas_src>

<mosaic_0001>
module attributes {stable_mosaic.version = 11 : i64} {
  func.func @chess_cnn_kernel(%arg0: i32, %arg1: memref<8x64xf32, #tpu.memory_space<vmem>>, %arg2: memref<64x1024xf32, #tpu.memory_space<vmem>>, %arg3: memref<1x1024xf32, #tpu.memory_space<vmem>>, %arg4: memref<1024x2048xf32, #tpu.memory_space<vmem>>, %arg5: memref<1x2048xf32, #tpu.memory_space<vmem>>, %arg6: memref<2048x256xf32, #tpu.memory_space<vmem>>, %arg7: memref<1x256xf32, #tpu.memory_space<vmem>>, %arg8: memref<256x128xf32, #tpu.memory_space<vmem>>, %arg9: memref<1x128xf32, #tpu.memory_space<vmem>>, %arg10: memref<8x128xf32, #tpu.memory_space<vmem>>) attributes {dimension_semantics = [#tpu.dimension_semantics<parallel>], iteration_bounds = array<i64: 1>, scalar_prefetch = 0 : i64, scratch_operands = 0 : i64, tpu.core_type = #tpu.core_type<tc>, window_params = [{transform_indices = @transform_0, window_bounds = array<i64: 8, 64>}, {pipeline_mode = #tpu.pipeline_mode<synchronous>, transform_indices = @transform_1, window_bounds = array<i64: 64, 1024>}, {pipeline_mode = #tpu.pipeline_mode<synchronous>, transform_indices = @transform_2, window_bounds = array<i64: 1, 1024>}, {pipeline_mode = #tpu.pipeline_mode<synchronous>, transform_indices = @transform_3, window_bounds = array<i64: 1024, 2048>}, {pipeline_mode = #tpu.pipeline_mode<synchronous>, transform_indices = @transform_4, window_bounds = array<i64: 1, 2048>}, {pipeline_mode = #tpu.pipeline_mode<synchronous>, transform_indices = @transform_5, window_bounds = array<i64: 2048, 256>}, {pipeline_mode = #tpu.pipeline_mode<synchronous>, transform_indices = @transform_6, window_bounds = array<i64: 1, 256>}, {pipeline_mode = #tpu.pipeline_mode<synchronous>, transform_indices = @transform_7, window_bounds = array<i64: 256, 128>}, {pipeline_mode = #tpu.pipeline_mode<synchronous>, transform_indices = @transform_8, window_bounds = array<i64: 1, 128>}, {transform_indices = @transform_9, window_bounds = array<i64: 8, 128>}]} {
    %c0 = arith.constant 0 : index
    %c0_0 = arith.constant 0 : index
    %0 = vector.load %arg1[%c0, %c0_0] : memref<8x64xf32, #tpu.memory_space<vmem>>, vector<8x64xf32>
    %c0_1 = arith.constant 0 : index
    %c0_2 = arith.constant 0 : index
    %1 = vector.load %arg2[%c0_1, %c0_2] : memref<64x1024xf32, #tpu.memory_space<vmem>>, vector<64x1024xf32>
    %cst = arith.constant dense<0.000000e+00> : vector<8x1024xf32>
    %2 = tpu.matmul %0, %1, %cst {dimension_numbers = #tpu.dot_dimension_numbers<[1], [0], [0], [1], [0, 0, 1, 1], [], []>} : vector<8x64xf32>, vector<64x1024xf32>, vector<8x1024xf32> -> vector<8x1024xf32>
    %c0_3 = arith.constant 0 : index
    %c0_4 = arith.constant 0 : index
    %3 = vector.load %arg3[%c0_3, %c0_4] : memref<1x1024xf32, #tpu.memory_space<vmem>>, vector<1x1024xf32>
    %4 = vector.broadcast %3 : vector<1x1024xf32> to vector<8x1024xf32>
    %5 = arith.addf %2, %4 : vector<8x1024xf32>
    %cst_5 = arith.constant 0.000000e+00 : f32
    %6 = vector.broadcast %cst_5 : f32 to vector<8x1024xf32>
    %7 = arith.maximumf %5, %6 : vector<8x1024xf32>
    %c0_6 = arith.constant 0 : index
    %c0_7 = arith.constant 0 : index
    %8 = vector.load %arg4[%c0_6, %c0_7] : memref<1024x2048xf32, #tpu.memory_space<vmem>>, vector<1024x2048xf32>
    %cst_8 = arith.constant dense<0.000000e+00> : vector<8x2048xf32>
    %9 = tpu.matmul %7, %8, %cst_8 {dimension_numbers = #tpu.dot_dimension_numbers<[1], [0], [0], [1], [0, 0, 1, 1], [], []>} : vector<8x1024xf32>, vector<1024x2048xf32>, vector<8x2048xf32> -> vector<8x2048xf32>
    %c0_9 = arith.constant 0 : index
    %c0_10 = arith.constant 0 : index
    %10 = vector.load %arg5[%c0_9, %c0_10] : memref<1x2048xf32, #tpu.memory_space<vmem>>, vector<1x2048xf32>
    %11 = vector.broadcast %10 : vector<1x2048xf32> to vector<8x2048xf32>
    %12 = arith.addf %9, %11 : vector<8x2048xf32>
    %cst_11 = arith.constant 0.000000e+00 : f32
    %13 = vector.broadcast %cst_11 : f32 to vector<8x2048xf32>
    %14 = arith.maximumf %12, %13 : vector<8x2048xf32>
    %c0_12 = arith.constant 0 : index
    %c0_13 = arith.constant 0 : index
    %15 = vector.load %arg6[%c0_12, %c0_13] : memref<2048x256xf32, #tpu.memory_space<vmem>>, vector<2048x256xf32>
    %cst_14 = arith.constant dense<0.000000e+00> : vector<8x256xf32>
    %16 = tpu.matmul %14, %15, %cst_14 {dimension_numbers = #tpu.dot_dimension_numbers<[1], [0], [0], [1], [0, 0, 1, 1], [], []>} : vector<8x2048xf32>, vector<2048x256xf32>, vector<8x256xf32> -> vector<8x256xf32>
    %c0_15 = arith.constant 0 : index
    %c0_16 = arith.constant 0 : index
    %17 = vector.load %arg7[%c0_15, %c0_16] : memref<1x256xf32, #tpu.memory_space<vmem>>, vector<1x256xf32>
    %18 = vector.broadcast %17 : vector<1x256xf32> to vector<8x256xf32>
    %19 = arith.addf %16, %18 : vector<8x256xf32>
    %cst_17 = arith.constant 0.000000e+00 : f32
    %20 = vector.broadcast %cst_17 : f32 to vector<8x256xf32>
    %21 = arith.maximumf %19, %20 : vector<8x256xf32>
    %c0_18 = arith.constant 0 : index
    %c0_19 = arith.constant 0 : index
    %22 = vector.load %arg8[%c0_18, %c0_19] : memref<256x128xf32, #tpu.memory_space<vmem>>, vector<256x128xf32>
    %cst_20 = arith.constant dense<0.000000e+00> : vector<8x128xf32>
    %23 = tpu.matmul %21, %22, %cst_20 {dimension_numbers = #tpu.dot_dimension_numbers<[1], [0], [0], [1], [0, 0, 1, 1], [], []>} : vector<8x256xf32>, vector<256x128xf32>, vector<8x128xf32> -> vector<8x128xf32>
    %c0_21 = arith.constant 0 : index
    %c0_22 = arith.constant 0 : index
    %24 = vector.load %arg9[%c0_21, %c0_22] : memref<1x128xf32, #tpu.memory_space<vmem>>, vector<1x128xf32>
    %25 = vector.broadcast %24 : vector<1x128xf32> to vector<8x128xf32>
    %26 = arith.addf %23, %25 : vector<8x128xf32>
    %c0_23 = arith.constant 0 : index
    %c0_24 = arith.constant 0 : index
    %27 = vector.load %arg10[%c0_23, %c0_24] : memref<8x128xf32, #tpu.memory_space<vmem>>, vector<8x128xf32>
    tpu.vector_store %arg10[%c0_23, %c0_24], %26 {strides = array<i32>} : memref<8x128xf32, #tpu.memory_space<vmem>>, vector<8x128xf32>,
    return
  }
  func.func @transform_0(%arg0: i32) -> (i32, i32) {
    %c0_i32 = arith.constant 0 : i32
    %c0_i32_0 = arith.constant 0 : i32
    return %arg0, %c0_i32 : i32, i32
  }
  func.func @transform_1(%arg0: i32) -> (i32, i32) {
    %c0_i32 = arith.constant 0 : i32
    %c0_i32_0 = arith.constant 0 : i32
    %c0_i32_1 = arith.constant 0 : i32
    return %c0_i32, %c0_i32_0 : i32, i32
  }
  func.func @transform_2(%arg0: i32) -> (i32, i32) {
    %c0_i32 = arith.constant 0 : i32
    %c0_i32_0 = arith.constant 0 : i32
    %c0_i32_1 = arith.constant 0 : i32
    return %c0_i32, %c0_i32_0 : i32, i32
  }
  func.func @transform_3(%arg0: i32) -> (i32, i32) {
    %c0_i32 = arith.constant 0 : i32
    %c0_i32_0 = arith.constant 0 : i32
    %c0_i32_1 = arith.constant 0 : i32
    return %c0_i32, %c0_i32_0 : i32, i32
  }
  func.func @transform_4(%arg0: i32) -> (i32, i32) {
    %c0_i32 = arith.constant 0 : i32
    %c0_i32_0 = arith.constant 0 : i32
    %c0_i32_1 = arith.constant 0 : i32
    return %c0_i32, %c0_i32_0 : i32, i32
  }
  func.func @transform_5(%arg0: i32) -> (i32, i32) {
    %c0_i32 = arith.constant 0 : i32
    %c0_i32_0 = arith.constant 0 : i32
    %c0_i32_1 = arith.constant 0 : i32
    return %c0_i32, %c0_i32_0 : i32, i32
  }
  func.func @transform_6(%arg0: i32) -> (i32, i32) {
    %c0_i32 = arith.constant 0 : i32
    %c0_i32_0 = arith.constant 0 : i32
    %c0_i32_1 = arith.constant 0 : i32
    return %c0_i32, %c0_i32_0 : i32, i32
  }
  func.func @transform_7(%arg0: i32) -> (i32, i32) {
    %c0_i32 = arith.constant 0 : i32
    %c0_i32_0 = arith.constant 0 : i32
    %c0_i32_1 = arith.constant 0 : i32
    return %c0_i32, %c0_i32_0 : i32, i32
  }
  func.func @transform_8(%arg0: i32) -> (i32, i32) {
    %c0_i32 = arith.constant 0 : i32
    %c0_i32_0 = arith.constant 0 : i32
    %c0_i32_1 = arith.constant 0 : i32
    return %c0_i32, %c0_i32_0 : i32, i32
  }
  func.func @transform_9(%arg0: i32) -> (i32, i32) {
    %c0_i32 = arith.constant 0 : i32
    %c0_i32_0 = arith.constant 0 : i32
    return %arg0, %c0_i32 : i32, i32
  }
}

</mosaic_0001>

<bundles_post_ra>
// kernel: tpu_custom_call.1
= control target key start
LH: loop header
LB: loop body
LE: loop exit
PB: predicated region body
PF: predicated region fallthrough
CT: control target
= control target key end

     0   :  { %14 = vsyncpa [#allocation3], 0  ;;  %s6894_s0 = inlined_call_operand.hbm [shape: f32[8,64], index: 0, kind: input, shape index: {}]   ;;  %s6895_s1 = inlined_call_operand.hbm [shape: f32[64,1024], index: 1, kind: input, shape index: {}]   ;;  %s6896_s2 = inlined_call_operand.hbm [shape: f32[1,1024], index: 2, kind: input, shape index: {}]   ;;  %s6897_s3 = inlined_call_operand.hbm [shape: f32[1024,2048], index: 3, kind: input, shape index: {}]   ;;  %s6898_s4 = inlined_call_operand.hbm [shape: f32[1,2048], index: 4, kind: input, shape index: {}]   ;;  %s6899_s5 = inlined_call_operand.hbm [shape: f32[2048,256], index: 5, kind: input, shape index: {}]   ;;  %s6900_s6 = inlined_call_operand.hbm [shape: f32[1,256], index: 6, kind: input, shape index: {}]   ;;  %s6901_s7 = inlined_call_operand.hbm [shape: f32[256,128], index: 7, kind: input, shape index: {}]   ;;  %s6902_s8 = inlined_call_operand.hbm [shape: f32[1,128], index: 8, kind: input, shape index: {}]   ;;  %s6903_s9 = inlined_call_operand.hbm [shape: f32[8,128], index: 9, kind: output, shape index: {}]  }
   0x1   :  { %15 = vsyncpa [#allocation6], 0 }
   0x2   :  { %16 = vsyncpa [#allocation9], 0 }
   0x3   :  { %17 = vsyncpa [#allocation12], 0 }
   0x4   :  { %18 = vsyncpa [#allocation15], 0 }
   0x5   :  { %19 = vsyncpa [#allocation4], 0  ;;  %s6469_s30 = smov [#allocation5]  }
   0x6   :  { %s35_s10 = sshll.u32 %s6469_s30, 4  ;;  %s36_s10 = int_to_ptr.vmem [resolvable:$true] %s35_s10 }
   0x7   :  { %s6265_s11 = scalar_lea.vmem %s36_s10, 8192  ;;  %p6270_p1 = scmp.lt.s32.totalorder %s36_s10, %s36_s10 }
   0x8   :  { %p6266_p0 = scmp.ne.s32.totalorder %s36_s10, %s6265_s11  ;;  %p6271_p2 = scmp.lt.s32.totalorder %s6265_s11, %s6265_s11 }
   0xa   :  { %p6272_p3 = por %p6271_p2, %p6270_p1 }
   0xc   :  { %p6273_p4 = pnand %p6272_p3, %p6266_p0 }
   0xe   :  { %6276 = shalt.err (!%p6273_p4)
}
   0xf   :  { %s6470_s12 = smov 1024   ;;  %s6471_s13 = smov 64  }
  0x10   :  { %41 = dma.hbm_to_vmem [thread:$0]  %s6895_s1, 8192, %s36_s10, [#allocation6], %s6470_s12, %s6470_s12, %s6471_s13  }
  0x11   :  { %s6472_s16 = smov [#allocation8]  }
  0x12   :  { %s57_s17 = sshll.u32 %s6472_s16, 4  ;;  %s58_s17 = int_to_ptr.vmem [resolvable:$true] %s57_s17 }
  0x13   :  { %s6285_s18 = scalar_lea.vmem %s58_s17, 262144  ;;  %p6290_p6 = scmp.lt.s32.totalorder %s58_s17, %s58_s17 }
  0x14   :  { %p6286_p5 = scmp.ne.s32.totalorder %s58_s17, %s6285_s18  ;;  %p6291_p7 = scmp.lt.s32.totalorder %s6285_s18, %s6285_s18 }
  0x16   :  { %p6292_p8 = por %p6291_p7, %p6290_p6 }
  0x18   :  { %p6293_p9 = pnand %p6292_p8, %p6286_p5 }
  0x1a   :  { %6296 = shalt.err (!%p6293_p9)
}
  0x1b   :  { %s6473_s19 = smov 2048   ;;  %s6474_s20 = smov 128  }
  0x1c   :  { %63 = dma.hbm_to_vmem [thread:$0]  %s6897_s3, 262144, %s58_s17, [#allocation9], %s6473_s19, %s6473_s19, %s6474_s20  }
  0x1d   :  { %s6475_s23 = smov [#allocation11]  }
  0x1e   :  { %s79_s24 = sshll.u32 %s6475_s23, 4  ;;  %s80_s24 = int_to_ptr.vmem [resolvable:$true] %s79_s24 }
  0x1f   :  { %s6305_s1 = scalar_lea.vmem %s80_s24, 65536  ;;  %p6310_p11 = scmp.lt.s32.totalorder %s80_s24, %s80_s24 }
  0x20   :  { %p6306_p10 = scmp.ne.s32.totalorder %s80_s24, %s6305_s1  ;;  %p6311_p12 = scmp.lt.s32.totalorder %s6305_s1, %s6305_s1 }
  0x22   :  { %p6312_p13 = por %p6311_p12, %p6310_p11 }
  0x24   :  { %p6313_p0 = pnand %p6312_p13, %p6306_p10 }
  0x26   :  { %6316 = shalt.err (!%p6313_p0)
}
  0x27   :  { %s6476_s25 = smov 256   ;;  %s6477_s26 = smov 16  }
  0x28   :  { %85 = dma.hbm_to_vmem [thread:$0]  %s6899_s5, 65536, %s80_s24, [#allocation12], %s6476_s25, %s6476_s25, %s6477_s26  }
  0x29   :  { %s6478_s29 = smov [#allocation14]  }
  0x2a   :  { %s101_s30 = sshll.u32 %s6478_s29, 4  ;;  %s102_s30 = int_to_ptr.vmem [resolvable:$true] %s101_s30 }
  0x2b   :  { %s6325_s3 = scalar_lea.vmem %s102_s30, 4096  ;;  %p6330_p2 = scmp.lt.s32.totalorder %s102_s30, %s102_s30 }
  0x2c   :  { %p6326_p1 = scmp.ne.s32.totalorder %s102_s30, %s6325_s3  ;;  %p6331_p3 = scmp.lt.s32.totalorder %s6325_s3, %s6325_s3 }
  0x2e   :  { %p6332_p4 = por %p6331_p3, %p6330_p2 }
  0x30   :  { %p6333_p5 = pnand %p6332_p4, %p6326_p1 }
  0x32   :  { %6336 = shalt.err (!%p6333_p5)
}
  0x33   :  { %s6479_s10 = smov 8   ;;  %s6480_s13 = smov [#allocation2]  }
  0x34   :  { %107 = dma.hbm_to_vmem [thread:$0]  %s6901_s7, 4096, %s102_s30, [#allocation15], %s6474_s20, %s6474_s20, %s6479_s10  }
  0x35   :  { %s26_s14 = sshll.u32 %s6480_s13, 4  ;;  %s6481_s15 = smov [#allocation7]   ;;  %s27_s14 = int_to_ptr.vmem [resolvable:$true] %s26_s14 }
  0x36   :  { %s48_s5 = sshll.u32 %s6481_s15, 4  ;;  %s6345_s16 = scalar_lea.vmem %s27_s14, 128  ;;  %s49_s5 = int_to_ptr.vmem [resolvable:$true] %s48_s5 }
  0x37   :  { %p6346_p6 = scmp.ne.s32.totalorder %s27_s14, %s6345_s16  ;;  %p6350_p7 = scmp.lt.s32.totalorder %s27_s14, %s27_s14 }
  0x38   :  { %p6351_p8 = scmp.lt.s32.totalorder %s6345_s16, %s6345_s16 }
  0x3a   :  { %p6352_p9 = por %p6351_p8, %p6350_p7 }
  0x3c   :  { %p6353_p10 = pnand %p6352_p9, %p6346_p6 }
  0x3e   :  { %6356 = shalt.err (!%p6353_p10)
}
  0x3f   :  { %29 = dma.hbm_to_vmem [thread:$0]  %s6894_s0, 128, %s27_s14, [#allocation3]  }
  0x40   :  { %s6365_s19 = scalar_lea.vmem %s49_s5, 128  ;;  %p6370_p12 = scmp.lt.s32.totalorder %s49_s5, %s49_s5 }
  0x41   :  { %p6366_p11 = scmp.ne.s32.totalorder %s49_s5, %s6365_s19  ;;  %p6371_p13 = scmp.lt.s32.totalorder %s6365_s19, %s6365_s19 }
  0x43   :  { %p6372_p0 = por %p6371_p13, %p6370_p12 }
  0x45   :  { %p6373_p1 = pnand %p6372_p0, %p6366_p11 }
  0x47   :  { %6376 = shalt.err (!%p6373_p1)
}
  0x48   :  { %51 = dma.hbm_to_vmem [thread:$0]  %s6896_s2, 128, %s49_s5, [#allocation6]  }
  0x49   :  { %s6482_s21 = smov [#allocation10]   ;;  %s6483_s23 = smov [#allocation13]  }
  0x4a   :  { %s70_s22 = sshll.u32 %s6482_s21, 4  ;;  %s92_s24 = sshll.u32 %s6483_s23, 4  ;;  %s71_s22 = int_to_ptr.vmem [resolvable:$true] %s70_s22  ;;  %s93_s24 = int_to_ptr.vmem [resolvable:$true] %s92_s24 }
  0x4b   :  { %s6385_s1 = scalar_lea.vmem %s71_s22, 256  ;;  %p6390_p3 = scmp.lt.s32.totalorder %s71_s22, %s71_s22 }
  0x4c   :  { %p6386_p2 = scmp.ne.s32.totalorder %s71_s22, %s6385_s1  ;;  %p6391_p4 = scmp.lt.s32.totalorder %s6385_s1, %s6385_s1 }
  0x4e   :  { %p6392_p5 = por %p6391_p4, %p6390_p3 }
  0x50   :  { %p6393_p6 = pnand %p6392_p5, %p6386_p2 }
  0x52   :  { %6396 = shalt.err (!%p6393_p6)
}
  0x53   :  { %73 = dma.hbm_to_vmem [thread:$0]  %s6898_s4, 256, %s71_s22, [#allocation9]  }
  0x54   :  { %s6405_s26 = scalar_lea.vmem %s93_s24, 32  ;;  %p6410_p8 = scmp.lt.s32.totalorder %s93_s24, %s93_s24 }
  0x55   :  { %p6406_p7 = scmp.ne.s32.totalorder %s93_s24, %s6405_s26  ;;  %p6411_p9 = scmp.lt.s32.totalorder %s6405_s26, %s6405_s26 }
  0x57   :  { %p6412_p10 = por %p6411_p9, %p6410_p8 }
  0x59   :  { %p6413_p11 = pnand %p6412_p10, %p6406_p7 }
  0x5b   :  { %6416 = shalt.err (!%p6413_p11)
}
  0x5c   :  { %95 = dma.hbm_to_vmem [thread:$0]  %s6900_s6, 32, %s93_s24, [#allocation12]  }
  0x5d   :  { %s6484_s28 = smov [#allocation16]  }
  0x5e   :  { %s114_s29 = sshll.u32 %s6484_s28, 4  ;;  %s115_s29 = int_to_ptr.vmem [resolvable:$true] %s114_s29 }
  0x5f   :  { %s6425_s30 = scalar_lea.vmem %s115_s29, 16  ;;  %s6429_s3 = scalar_lea.vmem %s115_s29, 32 }
  0x60   :  { %p6426_p12 = scmp.ne.s32.totalorder %s115_s29, %s6425_s30  ;;  %p6430_p13 = scmp.lt.s32.totalorder %s115_s29, %s115_s29 }
  0x61   :  { %p6431_p0 = scmp.lt.s32.totalorder %s6429_s3, %s6425_s30 }
  0x63   :  { %p6432_p1 = por %p6431_p0, %p6430_p13 }
  0x65   :  { %p6433_p2 = pnand %p6432_p1, %p6426_p12 }
  0x67   :  { %6436 = shalt.err (!%p6433_p2)
}
  0x68   :  { %117 = dma.hbm_to_vmem [thread:$0]  %s6902_s8, 16, %s115_s29, [#allocation15]  }
  0x69   :  { %6457 = dma.done.wait [#allocation3], 128  }
  0x6a   :  { %6458 = vsyncadd [#allocation3], 4294967168 }
  0x6b   :  { %6459 = dma.done.wait [#allocation6], 8320  }
  0x6c   :  { %6460 = vsyncadd [#allocation6], 4294958976 }
  0x6d   :  { %6461 = dma.done.wait [#allocation9], 262400  }
  0x6e   :  { %6462 = vsyncadd [#allocation9], 4294704896 }
  0x6f   :  { %6463 = dma.done.wait [#allocation12], 65568  }
  0x70   :  { %6464 = vsyncadd [#allocation12], 4294901728 }
  0x71   :  { %6465 = dma.done.wait [#allocation15], 4112  }
  0x72   :  { %6466 = vsyncadd [#allocation15], 4294963184  ;;  %v6485_v0 = vmov 0.0   ;;  %v203_v1 = vld [vmem:[#allocation5 + $0x1c8] sm:$0xff]  ;;  %v202_v2 = vld [vmem:[#allocation5 + $0x1c0] sm:$0xff]  ;;  %vm252_vm0 = vcmask 523264  }
  0x73   :  { %320 = vmatprep.mubr.f32.mxu1 %v6485_v0  ;;  %462 = vmatprep.mubr.f32.mxu0 %v6485_v0  ;;  %v195_v3 = vld [vmem:[#allocation5 + $0x188] sm:$0xff]  ;;  %v194_v4 = vld [vmem:[#allocation5 + $0x180] sm:$0xff]  ;;  %v6566_v22 = vld [vmem:[#allocation2] sm:$0xff]  ;;  %s6486_s6 = smov [#allocation17]  }
  0x74   :  { %272 = vmatprep.subr.mxu1 %v203_v1  ;;  %v187_v5 = vld [vmem:[#allocation5 + $0x148] sm:$0xff]  ;;  %v186_v6 = vld [vmem:[#allocation5 + $0x140] sm:$0xff]  ;;  %v205_v23 = vld [vmem:[#allocation5 + $0x1d8] sm:$0xff]  ;;  %s6178_s8 = sshll.u32 %s6486_s6, 4  ;;  %s6179_s8 = int_to_ptr.vmem [resolvable:$true] %s6178_s8 }
  0x75   :  { %273 = vmatpush1.msra.mxu1 %v202_v2  ;;  %v179_v7 = vld [vmem:[#allocation5 + $0x108] sm:$0xff]  ;;  %v178_v8 = vld [vmem:[#allocation5 + $0x100] sm:$0xff]  ;;  %v204_v24 = vld [vmem:[#allocation5 + $0x1d0] sm:$0xff]  ;;  %s6437_s11 = scalar_lea.vmem %s6179_s8, 128  ;;  %p6442_p4 = scmp.lt.s32.totalorder %s6179_s8, %s6179_s8 }
  0x76   :  { %274 = vmatprep.subr.mxu1 %v195_v3  ;;  %v171_v9 = vld [vmem:[#allocation5 + $0xc8] sm:$0xff]  ;;  %v170_v10 = vld [vmem:[#allocation5 + $0xc0] sm:$0xff]  ;;  %v197_v25 = vld [vmem:[#allocation5 + $0x198] sm:$0xff]  ;;  %p6438_p3 = scmp.ne.s32.totalorder %s6179_s8, %s6437_s11  ;;  %p6443_p5 = scmp.lt.s32.totalorder %s6437_s11, %s6437_s11 }
  0x77   :  { %275 = vmatpush1.msra.mxu1 %v194_v4  ;;  %v163_v11 = vld [vmem:[#allocation5 + $0x88] sm:$0xff]  ;;  %v162_v12 = vld [vmem:[#allocation5 + $0x80] sm:$0xff]  ;;  %v196_v27 = vld [vmem:[#allocation5 + $0x190] sm:$0xff] }
  0x78   :  { %276 = vmatprep.subr.mxu1 %v187_v5  ;;  %v155_v13 = vld [vmem:[#allocation5 + $0x48] sm:$0xff]  ;;  %v154_v14 = vld [vmem:[#allocation5 + $0x40] sm:$0xff]  ;;  %v189_v29 = vld [vmem:[#allocation5 + $0x158] sm:$0xff]  ;;  %p6444_p6 = por %p6443_p5, %p6442_p4 }
  0x79   :  { %277 = vmatpush1.msra.mxu1 %v186_v6  ;;  %v207_v15 = vld [vmem:[#allocation5 + $0x1e8] sm:$0xff]  ;;  %v206_v16 = vld [vmem:[#allocation5 + $0x1e0] sm:$0xff]  ;;  %v188_v31 = vld [vmem:[#allocation5 + $0x150] sm:$0xff] }
  0x7a   :  { %278 = vmatprep.subr.mxu1 %v179_v7  ;;  %v199_v17 = vld [vmem:[#allocation5 + $0x1a8] sm:$0xff]  ;;  %414 = vmatprep.subr.mxu0 %v207_v15  ;;  %v198_v19 = vld [vmem:[#allocation5 + $0x1a0] sm:$0xff]  ;;  %v181_v33 = vld [vmem:[#allocation5 + $0x118] sm:$0xff]  ;;  %p6445_p7 = pnand %p6444_p6, %p6438_p3 }
  0x7b   :  { %279 = vmatpush1.msra.mxu1 %v178_v8  ;;  %v147_v18 = vld [vmem:[#allocation5 + $0x8] sm:$0xff]  ;;  %v146_v20 = vld [vmem:[#allocation5] sm:$0xff]  ;;  %415 = vmatpush1.msra.mxu0 %v206_v16  ;;  %v180_v35 = vld [vmem:[#allocation5 + $0x110] sm:$0xff] }
  0x7c   :  { %280 = vmatprep.subr.mxu1 %v171_v9  ;;  %v191_v21 = vld [vmem:[#allocation5 + $0x168] sm:$0xff]  ;;  %416 = vmatprep.subr.mxu0 %v199_v17  ;;  %v190_v26 = vld [vmem:[#allocation5 + $0x160] sm:$0xff]  ;;  %v173_v37 = vld [vmem:[#allocation5 + $0xd8] sm:$0xff] }
  0x7d   :  { %281 = vmatpush1.msra.mxu1 %v170_v10  ;;  %417 = vmatpush1.msra.mxu0 %v198_v19  ;;  %v183_v28 = vld [vmem:[#allocation5 + $0x128] sm:$0xff]  ;;  %v182_v30 = vld [vmem:[#allocation5 + $0x120] sm:$0xff]  ;;  %v172_v39 = vld [vmem:[#allocation5 + $0xd0] sm:$0xff] }
  0x7e   :  { %282 = vmatprep.subr.mxu1 %v163_v11  ;;  %418 = vmatprep.subr.mxu0 %v191_v21  ;;  %v175_v32 = vld [vmem:[#allocation5 + $0xe8] sm:$0xff]  ;;  %v174_v34 = vld [vmem:[#allocation5 + $0xe0] sm:$0xff]  ;;  %v165_v41 = vld [vmem:[#allocation5 + $0x98] sm:$0xff] }
  0x7f   :  { %283 = vmatpush1.msra.mxu1 %v162_v12  ;;  %419 = vmatpush1.msra.mxu0 %v190_v26  ;;  %v167_v36 = vld [vmem:[#allocation5 + $0xa8] sm:$0xff]  ;;  %v166_v38 = vld [vmem:[#allocation5 + $0xa0] sm:$0xff]  ;;  %v164_v43 = vld [vmem:[#allocation5 + $0x90] sm:$0xff] }
  0x80   :  { %284 = vmatprep.subr.mxu1 %v155_v13  ;;  %420 = vmatprep.subr.mxu0 %v183_v28  ;;  %v159_v40 = vld [vmem:[#allocation5 + $0x68] sm:$0xff]  ;;  %v158_v42 = vld [vmem:[#allocation5 + $0x60] sm:$0xff]  ;;  %v157_v45 = vld [vmem:[#allocation5 + $0x58] sm:$0xff] }
  0x81   :  { %285 = vmatpush1.msra.mxu1 %v154_v14  ;;  %421 = vmatpush1.msra.mxu0 %v182_v30  ;;  %v151_v44 = vld [vmem:[#allocation5 + $0x28] sm:$0xff]  ;;  %v150_v46 = vld [vmem:[#allocation5 + $0x20] sm:$0xff]  ;;  %v156_v47 = vld [vmem:[#allocation5 + $0x50] sm:$0xff] }
  0x82   :  { %286 = vmatprep.subr.mxu1 %v147_v18  ;;  %422 = vmatprep.subr.mxu0 %v175_v32  ;;  %v149_v48 = vld [vmem:[#allocation5 + $0x18] sm:$0xff]  ;;  %v789_v49 = vld [vmem:[#allocation8 + $0x788] sm:$0xff]  ;;  %v788_v51 = vld [vmem:[#allocation8 + $0x780] sm:$0xff] }
  0x83   :  { %287 = vmatpush1.msra.mxu1 %v146_v20  ;;  %423 = vmatpush1.msra.mxu0 %v174_v34  ;;  %v148_v50 = vld [vmem:[#allocation5 + $0x10] sm:$0xff]  ;;  %v209_v52 = vld [vmem:[#allocation5 + $0x1f8] sm:$0xff]  ;;  %v772_v57 = vld [vmem:[#allocation8 + $0x700] sm:$0xff] }
  0x84   :  { %6191 = vmatmul.mubr.msk.f32.vlgmr.msra.gmra.mxu1 %vm252_vm0, %v6566_v22  ;;  %343 = vmatprep.subr.mxu1 %v205_v23  ;;  %v208_v53 = vld [vmem:[#allocation5 + $0x1f0] sm:$0xff]  ;;  %v201_v54 = vld [vmem:[#allocation5 + $0x1b8] sm:$0xff]  ;;  %v756_v61 = vld [vmem:[#allocation8 + $0x680] sm:$0xff] }
  0x85   :  { %344 = vmatpush1.msra.mxu1 %v204_v24  ;;  %391 = vmatprep.mubr.f32.mxu1 %v6485_v0  ;;  %v773_v55 = vld [vmem:[#allocation8 + $0x708] sm:$0xff]  ;;  %v193_v58 = vld [vmem:[#allocation5 + $0x178] sm:$0xff]  ;;  %v740_v2 = vld [vmem:[#allocation8 + $0x600] sm:$0xff] }
  0x86   :  { %345 = vmatprep.subr.mxu1 %v197_v25  ;;  %424 = vmatprep.subr.mxu0 %v167_v36  ;;  %v200_v56 = vld [vmem:[#allocation5 + $0x1b0] sm:$0xff]  ;;  %v185_v62 = vld [vmem:[#allocation5 + $0x138] sm:$0xff]  ;;  %v708_v9 = vld [vmem:[#allocation8 + $0x500] sm:$0xff] }
  0x87   :  { %346 = vmatpush1.msra.mxu1 %v196_v27  ;;  %425 = vmatpush1.msra.mxu0 %v166_v38  ;;  %v757_v59 = vld [vmem:[#allocation8 + $0x688] sm:$0xff]  ;;  %v177_v3 = vld [vmem:[#allocation5 + $0xf8] sm:$0xff]  ;;  %v692_v13 = vld [vmem:[#allocation8 + $0x480] sm:$0xff] }
  0x88   :  { %347 = vmatprep.subr.mxu1 %v189_v29  ;;  %426 = vmatprep.subr.mxu0 %v159_v40  ;;  %v192_v60 = vld [vmem:[#allocation5 + $0x170] sm:$0xff]  ;;  %v169_v6 = vld [vmem:[#allocation5 + $0xb8] sm:$0xff]  ;;  %v676_v17 = vld [vmem:[#allocation8 + $0x400] sm:$0xff] }
  0x89   :  { %348 = vmatpush1.msra.mxu1 %v188_v31  ;;  %427 = vmatpush1.msra.mxu0 %v158_v42  ;;  %v741_v63 = vld [vmem:[#allocation8 + $0x608] sm:$0xff]  ;;  %v161_v10 = vld [vmem:[#allocation5 + $0x78] sm:$0xff]  ;;  %v660_v20 = vld [vmem:[#allocation8 + $0x380] sm:$0xff] }
  0x8a   :  { %349 = vmatprep.subr.mxu1 %v181_v33  ;;  %428 = vmatprep.subr.mxu0 %v151_v44  ;;  %v184_v1 = vld [vmem:[#allocation5 + $0x130] sm:$0xff]  ;;  %v153_v14 = vld [vmem:[#allocation5 + $0x38] sm:$0xff]  ;;  %v1300_v21 = vld [vmem:[#allocation8 + $0x1780] sm:$0xff] }
  0x8b   :  { %350 = vmatpush1.msra.mxu1 %v180_v35  ;;  %429 = vmatpush1.msra.mxu0 %v150_v46  ;;  %v725_v4 = vld [vmem:[#allocation8 + $0x588] sm:$0xff]  ;;  %v644_v25 = vld [vmem:[#allocation8 + $0x300] sm:$0xff] }
  0x8c   :  { %351 = vmatprep.subr.mxu1 %v173_v37  ;;  %6193 = vmatmul.mubr.msk.f32.vlgmr.msra.gmra.mxu0 %vm252_vm0, %v6566_v22  ;;  %v176_v5 = vld [vmem:[#allocation5 + $0xf0] sm:$0xff]  ;;  %v1284_v26 = vld [vmem:[#allocation8 + $0x1700] sm:$0xff] }
  0x8d   :  { %352 = vmatpush1.msra.mxu1 %v172_v39  ;;  %2680 = vmatprep.subr.mxu0 %v789_v49  ;;  %v709_v7 = vld [vmem:[#allocation8 + $0x508] sm:$0xff]  ;;  %v628_v29 = vld [vmem:[#allocation8 + $0x280] sm:$0xff] }
  0x8e   :  { %353 = vmatprep.subr.mxu1 %v165_v41  ;;  %2681 = vmatpush1.msra.mxu0 %v788_v51  ;;  %v168_v8 = vld [vmem:[#allocation5 + $0xb0] sm:$0xff]  ;;  %v1268_v30 = vld [vmem:[#allocation8 + $0x1680] sm:$0xff] }
  0x8f   :  { %354 = vmatpush1.msra.mxu1 %v164_v43  ;;  %2682 = vmatprep.subr.mxu0 %v773_v55  ;;  %v693_v11 = vld [vmem:[#allocation8 + $0x488] sm:$0xff]  ;;  %v612_v33 = vld [vmem:[#allocation8 + $0x200] sm:$0xff] }
  0x90   :  { %355 = vmatprep.subr.mxu1 %v157_v45  ;;  %2683 = vmatpush1.msra.mxu0 %v772_v57  ;;  %v160_v12 = vld [vmem:[#allocation5 + $0x70] sm:$0xff]  ;;  %v596_v36 = vld [vmem:[#allocation8 + $0x180] sm:$0xff] }
  0x91   :  { %356 = vmatpush1.msra.mxu1 %v156_v47  ;;  %2684 = vmatprep.subr.mxu0 %v757_v59  ;;  %v677_v15 = vld [vmem:[#allocation8 + $0x408] sm:$0xff]  ;;  %v1236_v37 = vld [vmem:[#allocation8 + $0x1580] sm:$0xff] }
  0x92   :  { %357 = vmatprep.subr.mxu1 %v149_v48  ;;  %2685 = vmatpush1.msra.mxu0 %v756_v61  ;;  %v152_v16 = vld [vmem:[#allocation5 + $0x30] sm:$0xff]  ;;  %v580_v40 = vld [vmem:[#allocation8 + $0x100] sm:$0xff] }
  0x93   :  { %358 = vmatpush1.msra.mxu1 %v148_v50  ;;  %2686 = vmatprep.subr.mxu0 %v741_v63  ;;  %v661_v18 = vld [vmem:[#allocation8 + $0x388] sm:$0xff]  ;;  %v1220_v41 = vld [vmem:[#allocation8 + $0x1500] sm:$0xff] }
  0x94   :  { %6192 = vmatmul.mubr.msk.f32.vlgmr.msra.gmra.mxu1 %vm252_vm0, %v6566_v22  ;;  %485 = vmatprep.subr.mxu1 %v209_v52  ;;  %v1301_v19 = vld [vmem:[#allocation8 + $0x1788] sm:$0xff]  ;;  %v564_v44 = vld [vmem:[#allocation8 + $0x80] sm:$0xff] }
  0x95   :  { %486 = vmatpush1.msra.mxu1 %v208_v53  ;;  %533 = vmatprep.mubr.f32.mxu1 %v6485_v0  ;;  %v724_v0 = vld [vmem:[#allocation8 + $0x580] sm:$0xff]  ;;  %v645_v23 = vld [vmem:[#allocation8 + $0x308] sm:$0xff] }
  0x96   :  { %487 = vmatprep.subr.mxu1 %v201_v54  ;;  %2687 = vmatpush1.msra.mxu0 %v740_v2  ;;  %v1285_v24 = vld [vmem:[#allocation8 + $0x1708] sm:$0xff]  ;;  %v1204_v45 = vld [vmem:[#allocation8 + $0x1480] sm:$0xff] }
  0x97   :  { %488 = vmatpush1.msra.mxu1 %v200_v56  ;;  %2688 = vmatprep.subr.mxu0 %v725_v4  ;;  %v629_v27 = vld [vmem:[#allocation8 + $0x288] sm:$0xff]  ;;  %v548_v48 = vld [vmem:[#allocation8] sm:$0xff] }
  0x98   :  { %489 = vmatprep.subr.mxu1 %v193_v58  ;;  %2689 = vmatpush1.msra.mxu0 %v724_v0  ;;  %v1269_v28 = vld [vmem:[#allocation8 + $0x1688] sm:$0xff]  ;;  %v1188_v49 = vld [vmem:[#allocation8 + $0x1400] sm:$0xff] }
  0x99   :  { %490 = vmatpush1.msra.mxu1 %v192_v60  ;;  %2690 = vmatprep.subr.mxu0 %v709_v7  ;;  %v613_v31 = vld [vmem:[#allocation8 + $0x208] sm:$0xff]  ;;  %v1044_v52 = vld [vmem:[#allocation8 + $0xf80] sm:$0xff] }
  0x9a   :  { %491 = vmatprep.subr.mxu1 %v185_v62  ;;  %2691 = vmatpush1.msra.mxu0 %v708_v9  ;;  %v1253_v32 = vld [vmem:[#allocation8 + $0x1608] sm:$0xff]  ;;  %v1172_v53 = vld [vmem:[#allocation8 + $0x1380] sm:$0xff] }
  0x9b   :  { %492 = vmatpush1.msra.mxu1 %v184_v1  ;;  %2692 = vmatprep.subr.mxu0 %v693_v11  ;;  %v597_v34 = vld [vmem:[#allocation8 + $0x188] sm:$0xff]  ;;  %v1028_v56 = vld [vmem:[#allocation8 + $0xf00] sm:$0xff] }
  0x9c   :  { %493 = vmatprep.subr.mxu1 %v177_v3  ;;  %2693 = vmatpush1.msra.mxu0 %v692_v13  ;;  %v1237_v35 = vld [vmem:[#allocation8 + $0x1588] sm:$0xff]  ;;  %v1156_v57 = vld [vmem:[#allocation8 + $0x1300] sm:$0xff] }
  0x9d   :  { %494 = vmatpush1.msra.mxu1 %v176_v5  ;;  %2694 = vmatprep.subr.mxu0 %v677_v15  ;;  %v581_v38 = vld [vmem:[#allocation8 + $0x108] sm:$0xff]  ;;  %v1012_v60 = vld [vmem:[#allocation8 + $0xe80] sm:$0xff] }
  0x9e   :  { %495 = vmatprep.subr.mxu1 %v169_v6  ;;  %2695 = vmatpush1.msra.mxu0 %v676_v17  ;;  %v1221_v39 = vld [vmem:[#allocation8 + $0x1508] sm:$0xff]  ;;  %v1140_v61 = vld [vmem:[#allocation8 + $0x1280] sm:$0xff] }
  0x9f   :  { %496 = vmatpush1.msra.mxu1 %v168_v8  ;;  %2696 = vmatprep.subr.mxu0 %v661_v18  ;;  %v565_v42 = vld [vmem:[#allocation8 + $0x88] sm:$0xff]  ;;  %v996_v1 = vld [vmem:[#allocation8 + $0xe00] sm:$0xff] }
  0xa0   :  { %497 = vmatprep.subr.mxu1 %v161_v10  ;;  %2697 = vmatpush1.msra.mxu0 %v660_v20  ;;  %v1205_v43 = vld [vmem:[#allocation8 + $0x1488] sm:$0xff]  ;;  %v1124_v2 = vld [vmem:[#allocation8 + $0x1200] sm:$0xff] }
  0xa1   :  { %498 = vmatpush1.msra.mxu1 %v160_v12  ;;  %2698 = vmatprep.subr.mxu0 %v645_v23  ;;  %v549_v46 = vld [vmem:[#allocation8 + $0x8] sm:$0xff]  ;;  %v980_v5 = vld [vmem:[#allocation8 + $0xd80] sm:$0xff] }
  0xa2   :  { %499 = vmatprep.subr.mxu1 %v153_v14  ;;  %2699 = vmatpush1.msra.mxu0 %v644_v25  ;;  %v1189_v47 = vld [vmem:[#allocation8 + $0x1408] sm:$0xff]  ;;  %v1108_v0 = vld [vmem:[#allocation8 + $0x1180] sm:$0xff] }
  0xa3   :  { %500 = vmatpush1.msra.mxu1 %v152_v16  ;;  %2700 = vmatprep.subr.mxu0 %v629_v27  ;;  %v1045_v50 = vld [vmem:[#allocation8 + $0xf88] sm:$0xff]  ;;  %v964_v8 = vld [vmem:[#allocation8 + $0xd00] sm:$0xff] }
  0xa4   :  { %6194 = vmatmul.mubr.msk.f32.vlgmr.msra.gmra.mxu1 %vm252_vm0, %v6566_v22  ;;  %2751 = vmatprep.subr.mxu1 %v1301_v19  ;;  %v1252_v22 = vld [vmem:[#allocation8 + $0x1600] sm:$0xff]  ;;  %v1173_v51 = vld [vmem:[#allocation8 + $0x1388] sm:$0xff] }
  0xa5   :  { %2752 = vmatpush1.msra.mxu1 %v1300_v21  ;;  %2701 = vmatpush1.msra.mxu0 %v628_v29  ;;  %v1029_v54 = vld [vmem:[#allocation8 + $0xf08] sm:$0xff]  ;;  %v1092_v9 = vld [vmem:[#allocation8 + $0x1100] sm:$0xff] }
  0xa6   :  { %2753 = vmatprep.subr.mxu1 %v1285_v24  ;;  %2702 = vmatprep.subr.mxu0 %v613_v31  ;;  %v1157_v55 = vld [vmem:[#allocation8 + $0x1308] sm:$0xff]  ;;  %v948_v12 = vld [vmem:[#allocation8 + $0xc80] sm:$0xff] }
  0xa7   :  { %2754 = vmatpush1.msra.mxu1 %v1284_v26  ;;  %2703 = vmatpush1.msra.mxu0 %v612_v33  ;;  %v1013_v58 = vld [vmem:[#allocation8 + $0xe88] sm:$0xff]  ;;  %v1076_v13 = vld [vmem:[#allocation8 + $0x1080] sm:$0xff] }
  0xa8   :  { %2755 = vmatprep.subr.mxu1 %v1269_v28  ;;  %2704 = vmatprep.subr.mxu0 %v597_v34  ;;  %v1141_v59 = vld [vmem:[#allocation8 + $0x1288] sm:$0xff]  ;;  %v932_v16 = vld [vmem:[#allocation8 + $0xc00] sm:$0xff] }
  0xa9   :  { %2756 = vmatpush1.msra.mxu1 %v1268_v30  ;;  %2705 = vmatpush1.msra.mxu0 %v596_v36  ;;  %v997_v62 = vld [vmem:[#allocation8 + $0xe08] sm:$0xff]  ;;  %v1060_v17 = vld [vmem:[#allocation8 + $0x1000] sm:$0xff] }
  0xaa   :  { %2757 = vmatprep.subr.mxu1 %v1253_v32  ;;  %2706 = vmatprep.subr.mxu0 %v581_v38  ;;  %v1125_v63 = vld [vmem:[#allocation8 + $0x1208] sm:$0xff]  ;;  %v916_v20 = vld [vmem:[#allocation8 + $0xb80] sm:$0xff] }
  0xab   :  { %2758 = vmatpush1.msra.mxu1 %v1252_v22  ;;  %2707 = vmatpush1.msra.mxu0 %v580_v40  ;;  %v981_v3 = vld [vmem:[#allocation8 + $0xd88] sm:$0xff]  ;;  %v1556_v21 = vld [vmem:[#allocation8 + $0x1f80] sm:$0xff] }
  0xac   :  { %2759 = vmatprep.subr.mxu1 %v1237_v35  ;;  %2708 = vmatprep.subr.mxu0 %v565_v42  ;;  %v1109_v4 = vld [vmem:[#allocation8 + $0x1188] sm:$0xff]  ;;  %v900_v25 = vld [vmem:[#allocation8 + $0xb00] sm:$0xff] }
  0xad   :  { %2760 = vmatpush1.msra.mxu1 %v1236_v37  ;;  %2709 = vmatpush1.msra.mxu0 %v564_v44  ;;  %v965_v6 = vld [vmem:[#allocation8 + $0xd08] sm:$0xff]  ;;  %v1540_v26 = vld [vmem:[#allocation8 + $0x1f00] sm:$0xff] }
  0xae   :  { %2761 = vmatprep.subr.mxu1 %v1221_v39  ;;  %2710 = vmatprep.subr.mxu0 %v549_v46  ;;  %v1093_v7 = vld [vmem:[#allocation8 + $0x1108] sm:$0xff]  ;;  %v884_v29 = vld [vmem:[#allocation8 + $0xa80] sm:$0xff] }
  0xaf   :  { %2762 = vmatpush1.msra.mxu1 %v1220_v41  ;;  %2711 = vmatpush1.msra.mxu0 %v548_v48  ;;  %v949_v10 = vld [vmem:[#allocation8 + $0xc88] sm:$0xff]  ;;  %v1524_v30 = vld [vmem:[#allocation8 + $0x1e80] sm:$0xff] }
  0xb0   :  { %2763 = vmatprep.subr.mxu1 %v1205_v43  ;;  %2712 = vmatprep.subr.mxu0 %v1045_v50  ;;  %v1077_v11 = vld [vmem:[#allocation8 + $0x1088] sm:$0xff]  ;;  %v868_v33 = vld [vmem:[#allocation8 + $0xa00] sm:$0xff] }
  0xb1   :  { %2764 = vmatpush1.msra.mxu1 %v1204_v45  ;;  %2713 = vmatpush2.msra.mxu0 %v1044_v52  ;;  %v933_v14 = vld [vmem:[#allocation8 + $0xc08] sm:$0xff]  ;;  %v1508_v22 = vld [vmem:[#allocation8 + $0x1e00] sm:$0xff] }
  0xb2   :  { %2765 = vmatprep.subr.mxu1 %v1189_v47  ;;  %2714 = vmatprep.subr.mxu0 %v1029_v54  ;;  %v1061_v15 = vld [vmem:[#allocation8 + $0x1008] sm:$0xff]  ;;  %v852_v36 = vld [vmem:[#allocation8 + $0x980] sm:$0xff] }
  0xb3   :  { %2766 = vmatpush1.msra.mxu1 %v1188_v49  ;;  %2715 = vmatpush2.msra.mxu0 %v1028_v56  ;;  %v917_v18 = vld [vmem:[#allocation8 + $0xb88] sm:$0xff]  ;;  %v1492_v37 = vld [vmem:[#allocation8 + $0x1d80] sm:$0xff] }
  0xb4   :  { %2767 = vmatprep.subr.mxu1 %v1173_v51  ;;  %2716 = vmatprep.subr.mxu0 %v1013_v58  ;;  %v1557_v19 = vld [vmem:[#allocation8 + $0x1f88] sm:$0xff]  ;;  %v836_v40 = vld [vmem:[#allocation8 + $0x900] sm:$0xff] }
  0xb5   :  { %2768 = vmatpush1.msra.mxu1 %v1172_v53  ;;  %2717 = vmatpush2.msra.mxu0 %v1012_v60  ;;  %v901_v23 = vld [vmem:[#allocation8 + $0xb08] sm:$0xff]  ;;  %v1476_v41 = vld [vmem:[#allocation8 + $0x1d00] sm:$0xff] }
  0xb6   :  { %2769 = vmatprep.subr.mxu1 %v1157_v55  ;;  %2718 = vmatprep.subr.mxu0 %v997_v62  ;;  %v1541_v24 = vld [vmem:[#allocation8 + $0x1f08] sm:$0xff]  ;;  %v820_v44 = vld [vmem:[#allocation8 + $0x880] sm:$0xff] }
  0xb7   :  { %2770 = vmatpush1.msra.mxu1 %v1156_v57  ;;  %2719 = vmatpush2.msra.mxu0 %v996_v1  ;;  %v885_v27 = vld [vmem:[#allocation8 + $0xa88] sm:$0xff]  ;;  %v1460_v45 = vld [vmem:[#allocation8 + $0x1c80] sm:$0xff] }
  0xb8   :  { %2771 = vmatprep.subr.mxu1 %v1141_v59  ;;  %2720 = vmatprep.subr.mxu0 %v981_v3  ;;  %v1525_v28 = vld [vmem:[#allocation8 + $0x1e88] sm:$0xff]  ;;  %v804_v48 = vld [vmem:[#allocation8 + $0x800] sm:$0xff] }
  0xb9   :  { %2772 = vmatpush1.msra.mxu1 %v1140_v61  ;;  %2721 = vmatpush2.msra.mxu0 %v980_v5  ;;  %v869_v31 = vld [vmem:[#allocation8 + $0xa08] sm:$0xff]  ;;  %v1444_v49 = vld [vmem:[#allocation8 + $0x1c00] sm:$0xff]  ;;  %v212_v5 = vlaneseq }
  0xba   :  { %2773 = vmatprep.subr.mxu1 %v1125_v63  ;;  %2722 = vmatprep.subr.mxu0 %v965_v6  ;;  %v1509_v32 = vld [vmem:[#allocation8 + $0x1e08] sm:$0xff]  ;;  %v1428_v52 = vld [vmem:[#allocation8 + $0x1b80] sm:$0xff] }
  0xbb   :  { %2774 = vmatpush1.msra.mxu1 %v1124_v2  ;;  %2723 = vmatpush2.msra.mxu0 %v964_v8  ;;  %v853_v34 = vld [vmem:[#allocation8 + $0x988] sm:$0xff]  ;;  %v1412_v54 = vld [vmem:[#allocation8 + $0x1b00] sm:$0xff] }
  0xbc   :  { %2775 = vmatprep.subr.mxu1 %v1109_v4  ;;  %2724 = vmatprep.subr.mxu0 %v949_v10  ;;  %v1493_v35 = vld [vmem:[#allocation8 + $0x1d88] sm:$0xff]  ;;  %v1396_v56 = vld [vmem:[#allocation8 + $0x1a80] sm:$0xff] }
  0xbd   :  { %2776 = vmatpush1.msra.mxu1 %v1108_v0  ;;  %2725 = vmatpush2.msra.mxu0 %v948_v12  ;;  %v837_v38 = vld [vmem:[#allocation8 + $0x908] sm:$0xff]  ;;  %v1380_v58 = vld [vmem:[#allocation8 + $0x1a00] sm:$0xff]  ;;  %v6578_v0 = vshrl.u32 %v212_v5, 7 }
  0xbe   :  { %2777 = vmatprep.subr.mxu1 %v1093_v7  ;;  %2726 = vmatprep.subr.mxu0 %v933_v14  ;;  %v1477_v39 = vld [vmem:[#allocation8 + $0x1d08] sm:$0xff]  ;;  %v1364_v60 = vld [vmem:[#allocation8 + $0x1980] sm:$0xff]  ;;  %v6583_v7 = vld [vmem:[#allocation7] sm:$0xff] }
  0xbf   :  { %2778 = vmatpush1.msra.mxu1 %v1092_v9  ;;  %2727 = vmatpush2.msra.mxu0 %v932_v16  ;;  %v821_v42 = vld [vmem:[#allocation8 + $0x888] sm:$0xff]  ;;  %v1348_v62 = vld [vmem:[#allocation8 + $0x1900] sm:$0xff]  ;;  %v6581_v6 = vsub.s32 0, %v6578_v0  ;;  %v6586_v8 = vsub.s32 1, %v6578_v0 }
  0xc0   :  { %2779 = vmatprep.subr.mxu1 %v1077_v11  ;;  %2728 = vmatprep.subr.mxu0 %v917_v18  ;;  %v1461_v43 = vld [vmem:[#allocation8 + $0x1c88] sm:$0xff]  ;;  %v1332_v1 = vld [vmem:[#allocation8 + $0x1880] sm:$0xff] }
  0xc1   :  { %2780 = vmatpush1.msra.mxu1 %v1076_v13  ;;  %2729 = vmatpush2.msra.mxu0 %v916_v20  ;;  %v805_v46 = vld [vmem:[#allocation8 + $0x808] sm:$0xff]  ;;  %v1316_v3 = vld [vmem:[#allocation8 + $0x1800] sm:$0xff]  ;;  %v215_v9 = vrot.slane %v6583_v7, %v6581_v6  ;;  %v219_v10 = vrot.slane %v6583_v7, %v6586_v8  ;;  %v6599_v20 = vsub.s32 5, %v6578_v0 }
  0xc2   :  { %2781 = vmatprep.subr.mxu1 %v1061_v15  ;;  %2730 = vmatprep.subr.mxu0 %v901_v23  ;;  %v1445_v47 = vld [vmem:[#allocation8 + $0x1c08] sm:$0xff]  ;;  %v1780_v23 = vld [vmem:[#allocation8 + $0x2680] sm:$0xff] }
  0xc3   :  { %2782 = vmatpush1.msra.mxu1 %v1060_v17  ;;  %2731 = vmatpush2.msra.mxu0 %v900_v25  ;;  %v1813_v50 = vld [vmem:[#allocation8 + $0x2788] sm:$0xff]  ;;  %v1812_v17 = vld [vmem:[#allocation8 + $0x2780] sm:$0xff] }
  0xc4   :  { %2783 = vmatprep.subr.mxu1 %v1557_v19  ;;  %2732 = vmatprep.subr.mxu0 %v885_v27  ;;  %v1429_v51 = vld [vmem:[#allocation8 + $0x1b88] sm:$0xff]  ;;  %v1796_v19 = vld [vmem:[#allocation8 + $0x2700] sm:$0xff] }
  0xc5   :  { %2784 = vmatpush2.msra.mxu1 %v1556_v21  ;;  %2733 = vmatpush2.msra.mxu0 %v884_v29  ;;  %v1413_v53 = vld [vmem:[#allocation8 + $0x1b08] sm:$0xff]  ;;  %v1764_v27 = vld [vmem:[#allocation8 + $0x2600] sm:$0xff] }
  0xc6   :  { %2785 = vmatprep.subr.mxu1 %v1541_v24  ;;  %2734 = vmatprep.subr.mxu0 %v869_v31  ;;  %v1397_v55 = vld [vmem:[#allocation8 + $0x1a88] sm:$0xff]  ;;  %v6602_v24 = vsub.s32 2, %v6578_v0 }
  0xc7   :  { %2786 = vmatpush2.msra.mxu1 %v1540_v26  ;;  %2735 = vmatpush2.msra.mxu0 %v868_v33  ;;  %v1381_v57 = vld [vmem:[#allocation8 + $0x1a08] sm:$0xff]  ;;  %v6605_v26 = vsub.s32 3, %v6578_v0 }
  0xc8   :  { %2787 = vmatprep.subr.mxu1 %v1525_v28  ;;  %2736 = vmatprep.subr.mxu0 %v853_v34  ;;  %v1365_v59 = vld [vmem:[#allocation8 + $0x1988] sm:$0xff]  ;;  %v235_v28 = vrot.slane %v6583_v7, %v6599_v20  ;;  %v223_v31 = vrot.slane %v6583_v7, %v6602_v24 }
  0xc9   :  { %2788 = vmatpush2.msra.mxu1 %v1524_v30  ;;  %2737 = vmatpush2.msra.mxu0 %v852_v36  ;;  %v1349_v61 = vld [vmem:[#allocation8 + $0x1908] sm:$0xff]  ;;  %v1732_v36 = vld [vmem:[#allocation8 + $0x2500] sm:$0xff] }
  0xca   :  { %2789 = vmatprep.subr.mxu1 %v1509_v32  ;;  %2738 = vmatprep.subr.mxu0 %v837_v38  ;;  %v1333_v63 = vld [vmem:[#allocation8 + $0x1888] sm:$0xff]  ;;  %v1748_v32 = vld [vmem:[#allocation8 + $0x2580] sm:$0xff] }
  0xcb   :  { %2790 = vmatpush2.msra.mxu1 %v1508_v22  ;;  %2739 = vmatpush2.msra.mxu0 %v836_v40  ;;  %v1317_v2 = vld [vmem:[#allocation8 + $0x1808] sm:$0xff]  ;;  %v227_v22 = vrot.slane %v6583_v7, %v6605_v26 }
  0xcc   :  { %2791 = vmatprep.subr.mxu1 %v1493_v35  ;;  %2740 = vmatprep.subr.mxu0 %v821_v42  ;;  %v2325_v4 = vld [vmem:[#allocation8 + $0x3788] sm:$0xff] }
  0xcd   :  { %2792 = vmatpush2.msra.mxu1 %v1492_v37  ;;  %2741 = vmatpush2.msra.mxu0 %v820_v44  ;;  %v1797_v18 = vld [vmem:[#allocation8 + $0x2708] sm:$0xff] }
  0xce   :  { %2793 = vmatprep.subr.mxu1 %v1477_v39  ;;  %2742 = vmatprep.subr.mxu0 %v805_v46  ;;  %v1781_v21 = vld [vmem:[#allocation8 + $0x2688] sm:$0xff] }
  0xcf   :  { %2794 = vmatpush2.msra.mxu1 %v1476_v41  ;;  %2743 = vmatpush2.msra.mxu0 %v804_v48  ;;  %v1765_v25 = vld [vmem:[#allocation8 + $0x2608] sm:$0xff]  ;;  %v1716_v41 = vld [vmem:[#allocation8 + $0x2480] sm:$0xff] }
  0xd0   :  { %2795 = vmatprep.subr.mxu1 %v1461_v43  ;;  %2822 = vmatprep.subr.mxu0 %v1813_v50  ;;  %v1749_v29 = vld [vmem:[#allocation8 + $0x2588] sm:$0xff]  ;;  %v2324_v50 = vld [vmem:[#allocation8 + $0x3780] sm:$0xff] }
  0xd1   :  { %2796 = vmatpush2.msra.mxu1 %v1460_v45  ;;  %v1733_v33 = vld [vmem:[#allocation8 + $0x2508] sm:$0xff]  ;;  %v1700_v45 = vld [vmem:[#allocation8 + $0x2400] sm:$0xff] }
  0xd2   :  { %2797 = vmatprep.subr.mxu1 %v1445_v47  ;;  %v1717_v38 = vld [vmem:[#allocation8 + $0x2488] sm:$0xff] }
  0xd3   :  { %2798 = vmatpush2.msra.mxu1 %v1444_v49  ;;  %v1701_v44 = vld [vmem:[#allocation8 + $0x2408] sm:$0xff]  ;;  %v1684_v49 = vld [vmem:[#allocation8 + $0x2380] sm:$0xff] }
  0xd4   :  { %2799 = vmatprep.subr.mxu1 %v1429_v51  ;;  %v1685_v47 = vld [vmem:[#allocation8 + $0x2388] sm:$0xff] }
  0xd5   :  { %2800 = vmatpush2.msra.mxu1 %v1428_v52  ;;  %v1669_v51 = vld [vmem:[#allocation8 + $0x2308] sm:$0xff] }
  0xd6   :  { %2801 = vmatprep.subr.mxu1 %v1413_v53  ;;  %v2309_v52 = vld [vmem:[#allocation8 + $0x3708] sm:$0xff]  ;;  %v1668_v53 = vld [vmem:[#allocation8 + $0x2300] sm:$0xff] }
  0xd7   :  { %2802 = vmatpush2.msra.mxu1 %v1412_v54  ;;  %v2308_v54 = vld [vmem:[#allocation8 + $0x3700] sm:$0xff]  ;;  %v2245_v5 = vld [vmem:[#allocation8 + $0x3508] sm:$0xff] }
  0xd8   :  { %2803 = vmatprep.subr.mxu1 %v1397_v55  ;;  %v1653_v55 = vld [vmem:[#allocation8 + $0x2288] sm:$0xff] }
  0xd9   :  { %2804 = vmatpush2.msra.mxu1 %v1396_v56  ;;  %v2293_v56 = vld [vmem:[#allocation8 + $0x3688] sm:$0xff] }
  0xda   :  { %2805 = vmatprep.subr.mxu1 %v1381_v57  ;;  %v1652_v57 = vld [vmem:[#allocation8 + $0x2280] sm:$0xff] }
  0xdb   :  { %2806 = vmatpush2.msra.mxu1 %v1380_v58  ;;  %v2292_v58 = vld [vmem:[#allocation8 + $0x3680] sm:$0xff] }
  0xdc   :  { %2807 = vmatprep.subr.mxu1 %v1365_v59  ;;  %v1637_v59 = vld [vmem:[#allocation8 + $0x2208] sm:$0xff] }
  0xdd   :  { %2808 = vmatpush2.msra.mxu1 %v1364_v60  ;;  %v2277_v60 = vld [vmem:[#allocation8 + $0x3608] sm:$0xff] }
  0xde   :  { %2809 = vmatprep.subr.mxu1 %v1349_v61  ;;  %v1636_v61 = vld [vmem:[#allocation8 + $0x2200] sm:$0xff] }
  0xdf   :  { %2810 = vmatpush2.msra.mxu1 %v1348_v62  ;;  %v2276_v62 = vld [vmem:[#allocation8 + $0x3600] sm:$0xff] }
  0xe0   :  { %2811 = vmatprep.subr.mxu1 %v1333_v63  ;;  %v1621_v63 = vld [vmem:[#allocation8 + $0x2188] sm:$0xff] }
  0xe1   :  { %2812 = vmatpush2.msra.mxu1 %v1332_v1  ;;  %v2261_v1 = vld [vmem:[#allocation8 + $0x3588] sm:$0xff] }
  0xe2   :  { %2813 = vmatprep.subr.mxu1 %v1317_v2  ;;  %v1620_v2 = vld [vmem:[#allocation8 + $0x2180] sm:$0xff] }
  0xe3   :  { %2814 = vmatpush2.msra.mxu1 %v1316_v3  ;;  %v2260_v3 = vld [vmem:[#allocation8 + $0x3580] sm:$0xff] }
  0xe4   :  { %2893 = vmatprep.subr.mxu1 %v2325_v4  ;;  %v1605_v4 = vld [vmem:[#allocation8 + $0x2108] sm:$0xff] }
 0x144   :  { %v322_v11 = vpop.f32.mrf.mxu1 }
 0x145   :  { %v323_v12 = vadd.f32 %v322_v11, %v215_v9  ;;  %v1604_v9 = vld [vmem:[#allocation8 + $0x2100] sm:$0xff]  ;;  %v1589_v11 = vld [vmem:[#allocation8 + $0x2088] sm:$0xff] }
 0x146   :  { %v324_v13 = vpop.f32.mrf.mxu1 }
 0x147   :  { %v325_v14 = vadd.f32 %v324_v13, %v219_v10  ;;  %v6594_v16 = vmax.f32 %v323_v12, 0.0  ;;  %v2244_v10 = vld [vmem:[#allocation8 + $0x3500] sm:$0xff]  ;;  %v2229_v12 = vld [vmem:[#allocation8 + $0x3488] sm:$0xff] }
 0x148   :  { %v1588_v13 = vld [vmem:[#allocation8 + $0x2080] sm:$0xff] }
 0x149   :  { %v6592_v15 = vmax.f32 %v325_v14, 0.0  ;;  %v2228_v14 = vld [vmem:[#allocation8 + $0x3480] sm:$0xff] }
 0x14b   :  { %2744 = vmatprep.mubr.f32.mxu0 %v6592_v15 }
 0x14c   :  { %2745 = vmatmul.mubr.f32.vlgmr.msra.gmra.mxu0 %v6594_v16  ;;  %v6609_v30 = vpop.f32.mrf.mxu0 }
 0x14d   :  { %2823 = vmatpush1.msra.mxu0 %v1812_v17  ;;  %v1573_v17 = vld [vmem:[#allocation8 + $0x2008] sm:$0xff] }
 0x14e   :  { %2824 = vmatprep.subr.mxu0 %v1797_v18  ;;  %v466_v34 = vpop.f32.mrf.mxu0  ;;  %v2213_v18 = vld [vmem:[#allocation8 + $0x3408] sm:$0xff] }
 0x14f   :  { %2825 = vmatpush1.msra.mxu0 %v1796_v19  ;;  %v467_v37 = vadd.f32 %v466_v34, %v235_v28  ;;  %v1572_v19 = vld [vmem:[#allocation8 + $0x2000] sm:$0xff]  ;;  %v2165_v34 = vld [vmem:[#allocation8 + $0x3288] sm:$0xff] }
 0x150   :  { %2826 = vmatprep.subr.mxu0 %v1781_v21  ;;  %v2212_v21 = vld [vmem:[#allocation8 + $0x3400] sm:$0xff] }
 0x151   :  { %2827 = vmatpush1.msra.mxu0 %v1780_v23  ;;  %v6615_v42 = vmax.f32 %v467_v37, 0.0  ;;  %v2069_v23 = vld [vmem:[#allocation8 + $0x2f88] sm:$0xff]  ;;  %v2196_v28 = vld [vmem:[#allocation8 + $0x3380] sm:$0xff] }
 0x152   :  { %2828 = vmatprep.subr.mxu0 %v1765_v25  ;;  %v2197_v25 = vld [vmem:[#allocation8 + $0x3388] sm:$0xff] }
 0x153   :  { %2829 = vmatpush1.msra.mxu0 %v1764_v27  ;;  %2886 = vmatprep.mubr.f32.mxu0 %v6615_v42  ;;  %v2068_v27 = vld [vmem:[#allocation8 + $0x2f80] sm:$0xff]  ;;  %v2021_v37 = vld [vmem:[#allocation8 + $0x2e08] sm:$0xff] }
 0x154   :  { %2830 = vmatprep.subr.mxu0 %v1749_v29  ;;  %v393_v35 = vpop.f32.mrf.mxu1  ;;  %v2053_v29 = vld [vmem:[#allocation8 + $0x2f08] sm:$0xff] }
 0x155   :  { %2831 = vmatpush1.msra.mxu0 %v1748_v32  ;;  %v394_v39 = vadd.f32 %v393_v35, %v223_v31  ;;  %v2181_v31 = vld [vmem:[#allocation8 + $0x3308] sm:$0xff]  ;;  %v2052_v32 = vld [vmem:[#allocation8 + $0x2f00] sm:$0xff] }
 0x156   :  { %2832 = vmatprep.subr.mxu0 %v1733_v33  ;;  %v395_v40 = vpop.f32.mrf.mxu1  ;;  %v2180_v33 = vld [vmem:[#allocation8 + $0x3300] sm:$0xff] }
 0x157   :  { %v396_v43 = vadd.f32 %v395_v40, %v227_v22  ;;  %2833 = vmatpush1.msra.mxu0 %v1732_v36  ;;  %v6620_v48 = vmax.f32 %v394_v39, 0.0  ;;  %v2037_v22 = vld [vmem:[#allocation8 + $0x2e88] sm:$0xff]  ;;  %v2036_v35 = vld [vmem:[#allocation8 + $0x2e80] sm:$0xff] }
 0x158   :  { %2834 = vmatprep.subr.mxu0 %v1717_v38  ;;  %v2164_v36 = vld [vmem:[#allocation8 + $0x3280] sm:$0xff]  ;;  %v2149_v38 = vld [vmem:[#allocation8 + $0x3208] sm:$0xff] }
 0x159   :  { %v6618_v46 = vmax.f32 %v396_v43, 0.0  ;;  %2835 = vmatpush1.msra.mxu0 %v1716_v41  ;;  %v2020_v39 = vld [vmem:[#allocation8 + $0x2e00] sm:$0xff]  ;;  %v2005_v41 = vld [vmem:[#allocation8 + $0x2d88] sm:$0xff] }
 0x15a   :  { %2836 = vmatprep.subr.mxu0 %v1701_v44  ;;  %v2148_v40 = vld [vmem:[#allocation8 + $0x3200] sm:$0xff]  ;;  %v2133_v43 = vld [vmem:[#allocation8 + $0x3188] sm:$0xff] }
 0x15b   :  { %2837 = vmatpush1.msra.mxu0 %v1700_v45  ;;  %2815 = vmatprep.mubr.f32.mxu1 %v6618_v46  ;;  %v2004_v44 = vld [vmem:[#allocation8 + $0x2d80] sm:$0xff] }
 0x15c   :  { %2838 = vmatprep.subr.mxu0 %v1685_v47  ;;  %2816 = vmatmul.mubr.f32.vlgmr.msra.gmra.mxu1 %v6620_v48  ;;  %v2132_v45 = vld [vmem:[#allocation8 + $0x3180] sm:$0xff]  ;;  %v1989_v47 = vld [vmem:[#allocation8 + $0x2d08] sm:$0xff] }
 0x15d   :  { %2839 = vmatpush1.msra.mxu0 %v1684_v49  ;;  %2894 = vmatpush1.msra.mxu1 %v2324_v50  ;;  %v2117_v49 = vld [vmem:[#allocation8 + $0x3108] sm:$0xff]  ;;  %v1988_v50 = vld [vmem:[#allocation8 + $0x2d00] sm:$0xff] }
 0x15e   :  { %2840 = vmatprep.subr.mxu0 %v1669_v51  ;;  %2895 = vmatprep.subr.mxu1 %v2309_v52  ;;  %v2116_v51 = vld [vmem:[#allocation8 + $0x3100] sm:$0xff]  ;;  %v1973_v52 = vld [vmem:[#allocation8 + $0x2c88] sm:$0xff] }
 0x15f   :  { %2841 = vmatpush1.msra.mxu0 %v1668_v53  ;;  %2896 = vmatpush1.msra.mxu1 %v2308_v54  ;;  %v2101_v53 = vld [vmem:[#allocation8 + $0x3088] sm:$0xff]  ;;  %v1972_v54 = vld [vmem:[#allocation8 + $0x2c80] sm:$0xff] }
 0x160   :  { %2842 = vmatprep.subr.mxu0 %v1653_v55  ;;  %2897 = vmatprep.subr.mxu1 %v2293_v56  ;;  %v2100_v55 = vld [vmem:[#allocation8 + $0x3080] sm:$0xff]  ;;  %v1957_v56 = vld [vmem:[#allocation8 + $0x2c08] sm:$0xff] }
 0x161   :  { %2843 = vmatpush1.msra.mxu0 %v1652_v57  ;;  %2898 = vmatpush1.msra.mxu1 %v2292_v58  ;;  %v2085_v57 = vld [vmem:[#allocation8 + $0x3008] sm:$0xff]  ;;  %v1956_v58 = vld [vmem:[#allocation8 + $0x2c00] sm:$0xff] }
 0x162   :  { %2844 = vmatprep.subr.mxu0 %v1637_v59  ;;  %2899 = vmatprep.subr.mxu1 %v2277_v60  ;;  %v2084_v59 = vld [vmem:[#allocation8 + $0x3000] sm:$0xff]  ;;  %v1941_v60 = vld [vmem:[#allocation8 + $0x2b88] sm:$0xff] }
 0x163   :  { %2845 = vmatpush1.msra.mxu0 %v1636_v61  ;;  %2900 = vmatpush1.msra.mxu1 %v2276_v62  ;;  %v2581_v61 = vld [vmem:[#allocation8 + $0x3f88] sm:$0xff]  ;;  %v1940_v62 = vld [vmem:[#allocation8 + $0x2b80] sm:$0xff] }
 0x164   :  { %2846 = vmatprep.subr.mxu0 %v1621_v63  ;;  %2901 = vmatprep.subr.mxu1 %v2261_v1  ;;  %v2580_v63 = vld [vmem:[#allocation8 + $0x3f80] sm:$0xff]  ;;  %v1925_v1 = vld [vmem:[#allocation8 + $0x2b08] sm:$0xff] }
 0x165   :  { %2847 = vmatpush1.msra.mxu0 %v1620_v2  ;;  %2902 = vmatpush1.msra.mxu1 %v2260_v3  ;;  %v2565_v2 = vld [vmem:[#allocation8 + $0x3f08] sm:$0xff]  ;;  %v1924_v3 = vld [vmem:[#allocation8 + $0x2b00] sm:$0xff] }
 0x166   :  { %2848 = vmatprep.subr.mxu0 %v1605_v4  ;;  %2903 = vmatprep.subr.mxu1 %v2245_v5  ;;  %v2564_v4 = vld [vmem:[#allocation8 + $0x3f00] sm:$0xff]  ;;  %v6625_v5 = vsub.s32 4, %v6578_v0 }
 0x167   :  { %2849 = vmatpush1.msra.mxu0 %v1604_v9  ;;  %2904 = vmatpush1.msra.mxu1 %v2244_v10  ;;  %v1909_v9 = vld [vmem:[#allocation8 + $0x2a88] sm:$0xff] }
 0x168   :  { %2850 = vmatprep.subr.mxu0 %v1589_v11  ;;  %2905 = vmatprep.subr.mxu1 %v2229_v12  ;;  %v2549_v10 = vld [vmem:[#allocation8 + $0x3e88] sm:$0xff]  ;;  %v1908_v11 = vld [vmem:[#allocation8 + $0x2a80] sm:$0xff] }
 0x169   :  { %2851 = vmatpush1.msra.mxu0 %v1588_v13  ;;  %2906 = vmatpush1.msra.mxu1 %v2228_v14  ;;  %v2548_v12 = vld [vmem:[#allocation8 + $0x3e80] sm:$0xff]  ;;  %v1893_v13 = vld [vmem:[#allocation8 + $0x2a08] sm:$0xff] }
 0x16a   :  { %2852 = vmatprep.subr.mxu0 %v1573_v17  ;;  %2907 = vmatprep.subr.mxu1 %v2213_v18  ;;  %v2533_v14 = vld [vmem:[#allocation8 + $0x3e08] sm:$0xff]  ;;  %v1892_v17 = vld [vmem:[#allocation8 + $0x2a00] sm:$0xff] }
 0x16b   :  { %2853 = vmatpush1.msra.mxu0 %v1572_v19  ;;  %2908 = vmatpush1.msra.mxu1 %v2212_v21  ;;  %v2532_v18 = vld [vmem:[#allocation8 + $0x3e00] sm:$0xff]  ;;  %v231_v19 = vrot.slane %v6583_v7, %v6625_v5  ;;  %v1877_v21 = vld [vmem:[#allocation8 + $0x2988] sm:$0xff] }
 0x16c   :  { %2854 = vmatprep.subr.mxu0 %v2069_v23  ;;  %2909 = vmatprep.subr.mxu1 %v2197_v25  ;;  %v2517_v23 = vld [vmem:[#allocation8 + $0x3d88] sm:$0xff]  ;;  %v1876_v25 = vld [vmem:[#allocation8 + $0x2980] sm:$0xff] }
 0x16d   :  { %2855 = vmatpush2.msra.mxu0 %v2068_v27  ;;  %2910 = vmatpush1.msra.mxu1 %v2196_v28  ;;  %v2516_v27 = vld [vmem:[#allocation8 + $0x3d80] sm:$0xff]  ;;  %v1861_v28 = vld [vmem:[#allocation8 + $0x2908] sm:$0xff] }
 0x16e   :  { %2856 = vmatprep.subr.mxu0 %v2053_v29  ;;  %2911 = vmatprep.subr.mxu1 %v2181_v31  ;;  %v2501_v29 = vld [vmem:[#allocation8 + $0x3d08] sm:$0xff]  ;;  %v465_v31 = vadd.f32 %v6609_v30, %v231_v19  ;;  %v1828_v30 = vld [vmem:[#allocation8 + $0x2800] sm:$0xff] }
 0x16f   :  { %2857 = vmatpush2.msra.mxu0 %v2052_v32  ;;  %2912 = vmatpush1.msra.mxu1 %v2180_v33  ;;  %v1860_v32 = vld [vmem:[#allocation8 + $0x2900] sm:$0xff] }
 0x170   :  { %2858 = vmatprep.subr.mxu0 %v2037_v22  ;;  %2913 = vmatprep.subr.mxu1 %v2165_v34  ;;  %v2500_v33 = vld [vmem:[#allocation8 + $0x3d00] sm:$0xff]  ;;  %v1845_v22 = vld [vmem:[#allocation8 + $0x2888] sm:$0xff] }
 0x171   :  { %2859 = vmatpush2.msra.mxu0 %v2036_v35  ;;  %2914 = vmatpush1.msra.mxu1 %v2164_v36  ;;  %v2485_v34 = vld [vmem:[#allocation8 + $0x3c88] sm:$0xff]  ;;  %v1844_v35 = vld [vmem:[#allocation8 + $0x2880] sm:$0xff] }
 0x172   :  { %2860 = vmatprep.subr.mxu0 %v2021_v37  ;;  %2915 = vmatprep.subr.mxu1 %v2149_v38  ;;  %v2484_v36 = vld [vmem:[#allocation8 + $0x3c80] sm:$0xff]  ;;  %v1829_v37 = vld [vmem:[#allocation8 + $0x2808] sm:$0xff] }
 0x173   :  { %2861 = vmatpush2.msra.mxu0 %v2020_v39  ;;  %2916 = vmatpush1.msra.mxu1 %v2148_v40  ;;  %v2469_v38 = vld [vmem:[#allocation8 + $0x3c08] sm:$0xff]  ;;  %v6630_v39 = vmax.f32 %v465_v31, 0.0  ;;  %v2468_v40 = vld [vmem:[#allocation8 + $0x3c00] sm:$0xff] }
 0x174   :  { %2862 = vmatprep.subr.mxu0 %v2005_v41  ;;  %2917 = vmatprep.subr.mxu1 %v2133_v43  ;;  %v2453_v41 = vld [vmem:[#allocation8 + $0x3b88] sm:$0xff]  ;;  %v791_v43 = vld [vmem:[#allocation8 + $0x798] sm:$0xff] }
 0x175   :  { %2863 = vmatpush2.msra.mxu0 %v2004_v44  ;;  %2918 = vmatpush1.msra.mxu1 %v2132_v45  ;;  %v2452_v44 = vld [vmem:[#allocation8 + $0x3b80] sm:$0xff]  ;;  %v790_v45 = vld [vmem:[#allocation8 + $0x790] sm:$0xff] }
 0x176   :  { %2864 = vmatprep.subr.mxu0 %v1989_v47  ;;  %2919 = vmatprep.subr.mxu1 %v2117_v49  ;;  %v6633_v47 = vsub.s32 7, %v6578_v0  ;;  %v2437_v49 = vld [vmem:[#allocation8 + $0x3b08] sm:$0xff] }
 0x177   :  { %2865 = vmatpush2.msra.mxu0 %v1988_v50  ;;  %2920 = vmatpush1.msra.mxu1 %v2116_v51  ;;  %v775_v50 = vld [vmem:[#allocation8 + $0x718] sm:$0xff]  ;;  %v535_v51 = vpop.f32.mrf.mxu1 }
 0x178   :  { %2866 = vmatprep.subr.mxu0 %v1973_v52  ;;  %2921 = vmatprep.subr.mxu1 %v2101_v53  ;;  %v2436_v52 = vld [vmem:[#allocation8 + $0x3b00] sm:$0xff]  ;;  %v774_v53 = vld [vmem:[#allocation8 + $0x710] sm:$0xff] }
 0x179   :  { %2867 = vmatpush2.msra.mxu0 %v1972_v54  ;;  %2922 = vmatpush1.msra.mxu1 %v2100_v55  ;;  %v2421_v54 = vld [vmem:[#allocation8 + $0x3a88] sm:$0xff]  ;;  %v759_v55 = vld [vmem:[#allocation8 + $0x698] sm:$0xff] }
 0x17a   :  { %2868 = vmatprep.subr.mxu0 %v1957_v56  ;;  %2923 = vmatprep.subr.mxu1 %v2085_v57  ;;  %v2420_v56 = vld [vmem:[#allocation8 + $0x3a80] sm:$0xff]  ;;  %v758_v57 = vld [vmem:[#allocation8 + $0x690] sm:$0xff] }
 0x17b   :  { %2869 = vmatpush2.msra.mxu0 %v1956_v58  ;;  %2924 = vmatpush1.msra.mxu1 %v2084_v59  ;;  %v6638_v58 = vsub.s32 6, %v6578_v0  ;;  %v243_v59 = vrot.slane %v6583_v7, %v6633_v47 }
 0x17c   :  { %2870 = vmatprep.subr.mxu0 %v1941_v60  ;;  %2925 = vmatprep.subr.mxu1 %v2581_v61  ;;  %v2405_v60 = vld [vmem:[#allocation8 + $0x3a08] sm:$0xff]  ;;  %v743_v61 = vld [vmem:[#allocation8 + $0x618] sm:$0xff] }
 0x17d   :  { %2871 = vmatpush2.msra.mxu0 %v1940_v62  ;;  %2926 = vmatpush2.msra.mxu1 %v2580_v63  ;;  %v537_v62 = vpop.f32.mrf.mxu1  ;;  %v2404_v63 = vld [vmem:[#allocation8 + $0x3a00] sm:$0xff]  ;;  %v239_v0 = vrot.slane %v6583_v7, %v6638_v58 }
 0x17e   :  { %2872 = vmatprep.subr.mxu0 %v1925_v1  ;;  %2927 = vmatprep.subr.mxu1 %v2565_v2  ;;  %v742_v1 = vld [vmem:[#allocation8 + $0x610] sm:$0xff]  ;;  %v2389_v2 = vld [vmem:[#allocation8 + $0x3988] sm:$0xff]  ;;  %v2356_v7 = vld [vmem:[#allocation8 + $0x3880] sm:$0xff] }
 0x17f   :  { %2873 = vmatpush2.msra.mxu0 %v1924_v3  ;;  %2928 = vmatpush2.msra.mxu1 %v2564_v4  ;;  %v727_v3 = vld [vmem:[#allocation8 + $0x598] sm:$0xff]  ;;  %v538_v4 = vadd.f32 %v537_v62, %v243_v59  ;;  %v536_v19 = vadd.f32 %v535_v51, %v239_v0  ;;  %v1222_v59 = vld [vmem:[#allocation8 + $0x1510] sm:$0xff] }
 0x180   :  { %2874 = vmatprep.subr.mxu0 %v1909_v9  ;;  %2929 = vmatprep.subr.mxu1 %v2549_v10  ;;  %v2388_v9 = vld [vmem:[#allocation8 + $0x3980] sm:$0xff]  ;;  %v726_v10 = vld [vmem:[#allocation8 + $0x590] sm:$0xff]  ;;  %v599_v51 = vld [vmem:[#allocation8 + $0x198] sm:$0xff] }
 0x181   :  { %2875 = vmatpush2.msra.mxu0 %v1908_v11  ;;  %2930 = vmatpush2.msra.mxu1 %v2548_v12  ;;  %v2373_v11 = vld [vmem:[#allocation8 + $0x3908] sm:$0xff]  ;;  %v711_v12 = vld [vmem:[#allocation8 + $0x518] sm:$0xff]  ;;  %v6646_v31 = vmax.f32 %v536_v19, 0.0  ;;  %v566_v62 = vld [vmem:[#allocation8 + $0x90] sm:$0xff] }
 0x182   :  { %2876 = vmatprep.subr.mxu0 %v1893_v13  ;;  %2931 = vmatprep.subr.mxu1 %v2533_v14  ;;  %v2372_v13 = vld [vmem:[#allocation8 + $0x3900] sm:$0xff]  ;;  %v710_v14 = vld [vmem:[#allocation8 + $0x510] sm:$0xff]  ;;  %v1143_v19 = vld [vmem:[#allocation8 + $0x1298] sm:$0xff] }
 0x183   :  { %2877 = vmatpush2.msra.mxu0 %v1892_v17  ;;  %2932 = vmatpush2.msra.mxu1 %v2532_v18  ;;  %v2357_v17 = vld [vmem:[#allocation8 + $0x3888] sm:$0xff]  ;;  %v695_v18 = vld [vmem:[#allocation8 + $0x498] sm:$0xff]  ;;  %v1190_v0 = vld [vmem:[#allocation8 + $0x1410] sm:$0xff] }
 0x184   :  { %2878 = vmatprep.subr.mxu0 %v1877_v21  ;;  %2933 = vmatprep.subr.mxu1 %v2517_v23  ;;  %v6644_v21 = vmax.f32 %v538_v4, 0.0  ;;  %v694_v23 = vld [vmem:[#allocation8 + $0x490] sm:$0xff]  ;;  %v1047_v4 = vld [vmem:[#allocation8 + $0xf98] sm:$0xff] }
 0x185   :  { %2879 = vmatpush2.msra.mxu0 %v1876_v25  ;;  %2934 = vmatpush2.msra.mxu1 %v2516_v27  ;;  %v2341_v25 = vld [vmem:[#allocation8 + $0x3808] sm:$0xff]  ;;  %v679_v27 = vld [vmem:[#allocation8 + $0x418] sm:$0xff] }
 0x186   :  { %2880 = vmatprep.subr.mxu0 %v1861_v28  ;;  %2935 = vmatprep.subr.mxu1 %v2501_v29  ;;  %v2340_v28 = vld [vmem:[#allocation8 + $0x3800] sm:$0xff]  ;;  %v678_v29 = vld [vmem:[#allocation8 + $0x410] sm:$0xff] }
 0x187   :  { %2881 = vmatpush2.msra.mxu0 %v1860_v32  ;;  %2936 = vmatpush2.msra.mxu1 %v2500_v33  ;;  %v663_v32 = vld [vmem:[#allocation8 + $0x398] sm:$0xff] }
 0x188   :  { %2882 = vmatprep.subr.mxu0 %v1845_v22  ;;  %2937 = vmatprep.subr.mxu1 %v2485_v34  ;;  %v1303_v33 = vld [vmem:[#allocation8 + $0x1798] sm:$0xff]  ;;  %v662_v22 = vld [vmem:[#allocation8 + $0x390] sm:$0xff] }
 0x189   :  { %2883 = vmatpush2.msra.mxu0 %v1844_v35  ;;  %2938 = vmatpush2.msra.mxu1 %v2484_v36  ;;  %v1302_v34 = vld [vmem:[#allocation8 + $0x1790] sm:$0xff]  ;;  %v647_v35 = vld [vmem:[#allocation8 + $0x318] sm:$0xff] }
 0x18a   :  { %2884 = vmatprep.subr.mxu0 %v1829_v37  ;;  %2939 = vmatprep.subr.mxu1 %v2469_v38  ;;  %v1287_v36 = vld [vmem:[#allocation8 + $0x1718] sm:$0xff]  ;;  %v646_v37 = vld [vmem:[#allocation8 + $0x310] sm:$0xff] }
 0x18b   :  { %2885 = vmatpush2.msra.mxu0 %v1828_v30  ;;  %2940 = vmatpush2.msra.mxu1 %v2468_v40  ;;  %v1286_v38 = vld [vmem:[#allocation8 + $0x1710] sm:$0xff]  ;;  %v631_v30 = vld [vmem:[#allocation8 + $0x298] sm:$0xff] }
 0x18c   :  { %2887 = vmatmul.mubr.f32.vlgmr.msra.gmra.mxu0 %v6630_v39  ;;  %2941 = vmatprep.subr.mxu1 %v2453_v41  ;;  %v1271_v40 = vld [vmem:[#allocation8 + $0x1698] sm:$0xff]  ;;  %v630_v41 = vld [vmem:[#allocation8 + $0x290] sm:$0xff] }
 0x18d   :  { %2964 = vmatprep.subr.mxu0 %v791_v43  ;;  %2942 = vmatpush2.msra.mxu1 %v2452_v44  ;;  %v1270_v43 = vld [vmem:[#allocation8 + $0x1690] sm:$0xff]  ;;  %v615_v44 = vld [vmem:[#allocation8 + $0x218] sm:$0xff] }
 0x18e   :  { %2965 = vmatpush1.msra.mxu0 %v790_v45  ;;  %3028 = vmatprep.mubr.f32.mxu0 %v6592_v15  ;;  %v1255_v45 = vld [vmem:[#allocation8 + $0x1618] sm:$0xff] }
 0x18f   :  { %2943 = vmatprep.subr.mxu1 %v2437_v49  ;;  %2966 = vmatprep.subr.mxu0 %v775_v50  ;;  %v614_v49 = vld [vmem:[#allocation8 + $0x210] sm:$0xff] }
 0x190   :  { %2944 = vmatpush2.msra.mxu1 %v2436_v52  ;;  %2967 = vmatpush1.msra.mxu0 %v774_v53  ;;  %v1254_v50 = vld [vmem:[#allocation8 + $0x1610] sm:$0xff]  ;;  %v1239_v52 = vld [vmem:[#allocation8 + $0x1598] sm:$0xff] }
 0x191   :  { %2945 = vmatprep.subr.mxu1 %v2421_v54  ;;  %2968 = vmatprep.subr.mxu0 %v759_v55  ;;  %v598_v53 = vld [vmem:[#allocation8 + $0x190] sm:$0xff]  ;;  %v583_v55 = vld [vmem:[#allocation8 + $0x118] sm:$0xff] }
 0x192   :  { %2946 = vmatpush2.msra.mxu1 %v2420_v56  ;;  %2969 = vmatpush1.msra.mxu0 %v758_v57  ;;  %v1238_v54 = vld [vmem:[#allocation8 + $0x1590] sm:$0xff]  ;;  %v1223_v56 = vld [vmem:[#allocation8 + $0x1518] sm:$0xff] }
 0x193   :  { %2947 = vmatprep.subr.mxu1 %v2405_v60  ;;  %2970 = vmatprep.subr.mxu0 %v743_v61  ;;  %v582_v57 = vld [vmem:[#allocation8 + $0x110] sm:$0xff]  ;;  %v567_v60 = vld [vmem:[#allocation8 + $0x98] sm:$0xff] }
 0x194   :  { %2948 = vmatpush2.msra.mxu1 %v2404_v63  ;;  %2971 = vmatpush1.msra.mxu0 %v742_v1  ;;  %v1207_v61 = vld [vmem:[#allocation8 + $0x1498] sm:$0xff]  ;;  %v1206_v63 = vld [vmem:[#allocation8 + $0x1490] sm:$0xff] }
 0x195   :  { %2949 = vmatprep.subr.mxu1 %v2389_v2  ;;  %2972 = vmatprep.subr.mxu0 %v727_v3  ;;  %v551_v1 = vld [vmem:[#allocation8 + $0x18] sm:$0xff]  ;;  %v550_v3 = vld [vmem:[#allocation8 + $0x10] sm:$0xff] }
 0x196   :  { %2950 = vmatpush2.msra.mxu1 %v2388_v9  ;;  %2973 = vmatpush1.msra.mxu0 %v726_v10  ;;  %v1191_v2 = vld [vmem:[#allocation8 + $0x1418] sm:$0xff]  ;;  %v1046_v10 = vld [vmem:[#allocation8 + $0xf90] sm:$0xff] }
 0x197   :  { %2951 = vmatprep.subr.mxu1 %v2373_v11  ;;  %2974 = vmatprep.subr.mxu0 %v711_v12  ;;  %v1175_v9 = vld [vmem:[#allocation8 + $0x1398] sm:$0xff]  ;;  %v1174_v11 = vld [vmem:[#allocation8 + $0x1390] sm:$0xff] }
 0x198   :  { %2952 = vmatpush2.msra.mxu1 %v2372_v13  ;;  %2975 = vmatpush1.msra.mxu0 %v710_v14  ;;  %v1031_v12 = vld [vmem:[#allocation8 + $0xf18] sm:$0xff]  ;;  %v1030_v14 = vld [vmem:[#allocation8 + $0xf10] sm:$0xff] }
 0x199   :  { %2953 = vmatprep.subr.mxu1 %v2357_v17  ;;  %2976 = vmatprep.subr.mxu0 %v695_v18  ;;  %v1159_v13 = vld [vmem:[#allocation8 + $0x1318] sm:$0xff]  ;;  %v1158_v17 = vld [vmem:[#allocation8 + $0x1310] sm:$0xff] }
 0x19a   :  { %2954 = vmatpush2.msra.mxu1 %v2356_v7  ;;  %2977 = vmatpush1.msra.mxu0 %v694_v23  ;;  %v1015_v18 = vld [vmem:[#allocation8 + $0xe98] sm:$0xff]  ;;  %v1014_v7 = vld [vmem:[#allocation8 + $0xe90] sm:$0xff] }
 0x19b   :  { %2955 = vmatprep.subr.mxu1 %v2341_v25  ;;  %2957 = vmatprep.mubr.f32.mxu1 %v6644_v21  ;;  %v1142_v23 = vld [vmem:[#allocation8 + $0x1290] sm:$0xff]  ;;  %v999_v25 = vld [vmem:[#allocation8 + $0xe18] sm:$0xff] }
 0x19c   :  { %2978 = vmatprep.subr.mxu0 %v679_v27  ;;  %2956 = vmatpush2.msra.mxu1 %v2340_v28  ;;  %v1127_v27 = vld [vmem:[#allocation8 + $0x1218] sm:$0xff]  ;;  %v998_v28 = vld [vmem:[#allocation8 + $0xe10] sm:$0xff] }
 0x19d   :  { %2979 = vmatpush1.msra.mxu0 %v678_v29  ;;  %2958 = vmatmul.mubr.f32.vlgmr.msra.gmra.mxu1 %v6646_v31  ;;  %v1126_v29 = vld [vmem:[#allocation8 + $0x1210] sm:$0xff] }
 0x19e   :  { %2980 = vmatprep.subr.mxu0 %v663_v32  ;;  %3035 = vmatprep.subr.mxu1 %v1303_v33  ;;  %v983_v32 = vld [vmem:[#allocation8 + $0xd98] sm:$0xff] }
 0x19f   :  { %2981 = vmatpush1.msra.mxu0 %v662_v22  ;;  %3036 = vmatpush1.msra.mxu1 %v1302_v34  ;;  %v1111_v33 = vld [vmem:[#allocation8 + $0x1198] sm:$0xff]  ;;  %v982_v22 = vld [vmem:[#allocation8 + $0xd90] sm:$0xff] }
 0x1a0   :  { %3099 = vmatprep.mubr.f32.mxu1 %v6618_v46  ;;  %2982 = vmatprep.subr.mxu0 %v647_v35  ;;  %v1110_v34 = vld [vmem:[#allocation8 + $0x1190] sm:$0xff]  ;;  %v967_v35 = vld [vmem:[#allocation8 + $0xd18] sm:$0xff] }
 0x1a1   :  { %3037 = vmatprep.subr.mxu1 %v1287_v36  ;;  %2983 = vmatpush1.msra.mxu0 %v646_v37  ;;  %v1095_v36 = vld [vmem:[#allocation8 + $0x1118] sm:$0xff]  ;;  %v966_v37 = vld [vmem:[#allocation8 + $0xd10] sm:$0xff] }
 0x1a2   :  { %3038 = vmatpush1.msra.mxu1 %v1286_v38  ;;  %2984 = vmatprep.subr.mxu0 %v631_v30  ;;  %v1094_v38 = vld [vmem:[#allocation8 + $0x1110] sm:$0xff]  ;;  %v951_v30 = vld [vmem:[#allocation8 + $0xc98] sm:$0xff] }
 0x1a3   :  { %3039 = vmatprep.subr.mxu1 %v1271_v40  ;;  %2985 = vmatpush1.msra.mxu0 %v630_v41  ;;  %v1079_v40 = vld [vmem:[#allocation8 + $0x1098] sm:$0xff]  ;;  %v950_v41 = vld [vmem:[#allocation8 + $0xc90] sm:$0xff] }
 0x1a4   :  { %3040 = vmatpush1.msra.mxu1 %v1270_v43  ;;  %2986 = vmatprep.subr.mxu0 %v615_v44  ;;  %v1078_v43 = vld [vmem:[#allocation8 + $0x1090] sm:$0xff]  ;;  %v935_v44 = vld [vmem:[#allocation8 + $0xc18] sm:$0xff] }
 0x1a5   :  { %3041 = vmatprep.subr.mxu1 %v1255_v45  ;;  %2987 = vmatpush1.msra.mxu0 %v614_v49  ;;  %v1063_v45 = vld [vmem:[#allocation8 + $0x1018] sm:$0xff]  ;;  %v934_v49 = vld [vmem:[#allocation8 + $0xc10] sm:$0xff] }
 0x1a6   :  { %3042 = vmatpush1.msra.mxu1 %v1254_v50  ;;  %2988 = vmatprep.subr.mxu0 %v599_v51  ;;  %v1062_v50 = vld [vmem:[#allocation8 + $0x1010] sm:$0xff]  ;;  %v919_v51 = vld [vmem:[#allocation8 + $0xb98] sm:$0xff] }
 0x1a7   :  { %3043 = vmatprep.subr.mxu1 %v1239_v52  ;;  %2989 = vmatpush1.msra.mxu0 %v598_v53  ;;  %v1559_v52 = vld [vmem:[#allocation8 + $0x1f98] sm:$0xff]  ;;  %v918_v53 = vld [vmem:[#allocation8 + $0xb90] sm:$0xff] }
 0x1a8   :  { %3044 = vmatpush1.msra.mxu1 %v1238_v54  ;;  %2990 = vmatprep.subr.mxu0 %v583_v55  ;;  %v1558_v54 = vld [vmem:[#allocation8 + $0x1f90] sm:$0xff]  ;;  %v903_v55 = vld [vmem:[#allocation8 + $0xb18] sm:$0xff] }
 0x1a9   :  { %3045 = vmatprep.subr.mxu1 %v1223_v56  ;;  %2991 = vmatpush1.msra.mxu0 %v582_v57  ;;  %v1543_v56 = vld [vmem:[#allocation8 + $0x1f18] sm:$0xff]  ;;  %v902_v57 = vld [vmem:[#allocation8 + $0xb10] sm:$0xff] }
 0x1aa   :  { %3046 = vmatpush1.msra.mxu1 %v1222_v59  ;;  %2992 = vmatprep.subr.mxu0 %v567_v60  ;;  %v1542_v59 = vld [vmem:[#allocation8 + $0x1f10] sm:$0xff]  ;;  %v887_v60 = vld [vmem:[#allocation8 + $0xa98] sm:$0xff] }
 0x1ab   :  { %3047 = vmatprep.subr.mxu1 %v1207_v61  ;;  %2993 = vmatpush1.msra.mxu0 %v566_v62  ;;  %v1527_v61 = vld [vmem:[#allocation8 + $0x1e98] sm:$0xff]  ;;  %v886_v62 = vld [vmem:[#allocation8 + $0xa90] sm:$0xff] }
 0x1ac   :  { %3048 = vmatpush1.msra.mxu1 %v1206_v63  ;;  %2994 = vmatprep.subr.mxu0 %v551_v1  ;;  %v1526_v63 = vld [vmem:[#allocation8 + $0x1e90] sm:$0xff]  ;;  %v871_v1 = vld [vmem:[#allocation8 + $0xa18] sm:$0xff] }
 0x1ad   :  { %3049 = vmatprep.subr.mxu1 %v1191_v2  ;;  %2995 = vmatpush1.msra.mxu0 %v550_v3  ;;  %v1511_v2 = vld [vmem:[#allocation8 + $0x1e18] sm:$0xff]  ;;  %v870_v3 = vld [vmem:[#allocation8 + $0xa10] sm:$0xff] }
 0x1ae   :  { %3050 = vmatpush1.msra.mxu1 %v1190_v0  ;;  %2996 = vmatprep.subr.mxu0 %v1047_v4  ;;  %v1510_v0 = vld [vmem:[#allocation8 + $0x1e10] sm:$0xff]  ;;  %v855_v4 = vld [vmem:[#allocation8 + $0x998] sm:$0xff] }
 0x1af   :  { %3051 = vmatprep.subr.mxu1 %v1175_v9  ;;  %2997 = vmatpush2.msra.mxu0 %v1046_v10  ;;  %v1495_v9 = vld [vmem:[#allocation8 + $0x1d98] sm:$0xff]  ;;  %v854_v10 = vld [vmem:[#allocation8 + $0x990] sm:$0xff] }
 0x1b0   :  { %3052 = vmatpush1.msra.mxu1 %v1174_v11  ;;  %2998 = vmatprep.subr.mxu0 %v1031_v12  ;;  %v1494_v11 = vld [vmem:[#allocation8 + $0x1d90] sm:$0xff]  ;;  %v839_v12 = vld [vmem:[#allocation8 + $0x918] sm:$0xff] }
 0x1b1   :  { %3053 = vmatprep.subr.mxu1 %v1159_v13  ;;  %2999 = vmatpush2.msra.mxu0 %v1030_v14  ;;  %v1479_v13 = vld [vmem:[#allocation8 + $0x1d18] sm:$0xff]  ;;  %v838_v14 = vld [vmem:[#allocation8 + $0x910] sm:$0xff] }
 0x1b2   :  { %3054 = vmatpush1.msra.mxu1 %v1158_v17  ;;  %3000 = vmatprep.subr.mxu0 %v1015_v18  ;;  %v1478_v17 = vld [vmem:[#allocation8 + $0x1d10] sm:$0xff]  ;;  %v823_v18 = vld [vmem:[#allocation8 + $0x898] sm:$0xff] }
 0x1b3   :  { %3055 = vmatprep.subr.mxu1 %v1143_v19  ;;  %3001 = vmatpush2.msra.mxu0 %v1014_v7  ;;  %v1463_v19 = vld [vmem:[#allocation8 + $0x1c98] sm:$0xff]  ;;  %v822_v7 = vld [vmem:[#allocation8 + $0x890] sm:$0xff] }
 0x1b4   :  { %3056 = vmatpush1.msra.mxu1 %v1142_v23  ;;  %3002 = vmatprep.subr.mxu0 %v999_v25  ;;  %v1462_v23 = vld [vmem:[#allocation8 + $0x1c90] sm:$0xff]  ;;  %v807_v25 = vld [vmem:[#allocation8 + $0x818] sm:$0xff] }
 0x1b5   :  { %3057 = vmatprep.subr.mxu1 %v1127_v27  ;;  %3003 = vmatpush2.msra.mxu0 %v998_v28  ;;  %v1447_v27 = vld [vmem:[#allocation8 + $0x1c18] sm:$0xff]  ;;  %v806_v28 = vld [vmem:[#allocation8 + $0x810] sm:$0xff] }
 0x1b6   :  { %3058 = vmatpush1.msra.mxu1 %v1126_v29  ;;  %3004 = vmatprep.subr.mxu0 %v983_v32  ;;  %v1446_v29 = vld [vmem:[#allocation8 + $0x1c10] sm:$0xff]  ;;  %v1431_v32 = vld [vmem:[#allocation8 + $0x1b98] sm:$0xff] }
 0x1b7   :  { %3059 = vmatprep.subr.mxu1 %v1111_v33  ;;  %3005 = vmatpush2.msra.mxu0 %v982_v22  ;;  %v1815_v33 = vld [vmem:[#allocation8 + $0x2798] sm:$0xff]  ;;  %v1430_v22 = vld [vmem:[#allocation8 + $0x1b90] sm:$0xff] }
 0x1b8   :  { %3060 = vmatpush1.msra.mxu1 %v1110_v34  ;;  %3006 = vmatprep.subr.mxu0 %v967_v35  ;;  %v1814_v34 = vld [vmem:[#allocation8 + $0x2790] sm:$0xff]  ;;  %v1415_v35 = vld [vmem:[#allocation8 + $0x1b18] sm:$0xff] }
 0x1b9   :  { %3061 = vmatprep.subr.mxu1 %v1095_v36  ;;  %3007 = vmatpush2.msra.mxu0 %v966_v37  ;;  %v1799_v36 = vld [vmem:[#allocation8 + $0x2718] sm:$0xff]  ;;  %v1414_v37 = vld [vmem:[#allocation8 + $0x1b10] sm:$0xff] }
 0x1ba   :  { %3062 = vmatpush1.msra.mxu1 %v1094_v38  ;;  %3008 = vmatprep.subr.mxu0 %v951_v30  ;;  %v1798_v38 = vld [vmem:[#allocation8 + $0x2710] sm:$0xff]  ;;  %v1399_v30 = vld [vmem:[#allocation8 + $0x1a98] sm:$0xff] }
 0x1bb   :  { %3063 = vmatprep.subr.mxu1 %v1079_v40  ;;  %3009 = vmatpush2.msra.mxu0 %v950_v41  ;;  %v1783_v40 = vld [vmem:[#allocation8 + $0x2698] sm:$0xff]  ;;  %v1398_v41 = vld [vmem:[#allocation8 + $0x1a90] sm:$0xff] }
 0x1bc   :  { %3064 = vmatpush1.msra.mxu1 %v1078_v43  ;;  %3010 = vmatprep.subr.mxu0 %v935_v44  ;;  %v1782_v43 = vld [vmem:[#allocation8 + $0x2690] sm:$0xff]  ;;  %v1383_v44 = vld [vmem:[#allocation8 + $0x1a18] sm:$0xff] }
 0x1bd   :  { %3065 = vmatprep.subr.mxu1 %v1063_v45  ;;  %3011 = vmatpush2.msra.mxu0 %v934_v49  ;;  %v1767_v45 = vld [vmem:[#allocation8 + $0x2618] sm:$0xff]  ;;  %v1382_v49 = vld [vmem:[#allocation8 + $0x1a10] sm:$0xff] }
 0x1be   :  { %3066 = vmatpush1.msra.mxu1 %v1062_v50  ;;  %3012 = vmatprep.subr.mxu0 %v919_v51  ;;  %v1766_v50 = vld [vmem:[#allocation8 + $0x2610] sm:$0xff]  ;;  %v1367_v51 = vld [vmem:[#allocation8 + $0x1998] sm:$0xff] }
 0x1bf   :  { %3067 = vmatprep.subr.mxu1 %v1559_v52  ;;  %3013 = vmatpush2.msra.mxu0 %v918_v53  ;;  %v1751_v52 = vld [vmem:[#allocation8 + $0x2598] sm:$0xff]  ;;  %v1366_v53 = vld [vmem:[#allocation8 + $0x1990] sm:$0xff] }
 0x1c0   :  { %3068 = vmatpush2.msra.mxu1 %v1558_v54  ;;  %3014 = vmatprep.subr.mxu0 %v903_v55  ;;  %v1750_v54 = vld [vmem:[#allocation8 + $0x2590] sm:$0xff]  ;;  %v1351_v55 = vld [vmem:[#allocation8 + $0x1918] sm:$0xff] }
 0x1c1   :  { %3069 = vmatprep.subr.mxu1 %v1543_v56  ;;  %3015 = vmatpush2.msra.mxu0 %v902_v57  ;;  %v1735_v56 = vld [vmem:[#allocation8 + $0x2518] sm:$0xff]  ;;  %v1350_v57 = vld [vmem:[#allocation8 + $0x1910] sm:$0xff] }
 0x1c2   :  { %3070 = vmatpush2.msra.mxu1 %v1542_v59  ;;  %3016 = vmatprep.subr.mxu0 %v887_v60  ;;  %v1734_v59 = vld [vmem:[#allocation8 + $0x2510] sm:$0xff]  ;;  %v1335_v60 = vld [vmem:[#allocation8 + $0x1898] sm:$0xff] }
 0x1c3   :  { %3071 = vmatprep.subr.mxu1 %v1527_v61  ;;  %3017 = vmatpush2.msra.mxu0 %v886_v62  ;;  %v1719_v61 = vld [vmem:[#allocation8 + $0x2498] sm:$0xff]  ;;  %v1334_v62 = vld [vmem:[#allocation8 + $0x1890] sm:$0xff] }
 0x1c4   :  { %3072 = vmatpush2.msra.mxu1 %v1526_v63  ;;  %3018 = vmatprep.subr.mxu0 %v871_v1  ;;  %v1718_v63 = vld [vmem:[#allocation8 + $0x2490] sm:$0xff]  ;;  %v1319_v1 = vld [vmem:[#allocation8 + $0x1818] sm:$0xff] }
 0x1c5   :  { %3073 = vmatprep.subr.mxu1 %v1511_v2  ;;  %3019 = vmatpush2.msra.mxu0 %v870_v3  ;;  %v1703_v2 = vld [vmem:[#allocation8 + $0x2418] sm:$0xff]  ;;  %v1318_v3 = vld [vmem:[#allocation8 + $0x1810] sm:$0xff] }
 0x1c6   :  { %3074 = vmatpush2.msra.mxu1 %v1510_v0  ;;  %3020 = vmatprep.subr.mxu0 %v855_v4  ;;  %v1702_v0 = vld [vmem:[#allocation8 + $0x2410] sm:$0xff]  ;;  %v1687_v4 = vld [vmem:[#allocation8 + $0x2398] sm:$0xff] }
 0x1c7   :  { %3075 = vmatprep.subr.mxu1 %v1495_v9  ;;  %3021 = vmatpush2.msra.mxu0 %v854_v10  ;;  %v2327_v9 = vld [vmem:[#allocation8 + $0x3798] sm:$0xff]  ;;  %v1686_v10 = vld [vmem:[#allocation8 + $0x2390] sm:$0xff] }
 0x1c8   :  { %3076 = vmatpush2.msra.mxu1 %v1494_v11  ;;  %3022 = vmatprep.subr.mxu0 %v839_v12  ;;  %v2326_v11 = vld [vmem:[#allocation8 + $0x3790] sm:$0xff]  ;;  %v1671_v12 = vld [vmem:[#allocation8 + $0x2318] sm:$0xff] }
 0x1c9   :  { %3077 = vmatprep.subr.mxu1 %v1479_v13  ;;  %3023 = vmatpush2.msra.mxu0 %v838_v14  ;;  %v2311_v13 = vld [vmem:[#allocation8 + $0x3718] sm:$0xff]  ;;  %v1670_v14 = vld [vmem:[#allocation8 + $0x2310] sm:$0xff] }
 0x1ca   :  { %3078 = vmatpush2.msra.mxu1 %v1478_v17  ;;  %3024 = vmatprep.subr.mxu0 %v823_v18  ;;  %v2310_v17 = vld [vmem:[#allocation8 + $0x3710] sm:$0xff]  ;;  %v1655_v18 = vld [vmem:[#allocation8 + $0x2298] sm:$0xff] }
 0x1cb   :  { %3079 = vmatprep.subr.mxu1 %v1463_v19  ;;  %3025 = vmatpush2.msra.mxu0 %v822_v7  ;;  %v2295_v19 = vld [vmem:[#allocation8 + $0x3698] sm:$0xff]  ;;  %v1654_v7 = vld [vmem:[#allocation8 + $0x2290] sm:$0xff] }
 0x1cc   :  { %3080 = vmatpush2.msra.mxu1 %v1462_v23  ;;  %3026 = vmatprep.subr.mxu0 %v807_v25  ;;  %v2294_v23 = vld [vmem:[#allocation8 + $0x3690] sm:$0xff]  ;;  %v1639_v25 = vld [vmem:[#allocation8 + $0x2218] sm:$0xff] }
 0x1cd   :  { %3081 = vmatprep.subr.mxu1 %v1447_v27  ;;  %3027 = vmatpush2.msra.mxu0 %v806_v28  ;;  %v2279_v27 = vld [vmem:[#allocation8 + $0x3618] sm:$0xff]  ;;  %v1638_v28 = vld [vmem:[#allocation8 + $0x2210] sm:$0xff] }
 0x1ce   :  { %3082 = vmatpush2.msra.mxu1 %v1446_v29  ;;  %3029 = vmatmul.mubr.f32.vlgmr.msra.gmra.mxu0 %v6594_v16  ;;  %v2278_v29 = vld [vmem:[#allocation8 + $0x3610] sm:$0xff] }
 0x1cf   :  { %3083 = vmatprep.subr.mxu1 %v1431_v32  ;;  %3106 = vmatprep.subr.mxu0 %v1815_v33  ;;  %v1623_v32 = vld [vmem:[#allocation8 + $0x2198] sm:$0xff] }
 0x1d0   :  { %3084 = vmatpush2.msra.mxu1 %v1430_v22  ;;  %3107 = vmatpush1.msra.mxu0 %v1814_v34  ;;  %v2263_v33 = vld [vmem:[#allocation8 + $0x3598] sm:$0xff]  ;;  %v1622_v22 = vld [vmem:[#allocation8 + $0x2190] sm:$0xff] }
 0x1d1   :  { %3170 = vmatprep.mubr.f32.mxu0 %v6615_v42  ;;  %3085 = vmatprep.subr.mxu1 %v1415_v35  ;;  %v2262_v34 = vld [vmem:[#allocation8 + $0x3590] sm:$0xff]  ;;  %v1607_v35 = vld [vmem:[#allocation8 + $0x2118] sm:$0xff] }
 0x1d2   :  { %3108 = vmatprep.subr.mxu0 %v1799_v36  ;;  %3086 = vmatpush2.msra.mxu1 %v1414_v37  ;;  %v2247_v36 = vld [vmem:[#allocation8 + $0x3518] sm:$0xff]  ;;  %v1606_v37 = vld [vmem:[#allocation8 + $0x2110] sm:$0xff] }
 0x1d3   :  { %3109 = vmatpush1.msra.mxu0 %v1798_v38  ;;  %3087 = vmatprep.subr.mxu1 %v1399_v30  ;;  %v2246_v38 = vld [vmem:[#allocation8 + $0x3510] sm:$0xff]  ;;  %v1591_v30 = vld [vmem:[#allocation8 + $0x2098] sm:$0xff] }
 0x1d4   :  { %3110 = vmatprep.subr.mxu0 %v1783_v40  ;;  %3088 = vmatpush2.msra.mxu1 %v1398_v41  ;;  %v2231_v40 = vld [vmem:[#allocation8 + $0x3498] sm:$0xff]  ;;  %v1590_v41 = vld [vmem:[#allocation8 + $0x2090] sm:$0xff] }
 0x1d5   :  { %3111 = vmatpush1.msra.mxu0 %v1782_v43  ;;  %3089 = vmatprep.subr.mxu1 %v1383_v44  ;;  %v2230_v43 = vld [vmem:[#allocation8 + $0x3490] sm:$0xff]  ;;  %v1575_v44 = vld [vmem:[#allocation8 + $0x2018] sm:$0xff] }
 0x1d6   :  { %3112 = vmatprep.subr.mxu0 %v1767_v45  ;;  %3090 = vmatpush2.msra.mxu1 %v1382_v49  ;;  %v2215_v45 = vld [vmem:[#allocation8 + $0x3418] sm:$0xff]  ;;  %v1574_v49 = vld [vmem:[#allocation8 + $0x2010] sm:$0xff] }
 0x1d7   :  { %3113 = vmatpush1.msra.mxu0 %v1766_v50  ;;  %3091 = vmatprep.subr.mxu1 %v1367_v51  ;;  %v2214_v50 = vld [vmem:[#allocation8 + $0x3410] sm:$0xff]  ;;  %v2071_v51 = vld [vmem:[#allocation8 + $0x2f98] sm:$0xff] }
 0x1d8   :  { %3114 = vmatprep.subr.mxu0 %v1751_v52  ;;  %3092 = vmatpush2.msra.mxu1 %v1366_v53  ;;  %v2199_v52 = vld [vmem:[#allocation8 + $0x3398] sm:$0xff]  ;;  %v2070_v53 = vld [vmem:[#allocation8 + $0x2f90] sm:$0xff] }
 0x1d9   :  { %3115 = vmatpush1.msra.mxu0 %v1750_v54  ;;  %3093 = vmatprep.subr.mxu1 %v1351_v55  ;;  %v2198_v54 = vld [vmem:[#allocation8 + $0x3390] sm:$0xff]  ;;  %v2055_v55 = vld [vmem:[#allocation8 + $0x2f18] sm:$0xff] }
 0x1da   :  { %3116 = vmatprep.subr.mxu0 %v1735_v56  ;;  %3094 = vmatpush2.msra.mxu1 %v1350_v57  ;;  %v2183_v56 = vld [vmem:[#allocation8 + $0x3318] sm:$0xff]  ;;  %v2054_v57 = vld [vmem:[#allocation8 + $0x2f10] sm:$0xff] }
 0x1db   :  { %3117 = vmatpush1.msra.mxu0 %v1734_v59  ;;  %3095 = vmatprep.subr.mxu1 %v1335_v60  ;;  %v2182_v59 = vld [vmem:[#allocation8 + $0x3310] sm:$0xff]  ;;  %v2039_v60 = vld [vmem:[#allocation8 + $0x2e98] sm:$0xff] }
 0x1dc   :  { %3118 = vmatprep.subr.mxu0 %v1719_v61  ;;  %3096 = vmatpush2.msra.mxu1 %v1334_v62  ;;  %v2167_v61 = vld [vmem:[#allocation8 + $0x3298] sm:$0xff]  ;;  %v2038_v62 = vld [vmem:[#allocation8 + $0x2e90] sm:$0xff] }
 0x1dd   :  { %3119 = vmatpush1.msra.mxu0 %v1718_v63  ;;  %3097 = vmatprep.subr.mxu1 %v1319_v1  ;;  %v2166_v63 = vld [vmem:[#allocation8 + $0x3290] sm:$0xff]  ;;  %v2023_v1 = vld [vmem:[#allocation8 + $0x2e18] sm:$0xff] }
 0x1de   :  { %3120 = vmatprep.subr.mxu0 %v1703_v2  ;;  %3098 = vmatpush2.msra.mxu1 %v1318_v3  ;;  %v2151_v2 = vld [vmem:[#allocation8 + $0x3218] sm:$0xff]  ;;  %v2022_v3 = vld [vmem:[#allocation8 + $0x2e10] sm:$0xff] }
 0x1df   :  { %3121 = vmatpush1.msra.mxu0 %v1702_v0  ;;  %3100 = vmatmul.mubr.f32.vlgmr.msra.gmra.mxu1 %v6620_v48  ;;  %v2150_v0 = vld [vmem:[#allocation8 + $0x3210] sm:$0xff] }
 0x1e0   :  { %3122 = vmatprep.subr.mxu0 %v1687_v4  ;;  %3177 = vmatprep.subr.mxu1 %v2327_v9  ;;  %v2007_v4 = vld [vmem:[#allocation8 + $0x2d98] sm:$0xff] }
 0x1e1   :  { %3123 = vmatpush1.msra.mxu0 %v1686_v10  ;;  %3178 = vmatpush1.msra.mxu1 %v2326_v11  ;;  %v2135_v9 = vld [vmem:[#allocation8 + $0x3198] sm:$0xff]  ;;  %v2006_v10 = vld [vmem:[#allocation8 + $0x2d90] sm:$0xff] }
 0x1e2   :  { %3241 = vmatprep.mubr.f32.mxu1 %v6644_v21  ;;  %3124 = vmatprep.subr.mxu0 %v1671_v12  ;;  %v2134_v11 = vld [vmem:[#allocation8 + $0x3190] sm:$0xff]  ;;  %v1991_v12 = vld [vmem:[#allocation8 + $0x2d18] sm:$0xff] }
 0x1e3   :  { %3179 = vmatprep.subr.mxu1 %v2311_v13  ;;  %3125 = vmatpush1.msra.mxu0 %v1670_v14  ;;  %v2119_v13 = vld [vmem:[#allocation8 + $0x3118] sm:$0xff]  ;;  %v1990_v14 = vld [vmem:[#allocation8 + $0x2d10] sm:$0xff] }
 0x1e4   :  { %3180 = vmatpush1.msra.mxu1 %v2310_v17  ;;  %3126 = vmatprep.subr.mxu0 %v1655_v18  ;;  %v2118_v17 = vld [vmem:[#allocation8 + $0x3110] sm:$0xff]  ;;  %v1975_v18 = vld [vmem:[#allocation8 + $0x2c98] sm:$0xff] }
 0x1e5   :  { %3181 = vmatprep.subr.mxu1 %v2295_v19  ;;  %3127 = vmatpush1.msra.mxu0 %v1654_v7  ;;  %v2103_v19 = vld [vmem:[#allocation8 + $0x3098] sm:$0xff]  ;;  %v1974_v7 = vld [vmem:[#allocation8 + $0x2c90] sm:$0xff] }
 0x1e6   :  { %3182 = vmatpush1.msra.mxu1 %v2294_v23  ;;  %3128 = vmatprep.subr.mxu0 %v1639_v25  ;;  %v2102_v23 = vld [vmem:[#allocation8 + $0x3090] sm:$0xff]  ;;  %v1959_v25 = vld [vmem:[#allocation8 + $0x2c18] sm:$0xff] }
 0x1e7   :  { %3183 = vmatprep.subr.mxu1 %v2279_v27  ;;  %3129 = vmatpush1.msra.mxu0 %v1638_v28  ;;  %v2087_v27 = vld [vmem:[#allocation8 + $0x3018] sm:$0xff]  ;;  %v1958_v28 = vld [vmem:[#allocation8 + $0x2c10] sm:$0xff] }
 0x1e8   :  { %3184 = vmatpush1.msra.mxu1 %v2278_v29  ;;  %3130 = vmatprep.subr.mxu0 %v1623_v32  ;;  %v2086_v29 = vld [vmem:[#allocation8 + $0x3010] sm:$0xff]  ;;  %v1943_v32 = vld [vmem:[#allocation8 + $0x2b98] sm:$0xff] }
 0x1e9   :  { %3185 = vmatprep.subr.mxu1 %v2263_v33  ;;  %3131 = vmatpush1.msra.mxu0 %v1622_v22  ;;  %v2583_v33 = vld [vmem:[#allocation8 + $0x3f98] sm:$0xff]  ;;  %v1942_v22 = vld [vmem:[#allocation8 + $0x2b90] sm:$0xff] }
 0x1ea   :  { %3186 = vmatpush1.msra.mxu1 %v2262_v34  ;;  %3132 = vmatprep.subr.mxu0 %v1607_v35  ;;  %v2582_v34 = vld [vmem:[#allocation8 + $0x3f90] sm:$0xff]  ;;  %v1927_v35 = vld [vmem:[#allocation8 + $0x2b18] sm:$0xff] }
 0x1eb   :  { %3187 = vmatprep.subr.mxu1 %v2247_v36  ;;  %3133 = vmatpush1.msra.mxu0 %v1606_v37  ;;  %v2567_v36 = vld [vmem:[#allocation8 + $0x3f18] sm:$0xff]  ;;  %v1926_v37 = vld [vmem:[#allocation8 + $0x2b10] sm:$0xff] }
 0x1ec   :  { %3188 = vmatpush1.msra.mxu1 %v2246_v38  ;;  %3134 = vmatprep.subr.mxu0 %v1591_v30  ;;  %v2566_v38 = vld [vmem:[#allocation8 + $0x3f10] sm:$0xff]  ;;  %v1911_v30 = vld [vmem:[#allocation8 + $0x2a98] sm:$0xff] }
 0x1ed   :  { %3189 = vmatprep.subr.mxu1 %v2231_v40  ;;  %3135 = vmatpush1.msra.mxu0 %v1590_v41  ;;  %v2551_v40 = vld [vmem:[#allocation8 + $0x3e98] sm:$0xff]  ;;  %v1910_v41 = vld [vmem:[#allocation8 + $0x2a90] sm:$0xff] }
 0x1ee   :  { %3190 = vmatpush1.msra.mxu1 %v2230_v43  ;;  %3136 = vmatprep.subr.mxu0 %v1575_v44  ;;  %v2550_v43 = vld [vmem:[#allocation8 + $0x3e90] sm:$0xff]  ;;  %v1895_v44 = vld [vmem:[#allocation8 + $0x2a18] sm:$0xff] }
 0x1ef   :  { %3191 = vmatprep.subr.mxu1 %v2215_v45  ;;  %3137 = vmatpush1.msra.mxu0 %v1574_v49  ;;  %v2535_v45 = vld [vmem:[#allocation8 + $0x3e18] sm:$0xff]  ;;  %v1894_v49 = vld [vmem:[#allocation8 + $0x2a10] sm:$0xff] }
 0x1f0   :  { %3192 = vmatpush1.msra.mxu1 %v2214_v50  ;;  %3138 = vmatprep.subr.mxu0 %v2071_v51  ;;  %v2534_v50 = vld [vmem:[#allocation8 + $0x3e10] sm:$0xff]  ;;  %v1879_v51 = vld [vmem:[#allocation8 + $0x2998] sm:$0xff] }
 0x1f1   :  { %3193 = vmatprep.subr.mxu1 %v2199_v52  ;;  %3139 = vmatpush2.msra.mxu0 %v2070_v53  ;;  %v2519_v52 = vld [vmem:[#allocation8 + $0x3d98] sm:$0xff]  ;;  %v1878_v53 = vld [vmem:[#allocation8 + $0x2990] sm:$0xff] }
 0x1f2   :  { %3194 = vmatpush1.msra.mxu1 %v2198_v54  ;;  %3140 = vmatprep.subr.mxu0 %v2055_v55  ;;  %v2518_v54 = vld [vmem:[#allocation8 + $0x3d90] sm:$0xff]  ;;  %v1863_v55 = vld [vmem:[#allocation8 + $0x2918] sm:$0xff] }
 0x1f3   :  { %3195 = vmatprep.subr.mxu1 %v2183_v56  ;;  %3141 = vmatpush2.msra.mxu0 %v2054_v57  ;;  %v2503_v56 = vld [vmem:[#allocation8 + $0x3d18] sm:$0xff]  ;;  %v1862_v57 = vld [vmem:[#allocation8 + $0x2910] sm:$0xff] }
 0x1f4   :  { %3196 = vmatpush1.msra.mxu1 %v2182_v59  ;;  %3142 = vmatprep.subr.mxu0 %v2039_v60  ;;  %v2502_v59 = vld [vmem:[#allocation8 + $0x3d10] sm:$0xff]  ;;  %v1847_v60 = vld [vmem:[#allocation8 + $0x2898] sm:$0xff] }
 0x1f5   :  { %3197 = vmatprep.subr.mxu1 %v2167_v61  ;;  %3143 = vmatpush2.msra.mxu0 %v2038_v62  ;;  %v2487_v61 = vld [vmem:[#allocation8 + $0x3c98] sm:$0xff]  ;;  %v1846_v62 = vld [vmem:[#allocation8 + $0x2890] sm:$0xff] }
 0x1f6   :  { %3198 = vmatpush1.msra.mxu1 %v2166_v63  ;;  %3144 = vmatprep.subr.mxu0 %v2023_v1  ;;  %v2486_v63 = vld [vmem:[#allocation8 + $0x3c90] sm:$0xff]  ;;  %v1831_v1 = vld [vmem:[#allocation8 + $0x2818] sm:$0xff] }
 0x1f7   :  { %3199 = vmatprep.subr.mxu1 %v2151_v2  ;;  %3145 = vmatpush2.msra.mxu0 %v2022_v3  ;;  %v2471_v2 = vld [vmem:[#allocation8 + $0x3c18] sm:$0xff]  ;;  %v1830_v3 = vld [vmem:[#allocation8 + $0x2810] sm:$0xff] }
 0x1f8   :  { %3200 = vmatpush1.msra.mxu1 %v2150_v0  ;;  %3146 = vmatprep.subr.mxu0 %v2007_v4  ;;  %v2470_v0 = vld [vmem:[#allocation8 + $0x3c10] sm:$0xff]  ;;  %v2455_v4 = vld [vmem:[#allocation8 + $0x3b98] sm:$0xff] }
 0x1f9   :  { %3201 = vmatprep.subr.mxu1 %v2135_v9  ;;  %3147 = vmatpush2.msra.mxu0 %v2006_v10  ;;  %v793_v9 = vld [vmem:[#allocation8 + $0x7a8] sm:$0xff]  ;;  %v2454_v10 = vld [vmem:[#allocation8 + $0x3b90] sm:$0xff] }
 0x1fa   :  { %3202 = vmatpush1.msra.mxu1 %v2134_v11  ;;  %3148 = vmatprep.subr.mxu0 %v1991_v12  ;;  %v792_v11 = vld [vmem:[#allocation8 + $0x7a0] sm:$0xff]  ;;  %v2439_v12 = vld [vmem:[#allocation8 + $0x3b18] sm:$0xff] }
 0x1fb   :  { %3203 = vmatprep.subr.mxu1 %v2119_v13  ;;  %3149 = vmatpush2.msra.mxu0 %v1990_v14  ;;  %v777_v13 = vld [vmem:[#allocation8 + $0x728] sm:$0xff]  ;;  %v2438_v14 = vld [vmem:[#allocation8 + $0x3b10] sm:$0xff] }
 0x1fc   :  { %3204 = vmatpush1.msra.mxu1 %v2118_v17  ;;  %3150 = vmatprep.subr.mxu0 %v1975_v18  ;;  %v776_v17 = vld [vmem:[#allocation8 + $0x720] sm:$0xff]  ;;  %v2423_v18 = vld [vmem:[#allocation8 + $0x3a98] sm:$0xff] }
 0x1fd   :  { %3205 = vmatprep.subr.mxu1 %v2103_v19  ;;  %3151 = vmatpush2.msra.mxu0 %v1974_v7  ;;  %v761_v19 = vld [vmem:[#allocation8 + $0x6a8] sm:$0xff]  ;;  %v2422_v7 = vld [vmem:[#allocation8 + $0x3a90] sm:$0xff] }
 0x1fe   :  { %3206 = vmatpush1.msra.mxu1 %v2102_v23  ;;  %3152 = vmatprep.subr.mxu0 %v1959_v25  ;;  %v2596_v23 = vld [vmem:[#allocation10] sm:$0xff] }
 0x1ff   :  { %3207 = vmatprep.subr.mxu1 %v2087_v27  ;;  %3153 = vmatpush2.msra.mxu0 %v1958_v28  ;;  %v760_v25 = vld [vmem:[#allocation8 + $0x6a0] sm:$0xff]  ;;  %v2407_v27 = vld [vmem:[#allocation8 + $0x3a18] sm:$0xff]  ;;  %v745_v28 = vld [vmem:[#allocation8 + $0x628] sm:$0xff] }
 0x200   :  { %3208 = vmatpush1.msra.mxu1 %v2086_v29  ;;  %3154 = vmatprep.subr.mxu0 %v1943_v32  ;;  %v2406_v29 = vld [vmem:[#allocation8 + $0x3a10] sm:$0xff]  ;;  %v744_v32 = vld [vmem:[#allocation8 + $0x620] sm:$0xff] }
 0x201   :  { %3209 = vmatprep.subr.mxu1 %v2583_v33  ;;  %3155 = vmatpush2.msra.mxu0 %v1942_v22  ;;  %v2391_v33 = vld [vmem:[#allocation8 + $0x3998] sm:$0xff]  ;;  %v2603_v22 = vrot.slane %v2596_v23, %v6581_v6  ;;  %v1225_v23 = vld [vmem:[#allocation8 + $0x1528] sm:$0xff] }
 0x202   :  { %3210 = vmatpush2.msra.mxu1 %v2582_v34  ;;  %3156 = vmatprep.subr.mxu0 %v1927_v35  ;;  %v729_v34 = vld [vmem:[#allocation8 + $0x5a8] sm:$0xff]  ;;  %v2390_v35 = vld [vmem:[#allocation8 + $0x3990] sm:$0xff] }
 0x203   :  { %3211 = vmatprep.subr.mxu1 %v2567_v36  ;;  %3157 = vmatpush2.msra.mxu0 %v1926_v37  ;;  %v728_v37 = vld [vmem:[#allocation8 + $0x5a0] sm:$0xff] }
 0x204   :  { %3212 = vmatpush2.msra.mxu1 %v2566_v38  ;;  %3158 = vmatprep.subr.mxu0 %v1911_v30  ;;  %v2375_v38 = vld [vmem:[#allocation8 + $0x3918] sm:$0xff]  ;;  %v713_v30 = vld [vmem:[#allocation8 + $0x528] sm:$0xff] }
 0x205   :  { %3213 = vmatprep.subr.mxu1 %v2551_v40  ;;  %3159 = vmatpush2.msra.mxu0 %v1910_v41  ;;  %v2374_v40 = vld [vmem:[#allocation8 + $0x3910] sm:$0xff]  ;;  %v712_v41 = vld [vmem:[#allocation8 + $0x520] sm:$0xff] }
 0x206   :  { %3214 = vmatpush2.msra.mxu1 %v2550_v43  ;;  %3160 = vmatprep.subr.mxu0 %v1895_v44  ;;  %v2359_v43 = vld [vmem:[#allocation8 + $0x3898] sm:$0xff] }
 0x207   :  { %3215 = vmatprep.subr.mxu1 %v2535_v45  ;;  %3161 = vmatpush2.msra.mxu0 %v1894_v49  ;;  %v697_v45 = vld [vmem:[#allocation8 + $0x4a8] sm:$0xff]  ;;  %v2358_v49 = vld [vmem:[#allocation8 + $0x3890] sm:$0xff] }
 0x208   :  { %3216 = vmatpush2.msra.mxu1 %v2534_v50  ;;  %3162 = vmatprep.subr.mxu0 %v1879_v51  ;;  %v696_v50 = vld [vmem:[#allocation8 + $0x4a0] sm:$0xff]  ;;  %v2343_v51 = vld [vmem:[#allocation8 + $0x3818] sm:$0xff] }
 0x209   :  { %3217 = vmatprep.subr.mxu1 %v2519_v52  ;;  %3163 = vmatpush2.msra.mxu0 %v1878_v53  ;;  %v681_v53 = vld [vmem:[#allocation8 + $0x428] sm:$0xff] }
 0x20a   :  { %3218 = vmatpush2.msra.mxu1 %v2518_v54  ;;  %3164 = vmatprep.subr.mxu0 %v1863_v55  ;;  %v2342_v54 = vld [vmem:[#allocation8 + $0x3810] sm:$0xff] }
 0x20b   :  { %3219 = vmatprep.subr.mxu1 %v2503_v56  ;;  %3165 = vmatpush2.msra.mxu0 %v1862_v57  ;;  %v680_v56 = vld [vmem:[#allocation8 + $0x420] sm:$0xff]  ;;  %v665_v57 = vld [vmem:[#allocation8 + $0x3a8] sm:$0xff] }
 0x20c   :  { %3220 = vmatpush2.msra.mxu1 %v2502_v59  ;;  %3166 = vmatprep.subr.mxu0 %v1847_v60  ;;  %v2746_v36 = vpop.f32.mrf.mxu0  ;;  %v1305_v59 = vld [vmem:[#allocation8 + $0x17a8] sm:$0xff]  ;;  %v664_v60 = vld [vmem:[#allocation8 + $0x3a0] sm:$0xff] }
 0x20d   :  { %3221 = vmatprep.subr.mxu1 %v2487_v61  ;;  %3167 = vmatpush2.msra.mxu0 %v1846_v62  ;;  %v2747_v44 = vadd.f32 %v2746_v36, %v2603_v22  ;;  %v1304_v61 = vld [vmem:[#allocation8 + $0x17a0] sm:$0xff]  ;;  %v649_v62 = vld [vmem:[#allocation8 + $0x328] sm:$0xff] }
 0x20e   :  { %3222 = vmatpush2.msra.mxu1 %v2486_v63  ;;  %3168 = vmatprep.subr.mxu0 %v1831_v1  ;;  %v1289_v63 = vld [vmem:[#allocation8 + $0x1728] sm:$0xff]  ;;  %v648_v1 = vld [vmem:[#allocation8 + $0x320] sm:$0xff] }
 0x20f   :  { %3223 = vmatprep.subr.mxu1 %v2471_v2  ;;  %3169 = vmatpush2.msra.mxu0 %v1830_v3  ;;  %v1288_v2 = vld [vmem:[#allocation8 + $0x1720] sm:$0xff]  ;;  %v633_v3 = vld [vmem:[#allocation8 + $0x2a8] sm:$0xff] }
 0x210   :  { %3224 = vmatpush2.msra.mxu1 %v2470_v0  ;;  %3171 = vmatmul.mubr.f32.vlgmr.msra.gmra.mxu0 %v6630_v39  ;;  %v1273_v0 = vld [vmem:[#allocation8 + $0x16a8] sm:$0xff]  ;;  %v1192_v36 = vld [vmem:[#allocation8 + $0x1420] sm:$0xff] }
 0x211   :  { %3225 = vmatprep.subr.mxu1 %v2455_v4  ;;  %3248 = vmatprep.subr.mxu0 %v793_v9  ;;  %v632_v4 = vld [vmem:[#allocation8 + $0x2a0] sm:$0xff]  ;;  %v553_v22 = vld [vmem:[#allocation8 + $0x28] sm:$0xff] }
 0x212   :  { %3226 = vmatpush2.msra.mxu1 %v2454_v10  ;;  %3249 = vmatpush1.msra.mxu0 %v792_v11  ;;  %v1272_v9 = vld [vmem:[#allocation8 + $0x16a0] sm:$0xff]  ;;  %v617_v10 = vld [vmem:[#allocation8 + $0x228] sm:$0xff] }
 0x213   :  { %3312 = vmatprep.mubr.f32.mxu0 %v6592_v15  ;;  %3227 = vmatprep.subr.mxu1 %v2439_v12  ;;  %v1257_v11 = vld [vmem:[#allocation8 + $0x1628] sm:$0xff]  ;;  %v616_v12 = vld [vmem:[#allocation8 + $0x220] sm:$0xff] }
 0x214   :  { %3250 = vmatprep.subr.mxu0 %v777_v13  ;;  %3228 = vmatpush2.msra.mxu1 %v2438_v14  ;;  %v1256_v13 = vld [vmem:[#allocation8 + $0x1620] sm:$0xff]  ;;  %v601_v14 = vld [vmem:[#allocation8 + $0x1a8] sm:$0xff] }
 0x215   :  { %3251 = vmatpush1.msra.mxu0 %v776_v17  ;;  %3229 = vmatprep.subr.mxu1 %v2423_v18  ;;  %v1241_v17 = vld [vmem:[#allocation8 + $0x15a8] sm:$0xff]  ;;  %v600_v18 = vld [vmem:[#allocation8 + $0x1a0] sm:$0xff] }
 0x216   :  { %3252 = vmatprep.subr.mxu0 %v761_v19  ;;  %3230 = vmatpush2.msra.mxu1 %v2422_v7  ;;  %v1240_v19 = vld [vmem:[#allocation8 + $0x15a0] sm:$0xff]  ;;  %v585_v7 = vld [vmem:[#allocation8 + $0x128] sm:$0xff] }
 0x217   :  { %3253 = vmatpush1.msra.mxu0 %v760_v25  ;;  %3231 = vmatprep.subr.mxu1 %v2407_v27  ;;  %v584_v25 = vld [vmem:[#allocation8 + $0x120] sm:$0xff] }
 0x218   :  { %3254 = vmatprep.subr.mxu0 %v745_v28  ;;  %3232 = vmatpush2.msra.mxu1 %v2406_v29  ;;  %v1224_v27 = vld [vmem:[#allocation8 + $0x1520] sm:$0xff]  ;;  %v569_v28 = vld [vmem:[#allocation8 + $0xa8] sm:$0xff] }
 0x219   :  { %3255 = vmatpush1.msra.mxu0 %v744_v32  ;;  %3233 = vmatprep.subr.mxu1 %v2391_v33  ;;  %v1209_v29 = vld [vmem:[#allocation8 + $0x14a8] sm:$0xff]  ;;  %v568_v32 = vld [vmem:[#allocation8 + $0xa0] sm:$0xff] }
 0x21a   :  { %3256 = vmatprep.subr.mxu0 %v729_v34  ;;  %3234 = vmatpush2.msra.mxu1 %v2390_v35  ;;  %v1208_v33 = vld [vmem:[#allocation8 + $0x14a0] sm:$0xff]  ;;  %v1193_v34 = vld [vmem:[#allocation8 + $0x1428] sm:$0xff] }
 0x21b   :  { %3257 = vmatpush1.msra.mxu0 %v728_v37  ;;  %3235 = vmatprep.subr.mxu1 %v2375_v38  ;;  %v552_v35 = vld [vmem:[#allocation8 + $0x20] sm:$0xff]  ;;  %v1049_v37 = vld [vmem:[#allocation8 + $0xfa8] sm:$0xff] }
 0x21c   :  { %3258 = vmatprep.subr.mxu0 %v713_v30  ;;  %3236 = vmatpush2.msra.mxu1 %v2374_v40  ;;  %v2817_v52 = vpop.f32.mrf.mxu1  ;;  %v1177_v38 = vld [vmem:[#allocation8 + $0x13a8] sm:$0xff]  ;;  %v1048_v30 = vld [vmem:[#allocation8 + $0xfa0] sm:$0xff] }
 0x21d   :  { %3259 = vmatpush1.msra.mxu0 %v712_v41  ;;  %3237 = vmatprep.subr.mxu1 %v2359_v43  ;;  %v6658_v55 = vadd.f32 %v2817_v52, %v2747_v44  ;;  %v1176_v40 = vld [vmem:[#allocation8 + $0x13a0] sm:$0xff]  ;;  %v1033_v41 = vld [vmem:[#allocation8 + $0xf28] sm:$0xff] }
 0x21e   :  { %3260 = vmatprep.subr.mxu0 %v697_v45  ;;  %3238 = vmatpush2.msra.mxu1 %v2358_v49  ;;  %v1161_v43 = vld [vmem:[#allocation8 + $0x1328] sm:$0xff]  ;;  %v1032_v44 = vld [vmem:[#allocation8 + $0xf20] sm:$0xff] }
 0x21f   :  { %3261 = vmatpush1.msra.mxu0 %v696_v50  ;;  %3239 = vmatprep.subr.mxu1 %v2343_v51  ;;  %v1160_v45 = vld [vmem:[#allocation8 + $0x1320] sm:$0xff]  ;;  %v1017_v49 = vld [vmem:[#allocation8 + $0xea8] sm:$0xff] }
 0x220   :  { %3262 = vmatprep.subr.mxu0 %v681_v53  ;;  %3240 = vmatpush2.msra.mxu1 %v2342_v54  ;;  %v1145_v50 = vld [vmem:[#allocation8 + $0x12a8] sm:$0xff]  ;;  %v1016_v51 = vld [vmem:[#allocation8 + $0xea0] sm:$0xff] }
 0x221   :  { %3263 = vmatpush1.msra.mxu0 %v680_v56  ;;  %3242 = vmatmul.mubr.f32.vlgmr.msra.gmra.mxu1 %v6646_v31  ;;  %v1144_v52 = vld [vmem:[#allocation8 + $0x12a0] sm:$0xff]  ;;  %v1001_v53 = vld [vmem:[#allocation8 + $0xe28] sm:$0xff] }
 0x222   :  { %3264 = vmatprep.subr.mxu0 %v665_v57  ;;  %3319 = vmatprep.subr.mxu1 %v1305_v59  ;;  %v1129_v54 = vld [vmem:[#allocation8 + $0x1228] sm:$0xff]  ;;  %v1000_v56 = vld [vmem:[#allocation8 + $0xe20] sm:$0xff] }
 0x223   :  { %3265 = vmatpush1.msra.mxu0 %v664_v60  ;;  %3320 = vmatpush1.msra.mxu1 %v1304_v61  ;;  %v1128_v57 = vld [vmem:[#allocation8 + $0x1220] sm:$0xff]  ;;  %v985_v59 = vld [vmem:[#allocation8 + $0xda8] sm:$0xff] }
 0x224   :  { %3383 = vmatprep.mubr.f32.mxu1 %v6618_v46  ;;  %3266 = vmatprep.subr.mxu0 %v649_v62  ;;  %v1113_v60 = vld [vmem:[#allocation8 + $0x11a8] sm:$0xff]  ;;  %v984_v61 = vld [vmem:[#allocation8 + $0xda0] sm:$0xff] }
 0x225   :  { %3321 = vmatprep.subr.mxu1 %v1289_v63  ;;  %3267 = vmatpush1.msra.mxu0 %v648_v1  ;;  %v1112_v62 = vld [vmem:[#allocation8 + $0x11a0] sm:$0xff]  ;;  %v969_v63 = vld [vmem:[#allocation8 + $0xd28] sm:$0xff] }
 0x226   :  { %3322 = vmatpush1.msra.mxu1 %v1288_v2  ;;  %3268 = vmatprep.subr.mxu0 %v633_v3  ;;  %v1097_v1 = vld [vmem:[#allocation8 + $0x1128] sm:$0xff]  ;;  %v968_v2 = vld [vmem:[#allocation8 + $0xd20] sm:$0xff] }
 0x227   :  { %3323 = vmatprep.subr.mxu1 %v1273_v0  ;;  %3269 = vmatpush1.msra.mxu0 %v632_v4  ;;  %v1096_v3 = vld [vmem:[#allocation8 + $0x1120] sm:$0xff]  ;;  %v953_v0 = vld [vmem:[#allocation8 + $0xca8] sm:$0xff] }
 0x228   :  { %3324 = vmatpush1.msra.mxu1 %v1272_v9  ;;  %3270 = vmatprep.subr.mxu0 %v617_v10  ;;  %v1081_v4 = vld [vmem:[#allocation8 + $0x10a8] sm:$0xff]  ;;  %v952_v9 = vld [vmem:[#allocation8 + $0xca0] sm:$0xff] }
 0x229   :  { %3325 = vmatprep.subr.mxu1 %v1257_v11  ;;  %3271 = vmatpush1.msra.mxu0 %v616_v12  ;;  %v1080_v10 = vld [vmem:[#allocation8 + $0x10a0] sm:$0xff]  ;;  %v937_v11 = vld [vmem:[#allocation8 + $0xc28] sm:$0xff] }
 0x22a   :  { %3326 = vmatpush1.msra.mxu1 %v1256_v13  ;;  %3272 = vmatprep.subr.mxu0 %v601_v14  ;;  %v1065_v12 = vld [vmem:[#allocation8 + $0x1028] sm:$0xff]  ;;  %v936_v13 = vld [vmem:[#allocation8 + $0xc20] sm:$0xff] }
 0x22b   :  { %3327 = vmatprep.subr.mxu1 %v1241_v17  ;;  %3273 = vmatpush1.msra.mxu0 %v600_v18  ;;  %v1064_v14 = vld [vmem:[#allocation8 + $0x1020] sm:$0xff]  ;;  %v921_v17 = vld [vmem:[#allocation8 + $0xba8] sm:$0xff] }
 0x22c   :  { %3328 = vmatpush1.msra.mxu1 %v1240_v19  ;;  %3274 = vmatprep.subr.mxu0 %v585_v7  ;;  %v1561_v18 = vld [vmem:[#allocation8 + $0x1fa8] sm:$0xff]  ;;  %v920_v19 = vld [vmem:[#allocation8 + $0xba0] sm:$0xff] }
 0x22d   :  { %3329 = vmatprep.subr.mxu1 %v1225_v23  ;;  %3275 = vmatpush1.msra.mxu0 %v584_v25  ;;  %v1560_v7 = vld [vmem:[#allocation8 + $0x1fa0] sm:$0xff]  ;;  %v905_v23 = vld [vmem:[#allocation8 + $0xb28] sm:$0xff] }
 0x22e   :  { %3330 = vmatpush1.msra.mxu1 %v1224_v27  ;;  %3276 = vmatprep.subr.mxu0 %v569_v28  ;;  %v1545_v25 = vld [vmem:[#allocation8 + $0x1f28] sm:$0xff]  ;;  %v904_v27 = vld [vmem:[#allocation8 + $0xb20] sm:$0xff] }
 0x22f   :  { %3331 = vmatprep.subr.mxu1 %v1209_v29  ;;  %3277 = vmatpush1.msra.mxu0 %v568_v32  ;;  %v1544_v28 = vld [vmem:[#allocation8 + $0x1f20] sm:$0xff]  ;;  %v889_v29 = vld [vmem:[#allocation8 + $0xaa8] sm:$0xff] }
 0x230   :  { %3332 = vmatpush1.msra.mxu1 %v1208_v33  ;;  %3278 = vmatprep.subr.mxu0 %v553_v22  ;;  %v1529_v32 = vld [vmem:[#allocation8 + $0x1ea8] sm:$0xff]  ;;  %v888_v33 = vld [vmem:[#allocation8 + $0xaa0] sm:$0xff] }
 0x231   :  { %3333 = vmatprep.subr.mxu1 %v1193_v34  ;;  %3279 = vmatpush1.msra.mxu0 %v552_v35  ;;  %v1528_v22 = vld [vmem:[#allocation8 + $0x1ea0] sm:$0xff]  ;;  %v873_v34 = vld [vmem:[#allocation8 + $0xa28] sm:$0xff] }
 0x232   :  { %3334 = vmatpush1.msra.mxu1 %v1192_v36  ;;  %3280 = vmatprep.subr.mxu0 %v1049_v37  ;;  %v1513_v35 = vld [vmem:[#allocation8 + $0x1e28] sm:$0xff]  ;;  %v872_v36 = vld [vmem:[#allocation8 + $0xa20] sm:$0xff] }
 0x233   :  { %3335 = vmatprep.subr.mxu1 %v1177_v38  ;;  %3281 = vmatpush2.msra.mxu0 %v1048_v30  ;;  %v1512_v37 = vld [vmem:[#allocation8 + $0x1e20] sm:$0xff]  ;;  %v857_v38 = vld [vmem:[#allocation8 + $0x9a8] sm:$0xff] }
 0x234   :  { %3336 = vmatpush1.msra.mxu1 %v1176_v40  ;;  %3282 = vmatprep.subr.mxu0 %v1033_v41  ;;  %v1497_v30 = vld [vmem:[#allocation8 + $0x1da8] sm:$0xff]  ;;  %v856_v40 = vld [vmem:[#allocation8 + $0x9a0] sm:$0xff] }
 0x235   :  { %3337 = vmatprep.subr.mxu1 %v1161_v43  ;;  %3283 = vmatpush2.msra.mxu0 %v1032_v44  ;;  %v1496_v41 = vld [vmem:[#allocation8 + $0x1da0] sm:$0xff]  ;;  %v841_v43 = vld [vmem:[#allocation8 + $0x928] sm:$0xff]  ;;  %v6662_v44 = vpop.f32.mrf.mxu0 }
 0x236   :  { %3338 = vmatpush1.msra.mxu1 %v1160_v45  ;;  %3284 = vmatprep.subr.mxu0 %v1017_v49  ;;  %v1481_v45 = vld [vmem:[#allocation8 + $0x1d28] sm:$0xff]  ;;  %v840_v49 = vld [vmem:[#allocation8 + $0x920] sm:$0xff] }
 0x237   :  { %3339 = vmatprep.subr.mxu1 %v1145_v50  ;;  %3285 = vmatpush2.msra.mxu0 %v1016_v51  ;;  %v1480_v50 = vld [vmem:[#allocation8 + $0x1d20] sm:$0xff]  ;;  %v825_v51 = vld [vmem:[#allocation8 + $0x8a8] sm:$0xff] }
 0x238   :  { %3340 = vmatpush1.msra.mxu1 %v1144_v52  ;;  %3286 = vmatprep.subr.mxu0 %v1001_v53  ;;  %v1465_v52 = vld [vmem:[#allocation8 + $0x1ca8] sm:$0xff]  ;;  %v824_v53 = vld [vmem:[#allocation8 + $0x8a0] sm:$0xff] }
 0x239   :  { %3341 = vmatprep.subr.mxu1 %v1129_v54  ;;  %3287 = vmatpush2.msra.mxu0 %v1000_v56  ;;  %v1464_v56 = vld [vmem:[#allocation8 + $0x1ca0] sm:$0xff] }
 0x23a   :  { %3342 = vmatpush1.msra.mxu1 %v1128_v57  ;;  %3288 = vmatprep.subr.mxu0 %v985_v59  ;;  %v809_v57 = vld [vmem:[#allocation8 + $0x828] sm:$0xff] }
 0x23b   :  { %3343 = vmatprep.subr.mxu1 %v1113_v60  ;;  %3289 = vmatpush2.msra.mxu0 %v984_v61  ;;  %v1449_v60 = vld [vmem:[#allocation8 + $0x1c28] sm:$0xff]  ;;  %v808_v61 = vld [vmem:[#allocation8 + $0x820] sm:$0xff] }
 0x23c   :  { %3344 = vmatpush1.msra.mxu1 %v1112_v62  ;;  %3290 = vmatprep.subr.mxu0 %v969_v63  ;;  %v1448_v62 = vld [vmem:[#allocation8 + $0x1c20] sm:$0xff]  ;;  %v1433_v63 = vld [vmem:[#allocation8 + $0x1ba8] sm:$0xff] }
 0x23d   :  { %3345 = vmatprep.subr.mxu1 %v1097_v1  ;;  %3291 = vmatpush2.msra.mxu0 %v968_v2  ;;  %v1817_v1 = vld [vmem:[#allocation8 + $0x27a8] sm:$0xff]  ;;  %v1432_v2 = vld [vmem:[#allocation8 + $0x1ba0] sm:$0xff] }
 0x23e   :  { %3346 = vmatpush1.msra.mxu1 %v1096_v3  ;;  %3292 = vmatprep.subr.mxu0 %v953_v0  ;;  %v1816_v3 = vld [vmem:[#allocation8 + $0x27a0] sm:$0xff]  ;;  %v1801_v0 = vld [vmem:[#allocation8 + $0x2728] sm:$0xff] }
 0x23f   :  { %3347 = vmatprep.subr.mxu1 %v1081_v4  ;;  %3293 = vmatpush2.msra.mxu0 %v952_v9  ;;  %v1416_v4 = vld [vmem:[#allocation8 + $0x1b20] sm:$0xff] }
 0x240   :  { %3348 = vmatpush1.msra.mxu1 %v1080_v10  ;;  %3294 = vmatprep.subr.mxu0 %v937_v11  ;;  %v1800_v9 = vld [vmem:[#allocation8 + $0x2720] sm:$0xff]  ;;  %v1401_v10 = vld [vmem:[#allocation8 + $0x1aa8] sm:$0xff] }
 0x241   :  { %3349 = vmatprep.subr.mxu1 %v1065_v12  ;;  %3295 = vmatpush2.msra.mxu0 %v936_v13  ;;  %v1785_v11 = vld [vmem:[#allocation8 + $0x26a8] sm:$0xff]  ;;  %v1400_v12 = vld [vmem:[#allocation8 + $0x1aa0] sm:$0xff] }
 0x242   :  { %3350 = vmatpush1.msra.mxu1 %v1064_v14  ;;  %3296 = vmatprep.subr.mxu0 %v921_v17  ;;  %v1784_v13 = vld [vmem:[#allocation8 + $0x26a0] sm:$0xff]  ;;  %v1385_v14 = vld [vmem:[#allocation8 + $0x1a28] sm:$0xff] }
 0x243   :  { %3351 = vmatprep.subr.mxu1 %v1561_v18  ;;  %3297 = vmatpush2.msra.mxu0 %v920_v19  ;;  %v1769_v17 = vld [vmem:[#allocation8 + $0x2628] sm:$0xff]  ;;  %v1384_v18 = vld [vmem:[#allocation8 + $0x1a20] sm:$0xff] }
 0x244   :  { %3352 = vmatpush2.msra.mxu1 %v1560_v7  ;;  %3298 = vmatprep.subr.mxu0 %v905_v23  ;;  %v1768_v19 = vld [vmem:[#allocation8 + $0x2620] sm:$0xff]  ;;  %v1369_v7 = vld [vmem:[#allocation8 + $0x19a8] sm:$0xff] }
 0x245   :  { %3353 = vmatprep.subr.mxu1 %v1545_v25  ;;  %3299 = vmatpush2.msra.mxu0 %v904_v27  ;;  %v1753_v23 = vld [vmem:[#allocation8 + $0x25a8] sm:$0xff]  ;;  %v1368_v25 = vld [vmem:[#allocation8 + $0x19a0] sm:$0xff] }
 0x246   :  { %3354 = vmatpush2.msra.mxu1 %v1544_v28  ;;  %3300 = vmatprep.subr.mxu0 %v889_v29  ;;  %v1752_v27 = vld [vmem:[#allocation8 + $0x25a0] sm:$0xff]  ;;  %v1353_v28 = vld [vmem:[#allocation8 + $0x1928] sm:$0xff]  ;;  %v6669_v29 = vpop.f32.mrf.mxu1 }
 0x247   :  { %3355 = vmatprep.subr.mxu1 %v1529_v32  ;;  %3301 = vmatpush2.msra.mxu0 %v888_v33  ;;  %v1737_v32 = vld [vmem:[#allocation8 + $0x2528] sm:$0xff]  ;;  %v1352_v33 = vld [vmem:[#allocation8 + $0x1920] sm:$0xff] }
 0x248   :  { %3356 = vmatpush2.msra.mxu1 %v1528_v22  ;;  %3302 = vmatprep.subr.mxu0 %v873_v34  ;;  %v1736_v22 = vld [vmem:[#allocation8 + $0x2520] sm:$0xff]  ;;  %v1337_v34 = vld [vmem:[#allocation8 + $0x18a8] sm:$0xff] }
 0x249   :  { %3357 = vmatprep.subr.mxu1 %v1513_v35  ;;  %3303 = vmatpush2.msra.mxu0 %v872_v36  ;;  %v1721_v35 = vld [vmem:[#allocation8 + $0x24a8] sm:$0xff]  ;;  %v1336_v36 = vld [vmem:[#allocation8 + $0x18a0] sm:$0xff] }
 0x24a   :  { %3358 = vmatpush2.msra.mxu1 %v1512_v37  ;;  %3304 = vmatprep.subr.mxu0 %v857_v38  ;;  %v1720_v38 = vld [vmem:[#allocation8 + $0x24a0] sm:$0xff] }
 0x24b   :  { %3359 = vmatprep.subr.mxu1 %v1497_v30  ;;  %3305 = vmatpush2.msra.mxu0 %v856_v40  ;;  %v1321_v30 = vld [vmem:[#allocation8 + $0x1828] sm:$0xff] }
 0x24c   :  { %3360 = vmatpush2.msra.mxu1 %v1496_v41  ;;  %3306 = vmatprep.subr.mxu0 %v841_v43  ;;  %v2888_v54 = vpop.f32.mrf.mxu0  ;;  %v1705_v41 = vld [vmem:[#allocation8 + $0x2428] sm:$0xff]  ;;  %v1320_v43 = vld [vmem:[#allocation8 + $0x1820] sm:$0xff] }
 0x24d   :  { %3361 = vmatprep.subr.mxu1 %v1481_v45  ;;  %3307 = vmatpush2.msra.mxu0 %v840_v49  ;;  %v6665_v59 = vadd.f32 %v2888_v54, %v6658_v55  ;;  %v1417_v55 = vld [vmem:[#allocation8 + $0x1b28] sm:$0xff]  ;;  %v1704_v45 = vld [vmem:[#allocation8 + $0x2420] sm:$0xff] }
 0x24e   :  { %3362 = vmatpush2.msra.mxu1 %v1480_v50  ;;  %3308 = vmatprep.subr.mxu0 %v825_v51  ;;  %v1689_v49 = vld [vmem:[#allocation8 + $0x23a8] sm:$0xff]  ;;  %v1688_v51 = vld [vmem:[#allocation8 + $0x23a0] sm:$0xff] }
 0x24f   :  { %3363 = vmatprep.subr.mxu1 %v1465_v52  ;;  %3309 = vmatpush2.msra.mxu0 %v824_v53  ;;  %v2329_v50 = vld [vmem:[#allocation8 + $0x37a8] sm:$0xff]  ;;  %v2328_v52 = vld [vmem:[#allocation8 + $0x37a0] sm:$0xff] }
 0x250   :  { %3364 = vmatpush2.msra.mxu1 %v1464_v56  ;;  %3310 = vmatprep.subr.mxu0 %v809_v57  ;;  %v1673_v53 = vld [vmem:[#allocation8 + $0x2328] sm:$0xff]  ;;  %v1672_v56 = vld [vmem:[#allocation8 + $0x2320] sm:$0xff] }
 0x251   :  { %3365 = vmatprep.subr.mxu1 %v1449_v60  ;;  %3311 = vmatpush2.msra.mxu0 %v808_v61  ;;  %v2313_v54 = vld [vmem:[#allocation8 + $0x3728] sm:$0xff]  ;;  %v2312_v57 = vld [vmem:[#allocation8 + $0x3720] sm:$0xff] }
 0x252   :  { %3366 = vmatpush2.msra.mxu1 %v1448_v62  ;;  %3313 = vmatmul.mubr.f32.vlgmr.msra.gmra.mxu0 %v6594_v16  ;;  %v2297_v60 = vld [vmem:[#allocation8 + $0x36a8] sm:$0xff]  ;;  %v1656_v61 = vld [vmem:[#allocation8 + $0x22a0] sm:$0xff] }
 0x253   :  { %3367 = vmatprep.subr.mxu1 %v1433_v63  ;;  %3390 = vmatprep.subr.mxu0 %v1817_v1  ;;  %v2296_v62 = vld [vmem:[#allocation8 + $0x36a0] sm:$0xff]  ;;  %v1641_v63 = vld [vmem:[#allocation8 + $0x2228] sm:$0xff] }
 0x254   :  { %3368 = vmatpush2.msra.mxu1 %v1432_v2  ;;  %3391 = vmatpush1.msra.mxu0 %v1816_v3  ;;  %v2281_v1 = vld [vmem:[#allocation8 + $0x3628] sm:$0xff]  ;;  %v1640_v2 = vld [vmem:[#allocation8 + $0x2220] sm:$0xff] }
 0x255   :  { %3454 = vmatprep.mubr.f32.mxu0 %v6615_v42  ;;  %3369 = vmatprep.subr.mxu1 %v1417_v55  ;;  %v2280_v3 = vld [vmem:[#allocation8 + $0x3620] sm:$0xff]  ;;  %v1625_v55 = vld [vmem:[#allocation8 + $0x21a8] sm:$0xff] }
 0x256   :  { %3392 = vmatprep.subr.mxu0 %v1801_v0  ;;  %3370 = vmatpush2.msra.mxu1 %v1416_v4  ;;  %v2265_v0 = vld [vmem:[#allocation8 + $0x35a8] sm:$0xff]  ;;  %v1624_v4 = vld [vmem:[#allocation8 + $0x21a0] sm:$0xff] }
 0x257   :  { %3393 = vmatpush1.msra.mxu0 %v1800_v9  ;;  %3371 = vmatprep.subr.mxu1 %v1401_v10  ;;  %v2264_v9 = vld [vmem:[#allocation8 + $0x35a0] sm:$0xff]  ;;  %v1609_v10 = vld [vmem:[#allocation8 + $0x2128] sm:$0xff] }
 0x258   :  { %3394 = vmatprep.subr.mxu0 %v1785_v11  ;;  %3372 = vmatpush2.msra.mxu1 %v1400_v12  ;;  %v2249_v11 = vld [vmem:[#allocation8 + $0x3528] sm:$0xff]  ;;  %v1608_v12 = vld [vmem:[#allocation8 + $0x2120] sm:$0xff] }
 0x259   :  { %3395 = vmatpush1.msra.mxu0 %v1784_v13  ;;  %3373 = vmatprep.subr.mxu1 %v1385_v14  ;;  %v2248_v13 = vld [vmem:[#allocation8 + $0x3520] sm:$0xff]  ;;  %v1593_v14 = vld [vmem:[#allocation8 + $0x20a8] sm:$0xff] }
 0x25a   :  { %3396 = vmatprep.subr.mxu0 %v1769_v17  ;;  %3374 = vmatpush2.msra.mxu1 %v1384_v18  ;;  %v2233_v17 = vld [vmem:[#allocation8 + $0x34a8] sm:$0xff]  ;;  %v1592_v18 = vld [vmem:[#allocation8 + $0x20a0] sm:$0xff] }
 0x25b   :  { %3397 = vmatpush1.msra.mxu0 %v1768_v19  ;;  %3375 = vmatprep.subr.mxu1 %v1369_v7  ;;  %v2232_v19 = vld [vmem:[#allocation8 + $0x34a0] sm:$0xff]  ;;  %v1577_v7 = vld [vmem:[#allocation8 + $0x2028] sm:$0xff] }
 0x25c   :  { %3398 = vmatprep.subr.mxu0 %v1753_v23  ;;  %3376 = vmatpush2.msra.mxu1 %v1368_v25  ;;  %v2217_v23 = vld [vmem:[#allocation8 + $0x3428] sm:$0xff]  ;;  %v1576_v25 = vld [vmem:[#allocation8 + $0x2020] sm:$0xff] }
 0x25d   :  { %3399 = vmatpush1.msra.mxu0 %v1752_v27  ;;  %3377 = vmatprep.subr.mxu1 %v1353_v28  ;;  %v2959_v37 = vpop.f32.mrf.mxu1  ;;  %v2216_v27 = vld [vmem:[#allocation8 + $0x3420] sm:$0xff]  ;;  %v2073_v28 = vld [vmem:[#allocation8 + $0x2fa8] sm:$0xff] }
 0x25e   :  { %3400 = vmatprep.subr.mxu0 %v1737_v32  ;;  %3378 = vmatpush2.msra.mxu1 %v1352_v33  ;;  %v6672_v40 = vadd.f32 %v2959_v37, %v6665_v59  ;;  %v1657_v59 = vld [vmem:[#allocation8 + $0x22a8] sm:$0xff]  ;;  %v2072_v33 = vld [vmem:[#allocation8 + $0x2fa0] sm:$0xff] }
 0x25f   :  { %3401 = vmatpush1.msra.mxu0 %v1736_v22  ;;  %3379 = vmatprep.subr.mxu1 %v1337_v34  ;;  %v2201_v32 = vld [vmem:[#allocation8 + $0x33a8] sm:$0xff]  ;;  %v2200_v22 = vld [vmem:[#allocation8 + $0x33a0] sm:$0xff] }
 0x260   :  { %3402 = vmatprep.subr.mxu0 %v1721_v35  ;;  %3380 = vmatpush2.msra.mxu1 %v1336_v36  ;;  %v2057_v34 = vld [vmem:[#allocation8 + $0x2f28] sm:$0xff]  ;;  %v2056_v36 = vld [vmem:[#allocation8 + $0x2f20] sm:$0xff] }
 0x261   :  { %3403 = vmatpush1.msra.mxu0 %v1720_v38  ;;  %3381 = vmatprep.subr.mxu1 %v1321_v30  ;;  %v2185_v35 = vld [vmem:[#allocation8 + $0x3328] sm:$0xff]  ;;  %v2184_v37 = vld [vmem:[#allocation8 + $0x3320] sm:$0xff] }
 0x262   :  { %3404 = vmatprep.subr.mxu0 %v1705_v41  ;;  %3382 = vmatpush2.msra.mxu1 %v1320_v43  ;;  %v2041_v38 = vld [vmem:[#allocation8 + $0x2ea8] sm:$0xff]  ;;  %v2040_v41 = vld [vmem:[#allocation8 + $0x2ea0] sm:$0xff] }
 0x263   :  { %3405 = vmatpush1.msra.mxu0 %v1704_v45  ;;  %3384 = vmatmul.mubr.f32.vlgmr.msra.gmra.mxu1 %v6620_v48  ;;  %v2169_v30 = vld [vmem:[#allocation8 + $0x32a8] sm:$0xff]  ;;  %v2168_v43 = vld [vmem:[#allocation8 + $0x32a0] sm:$0xff] }
 0x264   :  { %3406 = vmatprep.subr.mxu0 %v1689_v49  ;;  %3461 = vmatprep.subr.mxu1 %v2329_v50  ;;  %v2025_v45 = vld [vmem:[#allocation8 + $0x2e28] sm:$0xff]  ;;  %v2024_v50 = vld [vmem:[#allocation8 + $0x2e20] sm:$0xff] }
 0x265   :  { %3407 = vmatpush1.msra.mxu0 %v1688_v51  ;;  %3462 = vmatpush1.msra.mxu1 %v2328_v52  ;;  %v2153_v49 = vld [vmem:[#allocation8 + $0x3228] sm:$0xff]  ;;  %v2152_v51 = vld [vmem:[#allocation8 + $0x3220] sm:$0xff] }
 0x266   :  { %3525 = vmatprep.mubr.f32.mxu1 %v6644_v21  ;;  %3408 = vmatprep.subr.mxu0 %v1673_v53  ;;  %v2009_v52 = vld [vmem:[#allocation8 + $0x2da8] sm:$0xff] }
 0x267   :  { %3463 = vmatprep.subr.mxu1 %v2313_v54  ;;  %3409 = vmatpush1.msra.mxu0 %v1672_v56  ;;  %v2137_v53 = vld [vmem:[#allocation8 + $0x31a8] sm:$0xff]  ;;  %v2008_v54 = vld [vmem:[#allocation8 + $0x2da0] sm:$0xff] }
 0x268   :  { %3464 = vmatpush1.msra.mxu1 %v2312_v57  ;;  %3410 = vmatprep.subr.mxu0 %v1657_v59  ;;  %v2136_v56 = vld [vmem:[#allocation8 + $0x31a0] sm:$0xff]  ;;  %v1993_v57 = vld [vmem:[#allocation8 + $0x2d28] sm:$0xff] }
 0x269   :  { %3465 = vmatprep.subr.mxu1 %v2297_v60  ;;  %3411 = vmatpush1.msra.mxu0 %v1656_v61  ;;  %v2121_v59 = vld [vmem:[#allocation8 + $0x3128] sm:$0xff]  ;;  %v1992_v60 = vld [vmem:[#allocation8 + $0x2d20] sm:$0xff] }
 0x26a   :  { %3466 = vmatpush1.msra.mxu1 %v2296_v62  ;;  %3412 = vmatprep.subr.mxu0 %v1641_v63  ;;  %v2120_v61 = vld [vmem:[#allocation8 + $0x3120] sm:$0xff]  ;;  %v1977_v62 = vld [vmem:[#allocation8 + $0x2ca8] sm:$0xff] }
 0x26b   :  { %3467 = vmatprep.subr.mxu1 %v2281_v1  ;;  %3413 = vmatpush1.msra.mxu0 %v1640_v2  ;;  %v2105_v63 = vld [vmem:[#allocation8 + $0x30a8] sm:$0xff]  ;;  %v1976_v1 = vld [vmem:[#allocation8 + $0x2ca0] sm:$0xff] }
 0x26c   :  { %3468 = vmatpush1.msra.mxu1 %v2280_v3  ;;  %3414 = vmatprep.subr.mxu0 %v1625_v55  ;;  %v2104_v2 = vld [vmem:[#allocation8 + $0x30a0] sm:$0xff]  ;;  %v1961_v3 = vld [vmem:[#allocation8 + $0x2c28] sm:$0xff] }
 0x26d   :  { %3469 = vmatprep.subr.mxu1 %v2265_v0  ;;  %3415 = vmatpush1.msra.mxu0 %v1624_v4  ;;  %v2089_v55 = vld [vmem:[#allocation8 + $0x3028] sm:$0xff]  ;;  %v1960_v0 = vld [vmem:[#allocation8 + $0x2c20] sm:$0xff] }
 0x26e   :  { %3470 = vmatpush1.msra.mxu1 %v2264_v9  ;;  %3416 = vmatprep.subr.mxu0 %v1609_v10  ;;  %v2088_v4 = vld [vmem:[#allocation8 + $0x3020] sm:$0xff]  ;;  %v1945_v9 = vld [vmem:[#allocation8 + $0x2ba8] sm:$0xff] }
 0x26f   :  { %3471 = vmatprep.subr.mxu1 %v2249_v11  ;;  %3417 = vmatpush1.msra.mxu0 %v1608_v12  ;;  %v2585_v10 = vld [vmem:[#allocation8 + $0x3fa8] sm:$0xff]  ;;  %v1944_v11 = vld [vmem:[#allocation8 + $0x2ba0] sm:$0xff] }
 0x270   :  { %3472 = vmatpush1.msra.mxu1 %v2248_v13  ;;  %3418 = vmatprep.subr.mxu0 %v1593_v14  ;;  %v2584_v12 = vld [vmem:[#allocation8 + $0x3fa0] sm:$0xff]  ;;  %v1929_v13 = vld [vmem:[#allocation8 + $0x2b28] sm:$0xff] }
 0x271   :  { %3473 = vmatprep.subr.mxu1 %v2233_v17  ;;  %3419 = vmatpush1.msra.mxu0 %v1592_v18  ;;  %v2569_v14 = vld [vmem:[#allocation8 + $0x3f28] sm:$0xff]  ;;  %v1928_v17 = vld [vmem:[#allocation8 + $0x2b20] sm:$0xff] }
 0x272   :  { %3474 = vmatpush1.msra.mxu1 %v2232_v19  ;;  %3420 = vmatprep.subr.mxu0 %v1577_v7  ;;  %v2568_v18 = vld [vmem:[#allocation8 + $0x3f20] sm:$0xff]  ;;  %v1913_v19 = vld [vmem:[#allocation8 + $0x2aa8] sm:$0xff] }
 0x273   :  { %3475 = vmatprep.subr.mxu1 %v2217_v23  ;;  %3421 = vmatpush1.msra.mxu0 %v1576_v25  ;;  %v2553_v7 = vld [vmem:[#allocation8 + $0x3ea8] sm:$0xff]  ;;  %v1912_v23 = vld [vmem:[#allocation8 + $0x2aa0] sm:$0xff] }
 0x274   :  { %3476 = vmatpush1.msra.mxu1 %v2216_v27  ;;  %3422 = vmatprep.subr.mxu0 %v2073_v28  ;;  %v2552_v25 = vld [vmem:[#allocation8 + $0x3ea0] sm:$0xff]  ;;  %v1897_v27 = vld [vmem:[#allocation8 + $0x2a28] sm:$0xff] }
 0x275   :  { %3477 = vmatprep.subr.mxu1 %v2201_v32  ;;  %3423 = vmatpush2.msra.mxu0 %v2072_v33  ;;  %v2537_v28 = vld [vmem:[#allocation8 + $0x3e28] sm:$0xff]  ;;  %v1896_v32 = vld [vmem:[#allocation8 + $0x2a20] sm:$0xff] }
 0x276   :  { %3478 = vmatpush1.msra.mxu1 %v2200_v22  ;;  %3424 = vmatprep.subr.mxu0 %v2057_v34  ;;  %v2536_v33 = vld [vmem:[#allocation8 + $0x3e20] sm:$0xff]  ;;  %v1881_v22 = vld [vmem:[#allocation8 + $0x29a8] sm:$0xff] }
 0x277   :  { %3479 = vmatprep.subr.mxu1 %v2185_v35  ;;  %3425 = vmatpush2.msra.mxu0 %v2056_v36  ;;  %v2521_v34 = vld [vmem:[#allocation8 + $0x3da8] sm:$0xff]  ;;  %v1880_v35 = vld [vmem:[#allocation8 + $0x29a0] sm:$0xff] }
 0x278   :  { %3480 = vmatpush1.msra.mxu1 %v2184_v37  ;;  %3426 = vmatprep.subr.mxu0 %v2041_v38  ;;  %v2520_v36 = vld [vmem:[#allocation8 + $0x3da0] sm:$0xff]  ;;  %v1865_v37 = vld [vmem:[#allocation8 + $0x2928] sm:$0xff] }
 0x279   :  { %3481 = vmatprep.subr.mxu1 %v2169_v30  ;;  %3427 = vmatpush2.msra.mxu0 %v2040_v41  ;;  %v2505_v38 = vld [vmem:[#allocation8 + $0x3d28] sm:$0xff]  ;;  %v1864_v30 = vld [vmem:[#allocation8 + $0x2920] sm:$0xff] }
 0x27a   :  { %3482 = vmatpush1.msra.mxu1 %v2168_v43  ;;  %3428 = vmatprep.subr.mxu0 %v2025_v45  ;;  %v2504_v41 = vld [vmem:[#allocation8 + $0x3d20] sm:$0xff]  ;;  %v1849_v43 = vld [vmem:[#allocation8 + $0x28a8] sm:$0xff] }
 0x27b   :  { %3483 = vmatprep.subr.mxu1 %v2153_v49  ;;  %3429 = vmatpush2.msra.mxu0 %v2024_v50  ;;  %v2489_v45 = vld [vmem:[#allocation8 + $0x3ca8] sm:$0xff]  ;;  %v1848_v49 = vld [vmem:[#allocation8 + $0x28a0] sm:$0xff] }
 0x27c   :  { %3484 = vmatpush1.msra.mxu1 %v2152_v51  ;;  %3430 = vmatprep.subr.mxu0 %v2009_v52  ;;  %v2488_v50 = vld [vmem:[#allocation8 + $0x3ca0] sm:$0xff]  ;;  %v1833_v51 = vld [vmem:[#allocation8 + $0x2828] sm:$0xff] }
 0x27d   :  { %3485 = vmatprep.subr.mxu1 %v2137_v53  ;;  %3431 = vmatpush2.msra.mxu0 %v2008_v54  ;;  %v2473_v52 = vld [vmem:[#allocation8 + $0x3c28] sm:$0xff]  ;;  %v1832_v53 = vld [vmem:[#allocation8 + $0x2820] sm:$0xff] }
 0x27e   :  { %3486 = vmatpush1.msra.mxu1 %v2136_v56  ;;  %3432 = vmatprep.subr.mxu0 %v1993_v57  ;;  %v2472_v54 = vld [vmem:[#allocation8 + $0x3c20] sm:$0xff]  ;;  %v2457_v56 = vld [vmem:[#allocation8 + $0x3ba8] sm:$0xff]  ;;  %v795_v57 = vld [vmem:[#allocation8 + $0x7b8] sm:$0xff] }
 0x27f   :  { %3487 = vmatprep.subr.mxu1 %v2121_v59  ;;  %3433 = vmatpush2.msra.mxu0 %v1992_v60  ;;  %v2456_v59 = vld [vmem:[#allocation8 + $0x3ba0] sm:$0xff]  ;;  %v794_v60 = vld [vmem:[#allocation8 + $0x7b0] sm:$0xff] }
 0x280   :  { %3488 = vmatpush1.msra.mxu1 %v2120_v61  ;;  %3434 = vmatprep.subr.mxu0 %v1977_v62  ;;  %v2441_v61 = vld [vmem:[#allocation8 + $0x3b28] sm:$0xff]  ;;  %v779_v62 = vld [vmem:[#allocation8 + $0x738] sm:$0xff] }
 0x281   :  { %3489 = vmatprep.subr.mxu1 %v2105_v63  ;;  %3435 = vmatpush2.msra.mxu0 %v1976_v1  ;;  %v2440_v63 = vld [vmem:[#allocation8 + $0x3b20] sm:$0xff]  ;;  %v778_v1 = vld [vmem:[#allocation8 + $0x730] sm:$0xff] }
 0x282   :  { %3490 = vmatpush1.msra.mxu1 %v2104_v2  ;;  %3436 = vmatprep.subr.mxu0 %v1961_v3  ;;  %v2425_v2 = vld [vmem:[#allocation8 + $0x3aa8] sm:$0xff]  ;;  %v763_v3 = vld [vmem:[#allocation8 + $0x6b8] sm:$0xff] }
 0x283   :  { %3491 = vmatprep.subr.mxu1 %v2089_v55  ;;  %3437 = vmatpush2.msra.mxu0 %v1960_v0  ;;  %v2424_v55 = vld [vmem:[#allocation8 + $0x3aa0] sm:$0xff]  ;;  %v762_v0 = vld [vmem:[#allocation8 + $0x6b0] sm:$0xff] }
 0x284   :  { %3492 = vmatpush1.msra.mxu1 %v2088_v4  ;;  %3438 = vmatprep.subr.mxu0 %v1945_v9  ;;  %v2409_v4 = vld [vmem:[#allocation8 + $0x3a28] sm:$0xff]  ;;  %v6678_v9 = vpop.f32.mrf.mxu0 }
 0x285   :  { %3493 = vmatprep.subr.mxu1 %v2585_v10  ;;  %3439 = vmatpush2.msra.mxu0 %v1944_v11  ;;  %v747_v10 = vld [vmem:[#allocation8 + $0x638] sm:$0xff]  ;;  %v2408_v11 = vld [vmem:[#allocation8 + $0x3a20] sm:$0xff] }
 0x286   :  { %3494 = vmatpush2.msra.mxu1 %v2584_v12  ;;  %3440 = vmatprep.subr.mxu0 %v1929_v13  ;;  %v6249_v12 = vld [vmem:[#allocation10] sm:$0xff] }
 0x287   :  { %3495 = vmatprep.subr.mxu1 %v2569_v14  ;;  %3441 = vmatpush2.msra.mxu0 %v1928_v17  ;;  %v2611_v13 = vrot.slane %v6249_v12, %v6602_v24  ;;  %v746_v14 = vld [vmem:[#allocation8 + $0x630] sm:$0xff]  ;;  %v2393_v17 = vld [vmem:[#allocation8 + $0x39a8] sm:$0xff]  ;;  %v587_v12 = vld [vmem:[#allocation8 + $0x138] sm:$0xff] }
 0x288   :  { %3496 = vmatpush2.msra.mxu1 %v2568_v18  ;;  %3442 = vmatprep.subr.mxu0 %v1913_v19  ;;  %v731_v19 = vld [vmem:[#allocation8 + $0x5b8] sm:$0xff] }
 0x289   :  { %3497 = vmatprep.subr.mxu1 %v2553_v7  ;;  %3443 = vmatpush2.msra.mxu0 %v1912_v23  ;;  %v2392_v7 = vld [vmem:[#allocation8 + $0x39a0] sm:$0xff]  ;;  %v730_v23 = vld [vmem:[#allocation8 + $0x5b0] sm:$0xff] }
 0x28a   :  { %3498 = vmatpush2.msra.mxu1 %v2552_v25  ;;  %3444 = vmatprep.subr.mxu0 %v1897_v27  ;;  %v2377_v25 = vld [vmem:[#allocation8 + $0x3928] sm:$0xff]  ;;  %v6681_v27 = vpop.f32.mrf.mxu1 }
 0x28b   :  { %3499 = vmatprep.subr.mxu1 %v2537_v28  ;;  %3445 = vmatpush2.msra.mxu0 %v1896_v32  ;;  %v715_v28 = vld [vmem:[#allocation8 + $0x538] sm:$0xff]  ;;  %v2376_v32 = vld [vmem:[#allocation8 + $0x3920] sm:$0xff] }
 0x28c   :  { %3500 = vmatpush2.msra.mxu1 %v2536_v33  ;;  %3446 = vmatprep.subr.mxu0 %v1881_v22  ;;  %v714_v22 = vld [vmem:[#allocation8 + $0x530] sm:$0xff] }
 0x28d   :  { %3501 = vmatprep.subr.mxu1 %v2521_v34  ;;  %3447 = vmatpush2.msra.mxu0 %v1880_v35  ;;  %v2361_v34 = vld [vmem:[#allocation8 + $0x38a8] sm:$0xff]  ;;  %v699_v35 = vld [vmem:[#allocation8 + $0x4b8] sm:$0xff] }
 0x28e   :  { %3502 = vmatpush2.msra.mxu1 %v2520_v36  ;;  %3448 = vmatprep.subr.mxu0 %v1865_v37  ;;  %v3030_v18 = vpop.f32.mrf.mxu0  ;;  %v2360_v36 = vld [vmem:[#allocation8 + $0x38a0] sm:$0xff] }
 0x28f   :  { %3503 = vmatprep.subr.mxu1 %v2505_v38  ;;  %3449 = vmatpush2.msra.mxu0 %v1864_v30  ;;  %v3031_v33 = vadd.f32 %v3030_v18, %v2611_v13  ;;  %v698_v38 = vld [vmem:[#allocation8 + $0x4b0] sm:$0xff]  ;;  %v2345_v30 = vld [vmem:[#allocation8 + $0x3828] sm:$0xff]  ;;  %v1227_v13 = vld [vmem:[#allocation8 + $0x1538] sm:$0xff] }
 0x290   :  { %3504 = vmatpush2.msra.mxu1 %v2504_v41  ;;  %3450 = vmatprep.subr.mxu0 %v1849_v43  ;;  %v683_v43 = vld [vmem:[#allocation8 + $0x438] sm:$0xff] }
 0x291   :  { %3505 = vmatprep.subr.mxu1 %v2489_v45  ;;  %3451 = vmatpush2.msra.mxu0 %v1848_v49  ;;  %v2344_v45 = vld [vmem:[#allocation8 + $0x3820] sm:$0xff]  ;;  %v682_v49 = vld [vmem:[#allocation8 + $0x430] sm:$0xff]  ;;  %v571_v18 = vld [vmem:[#allocation8 + $0xb8] sm:$0xff] }
 0x292   :  { %3506 = vmatpush2.msra.mxu1 %v2488_v50  ;;  %3452 = vmatprep.subr.mxu0 %v1833_v51  ;;  %v667_v50 = vld [vmem:[#allocation8 + $0x3b8] sm:$0xff] }
 0x293   :  { %3507 = vmatprep.subr.mxu1 %v2473_v52  ;;  %3453 = vmatpush2.msra.mxu0 %v1832_v53  ;;  %v1307_v51 = vld [vmem:[#allocation8 + $0x17b8] sm:$0xff]  ;;  %v666_v52 = vld [vmem:[#allocation8 + $0x3b0] sm:$0xff] }
 0x294   :  { %3508 = vmatpush2.msra.mxu1 %v2472_v54  ;;  %3455 = vmatmul.mubr.f32.vlgmr.msra.gmra.mxu0 %v6630_v39  ;;  %v1306_v53 = vld [vmem:[#allocation8 + $0x17b0] sm:$0xff]  ;;  %v651_v54 = vld [vmem:[#allocation8 + $0x338] sm:$0xff] }
 0x295   :  { %3509 = vmatprep.subr.mxu1 %v2457_v56  ;;  %3532 = vmatprep.subr.mxu0 %v795_v57  ;;  %v1291_v56 = vld [vmem:[#allocation8 + $0x1738] sm:$0xff]  ;;  %v650_v57 = vld [vmem:[#allocation8 + $0x330] sm:$0xff] }
 0x296   :  { %3510 = vmatpush2.msra.mxu1 %v2456_v59  ;;  %3533 = vmatpush1.msra.mxu0 %v794_v60  ;;  %v1290_v59 = vld [vmem:[#allocation8 + $0x1730] sm:$0xff]  ;;  %v635_v60 = vld [vmem:[#allocation8 + $0x2b8] sm:$0xff] }
 0x297   :  { %3596 = vmatprep.mubr.f32.mxu0 %v6592_v15  ;;  %3511 = vmatprep.subr.mxu1 %v2441_v61  ;;  %v1275_v61 = vld [vmem:[#allocation8 + $0x16b8] sm:$0xff] }
 0x298   :  { %3534 = vmatprep.subr.mxu0 %v779_v62  ;;  %3512 = vmatpush2.msra.mxu1 %v2440_v63  ;;  %v634_v62 = vld [vmem:[#allocation8 + $0x2b0] sm:$0xff] }
 0x299   :  { %3535 = vmatpush1.msra.mxu0 %v778_v1  ;;  %3513 = vmatprep.subr.mxu1 %v2425_v2  ;;  %v1274_v63 = vld [vmem:[#allocation8 + $0x16b0] sm:$0xff]  ;;  %v619_v1 = vld [vmem:[#allocation8 + $0x238] sm:$0xff] }
 0x29a   :  { %3536 = vmatprep.subr.mxu0 %v763_v3  ;;  %3514 = vmatpush2.msra.mxu1 %v2424_v55  ;;  %v1259_v2 = vld [vmem:[#allocation8 + $0x1638] sm:$0xff]  ;;  %v618_v3 = vld [vmem:[#allocation8 + $0x230] sm:$0xff] }
 0x29b   :  { %3537 = vmatpush1.msra.mxu0 %v762_v0  ;;  %3515 = vmatprep.subr.mxu1 %v2409_v4  ;;  %v1258_v55 = vld [vmem:[#allocation8 + $0x1630] sm:$0xff]  ;;  %v603_v0 = vld [vmem:[#allocation8 + $0x1b8] sm:$0xff] }
 0x29c   :  { %3538 = vmatprep.subr.mxu0 %v747_v10  ;;  %3516 = vmatpush2.msra.mxu1 %v2408_v11  ;;  %v1243_v4 = vld [vmem:[#allocation8 + $0x15b8] sm:$0xff]  ;;  %v602_v10 = vld [vmem:[#allocation8 + $0x1b0] sm:$0xff] }
 0x29d   :  { %3539 = vmatpush1.msra.mxu0 %v746_v14  ;;  %3517 = vmatprep.subr.mxu1 %v2393_v17  ;;  %v1242_v11 = vld [vmem:[#allocation8 + $0x15b0] sm:$0xff] }
 0x29e   :  { %3540 = vmatprep.subr.mxu0 %v731_v19  ;;  %3518 = vmatpush2.msra.mxu1 %v2392_v7  ;;  %v586_v14 = vld [vmem:[#allocation8 + $0x130] sm:$0xff]  ;;  %v1211_v19 = vld [vmem:[#allocation8 + $0x14b8] sm:$0xff] }
 0x29f   :  { %3541 = vmatpush1.msra.mxu0 %v730_v23  ;;  %3519 = vmatprep.subr.mxu1 %v2377_v25  ;;  %v3101_v37 = vpop.f32.mrf.mxu1  ;;  %v1226_v17 = vld [vmem:[#allocation8 + $0x1530] sm:$0xff]  ;;  %v555_v25 = vld [vmem:[#allocation8 + $0x38] sm:$0xff] }
 0x2a0   :  { %3542 = vmatprep.subr.mxu0 %v715_v28  ;;  %3520 = vmatpush2.msra.mxu1 %v2376_v32  ;;  %v6683_v41 = vadd.f32 %v3101_v37, %v3031_v33  ;;  %v570_v7 = vld [vmem:[#allocation8 + $0xb0] sm:$0xff]  ;;  %v1195_v28 = vld [vmem:[#allocation8 + $0x1438] sm:$0xff] }
 0x2a1   :  { %3543 = vmatpush1.msra.mxu0 %v714_v22  ;;  %3521 = vmatprep.subr.mxu1 %v2361_v34  ;;  %v1210_v23 = vld [vmem:[#allocation8 + $0x14b0] sm:$0xff]  ;;  %v1051_v22 = vld [vmem:[#allocation8 + $0xfb8] sm:$0xff] }
 0x2a2   :  { %3544 = vmatprep.subr.mxu0 %v699_v35  ;;  %3522 = vmatpush2.msra.mxu1 %v2360_v36  ;;  %v554_v32 = vld [vmem:[#allocation8 + $0x30] sm:$0xff]  ;;  %v1179_v34 = vld [vmem:[#allocation8 + $0x13b8] sm:$0xff] }
 0x2a3   :  { %3545 = vmatpush1.msra.mxu0 %v698_v38  ;;  %3523 = vmatprep.subr.mxu1 %v2345_v30  ;;  %v1194_v33 = vld [vmem:[#allocation8 + $0x1430] sm:$0xff]  ;;  %v1035_v37 = vld [vmem:[#allocation8 + $0xf38] sm:$0xff] }
 0x2a4   :  { %3546 = vmatprep.subr.mxu0 %v683_v43  ;;  %3524 = vmatpush2.msra.mxu1 %v2344_v45  ;;  %v1050_v35 = vld [vmem:[#allocation8 + $0xfb0] sm:$0xff]  ;;  %v1163_v38 = vld [vmem:[#allocation8 + $0x1338] sm:$0xff] }
 0x2a5   :  { %3547 = vmatpush1.msra.mxu0 %v682_v49  ;;  %3526 = vmatmul.mubr.f32.vlgmr.msra.gmra.mxu1 %v6646_v31  ;;  %v1178_v36 = vld [vmem:[#allocation8 + $0x13b0] sm:$0xff]  ;;  %v1019_v45 = vld [vmem:[#allocation8 + $0xeb8] sm:$0xff] }
 0x2a6   :  { %3548 = vmatprep.subr.mxu0 %v667_v50  ;;  %3603 = vmatprep.subr.mxu1 %v1307_v51  ;;  %v1034_v30 = vld [vmem:[#allocation8 + $0xf30] sm:$0xff]  ;;  %v1147_v49 = vld [vmem:[#allocation8 + $0x12b8] sm:$0xff] }
 0x2a7   :  { %3549 = vmatpush1.msra.mxu0 %v666_v52  ;;  %3604 = vmatpush1.msra.mxu1 %v1306_v53  ;;  %v1162_v43 = vld [vmem:[#allocation8 + $0x1330] sm:$0xff]  ;;  %v1003_v52 = vld [vmem:[#allocation8 + $0xe38] sm:$0xff] }
 0x2a8   :  { %3667 = vmatprep.mubr.f32.mxu1 %v6618_v46  ;;  %3550 = vmatprep.subr.mxu0 %v651_v54  ;;  %v1018_v50 = vld [vmem:[#allocation8 + $0xeb0] sm:$0xff]  ;;  %v1131_v53 = vld [vmem:[#allocation8 + $0x1238] sm:$0xff] }
 0x2a9   :  { %3605 = vmatprep.subr.mxu1 %v1291_v56  ;;  %3551 = vmatpush1.msra.mxu0 %v650_v57  ;;  %v1146_v51 = vld [vmem:[#allocation8 + $0x12b0] sm:$0xff]  ;;  %v987_v57 = vld [vmem:[#allocation8 + $0xdb8] sm:$0xff] }
 0x2aa   :  { %3606 = vmatpush1.msra.mxu1 %v1290_v59  ;;  %3552 = vmatprep.subr.mxu0 %v635_v60  ;;  %v1002_v54 = vld [vmem:[#allocation8 + $0xe30] sm:$0xff]  ;;  %v1115_v59 = vld [vmem:[#allocation8 + $0x11b8] sm:$0xff] }
 0x2ab   :  { %3607 = vmatprep.subr.mxu1 %v1275_v61  ;;  %3553 = vmatpush1.msra.mxu0 %v634_v62  ;;  %v1130_v56 = vld [vmem:[#allocation8 + $0x1230] sm:$0xff]  ;;  %v971_v62 = vld [vmem:[#allocation8 + $0xd38] sm:$0xff] }
 0x2ac   :  { %3608 = vmatpush1.msra.mxu1 %v1274_v63  ;;  %3554 = vmatprep.subr.mxu0 %v619_v1  ;;  %v986_v60 = vld [vmem:[#allocation8 + $0xdb0] sm:$0xff]  ;;  %v1099_v63 = vld [vmem:[#allocation8 + $0x1138] sm:$0xff] }
 0x2ad   :  { %3609 = vmatprep.subr.mxu1 %v1259_v2  ;;  %3555 = vmatpush1.msra.mxu0 %v618_v3  ;;  %v1114_v61 = vld [vmem:[#allocation8 + $0x11b0] sm:$0xff]  ;;  %v955_v3 = vld [vmem:[#allocation8 + $0xcb8] sm:$0xff] }
 0x2ae   :  { %3610 = vmatpush1.msra.mxu1 %v1258_v55  ;;  %3556 = vmatprep.subr.mxu0 %v603_v0  ;;  %v970_v1 = vld [vmem:[#allocation8 + $0xd30] sm:$0xff]  ;;  %v1083_v55 = vld [vmem:[#allocation8 + $0x10b8] sm:$0xff] }
 0x2af   :  { %3611 = vmatprep.subr.mxu1 %v1243_v4  ;;  %3557 = vmatpush1.msra.mxu0 %v602_v10  ;;  %v1098_v2 = vld [vmem:[#allocation8 + $0x1130] sm:$0xff]  ;;  %v939_v10 = vld [vmem:[#allocation8 + $0xc38] sm:$0xff] }
 0x2b0   :  { %3612 = vmatpush1.msra.mxu1 %v1242_v11  ;;  %3558 = vmatprep.subr.mxu0 %v587_v12  ;;  %v954_v0 = vld [vmem:[#allocation8 + $0xcb0] sm:$0xff]  ;;  %v1067_v11 = vld [vmem:[#allocation8 + $0x1038] sm:$0xff] }
 0x2b1   :  { %3613 = vmatprep.subr.mxu1 %v1227_v13  ;;  %3559 = vmatpush1.msra.mxu0 %v586_v14  ;;  %v1082_v4 = vld [vmem:[#allocation8 + $0x10b0] sm:$0xff]  ;;  %v923_v14 = vld [vmem:[#allocation8 + $0xbb8] sm:$0xff] }
 0x2b2   :  { %3614 = vmatpush1.msra.mxu1 %v1226_v17  ;;  %3560 = vmatprep.subr.mxu0 %v571_v18  ;;  %v938_v12 = vld [vmem:[#allocation8 + $0xc30] sm:$0xff]  ;;  %v1563_v17 = vld [vmem:[#allocation8 + $0x1fb8] sm:$0xff] }
 0x2b3   :  { %3615 = vmatprep.subr.mxu1 %v1211_v19  ;;  %3561 = vmatpush1.msra.mxu0 %v570_v7  ;;  %v1066_v13 = vld [vmem:[#allocation8 + $0x1030] sm:$0xff]  ;;  %v907_v7 = vld [vmem:[#allocation8 + $0xb38] sm:$0xff] }
 0x2b4   :  { %3616 = vmatpush1.msra.mxu1 %v1210_v23  ;;  %3562 = vmatprep.subr.mxu0 %v555_v25  ;;  %v922_v18 = vld [vmem:[#allocation8 + $0xbb0] sm:$0xff]  ;;  %v1547_v23 = vld [vmem:[#allocation8 + $0x1f38] sm:$0xff] }
 0x2b5   :  { %3617 = vmatprep.subr.mxu1 %v1195_v28  ;;  %3563 = vmatpush1.msra.mxu0 %v554_v32  ;;  %v1562_v19 = vld [vmem:[#allocation8 + $0x1fb0] sm:$0xff]  ;;  %v891_v32 = vld [vmem:[#allocation8 + $0xab8] sm:$0xff] }
 0x2b6   :  { %3618 = vmatpush1.msra.mxu1 %v1194_v33  ;;  %3564 = vmatprep.subr.mxu0 %v1051_v22  ;;  %v906_v25 = vld [vmem:[#allocation8 + $0xb30] sm:$0xff]  ;;  %v1531_v33 = vld [vmem:[#allocation8 + $0x1eb8] sm:$0xff] }
 0x2b7   :  { %3619 = vmatprep.subr.mxu1 %v1179_v34  ;;  %3565 = vmatpush2.msra.mxu0 %v1050_v35  ;;  %v1546_v28 = vld [vmem:[#allocation8 + $0x1f30] sm:$0xff]  ;;  %v875_v35 = vld [vmem:[#allocation8 + $0xa38] sm:$0xff] }
 0x2b8   :  { %3620 = vmatpush1.msra.mxu1 %v1178_v36  ;;  %3566 = vmatprep.subr.mxu0 %v1035_v37  ;;  %v890_v22 = vld [vmem:[#allocation8 + $0xab0] sm:$0xff]  ;;  %v1515_v36 = vld [vmem:[#allocation8 + $0x1e38] sm:$0xff] }
 0x2b9   :  { %3621 = vmatprep.subr.mxu1 %v1163_v38  ;;  %3567 = vmatpush2.msra.mxu0 %v1034_v30  ;;  %v1530_v34 = vld [vmem:[#allocation8 + $0x1eb0] sm:$0xff]  ;;  %v859_v30 = vld [vmem:[#allocation8 + $0x9b8] sm:$0xff] }
 0x2ba   :  { %3622 = vmatpush1.msra.mxu1 %v1162_v43  ;;  %3568 = vmatprep.subr.mxu0 %v1019_v45  ;;  %v874_v37 = vld [vmem:[#allocation8 + $0xa30] sm:$0xff]  ;;  %v1499_v43 = vld [vmem:[#allocation8 + $0x1db8] sm:$0xff] }
 0x2bb   :  { %3623 = vmatprep.subr.mxu1 %v1147_v49  ;;  %3569 = vmatpush2.msra.mxu0 %v1018_v50  ;;  %v1514_v38 = vld [vmem:[#allocation8 + $0x1e30] sm:$0xff]  ;;  %v843_v50 = vld [vmem:[#allocation8 + $0x938] sm:$0xff] }
 0x2bc   :  { %3624 = vmatpush1.msra.mxu1 %v1146_v51  ;;  %3570 = vmatprep.subr.mxu0 %v1003_v52  ;;  %v858_v45 = vld [vmem:[#allocation8 + $0x9b0] sm:$0xff]  ;;  %v6687_v51 = vpop.f32.mrf.mxu0  ;;  %v1483_v52 = vld [vmem:[#allocation8 + $0x1d38] sm:$0xff] }
 0x2bd   :  { %3625 = vmatprep.subr.mxu1 %v1131_v53  ;;  %3571 = vmatpush2.msra.mxu0 %v1002_v54  ;;  %v1498_v49 = vld [vmem:[#allocation8 + $0x1db0] sm:$0xff] }
 0x2be   :  { %3626 = vmatpush1.msra.mxu1 %v1130_v56  ;;  %3572 = vmatprep.subr.mxu0 %v987_v57  ;;  %v842_v53 = vld [vmem:[#allocation8 + $0x930] sm:$0xff]  ;;  %v827_v56 = vld [vmem:[#allocation8 + $0x8b8] sm:$0xff] }
 0x2bf   :  { %3627 = vmatprep.subr.mxu1 %v1115_v59  ;;  %3573 = vmatpush2.msra.mxu0 %v986_v60  ;;  %v1482_v54 = vld [vmem:[#allocation8 + $0x1d30] sm:$0xff]  ;;  %v1467_v57 = vld [vmem:[#allocation8 + $0x1cb8] sm:$0xff] }
 0x2c0   :  { %3628 = vmatpush1.msra.mxu1 %v1114_v61  ;;  %3574 = vmatprep.subr.mxu0 %v971_v62  ;;  %v826_v59 = vld [vmem:[#allocation8 + $0x8b0] sm:$0xff]  ;;  %v811_v62 = vld [vmem:[#allocation8 + $0x838] sm:$0xff] }
 0x2c1   :  { %3629 = vmatprep.subr.mxu1 %v1099_v63  ;;  %3575 = vmatpush2.msra.mxu0 %v970_v1  ;;  %v1466_v61 = vld [vmem:[#allocation8 + $0x1cb0] sm:$0xff]  ;;  %v1451_v1 = vld [vmem:[#allocation8 + $0x1c38] sm:$0xff] }
 0x2c2   :  { %3630 = vmatpush1.msra.mxu1 %v1098_v2  ;;  %3576 = vmatprep.subr.mxu0 %v955_v3  ;;  %v810_v2 = vld [vmem:[#allocation8 + $0x830] sm:$0xff] }
 0x2c3   :  { %3631 = vmatprep.subr.mxu1 %v1083_v55  ;;  %3577 = vmatpush2.msra.mxu0 %v954_v0  ;;  %v1450_v3 = vld [vmem:[#allocation8 + $0x1c30] sm:$0xff]  ;;  %v1435_v55 = vld [vmem:[#allocation8 + $0x1bb8] sm:$0xff] }
 0x2c4   :  { %3632 = vmatpush1.msra.mxu1 %v1082_v4  ;;  %3578 = vmatprep.subr.mxu0 %v939_v10  ;;  %v1819_v0 = vld [vmem:[#allocation8 + $0x27b8] sm:$0xff]  ;;  %v1434_v4 = vld [vmem:[#allocation8 + $0x1bb0] sm:$0xff] }
 0x2c5   :  { %3633 = vmatprep.subr.mxu1 %v1067_v11  ;;  %3579 = vmatpush2.msra.mxu0 %v938_v12  ;;  %v1818_v10 = vld [vmem:[#allocation8 + $0x27b0] sm:$0xff]  ;;  %v1803_v11 = vld [vmem:[#allocation8 + $0x2738] sm:$0xff] }
 0x2c6   :  { %3634 = vmatpush1.msra.mxu1 %v1066_v13  ;;  %3580 = vmatprep.subr.mxu0 %v923_v14  ;;  %v1418_v12 = vld [vmem:[#allocation8 + $0x1b30] sm:$0xff]  ;;  %v1403_v14 = vld [vmem:[#allocation8 + $0x1ab8] sm:$0xff] }
 0x2c7   :  { %3635 = vmatprep.subr.mxu1 %v1563_v17  ;;  %3581 = vmatpush2.msra.mxu0 %v922_v18  ;;  %v1802_v13 = vld [vmem:[#allocation8 + $0x2730] sm:$0xff]  ;;  %v1787_v17 = vld [vmem:[#allocation8 + $0x26b8] sm:$0xff] }
 0x2c8   :  { %3636 = vmatpush2.msra.mxu1 %v1562_v19  ;;  %3582 = vmatprep.subr.mxu0 %v907_v7  ;;  %v1402_v18 = vld [vmem:[#allocation8 + $0x1ab0] sm:$0xff]  ;;  %v1387_v7 = vld [vmem:[#allocation8 + $0x1a38] sm:$0xff] }
 0x2c9   :  { %3637 = vmatprep.subr.mxu1 %v1547_v23  ;;  %3583 = vmatpush2.msra.mxu0 %v906_v25  ;;  %v1786_v19 = vld [vmem:[#allocation8 + $0x26b0] sm:$0xff]  ;;  %v1771_v23 = vld [vmem:[#allocation8 + $0x2638] sm:$0xff] }
 0x2ca   :  { %3638 = vmatpush2.msra.mxu1 %v1546_v28  ;;  %3584 = vmatprep.subr.mxu0 %v891_v32  ;;  %v1386_v25 = vld [vmem:[#allocation8 + $0x1a30] sm:$0xff]  ;;  %v1371_v32 = vld [vmem:[#allocation8 + $0x19b8] sm:$0xff] }
 0x2cb   :  { %3639 = vmatprep.subr.mxu1 %v1531_v33  ;;  %3585 = vmatpush2.msra.mxu0 %v890_v22  ;;  %v1770_v28 = vld [vmem:[#allocation8 + $0x2630] sm:$0xff]  ;;  %v1755_v33 = vld [vmem:[#allocation8 + $0x25b8] sm:$0xff] }
 0x2cc   :  { %3640 = vmatpush2.msra.mxu1 %v1530_v34  ;;  %3586 = vmatprep.subr.mxu0 %v875_v35  ;;  %v1370_v22 = vld [vmem:[#allocation8 + $0x19b0] sm:$0xff]  ;;  %v1355_v35 = vld [vmem:[#allocation8 + $0x1938] sm:$0xff] }
 0x2cd   :  { %3641 = vmatprep.subr.mxu1 %v1515_v36  ;;  %3587 = vmatpush2.msra.mxu0 %v874_v37  ;;  %v1754_v34 = vld [vmem:[#allocation8 + $0x25b0] sm:$0xff]  ;;  %v6694_v36 = vpop.f32.mrf.mxu1  ;;  %v1739_v37 = vld [vmem:[#allocation8 + $0x2538] sm:$0xff] }
 0x2ce   :  { %3642 = vmatpush2.msra.mxu1 %v1514_v38  ;;  %3588 = vmatprep.subr.mxu0 %v859_v30  ;;  %v1354_v38 = vld [vmem:[#allocation8 + $0x1930] sm:$0xff] }
 0x2cf   :  { %3643 = vmatprep.subr.mxu1 %v1499_v43  ;;  %3589 = vmatpush2.msra.mxu0 %v858_v45  ;;  %v1738_v30 = vld [vmem:[#allocation8 + $0x2530] sm:$0xff]  ;;  %v1339_v43 = vld [vmem:[#allocation8 + $0x18b8] sm:$0xff] }
 0x2d0   :  { %3644 = vmatpush2.msra.mxu1 %v1498_v49  ;;  %3590 = vmatprep.subr.mxu0 %v843_v50  ;;  %v3172_v60 = vpop.f32.mrf.mxu0  ;;  %v1723_v45 = vld [vmem:[#allocation8 + $0x24b8] sm:$0xff]  ;;  %v1338_v49 = vld [vmem:[#allocation8 + $0x18b0] sm:$0xff] }
 0x2d1   :  { %3645 = vmatprep.subr.mxu1 %v1483_v52  ;;  %3591 = vmatpush2.msra.mxu0 %v842_v53  ;;  %v6690_v63 = vadd.f32 %v3172_v60, %v6683_v41  ;;  %v1419_v41 = vld [vmem:[#allocation8 + $0x1b38] sm:$0xff]  ;;  %v1722_v52 = vld [vmem:[#allocation8 + $0x24b0] sm:$0xff] }
 0x2d2   :  { %3646 = vmatpush2.msra.mxu1 %v1482_v54  ;;  %3592 = vmatprep.subr.mxu0 %v827_v56  ;;  %v1323_v53 = vld [vmem:[#allocation8 + $0x1838] sm:$0xff] }
 0x2d3   :  { %3647 = vmatprep.subr.mxu1 %v1467_v57  ;;  %3593 = vmatpush2.msra.mxu0 %v826_v59  ;;  %v1707_v56 = vld [vmem:[#allocation8 + $0x2438] sm:$0xff]  ;;  %v1322_v57 = vld [vmem:[#allocation8 + $0x1830] sm:$0xff] }
 0x2d4   :  { %3648 = vmatpush2.msra.mxu1 %v1466_v61  ;;  %3594 = vmatprep.subr.mxu0 %v811_v62  ;;  %v1706_v59 = vld [vmem:[#allocation8 + $0x2430] sm:$0xff]  ;;  %v1691_v60 = vld [vmem:[#allocation8 + $0x23b8] sm:$0xff] }
 0x2d5   :  { %3649 = vmatprep.subr.mxu1 %v1451_v1  ;;  %3595 = vmatpush2.msra.mxu0 %v810_v2  ;;  %v2331_v61 = vld [vmem:[#allocation8 + $0x37b8] sm:$0xff]  ;;  %v1690_v62 = vld [vmem:[#allocation8 + $0x23b0] sm:$0xff] }
 0x2d6   :  { %3650 = vmatpush2.msra.mxu1 %v1450_v3  ;;  %3597 = vmatmul.mubr.f32.vlgmr.msra.gmra.mxu0 %v6594_v16  ;;  %v2330_v1 = vld [vmem:[#allocation8 + $0x37b0] sm:$0xff]  ;;  %v2315_v2 = vld [vmem:[#allocation8 + $0x3738] sm:$0xff] }
 0x2d7   :  { %3651 = vmatprep.subr.mxu1 %v1435_v55  ;;  %3674 = vmatprep.subr.mxu0 %v1819_v0  ;;  %v1674_v3 = vld [vmem:[#allocation8 + $0x2330] sm:$0xff]  ;;  %v1659_v0 = vld [vmem:[#allocation8 + $0x22b8] sm:$0xff] }
 0x2d8   :  { %3652 = vmatpush2.msra.mxu1 %v1434_v4  ;;  %3675 = vmatpush1.msra.mxu0 %v1818_v10  ;;  %v2314_v55 = vld [vmem:[#allocation8 + $0x3730] sm:$0xff]  ;;  %v2299_v4 = vld [vmem:[#allocation8 + $0x36b8] sm:$0xff] }
 0x2d9   :  { %3738 = vmatprep.mubr.f32.mxu0 %v6615_v42  ;;  %3653 = vmatprep.subr.mxu1 %v1419_v41  ;;  %v1658_v10 = vld [vmem:[#allocation8 + $0x22b0] sm:$0xff] }
 0x2da   :  { %3676 = vmatprep.subr.mxu0 %v1803_v11  ;;  %3654 = vmatpush2.msra.mxu1 %v1418_v12  ;;  %v2298_v41 = vld [vmem:[#allocation8 + $0x36b0] sm:$0xff]  ;;  %v1643_v11 = vld [vmem:[#allocation8 + $0x2238] sm:$0xff] }
 0x2db   :  { %3677 = vmatpush1.msra.mxu0 %v1802_v13  ;;  %3655 = vmatprep.subr.mxu1 %v1403_v14  ;;  %v2283_v12 = vld [vmem:[#allocation8 + $0x3638] sm:$0xff]  ;;  %v1642_v13 = vld [vmem:[#allocation8 + $0x2230] sm:$0xff] }
 0x2dc   :  { %3678 = vmatprep.subr.mxu0 %v1787_v17  ;;  %3656 = vmatpush2.msra.mxu1 %v1402_v18  ;;  %v2282_v14 = vld [vmem:[#allocation8 + $0x3630] sm:$0xff]  ;;  %v1627_v17 = vld [vmem:[#allocation8 + $0x21b8] sm:$0xff] }
 0x2dd   :  { %3679 = vmatpush1.msra.mxu0 %v1786_v19  ;;  %3657 = vmatprep.subr.mxu1 %v1387_v7  ;;  %v2267_v18 = vld [vmem:[#allocation8 + $0x35b8] sm:$0xff]  ;;  %v1626_v19 = vld [vmem:[#allocation8 + $0x21b0] sm:$0xff] }
 0x2de   :  { %3680 = vmatprep.subr.mxu0 %v1771_v23  ;;  %3658 = vmatpush2.msra.mxu1 %v1386_v25  ;;  %v2266_v7 = vld [vmem:[#allocation8 + $0x35b0] sm:$0xff]  ;;  %v1611_v23 = vld [vmem:[#allocation8 + $0x2138] sm:$0xff] }
 0x2df   :  { %3681 = vmatpush1.msra.mxu0 %v1770_v28  ;;  %3659 = vmatprep.subr.mxu1 %v1371_v32  ;;  %v2251_v25 = vld [vmem:[#allocation8 + $0x3538] sm:$0xff]  ;;  %v1610_v28 = vld [vmem:[#allocation8 + $0x2130] sm:$0xff] }
 0x2e0   :  { %3682 = vmatprep.subr.mxu0 %v1755_v33  ;;  %3660 = vmatpush2.msra.mxu1 %v1370_v22  ;;  %v2250_v32 = vld [vmem:[#allocation8 + $0x3530] sm:$0xff]  ;;  %v1595_v33 = vld [vmem:[#allocation8 + $0x20b8] sm:$0xff] }
 0x2e1   :  { %3683 = vmatpush1.msra.mxu0 %v1754_v34  ;;  %3661 = vmatprep.subr.mxu1 %v1355_v35  ;;  %v3243_v50 = vpop.f32.mrf.mxu1  ;;  %v2235_v22 = vld [vmem:[#allocation8 + $0x34b8] sm:$0xff]  ;;  %v1594_v34 = vld [vmem:[#allocation8 + $0x20b0] sm:$0xff] }
 0x2e2   :  { %3684 = vmatprep.subr.mxu0 %v1739_v37  ;;  %3662 = vmatpush2.msra.mxu1 %v1354_v38  ;;  %v6697_v54 = vadd.f32 %v3243_v50, %v6690_v63  ;;  %v1675_v63 = vld [vmem:[#allocation8 + $0x2338] sm:$0xff]  ;;  %v2234_v35 = vld [vmem:[#allocation8 + $0x34b0] sm:$0xff] }
 0x2e3   :  { %3685 = vmatpush1.msra.mxu0 %v1738_v30  ;;  %3663 = vmatprep.subr.mxu1 %v1339_v43  ;;  %v1579_v37 = vld [vmem:[#allocation8 + $0x2038] sm:$0xff]  ;;  %v1578_v30 = vld [vmem:[#allocation8 + $0x2030] sm:$0xff] }
 0x2e4   :  { %3686 = vmatprep.subr.mxu0 %v1723_v45  ;;  %3664 = vmatpush2.msra.mxu1 %v1338_v49  ;;  %v2219_v38 = vld [vmem:[#allocation8 + $0x3438] sm:$0xff]  ;;  %v2218_v43 = vld [vmem:[#allocation8 + $0x3430] sm:$0xff] }
 0x2e5   :  { %3687 = vmatpush1.msra.mxu0 %v1722_v52  ;;  %3665 = vmatprep.subr.mxu1 %v1323_v53  ;;  %v2075_v45 = vld [vmem:[#allocation8 + $0x2fb8] sm:$0xff]  ;;  %v2074_v50 = vld [vmem:[#allocation8 + $0x2fb0] sm:$0xff] }
 0x2e6   :  { %3688 = vmatprep.subr.mxu0 %v1707_v56  ;;  %3666 = vmatpush2.msra.mxu1 %v1322_v57  ;;  %v2203_v49 = vld [vmem:[#allocation8 + $0x33b8] sm:$0xff]  ;;  %v2202_v52 = vld [vmem:[#allocation8 + $0x33b0] sm:$0xff] }
 0x2e7   :  { %3689 = vmatpush1.msra.mxu0 %v1706_v59  ;;  %3668 = vmatmul.mubr.f32.vlgmr.msra.gmra.mxu1 %v6620_v48  ;;  %v2059_v53 = vld [vmem:[#allocation8 + $0x2f38] sm:$0xff]  ;;  %v2058_v57 = vld [vmem:[#allocation8 + $0x2f30] sm:$0xff] }
 0x2e8   :  { %3690 = vmatprep.subr.mxu0 %v1691_v60  ;;  %3745 = vmatprep.subr.mxu1 %v2331_v61  ;;  %v2187_v56 = vld [vmem:[#allocation8 + $0x3338] sm:$0xff]  ;;  %v2186_v59 = vld [vmem:[#allocation8 + $0x3330] sm:$0xff] }
 0x2e9   :  { %3691 = vmatpush1.msra.mxu0 %v1690_v62  ;;  %3746 = vmatpush1.msra.mxu1 %v2330_v1  ;;  %v2043_v60 = vld [vmem:[#allocation8 + $0x2eb8] sm:$0xff]  ;;  %v2042_v62 = vld [vmem:[#allocation8 + $0x2eb0] sm:$0xff] }
 0x2ea   :  { %3809 = vmatprep.mubr.f32.mxu1 %v6644_v21  ;;  %3692 = vmatprep.subr.mxu0 %v1675_v63  ;;  %v2171_v61 = vld [vmem:[#allocation8 + $0x32b8] sm:$0xff]  ;;  %v2170_v1 = vld [vmem:[#allocation8 + $0x32b0] sm:$0xff] }
 0x2eb   :  { %3747 = vmatprep.subr.mxu1 %v2315_v2  ;;  %3693 = vmatpush1.msra.mxu0 %v1674_v3  ;;  %v2027_v63 = vld [vmem:[#allocation8 + $0x2e38] sm:$0xff]  ;;  %v2026_v3 = vld [vmem:[#allocation8 + $0x2e30] sm:$0xff] }
 0x2ec   :  { %3748 = vmatpush1.msra.mxu1 %v2314_v55  ;;  %3694 = vmatprep.subr.mxu0 %v1659_v0  ;;  %v2155_v2 = vld [vmem:[#allocation8 + $0x3238] sm:$0xff]  ;;  %v2154_v55 = vld [vmem:[#allocation8 + $0x3230] sm:$0xff] }
 0x2ed   :  { %3749 = vmatprep.subr.mxu1 %v2299_v4  ;;  %3695 = vmatpush1.msra.mxu0 %v1658_v10  ;;  %v2011_v0 = vld [vmem:[#allocation8 + $0x2db8] sm:$0xff]  ;;  %v2010_v10 = vld [vmem:[#allocation8 + $0x2db0] sm:$0xff] }
 0x2ee   :  { %3750 = vmatpush1.msra.mxu1 %v2298_v41  ;;  %3696 = vmatprep.subr.mxu0 %v1643_v11  ;;  %v2139_v4 = vld [vmem:[#allocation8 + $0x31b8] sm:$0xff]  ;;  %v2138_v41 = vld [vmem:[#allocation8 + $0x31b0] sm:$0xff] }
 0x2ef   :  { %3751 = vmatprep.subr.mxu1 %v2283_v12  ;;  %3697 = vmatpush1.msra.mxu0 %v1642_v13  ;;  %v1995_v11 = vld [vmem:[#allocation8 + $0x2d38] sm:$0xff]  ;;  %v1994_v13 = vld [vmem:[#allocation8 + $0x2d30] sm:$0xff] }
 0x2f0   :  { %3752 = vmatpush1.msra.mxu1 %v2282_v14  ;;  %3698 = vmatprep.subr.mxu0 %v1627_v17  ;;  %v2123_v12 = vld [vmem:[#allocation8 + $0x3138] sm:$0xff]  ;;  %v2122_v14 = vld [vmem:[#allocation8 + $0x3130] sm:$0xff] }
 0x2f1   :  { %3753 = vmatprep.subr.mxu1 %v2267_v18  ;;  %3699 = vmatpush1.msra.mxu0 %v1626_v19  ;;  %v1979_v17 = vld [vmem:[#allocation8 + $0x2cb8] sm:$0xff]  ;;  %v1978_v19 = vld [vmem:[#allocation8 + $0x2cb0] sm:$0xff] }
 0x2f2   :  { %3754 = vmatpush1.msra.mxu1 %v2266_v7  ;;  %3700 = vmatprep.subr.mxu0 %v1611_v23  ;;  %v2107_v18 = vld [vmem:[#allocation8 + $0x30b8] sm:$0xff]  ;;  %v2106_v7 = vld [vmem:[#allocation8 + $0x30b0] sm:$0xff] }
 0x2f3   :  { %3755 = vmatprep.subr.mxu1 %v2251_v25  ;;  %3701 = vmatpush1.msra.mxu0 %v1610_v28  ;;  %v1963_v23 = vld [vmem:[#allocation8 + $0x2c38] sm:$0xff]  ;;  %v1962_v28 = vld [vmem:[#allocation8 + $0x2c30] sm:$0xff] }
 0x2f4   :  { %3756 = vmatpush1.msra.mxu1 %v2250_v32  ;;  %3702 = vmatprep.subr.mxu0 %v1595_v33  ;;  %v2091_v25 = vld [vmem:[#allocation8 + $0x3038] sm:$0xff]  ;;  %v2090_v32 = vld [vmem:[#allocation8 + $0x3030] sm:$0xff] }
 0x2f5   :  { %3757 = vmatprep.subr.mxu1 %v2235_v22  ;;  %3703 = vmatpush1.msra.mxu0 %v1594_v34  ;;  %v1947_v33 = vld [vmem:[#allocation8 + $0x2bb8] sm:$0xff]  ;;  %v1946_v34 = vld [vmem:[#allocation8 + $0x2bb0] sm:$0xff] }
 0x2f6   :  { %3758 = vmatpush1.msra.mxu1 %v2234_v35  ;;  %3704 = vmatprep.subr.mxu0 %v1579_v37  ;;  %v2587_v22 = vld [vmem:[#allocation8 + $0x3fb8] sm:$0xff]  ;;  %v2586_v35 = vld [vmem:[#allocation8 + $0x3fb0] sm:$0xff] }
 0x2f7   :  { %3759 = vmatprep.subr.mxu1 %v2219_v38  ;;  %3705 = vmatpush1.msra.mxu0 %v1578_v30  ;;  %v1931_v37 = vld [vmem:[#allocation8 + $0x2b38] sm:$0xff]  ;;  %v1930_v30 = vld [vmem:[#allocation8 + $0x2b30] sm:$0xff] }
 0x2f8   :  { %3760 = vmatpush1.msra.mxu1 %v2218_v43  ;;  %3706 = vmatprep.subr.mxu0 %v2075_v45  ;;  %v2571_v38 = vld [vmem:[#allocation8 + $0x3f38] sm:$0xff]  ;;  %v2570_v43 = vld [vmem:[#allocation8 + $0x3f30] sm:$0xff] }
 0x2f9   :  { %3761 = vmatprep.subr.mxu1 %v2203_v49  ;;  %3707 = vmatpush2.msra.mxu0 %v2074_v50  ;;  %v1915_v45 = vld [vmem:[#allocation8 + $0x2ab8] sm:$0xff]  ;;  %v1914_v50 = vld [vmem:[#allocation8 + $0x2ab0] sm:$0xff] }
 0x2fa   :  { %3762 = vmatpush1.msra.mxu1 %v2202_v52  ;;  %3708 = vmatprep.subr.mxu0 %v2059_v53  ;;  %v2555_v49 = vld [vmem:[#allocation8 + $0x3eb8] sm:$0xff]  ;;  %v2554_v52 = vld [vmem:[#allocation8 + $0x3eb0] sm:$0xff] }
 0x2fb   :  { %3763 = vmatprep.subr.mxu1 %v2187_v56  ;;  %3709 = vmatpush2.msra.mxu0 %v2058_v57  ;;  %v1899_v53 = vld [vmem:[#allocation8 + $0x2a38] sm:$0xff]  ;;  %v1898_v57 = vld [vmem:[#allocation8 + $0x2a30] sm:$0xff] }
 0x2fc   :  { %3764 = vmatpush1.msra.mxu1 %v2186_v59  ;;  %3710 = vmatprep.subr.mxu0 %v2043_v60  ;;  %v2539_v56 = vld [vmem:[#allocation8 + $0x3e38] sm:$0xff]  ;;  %v2538_v59 = vld [vmem:[#allocation8 + $0x3e30] sm:$0xff] }
 0x2fd   :  { %3765 = vmatprep.subr.mxu1 %v2171_v61  ;;  %3711 = vmatpush2.msra.mxu0 %v2042_v62  ;;  %v1883_v60 = vld [vmem:[#allocation8 + $0x29b8] sm:$0xff]  ;;  %v1882_v62 = vld [vmem:[#allocation8 + $0x29b0] sm:$0xff] }
 0x2fe   :  { %3766 = vmatpush1.msra.mxu1 %v2170_v1  ;;  %3712 = vmatprep.subr.mxu0 %v2027_v63  ;;  %v2523_v61 = vld [vmem:[#allocation8 + $0x3db8] sm:$0xff]  ;;  %v2522_v1 = vld [vmem:[#allocation8 + $0x3db0] sm:$0xff] }
 0x2ff   :  { %3767 = vmatprep.subr.mxu1 %v2155_v2  ;;  %3713 = vmatpush2.msra.mxu0 %v2026_v3  ;;  %v1867_v63 = vld [vmem:[#allocation8 + $0x2938] sm:$0xff]  ;;  %v1866_v3 = vld [vmem:[#allocation8 + $0x2930] sm:$0xff] }
 0x300   :  { %3768 = vmatpush1.msra.mxu1 %v2154_v55  ;;  %3714 = vmatprep.subr.mxu0 %v2011_v0  ;;  %v2507_v2 = vld [vmem:[#allocation8 + $0x3d38] sm:$0xff]  ;;  %v2506_v55 = vld [vmem:[#allocation8 + $0x3d30] sm:$0xff] }
 0x301   :  { %3769 = vmatprep.subr.mxu1 %v2139_v4  ;;  %3715 = vmatpush2.msra.mxu0 %v2010_v10  ;;  %v1851_v0 = vld [vmem:[#allocation8 + $0x28b8] sm:$0xff]  ;;  %v1850_v10 = vld [vmem:[#allocation8 + $0x28b0] sm:$0xff] }
 0x302   :  { %3770 = vmatpush1.msra.mxu1 %v2138_v41  ;;  %3716 = vmatprep.subr.mxu0 %v1995_v11  ;;  %v2491_v4 = vld [vmem:[#allocation8 + $0x3cb8] sm:$0xff]  ;;  %v2490_v41 = vld [vmem:[#allocation8 + $0x3cb0] sm:$0xff] }
 0x303   :  { %3771 = vmatprep.subr.mxu1 %v2123_v12  ;;  %3717 = vmatpush2.msra.mxu0 %v1994_v13  ;;  %v1835_v11 = vld [vmem:[#allocation8 + $0x2838] sm:$0xff]  ;;  %v1834_v13 = vld [vmem:[#allocation8 + $0x2830] sm:$0xff] }
 0x304   :  { %3772 = vmatpush1.msra.mxu1 %v2122_v14  ;;  %3718 = vmatprep.subr.mxu0 %v1979_v17  ;;  %v2475_v12 = vld [vmem:[#allocation8 + $0x3c38] sm:$0xff]  ;;  %v2474_v14 = vld [vmem:[#allocation8 + $0x3c30] sm:$0xff] }
 0x305   :  { %3773 = vmatprep.subr.mxu1 %v2107_v18  ;;  %3719 = vmatpush2.msra.mxu0 %v1978_v19  ;;  %v2459_v17 = vld [vmem:[#allocation8 + $0x3bb8] sm:$0xff]  ;;  %v797_v18 = vld [vmem:[#allocation8 + $0x7c8] sm:$0xff]  ;;  %v2458_v19 = vld [vmem:[#allocation8 + $0x3bb0] sm:$0xff] }
 0x306   :  { %3774 = vmatpush1.msra.mxu1 %v2106_v7  ;;  %3720 = vmatprep.subr.mxu0 %v1963_v23  ;;  %v796_v7 = vld [vmem:[#allocation8 + $0x7c0] sm:$0xff]  ;;  %v2443_v23 = vld [vmem:[#allocation8 + $0x3b38] sm:$0xff] }
 0x307   :  { %3775 = vmatprep.subr.mxu1 %v2091_v25  ;;  %3721 = vmatpush2.msra.mxu0 %v1962_v28  ;;  %v781_v25 = vld [vmem:[#allocation8 + $0x748] sm:$0xff]  ;;  %v2442_v28 = vld [vmem:[#allocation8 + $0x3b30] sm:$0xff] }
 0x308   :  { %3776 = vmatpush1.msra.mxu1 %v2090_v32  ;;  %3722 = vmatprep.subr.mxu0 %v1947_v33  ;;  %v780_v32 = vld [vmem:[#allocation8 + $0x740] sm:$0xff]  ;;  %v2427_v33 = vld [vmem:[#allocation8 + $0x3ab8] sm:$0xff] }
 0x309   :  { %3777 = vmatprep.subr.mxu1 %v2587_v22  ;;  %3723 = vmatpush2.msra.mxu0 %v1946_v34  ;;  %v765_v22 = vld [vmem:[#allocation8 + $0x6c8] sm:$0xff]  ;;  %v2426_v34 = vld [vmem:[#allocation8 + $0x3ab0] sm:$0xff] }
 0x30a   :  { %3778 = vmatpush2.msra.mxu1 %v2586_v35  ;;  %3724 = vmatprep.subr.mxu0 %v1931_v37  ;;  %v764_v35 = vld [vmem:[#allocation8 + $0x6c0] sm:$0xff]  ;;  %v2411_v37 = vld [vmem:[#allocation8 + $0x3a38] sm:$0xff] }
 0x30b   :  { %3779 = vmatprep.subr.mxu1 %v2571_v38  ;;  %3725 = vmatpush2.msra.mxu0 %v1930_v30  ;;  %v6703_v38 = vpop.f32.mrf.mxu0  ;;  %v749_v30 = vld [vmem:[#allocation8 + $0x648] sm:$0xff] }
 0x30c   :  { %3780 = vmatpush2.msra.mxu1 %v2570_v43  ;;  %3726 = vmatprep.subr.mxu0 %v1915_v45  ;;  %v2410_v43 = vld [vmem:[#allocation8 + $0x3a30] sm:$0xff]  ;;  %v6250_v45 = vld [vmem:[#allocation10] sm:$0xff] }
 0x30d   :  { %3781 = vmatprep.subr.mxu1 %v2555_v49  ;;  %3727 = vmatpush2.msra.mxu0 %v1914_v50  ;;  %v2619_v49 = vrot.slane %v6250_v45, %v6625_v5  ;;  %v748_v50 = vld [vmem:[#allocation8 + $0x640] sm:$0xff] }
 0x30e   :  { %3782 = vmatpush2.msra.mxu1 %v2554_v52  ;;  %3728 = vmatprep.subr.mxu0 %v1899_v53  ;;  %v2395_v52 = vld [vmem:[#allocation8 + $0x39b8] sm:$0xff]  ;;  %v1260_v45 = vld [vmem:[#allocation8 + $0x1640] sm:$0xff] }
 0x30f   :  { %3783 = vmatprep.subr.mxu1 %v2539_v56  ;;  %3729 = vmatpush2.msra.mxu0 %v1898_v57  ;;  %v733_v56 = vld [vmem:[#allocation8 + $0x5c8] sm:$0xff]  ;;  %v2394_v57 = vld [vmem:[#allocation8 + $0x39b0] sm:$0xff] }
 0x310   :  { %3784 = vmatpush2.msra.mxu1 %v2538_v59  ;;  %3730 = vmatprep.subr.mxu0 %v1883_v60  ;;  %v732_v59 = vld [vmem:[#allocation8 + $0x5c0] sm:$0xff]  ;;  %v2379_v60 = vld [vmem:[#allocation8 + $0x3938] sm:$0xff] }
 0x311   :  { %3785 = vmatprep.subr.mxu1 %v2523_v61  ;;  %3731 = vmatpush2.msra.mxu0 %v1882_v62  ;;  %v6706_v61 = vpop.f32.mrf.mxu1  ;;  %v717_v62 = vld [vmem:[#allocation8 + $0x548] sm:$0xff] }
 0x312   :  { %3786 = vmatpush2.msra.mxu1 %v2522_v1  ;;  %3732 = vmatprep.subr.mxu0 %v1867_v63  ;;  %v3314_v53 = vpop.f32.mrf.mxu0  ;;  %v2378_v1 = vld [vmem:[#allocation8 + $0x3930] sm:$0xff] }
 0x313   :  { %3787 = vmatprep.subr.mxu1 %v2507_v2  ;;  %3733 = vmatpush2.msra.mxu0 %v1866_v3  ;;  %v3315_v63 = vadd.f32 %v3314_v53, %v2619_v49  ;;  %v716_v2 = vld [vmem:[#allocation8 + $0x540] sm:$0xff]  ;;  %v2363_v3 = vld [vmem:[#allocation8 + $0x38b8] sm:$0xff]  ;;  %v605_v49 = vld [vmem:[#allocation8 + $0x1c8] sm:$0xff] }
 0x314   :  { %3788 = vmatpush2.msra.mxu1 %v2506_v55  ;;  %3734 = vmatprep.subr.mxu0 %v1851_v0  ;;  %v701_v55 = vld [vmem:[#allocation8 + $0x4c8] sm:$0xff]  ;;  %v2362_v0 = vld [vmem:[#allocation8 + $0x38b0] sm:$0xff]  ;;  %v1244_v53 = vld [vmem:[#allocation8 + $0x15c0] sm:$0xff] }
 0x315   :  { %3789 = vmatprep.subr.mxu1 %v2491_v4  ;;  %3735 = vmatpush2.msra.mxu0 %v1850_v10  ;;  %v700_v10 = vld [vmem:[#allocation8 + $0x4c0] sm:$0xff] }
 0x316   :  { %3790 = vmatpush2.msra.mxu1 %v2490_v41  ;;  %3736 = vmatprep.subr.mxu0 %v1835_v11  ;;  %v2347_v41 = vld [vmem:[#allocation8 + $0x3838] sm:$0xff] }
 0x317   :  { %3791 = vmatprep.subr.mxu1 %v2475_v12  ;;  %3737 = vmatpush2.msra.mxu0 %v1834_v13  ;;  %v685_v12 = vld [vmem:[#allocation8 + $0x448] sm:$0xff]  ;;  %v2346_v13 = vld [vmem:[#allocation8 + $0x3830] sm:$0xff] }
 0x318   :  { %3792 = vmatpush2.msra.mxu1 %v2474_v14  ;;  %3739 = vmatmul.mubr.f32.vlgmr.msra.gmra.mxu0 %v6630_v39  ;;  %v684_v14 = vld [vmem:[#allocation8 + $0x440] sm:$0xff] }
 0x319   :  { %3793 = vmatprep.subr.mxu1 %v2459_v17  ;;  %3816 = vmatprep.subr.mxu0 %v797_v18  ;;  %v669_v17 = vld [vmem:[#allocation8 + $0x3c8] sm:$0xff] }
 0x31a   :  { %3794 = vmatpush2.msra.mxu1 %v2458_v19  ;;  %3817 = vmatpush1.msra.mxu0 %v796_v7  ;;  %v1309_v18 = vld [vmem:[#allocation8 + $0x17c8] sm:$0xff]  ;;  %v668_v19 = vld [vmem:[#allocation8 + $0x3c0] sm:$0xff] }
 0x31b   :  { %3880 = vmatprep.mubr.f32.mxu0 %v6592_v15  ;;  %3795 = vmatprep.subr.mxu1 %v2443_v23  ;;  %v1308_v7 = vld [vmem:[#allocation8 + $0x17c0] sm:$0xff]  ;;  %v653_v23 = vld [vmem:[#allocation8 + $0x348] sm:$0xff] }
 0x31c   :  { %3818 = vmatprep.subr.mxu0 %v781_v25  ;;  %3796 = vmatpush2.msra.mxu1 %v2442_v28  ;;  %v1293_v25 = vld [vmem:[#allocation8 + $0x1748] sm:$0xff]  ;;  %v652_v28 = vld [vmem:[#allocation8 + $0x340] sm:$0xff] }
 0x31d   :  { %3819 = vmatpush1.msra.mxu0 %v780_v32  ;;  %3797 = vmatprep.subr.mxu1 %v2427_v33  ;;  %v1292_v32 = vld [vmem:[#allocation8 + $0x1740] sm:$0xff]  ;;  %v637_v33 = vld [vmem:[#allocation8 + $0x2c8] sm:$0xff] }
 0x31e   :  { %3820 = vmatprep.subr.mxu0 %v765_v22  ;;  %3798 = vmatpush2.msra.mxu1 %v2426_v34  ;;  %v1277_v22 = vld [vmem:[#allocation8 + $0x16c8] sm:$0xff]  ;;  %v636_v34 = vld [vmem:[#allocation8 + $0x2c0] sm:$0xff] }
 0x31f   :  { %3821 = vmatpush1.msra.mxu0 %v764_v35  ;;  %3799 = vmatprep.subr.mxu1 %v2411_v37  ;;  %v1276_v35 = vld [vmem:[#allocation8 + $0x16c0] sm:$0xff]  ;;  %v621_v37 = vld [vmem:[#allocation8 + $0x248] sm:$0xff] }
 0x320   :  { %3822 = vmatprep.subr.mxu0 %v749_v30  ;;  %3800 = vmatpush2.msra.mxu1 %v2410_v43  ;;  %v1261_v30 = vld [vmem:[#allocation8 + $0x1648] sm:$0xff]  ;;  %v620_v43 = vld [vmem:[#allocation8 + $0x240] sm:$0xff] }
 0x321   :  { %3823 = vmatpush1.msra.mxu0 %v748_v50  ;;  %3801 = vmatprep.subr.mxu1 %v2395_v52  ;;  %v1245_v50 = vld [vmem:[#allocation8 + $0x15c8] sm:$0xff]  ;;  %v604_v52 = vld [vmem:[#allocation8 + $0x1c0] sm:$0xff] }
 0x322   :  { %3824 = vmatprep.subr.mxu0 %v733_v56  ;;  %3802 = vmatpush2.msra.mxu1 %v2394_v57  ;;  %v589_v56 = vld [vmem:[#allocation8 + $0x148] sm:$0xff] }
 0x323   :  { %3825 = vmatpush1.msra.mxu0 %v732_v59  ;;  %3803 = vmatprep.subr.mxu1 %v2379_v60  ;;  %v3385_v4 = vpop.f32.mrf.mxu1  ;;  %v1229_v57 = vld [vmem:[#allocation8 + $0x1548] sm:$0xff]  ;;  %v588_v59 = vld [vmem:[#allocation8 + $0x140] sm:$0xff] }
 0x324   :  { %3826 = vmatprep.subr.mxu0 %v717_v62  ;;  %3804 = vmatpush2.msra.mxu1 %v2378_v1  ;;  %v6708_v11 = vadd.f32 %v3385_v4, %v3315_v63  ;;  %v1228_v60 = vld [vmem:[#allocation8 + $0x1540] sm:$0xff]  ;;  %v573_v62 = vld [vmem:[#allocation8 + $0xc8] sm:$0xff] }
 0x325   :  { %3827 = vmatpush1.msra.mxu0 %v716_v2  ;;  %3805 = vmatprep.subr.mxu1 %v2363_v3  ;;  %v1213_v1 = vld [vmem:[#allocation8 + $0x14c8] sm:$0xff]  ;;  %v572_v63 = vld [vmem:[#allocation8 + $0xc0] sm:$0xff] }
 0x326   :  { %3828 = vmatprep.subr.mxu0 %v701_v55  ;;  %3806 = vmatpush2.msra.mxu1 %v2362_v0  ;;  %v1212_v2 = vld [vmem:[#allocation8 + $0x14c0] sm:$0xff]  ;;  %v557_v3 = vld [vmem:[#allocation8 + $0x48] sm:$0xff] }
 0x327   :  { %3829 = vmatpush1.msra.mxu0 %v700_v10  ;;  %3807 = vmatprep.subr.mxu1 %v2347_v41  ;;  %v1197_v55 = vld [vmem:[#allocation8 + $0x1448] sm:$0xff]  ;;  %v556_v0 = vld [vmem:[#allocation8 + $0x40] sm:$0xff] }
 0x328   :  { %3830 = vmatprep.subr.mxu0 %v685_v12  ;;  %3808 = vmatpush2.msra.mxu1 %v2346_v13  ;;  %v1196_v4 = vld [vmem:[#allocation8 + $0x1440] sm:$0xff]  ;;  %v1053_v10 = vld [vmem:[#allocation8 + $0xfc8] sm:$0xff] }
 0x329   :  { %3831 = vmatpush1.msra.mxu0 %v684_v14  ;;  %3810 = vmatmul.mubr.f32.vlgmr.msra.gmra.mxu1 %v6646_v31  ;;  %v1181_v41 = vld [vmem:[#allocation8 + $0x13c8] sm:$0xff]  ;;  %v1052_v12 = vld [vmem:[#allocation8 + $0xfc0] sm:$0xff] }
 0x32a   :  { %3832 = vmatprep.subr.mxu0 %v669_v17  ;;  %3887 = vmatprep.subr.mxu1 %v1309_v18  ;;  %v1180_v13 = vld [vmem:[#allocation8 + $0x13c0] sm:$0xff]  ;;  %v1037_v14 = vld [vmem:[#allocation8 + $0xf48] sm:$0xff] }
 0x32b   :  { %3833 = vmatpush1.msra.mxu0 %v668_v19  ;;  %3888 = vmatpush1.msra.mxu1 %v1308_v7  ;;  %v1165_v17 = vld [vmem:[#allocation8 + $0x1348] sm:$0xff]  ;;  %v1036_v18 = vld [vmem:[#allocation8 + $0xf40] sm:$0xff] }
 0x32c   :  { %3951 = vmatprep.mubr.f32.mxu1 %v6618_v46  ;;  %3834 = vmatprep.subr.mxu0 %v653_v23  ;;  %v1164_v19 = vld [vmem:[#allocation8 + $0x1340] sm:$0xff]  ;;  %v1021_v7 = vld [vmem:[#allocation8 + $0xec8] sm:$0xff] }
 0x32d   :  { %3889 = vmatprep.subr.mxu1 %v1293_v25  ;;  %3835 = vmatpush1.msra.mxu0 %v652_v28  ;;  %v1149_v23 = vld [vmem:[#allocation8 + $0x12c8] sm:$0xff]  ;;  %v1020_v25 = vld [vmem:[#allocation8 + $0xec0] sm:$0xff] }
 0x32e   :  { %3890 = vmatpush1.msra.mxu1 %v1292_v32  ;;  %3836 = vmatprep.subr.mxu0 %v637_v33  ;;  %v1148_v28 = vld [vmem:[#allocation8 + $0x12c0] sm:$0xff]  ;;  %v1005_v32 = vld [vmem:[#allocation8 + $0xe48] sm:$0xff] }
 0x32f   :  { %3891 = vmatprep.subr.mxu1 %v1277_v22  ;;  %3837 = vmatpush1.msra.mxu0 %v636_v34  ;;  %v1133_v33 = vld [vmem:[#allocation8 + $0x1248] sm:$0xff]  ;;  %v1004_v22 = vld [vmem:[#allocation8 + $0xe40] sm:$0xff] }
 0x330   :  { %3892 = vmatpush1.msra.mxu1 %v1276_v35  ;;  %3838 = vmatprep.subr.mxu0 %v621_v37  ;;  %v1132_v34 = vld [vmem:[#allocation8 + $0x1240] sm:$0xff]  ;;  %v989_v35 = vld [vmem:[#allocation8 + $0xdc8] sm:$0xff] }
 0x331   :  { %3893 = vmatprep.subr.mxu1 %v1261_v30  ;;  %3839 = vmatpush1.msra.mxu0 %v620_v43  ;;  %v1117_v37 = vld [vmem:[#allocation8 + $0x11c8] sm:$0xff]  ;;  %v988_v30 = vld [vmem:[#allocation8 + $0xdc0] sm:$0xff] }
 0x332   :  { %3894 = vmatpush1.msra.mxu1 %v1260_v45  ;;  %3840 = vmatprep.subr.mxu0 %v605_v49  ;;  %v1116_v43 = vld [vmem:[#allocation8 + $0x11c0] sm:$0xff]  ;;  %v973_v45 = vld [vmem:[#allocation8 + $0xd48] sm:$0xff] }
 0x333   :  { %3895 = vmatprep.subr.mxu1 %v1245_v50  ;;  %3841 = vmatpush1.msra.mxu0 %v604_v52  ;;  %v1101_v49 = vld [vmem:[#allocation8 + $0x1148] sm:$0xff]  ;;  %v972_v50 = vld [vmem:[#allocation8 + $0xd40] sm:$0xff] }
 0x334   :  { %3896 = vmatpush1.msra.mxu1 %v1244_v53  ;;  %3842 = vmatprep.subr.mxu0 %v589_v56  ;;  %v1100_v52 = vld [vmem:[#allocation8 + $0x1140] sm:$0xff]  ;;  %v957_v53 = vld [vmem:[#allocation8 + $0xcc8] sm:$0xff] }
 0x335   :  { %3897 = vmatprep.subr.mxu1 %v1229_v57  ;;  %3843 = vmatpush1.msra.mxu0 %v588_v59  ;;  %v1085_v56 = vld [vmem:[#allocation8 + $0x10c8] sm:$0xff]  ;;  %v956_v57 = vld [vmem:[#allocation8 + $0xcc0] sm:$0xff] }
 0x336   :  { %3898 = vmatpush1.msra.mxu1 %v1228_v60  ;;  %3844 = vmatprep.subr.mxu0 %v573_v62  ;;  %v1084_v59 = vld [vmem:[#allocation8 + $0x10c0] sm:$0xff]  ;;  %v941_v60 = vld [vmem:[#allocation8 + $0xc48] sm:$0xff] }
 0x337   :  { %3899 = vmatprep.subr.mxu1 %v1213_v1  ;;  %3845 = vmatpush1.msra.mxu0 %v572_v63  ;;  %v1069_v62 = vld [vmem:[#allocation8 + $0x1048] sm:$0xff]  ;;  %v940_v1 = vld [vmem:[#allocation8 + $0xc40] sm:$0xff] }
 0x338   :  { %3900 = vmatpush1.msra.mxu1 %v1212_v2  ;;  %3846 = vmatprep.subr.mxu0 %v557_v3  ;;  %v1068_v63 = vld [vmem:[#allocation8 + $0x1040] sm:$0xff]  ;;  %v925_v2 = vld [vmem:[#allocation8 + $0xbc8] sm:$0xff] }
 0x339   :  { %3901 = vmatprep.subr.mxu1 %v1197_v55  ;;  %3847 = vmatpush1.msra.mxu0 %v556_v0  ;;  %v1565_v3 = vld [vmem:[#allocation8 + $0x1fc8] sm:$0xff]  ;;  %v924_v55 = vld [vmem:[#allocation8 + $0xbc0] sm:$0xff] }
 0x33a   :  { %3902 = vmatpush1.msra.mxu1 %v1196_v4  ;;  %3848 = vmatprep.subr.mxu0 %v1053_v10  ;;  %v1564_v0 = vld [vmem:[#allocation8 + $0x1fc0] sm:$0xff]  ;;  %v909_v4 = vld [vmem:[#allocation8 + $0xb48] sm:$0xff] }
 0x33b   :  { %3903 = vmatprep.subr.mxu1 %v1181_v41  ;;  %3849 = vmatpush2.msra.mxu0 %v1052_v12  ;;  %v1549_v10 = vld [vmem:[#allocation8 + $0x1f48] sm:$0xff]  ;;  %v908_v41 = vld [vmem:[#allocation8 + $0xb40] sm:$0xff] }
 0x33c   :  { %3904 = vmatpush1.msra.mxu1 %v1180_v13  ;;  %3850 = vmatprep.subr.mxu0 %v1037_v14  ;;  %v1548_v12 = vld [vmem:[#allocation8 + $0x1f40] sm:$0xff]  ;;  %v893_v13 = vld [vmem:[#allocation8 + $0xac8] sm:$0xff] }
 0x33d   :  { %3905 = vmatprep.subr.mxu1 %v1165_v17  ;;  %3851 = vmatpush2.msra.mxu0 %v1036_v18  ;;  %v1533_v14 = vld [vmem:[#allocation8 + $0x1ec8] sm:$0xff]  ;;  %v892_v17 = vld [vmem:[#allocation8 + $0xac0] sm:$0xff] }
 0x33e   :  { %3906 = vmatpush1.msra.mxu1 %v1164_v19  ;;  %3852 = vmatprep.subr.mxu0 %v1021_v7  ;;  %v1532_v18 = vld [vmem:[#allocation8 + $0x1ec0] sm:$0xff]  ;;  %v877_v19 = vld [vmem:[#allocation8 + $0xa48] sm:$0xff] }
 0x33f   :  { %3907 = vmatprep.subr.mxu1 %v1149_v23  ;;  %3853 = vmatpush2.msra.mxu0 %v1020_v25  ;;  %v1517_v7 = vld [vmem:[#allocation8 + $0x1e48] sm:$0xff]  ;;  %v876_v23 = vld [vmem:[#allocation8 + $0xa40] sm:$0xff] }
 0x340   :  { %3908 = vmatpush1.msra.mxu1 %v1148_v28  ;;  %3854 = vmatprep.subr.mxu0 %v1005_v32  ;;  %v1516_v25 = vld [vmem:[#allocation8 + $0x1e40] sm:$0xff]  ;;  %v861_v28 = vld [vmem:[#allocation8 + $0x9c8] sm:$0xff] }
 0x341   :  { %3909 = vmatprep.subr.mxu1 %v1133_v33  ;;  %3855 = vmatpush2.msra.mxu0 %v1004_v22  ;;  %v1501_v32 = vld [vmem:[#allocation8 + $0x1dc8] sm:$0xff]  ;;  %v860_v33 = vld [vmem:[#allocation8 + $0x9c0] sm:$0xff] }
 0x342   :  { %3910 = vmatpush1.msra.mxu1 %v1132_v34  ;;  %3856 = vmatprep.subr.mxu0 %v989_v35  ;;  %v1500_v22 = vld [vmem:[#allocation8 + $0x1dc0] sm:$0xff]  ;;  %v845_v34 = vld [vmem:[#allocation8 + $0x948] sm:$0xff]  ;;  %v6712_v35 = vpop.f32.mrf.mxu0 }
 0x343   :  { %3911 = vmatprep.subr.mxu1 %v1117_v37  ;;  %3857 = vmatpush2.msra.mxu0 %v988_v30  ;;  %v1485_v37 = vld [vmem:[#allocation8 + $0x1d48] sm:$0xff]  ;;  %v844_v30 = vld [vmem:[#allocation8 + $0x940] sm:$0xff] }
 0x344   :  { %3912 = vmatpush1.msra.mxu1 %v1116_v43  ;;  %3858 = vmatprep.subr.mxu0 %v973_v45  ;;  %v1484_v43 = vld [vmem:[#allocation8 + $0x1d40] sm:$0xff]  ;;  %v829_v45 = vld [vmem:[#allocation8 + $0x8c8] sm:$0xff] }
 0x345   :  { %3913 = vmatprep.subr.mxu1 %v1101_v49  ;;  %3859 = vmatpush2.msra.mxu0 %v972_v50  ;;  %v1469_v49 = vld [vmem:[#allocation8 + $0x1cc8] sm:$0xff]  ;;  %v828_v50 = vld [vmem:[#allocation8 + $0x8c0] sm:$0xff] }
 0x346   :  { %3914 = vmatpush1.msra.mxu1 %v1100_v52  ;;  %3860 = vmatprep.subr.mxu0 %v957_v53  ;;  %v1468_v53 = vld [vmem:[#allocation8 + $0x1cc0] sm:$0xff] }
 0x347   :  { %3915 = vmatprep.subr.mxu1 %v1085_v56  ;;  %3861 = vmatpush2.msra.mxu0 %v956_v57  ;;  %v813_v56 = vld [vmem:[#allocation8 + $0x848] sm:$0xff] }
 0x348   :  { %3916 = vmatpush1.msra.mxu1 %v1084_v59  ;;  %3862 = vmatprep.subr.mxu0 %v941_v60  ;;  %v1453_v59 = vld [vmem:[#allocation8 + $0x1c48] sm:$0xff]  ;;  %v812_v60 = vld [vmem:[#allocation8 + $0x840] sm:$0xff] }
 0x349   :  { %3917 = vmatprep.subr.mxu1 %v1069_v62  ;;  %3863 = vmatpush2.msra.mxu0 %v940_v1  ;;  %v1452_v62 = vld [vmem:[#allocation8 + $0x1c40] sm:$0xff]  ;;  %v1437_v1 = vld [vmem:[#allocation8 + $0x1bc8] sm:$0xff] }
 0x34a   :  { %3918 = vmatpush1.msra.mxu1 %v1068_v63  ;;  %3864 = vmatprep.subr.mxu0 %v925_v2  ;;  %v1821_v63 = vld [vmem:[#allocation8 + $0x27c8] sm:$0xff]  ;;  %v1436_v2 = vld [vmem:[#allocation8 + $0x1bc0] sm:$0xff] }
 0x34b   :  { %3919 = vmatprep.subr.mxu1 %v1565_v3  ;;  %3865 = vmatpush2.msra.mxu0 %v924_v55  ;;  %v1820_v3 = vld [vmem:[#allocation8 + $0x27c0] sm:$0xff]  ;;  %v1805_v55 = vld [vmem:[#allocation8 + $0x2748] sm:$0xff] }
 0x34c   :  { %3920 = vmatpush2.msra.mxu1 %v1564_v0  ;;  %3866 = vmatprep.subr.mxu0 %v909_v4  ;;  %v1420_v0 = vld [vmem:[#allocation8 + $0x1b40] sm:$0xff] }
 0x34d   :  { %3921 = vmatprep.subr.mxu1 %v1549_v10  ;;  %3867 = vmatpush2.msra.mxu0 %v908_v41  ;;  %v1804_v4 = vld [vmem:[#allocation8 + $0x2740] sm:$0xff]  ;;  %v1405_v10 = vld [vmem:[#allocation8 + $0x1ac8] sm:$0xff] }
 0x34e   :  { %3922 = vmatpush2.msra.mxu1 %v1548_v12  ;;  %3868 = vmatprep.subr.mxu0 %v893_v13  ;;  %v1789_v41 = vld [vmem:[#allocation8 + $0x26c8] sm:$0xff]  ;;  %v1404_v12 = vld [vmem:[#allocation8 + $0x1ac0] sm:$0xff] }
 0x34f   :  { %3923 = vmatprep.subr.mxu1 %v1533_v14  ;;  %3869 = vmatpush2.msra.mxu0 %v892_v17  ;;  %v1788_v13 = vld [vmem:[#allocation8 + $0x26c0] sm:$0xff]  ;;  %v1389_v14 = vld [vmem:[#allocation8 + $0x1a48] sm:$0xff] }
 0x350   :  { %3924 = vmatpush2.msra.mxu1 %v1532_v18  ;;  %3870 = vmatprep.subr.mxu0 %v877_v19  ;;  %v1773_v17 = vld [vmem:[#allocation8 + $0x2648] sm:$0xff]  ;;  %v1388_v18 = vld [vmem:[#allocation8 + $0x1a40] sm:$0xff] }
 0x351   :  { %3925 = vmatprep.subr.mxu1 %v1517_v7  ;;  %3871 = vmatpush2.msra.mxu0 %v876_v23  ;;  %v1772_v19 = vld [vmem:[#allocation8 + $0x2640] sm:$0xff]  ;;  %v1373_v7 = vld [vmem:[#allocation8 + $0x19c8] sm:$0xff] }
 0x352   :  { %3926 = vmatpush2.msra.mxu1 %v1516_v25  ;;  %3872 = vmatprep.subr.mxu0 %v861_v28  ;;  %v1757_v23 = vld [vmem:[#allocation8 + $0x25c8] sm:$0xff]  ;;  %v1372_v25 = vld [vmem:[#allocation8 + $0x19c0] sm:$0xff] }
 0x353   :  { %3927 = vmatprep.subr.mxu1 %v1501_v32  ;;  %3873 = vmatpush2.msra.mxu0 %v860_v33  ;;  %v1756_v28 = vld [vmem:[#allocation8 + $0x25c0] sm:$0xff]  ;;  %v1357_v32 = vld [vmem:[#allocation8 + $0x1948] sm:$0xff]  ;;  %v6719_v33 = vpop.f32.mrf.mxu1 }
 0x354   :  { %3928 = vmatpush2.msra.mxu1 %v1500_v22  ;;  %3874 = vmatprep.subr.mxu0 %v845_v34  ;;  %v3456_v52 = vpop.f32.mrf.mxu0  ;;  %v1741_v22 = vld [vmem:[#allocation8 + $0x2548] sm:$0xff]  ;;  %v1356_v34 = vld [vmem:[#allocation8 + $0x1940] sm:$0xff] }
 0x355   :  { %3929 = vmatprep.subr.mxu1 %v1485_v37  ;;  %3875 = vmatpush2.msra.mxu0 %v844_v30  ;;  %v6715_v57 = vadd.f32 %v3456_v52, %v6708_v11  ;;  %v1421_v11 = vld [vmem:[#allocation8 + $0x1b48] sm:$0xff]  ;;  %v1740_v37 = vld [vmem:[#allocation8 + $0x2540] sm:$0xff] }
 0x356   :  { %3930 = vmatpush2.msra.mxu1 %v1484_v43  ;;  %3876 = vmatprep.subr.mxu0 %v829_v45  ;;  %v1341_v30 = vld [vmem:[#allocation8 + $0x18c8] sm:$0xff]  ;;  %v1340_v45 = vld [vmem:[#allocation8 + $0x18c0] sm:$0xff] }
 0x357   :  { %3931 = vmatprep.subr.mxu1 %v1469_v49  ;;  %3877 = vmatpush2.msra.mxu0 %v828_v50  ;;  %v1725_v43 = vld [vmem:[#allocation8 + $0x24c8] sm:$0xff]  ;;  %v1724_v50 = vld [vmem:[#allocation8 + $0x24c0] sm:$0xff] }
 0x358   :  { %3932 = vmatpush2.msra.mxu1 %v1468_v53  ;;  %3878 = vmatprep.subr.mxu0 %v813_v56  ;;  %v1325_v52 = vld [vmem:[#allocation8 + $0x1848] sm:$0xff] }
 0x359   :  { %3933 = vmatprep.subr.mxu1 %v1453_v59  ;;  %3879 = vmatpush2.msra.mxu0 %v812_v60  ;;  %v1709_v56 = vld [vmem:[#allocation8 + $0x2448] sm:$0xff]  ;;  %v1324_v59 = vld [vmem:[#allocation8 + $0x1840] sm:$0xff] }
 0x35a   :  { %3934 = vmatpush2.msra.mxu1 %v1452_v62  ;;  %3881 = vmatmul.mubr.f32.vlgmr.msra.gmra.mxu0 %v6594_v16  ;;  %v1708_v60 = vld [vmem:[#allocation8 + $0x2440] sm:$0xff]  ;;  %v1693_v62 = vld [vmem:[#allocation8 + $0x23c8] sm:$0xff] }
 0x35b   :  { %3935 = vmatprep.subr.mxu1 %v1437_v1  ;;  %3958 = vmatprep.subr.mxu0 %v1821_v63  ;;  %v2333_v1 = vld [vmem:[#allocation8 + $0x37c8] sm:$0xff]  ;;  %v1692_v63 = vld [vmem:[#allocation8 + $0x23c0] sm:$0xff] }
 0x35c   :  { %3936 = vmatpush2.msra.mxu1 %v1436_v2  ;;  %3959 = vmatpush1.msra.mxu0 %v1820_v3  ;;  %v2332_v2 = vld [vmem:[#allocation8 + $0x37c0] sm:$0xff]  ;;  %v2317_v3 = vld [vmem:[#allocation8 + $0x3748] sm:$0xff] }
 0x35d   :  { %4022 = vmatprep.mubr.f32.mxu0 %v6615_v42  ;;  %3937 = vmatprep.subr.mxu1 %v1421_v11  ;;  %v1676_v11 = vld [vmem:[#allocation8 + $0x2340] sm:$0xff] }
 0x35e   :  { %3960 = vmatprep.subr.mxu0 %v1805_v55  ;;  %3938 = vmatpush2.msra.mxu1 %v1420_v0  ;;  %v2316_v55 = vld [vmem:[#allocation8 + $0x3740] sm:$0xff]  ;;  %v1661_v0 = vld [vmem:[#allocation8 + $0x22c8] sm:$0xff] }
 0x35f   :  { %3961 = vmatpush1.msra.mxu0 %v1804_v4  ;;  %3939 = vmatprep.subr.mxu1 %v1405_v10  ;;  %v2301_v4 = vld [vmem:[#allocation8 + $0x36c8] sm:$0xff]  ;;  %v1660_v10 = vld [vmem:[#allocation8 + $0x22c0] sm:$0xff] }
 0x360   :  { %3962 = vmatprep.subr.mxu0 %v1789_v41  ;;  %3940 = vmatpush2.msra.mxu1 %v1404_v12  ;;  %v2300_v41 = vld [vmem:[#allocation8 + $0x36c0] sm:$0xff]  ;;  %v1645_v12 = vld [vmem:[#allocation8 + $0x2248] sm:$0xff] }
 0x361   :  { %3963 = vmatpush1.msra.mxu0 %v1788_v13  ;;  %3941 = vmatprep.subr.mxu1 %v1389_v14  ;;  %v2285_v13 = vld [vmem:[#allocation8 + $0x3648] sm:$0xff]  ;;  %v1644_v14 = vld [vmem:[#allocation8 + $0x2240] sm:$0xff] }
 0x362   :  { %3964 = vmatprep.subr.mxu0 %v1773_v17  ;;  %3942 = vmatpush2.msra.mxu1 %v1388_v18  ;;  %v2284_v17 = vld [vmem:[#allocation8 + $0x3640] sm:$0xff]  ;;  %v1629_v18 = vld [vmem:[#allocation8 + $0x21c8] sm:$0xff] }
 0x363   :  { %3965 = vmatpush1.msra.mxu0 %v1772_v19  ;;  %3943 = vmatprep.subr.mxu1 %v1373_v7  ;;  %v2269_v19 = vld [vmem:[#allocation8 + $0x35c8] sm:$0xff]  ;;  %v1628_v7 = vld [vmem:[#allocation8 + $0x21c0] sm:$0xff] }
 0x364   :  { %3966 = vmatprep.subr.mxu0 %v1757_v23  ;;  %3944 = vmatpush2.msra.mxu1 %v1372_v25  ;;  %v2268_v23 = vld [vmem:[#allocation8 + $0x35c0] sm:$0xff]  ;;  %v1613_v25 = vld [vmem:[#allocation8 + $0x2148] sm:$0xff] }
 0x365   :  { %3967 = vmatpush1.msra.mxu0 %v1756_v28  ;;  %3945 = vmatprep.subr.mxu1 %v1357_v32  ;;  %v3527_v49 = vpop.f32.mrf.mxu1  ;;  %v2253_v28 = vld [vmem:[#allocation8 + $0x3548] sm:$0xff]  ;;  %v1612_v32 = vld [vmem:[#allocation8 + $0x2140] sm:$0xff] }
 0x366   :  { %3968 = vmatprep.subr.mxu0 %v1741_v22  ;;  %3946 = vmatpush2.msra.mxu1 %v1356_v34  ;;  %v6722_v53 = vadd.f32 %v3527_v49, %v6715_v57  ;;  %v1677_v57 = vld [vmem:[#allocation8 + $0x2348] sm:$0xff]  ;;  %v2252_v22 = vld [vmem:[#allocation8 + $0x3540] sm:$0xff] }
 0x367   :  { %3969 = vmatpush1.msra.mxu0 %v1740_v37  ;;  %3947 = vmatprep.subr.mxu1 %v1341_v30  ;;  %v1597_v34 = vld [vmem:[#allocation8 + $0x20c8] sm:$0xff]  ;;  %v1596_v30 = vld [vmem:[#allocation8 + $0x20c0] sm:$0xff] }
 0x368   :  { %3970 = vmatprep.subr.mxu0 %v1725_v43  ;;  %3948 = vmatpush2.msra.mxu1 %v1340_v45  ;;  %v2237_v37 = vld [vmem:[#allocation8 + $0x34c8] sm:$0xff]  ;;  %v2236_v43 = vld [vmem:[#allocation8 + $0x34c0] sm:$0xff] }
 0x369   :  { %3971 = vmatpush1.msra.mxu0 %v1724_v50  ;;  %3949 = vmatprep.subr.mxu1 %v1325_v52  ;;  %v1581_v45 = vld [vmem:[#allocation8 + $0x2048] sm:$0xff]  ;;  %v1580_v50 = vld [vmem:[#allocation8 + $0x2040] sm:$0xff] }
 0x36a   :  { %3972 = vmatprep.subr.mxu0 %v1709_v56  ;;  %3950 = vmatpush2.msra.mxu1 %v1324_v59  ;;  %v2221_v49 = vld [vmem:[#allocation8 + $0x3448] sm:$0xff]  ;;  %v2220_v52 = vld [vmem:[#allocation8 + $0x3440] sm:$0xff] }
 0x36b   :  { %3973 = vmatpush1.msra.mxu0 %v1708_v60  ;;  %3952 = vmatmul.mubr.f32.vlgmr.msra.gmra.mxu1 %v6620_v48  ;;  %v2077_v56 = vld [vmem:[#allocation8 + $0x2fc8] sm:$0xff]  ;;  %v2076_v60 = vld [vmem:[#allocation8 + $0x2fc0] sm:$0xff] }
 0x36c   :  { %3974 = vmatprep.subr.mxu0 %v1693_v62  ;;  %4029 = vmatprep.subr.mxu1 %v2333_v1  ;;  %v2205_v59 = vld [vmem:[#allocation8 + $0x33c8] sm:$0xff]  ;;  %v2204_v62 = vld [vmem:[#allocation8 + $0x33c0] sm:$0xff] }
 0x36d   :  { %3975 = vmatpush1.msra.mxu0 %v1692_v63  ;;  %4030 = vmatpush1.msra.mxu1 %v2332_v2  ;;  %v2061_v1 = vld [vmem:[#allocation8 + $0x2f48] sm:$0xff]  ;;  %v2060_v2 = vld [vmem:[#allocation8 + $0x2f40] sm:$0xff] }
 0x36e   :  { %4093 = vmatprep.mubr.f32.mxu1 %v6644_v21  ;;  %3976 = vmatprep.subr.mxu0 %v1677_v57  ;;  %v2189_v63 = vld [vmem:[#allocation8 + $0x3348] sm:$0xff]  ;;  %v2188_v57 = vld [vmem:[#allocation8 + $0x3340] sm:$0xff] }
 0x36f   :  { %4031 = vmatprep.subr.mxu1 %v2317_v3  ;;  %3977 = vmatpush1.msra.mxu0 %v1676_v11  ;;  %v2045_v3 = vld [vmem:[#allocation8 + $0x2ec8] sm:$0xff] }
 0x370   :  { %4032 = vmatpush1.msra.mxu1 %v2316_v55  ;;  %3978 = vmatprep.subr.mxu0 %v1661_v0  ;;  %v2173_v11 = vld [vmem:[#allocation8 + $0x32c8] sm:$0xff]  ;;  %v2044_v55 = vld [vmem:[#allocation8 + $0x2ec0] sm:$0xff] }
 0x371   :  { %4033 = vmatprep.subr.mxu1 %v2301_v4  ;;  %3979 = vmatpush1.msra.mxu0 %v1660_v10  ;;  %v2172_v0 = vld [vmem:[#allocation8 + $0x32c0] sm:$0xff]  ;;  %v2029_v4 = vld [vmem:[#allocation8 + $0x2e48] sm:$0xff] }
 0x372   :  { %4034 = vmatpush1.msra.mxu1 %v2300_v41  ;;  %3980 = vmatprep.subr.mxu0 %v1645_v12  ;;  %v2157_v10 = vld [vmem:[#allocation8 + $0x3248] sm:$0xff]  ;;  %v2028_v41 = vld [vmem:[#allocation8 + $0x2e40] sm:$0xff] }
 0x373   :  { %4035 = vmatprep.subr.mxu1 %v2285_v13  ;;  %3981 = vmatpush1.msra.mxu0 %v1644_v14  ;;  %v2156_v12 = vld [vmem:[#allocation8 + $0x3240] sm:$0xff]  ;;  %v2013_v13 = vld [vmem:[#allocation8 + $0x2dc8] sm:$0xff] }
 0x374   :  { %4036 = vmatpush1.msra.mxu1 %v2284_v17  ;;  %3982 = vmatprep.subr.mxu0 %v1629_v18  ;;  %v2141_v14 = vld [vmem:[#allocation8 + $0x31c8] sm:$0xff]  ;;  %v2012_v17 = vld [vmem:[#allocation8 + $0x2dc0] sm:$0xff] }
 0x375   :  { %4037 = vmatprep.subr.mxu1 %v2269_v19  ;;  %3983 = vmatpush1.msra.mxu0 %v1628_v7  ;;  %v2140_v18 = vld [vmem:[#allocation8 + $0x31c0] sm:$0xff]  ;;  %v1997_v19 = vld [vmem:[#allocation8 + $0x2d48] sm:$0xff] }
 0x376   :  { %4038 = vmatpush1.msra.mxu1 %v2268_v23  ;;  %3984 = vmatprep.subr.mxu0 %v1613_v25  ;;  %v2125_v7 = vld [vmem:[#allocation8 + $0x3148] sm:$0xff]  ;;  %v1996_v23 = vld [vmem:[#allocation8 + $0x2d40] sm:$0xff] }
 0x377   :  { %4039 = vmatprep.subr.mxu1 %v2253_v28  ;;  %3985 = vmatpush1.msra.mxu0 %v1612_v32  ;;  %v2124_v25 = vld [vmem:[#allocation8 + $0x3140] sm:$0xff]  ;;  %v1981_v28 = vld [vmem:[#allocation8 + $0x2cc8] sm:$0xff] }
 0x378   :  { %4040 = vmatpush1.msra.mxu1 %v2252_v22  ;;  %3986 = vmatprep.subr.mxu0 %v1597_v34  ;;  %v2109_v32 = vld [vmem:[#allocation8 + $0x30c8] sm:$0xff]  ;;  %v1980_v22 = vld [vmem:[#allocation8 + $0x2cc0] sm:$0xff] }
 0x379   :  { %4041 = vmatprep.subr.mxu1 %v2237_v37  ;;  %3987 = vmatpush1.msra.mxu0 %v1596_v30  ;;  %v2108_v34 = vld [vmem:[#allocation8 + $0x30c0] sm:$0xff]  ;;  %v1965_v37 = vld [vmem:[#allocation8 + $0x2c48] sm:$0xff] }
 0x37a   :  { %4042 = vmatpush1.msra.mxu1 %v2236_v43  ;;  %3988 = vmatprep.subr.mxu0 %v1581_v45  ;;  %v2093_v30 = vld [vmem:[#allocation8 + $0x3048] sm:$0xff]  ;;  %v1964_v43 = vld [vmem:[#allocation8 + $0x2c40] sm:$0xff] }
 0x37b   :  { %4043 = vmatprep.subr.mxu1 %v2221_v49  ;;  %3989 = vmatpush1.msra.mxu0 %v1580_v50  ;;  %v2092_v45 = vld [vmem:[#allocation8 + $0x3040] sm:$0xff]  ;;  %v1949_v49 = vld [vmem:[#allocation8 + $0x2bc8] sm:$0xff] }
 0x37c   :  { %4044 = vmatpush1.msra.mxu1 %v2220_v52  ;;  %3990 = vmatprep.subr.mxu0 %v2077_v56  ;;  %v2589_v50 = vld [vmem:[#allocation8 + $0x3fc8] sm:$0xff]  ;;  %v1948_v52 = vld [vmem:[#allocation8 + $0x2bc0] sm:$0xff] }
 0x37d   :  { %4045 = vmatprep.subr.mxu1 %v2205_v59  ;;  %3991 = vmatpush2.msra.mxu0 %v2076_v60  ;;  %v2588_v56 = vld [vmem:[#allocation8 + $0x3fc0] sm:$0xff]  ;;  %v1933_v59 = vld [vmem:[#allocation8 + $0x2b48] sm:$0xff] }
 0x37e   :  { %4046 = vmatpush1.msra.mxu1 %v2204_v62  ;;  %3992 = vmatprep.subr.mxu0 %v2061_v1  ;;  %v2573_v60 = vld [vmem:[#allocation8 + $0x3f48] sm:$0xff]  ;;  %v1932_v62 = vld [vmem:[#allocation8 + $0x2b40] sm:$0xff] }
 0x37f   :  { %4047 = vmatprep.subr.mxu1 %v2189_v63  ;;  %3993 = vmatpush2.msra.mxu0 %v2060_v2  ;;  %v2572_v1 = vld [vmem:[#allocation8 + $0x3f40] sm:$0xff]  ;;  %v1917_v63 = vld [vmem:[#allocation8 + $0x2ac8] sm:$0xff] }
 0x380   :  { %4048 = vmatpush1.msra.mxu1 %v2188_v57  ;;  %3994 = vmatprep.subr.mxu0 %v2045_v3  ;;  %v2557_v2 = vld [vmem:[#allocation8 + $0x3ec8] sm:$0xff]  ;;  %v1916_v57 = vld [vmem:[#allocation8 + $0x2ac0] sm:$0xff] }
 0x381   :  { %4049 = vmatprep.subr.mxu1 %v2173_v11  ;;  %3995 = vmatpush2.msra.mxu0 %v2044_v55  ;;  %v2556_v3 = vld [vmem:[#allocation8 + $0x3ec0] sm:$0xff]  ;;  %v1901_v11 = vld [vmem:[#allocation8 + $0x2a48] sm:$0xff] }
 0x382   :  { %4050 = vmatpush1.msra.mxu1 %v2172_v0  ;;  %3996 = vmatprep.subr.mxu0 %v2029_v4  ;;  %v2541_v55 = vld [vmem:[#allocation8 + $0x3e48] sm:$0xff]  ;;  %v1900_v0 = vld [vmem:[#allocation8 + $0x2a40] sm:$0xff] }
 0x383   :  { %4051 = vmatprep.subr.mxu1 %v2157_v10  ;;  %3997 = vmatpush2.msra.mxu0 %v2028_v41  ;;  %v2540_v4 = vld [vmem:[#allocation8 + $0x3e40] sm:$0xff]  ;;  %v1885_v10 = vld [vmem:[#allocation8 + $0x29c8] sm:$0xff] }
 0x384   :  { %4052 = vmatpush1.msra.mxu1 %v2156_v12  ;;  %3998 = vmatprep.subr.mxu0 %v2013_v13  ;;  %v2525_v41 = vld [vmem:[#allocation8 + $0x3dc8] sm:$0xff]  ;;  %v1884_v12 = vld [vmem:[#allocation8 + $0x29c0] sm:$0xff] }
 0x385   :  { %4053 = vmatprep.subr.mxu1 %v2141_v14  ;;  %3999 = vmatpush2.msra.mxu0 %v2012_v17  ;;  %v2524_v13 = vld [vmem:[#allocation8 + $0x3dc0] sm:$0xff]  ;;  %v1869_v14 = vld [vmem:[#allocation8 + $0x2948] sm:$0xff] }
 0x386   :  { %4054 = vmatpush1.msra.mxu1 %v2140_v18  ;;  %4000 = vmatprep.subr.mxu0 %v1997_v19  ;;  %v2509_v17 = vld [vmem:[#allocation8 + $0x3d48] sm:$0xff]  ;;  %v1868_v18 = vld [vmem:[#allocation8 + $0x2940] sm:$0xff] }
 0x387   :  { %4055 = vmatprep.subr.mxu1 %v2125_v7  ;;  %4001 = vmatpush2.msra.mxu0 %v1996_v23  ;;  %v2508_v19 = vld [vmem:[#allocation8 + $0x3d40] sm:$0xff]  ;;  %v1853_v7 = vld [vmem:[#allocation8 + $0x28c8] sm:$0xff] }
 0x388   :  { %4056 = vmatpush1.msra.mxu1 %v2124_v25  ;;  %4002 = vmatprep.subr.mxu0 %v1981_v28  ;;  %v2493_v23 = vld [vmem:[#allocation8 + $0x3cc8] sm:$0xff]  ;;  %v1852_v25 = vld [vmem:[#allocation8 + $0x28c0] sm:$0xff] }
 0x389   :  { %4057 = vmatprep.subr.mxu1 %v2109_v32  ;;  %4003 = vmatpush2.msra.mxu0 %v1980_v22  ;;  %v2492_v28 = vld [vmem:[#allocation8 + $0x3cc0] sm:$0xff]  ;;  %v1837_v32 = vld [vmem:[#allocation8 + $0x2848] sm:$0xff] }
 0x38a   :  { %4058 = vmatpush1.msra.mxu1 %v2108_v34  ;;  %4004 = vmatprep.subr.mxu0 %v1965_v37  ;;  %v2477_v22 = vld [vmem:[#allocation8 + $0x3c48] sm:$0xff]  ;;  %v1836_v34 = vld [vmem:[#allocation8 + $0x2840] sm:$0xff] }
 0x38b   :  { %4059 = vmatprep.subr.mxu1 %v2093_v30  ;;  %4005 = vmatpush2.msra.mxu0 %v1964_v43  ;;  %v2476_v37 = vld [vmem:[#allocation8 + $0x3c40] sm:$0xff]  ;;  %v2461_v30 = vld [vmem:[#allocation8 + $0x3bc8] sm:$0xff]  ;;  %v799_v43 = vld [vmem:[#allocation8 + $0x7d8] sm:$0xff] }
 0x38c   :  { %4060 = vmatpush1.msra.mxu1 %v2092_v45  ;;  %4006 = vmatprep.subr.mxu0 %v1949_v49  ;;  %v2460_v45 = vld [vmem:[#allocation8 + $0x3bc0] sm:$0xff]  ;;  %v798_v49 = vld [vmem:[#allocation8 + $0x7d0] sm:$0xff] }
 0x38d   :  { %4061 = vmatprep.subr.mxu1 %v2589_v50  ;;  %4007 = vmatpush2.msra.mxu0 %v1948_v52  ;;  %v2445_v50 = vld [vmem:[#allocation8 + $0x3b48] sm:$0xff]  ;;  %v783_v52 = vld [vmem:[#allocation8 + $0x758] sm:$0xff] }
 0x38e   :  { %4062 = vmatpush2.msra.mxu1 %v2588_v56  ;;  %4008 = vmatprep.subr.mxu0 %v1933_v59  ;;  %v2444_v56 = vld [vmem:[#allocation8 + $0x3b40] sm:$0xff]  ;;  %v782_v59 = vld [vmem:[#allocation8 + $0x750] sm:$0xff] }
 0x38f   :  { %4063 = vmatprep.subr.mxu1 %v2573_v60  ;;  %4009 = vmatpush2.msra.mxu0 %v1932_v62  ;;  %v2429_v60 = vld [vmem:[#allocation8 + $0x3ac8] sm:$0xff]  ;;  %v767_v62 = vld [vmem:[#allocation8 + $0x6d8] sm:$0xff] }
 0x390   :  { %4064 = vmatpush2.msra.mxu1 %v2572_v1  ;;  %4010 = vmatprep.subr.mxu0 %v1917_v63  ;;  %v2428_v1 = vld [vmem:[#allocation8 + $0x3ac0] sm:$0xff]  ;;  %v766_v63 = vld [vmem:[#allocation8 + $0x6d0] sm:$0xff] }
 0x391   :  { %4065 = vmatprep.subr.mxu1 %v2557_v2  ;;  %4011 = vmatpush2.msra.mxu0 %v1916_v57  ;;  %v2413_v2 = vld [vmem:[#allocation8 + $0x3a48] sm:$0xff]  ;;  %v6728_v57 = vpop.f32.mrf.mxu0 }
 0x392   :  { %4066 = vmatpush2.msra.mxu1 %v2556_v3  ;;  %4012 = vmatprep.subr.mxu0 %v1901_v11  ;;  %v751_v3 = vld [vmem:[#allocation8 + $0x658] sm:$0xff]  ;;  %v2412_v11 = vld [vmem:[#allocation8 + $0x3a40] sm:$0xff] }
 0x393   :  { %4067 = vmatprep.subr.mxu1 %v2541_v55  ;;  %4013 = vmatpush2.msra.mxu0 %v1900_v0  ;;  %v6251_v55 = vld [vmem:[#allocation10] sm:$0xff] }
 0x394   :  { %4068 = vmatpush2.msra.mxu1 %v2540_v4  ;;  %4014 = vmatprep.subr.mxu0 %v1885_v10  ;;  %v2627_v0 = vrot.slane %v6251_v55, %v6638_v58  ;;  %v750_v4 = vld [vmem:[#allocation8 + $0x650] sm:$0xff]  ;;  %v2397_v10 = vld [vmem:[#allocation8 + $0x39c8] sm:$0xff] }
 0x395   :  { %4069 = vmatprep.subr.mxu1 %v2525_v41  ;;  %4015 = vmatpush2.msra.mxu0 %v1884_v12  ;;  %v735_v12 = vld [vmem:[#allocation8 + $0x5d8] sm:$0xff]  ;;  %v638_v55 = vld [vmem:[#allocation8 + $0x2d0] sm:$0xff] }
 0x396   :  { %4070 = vmatpush2.msra.mxu1 %v2524_v13  ;;  %4016 = vmatprep.subr.mxu0 %v1869_v14  ;;  %v3598_v41 = vpop.f32.mrf.mxu0  ;;  %v2396_v13 = vld [vmem:[#allocation8 + $0x39c0] sm:$0xff]  ;;  %v734_v14 = vld [vmem:[#allocation8 + $0x5d0] sm:$0xff] }
 0x397   :  { %4071 = vmatprep.subr.mxu1 %v2509_v17  ;;  %4017 = vmatpush2.msra.mxu0 %v1868_v18  ;;  %v2381_v17 = vld [vmem:[#allocation8 + $0x3948] sm:$0xff]  ;;  %v6731_v18 = vpop.f32.mrf.mxu1 }
 0x398   :  { %4072 = vmatpush2.msra.mxu1 %v2508_v19  ;;  %4018 = vmatprep.subr.mxu0 %v1853_v7  ;;  %v719_v19 = vld [vmem:[#allocation8 + $0x558] sm:$0xff]  ;;  %v2380_v7 = vld [vmem:[#allocation8 + $0x3940] sm:$0xff] }
 0x399   :  { %4073 = vmatprep.subr.mxu1 %v2493_v23  ;;  %4019 = vmatpush2.msra.mxu0 %v1852_v25  ;;  %v3599_v23 = vadd.f32 %v3598_v41, %v2627_v0  ;;  %v718_v25 = vld [vmem:[#allocation8 + $0x550] sm:$0xff] }
 0x39a   :  { %4074 = vmatpush2.msra.mxu1 %v2492_v28  ;;  %4020 = vmatprep.subr.mxu0 %v1837_v32  ;;  %v2365_v28 = vld [vmem:[#allocation8 + $0x38c8] sm:$0xff]  ;;  %v703_v32 = vld [vmem:[#allocation8 + $0x4d8] sm:$0xff]  ;;  %v1278_v0 = vld [vmem:[#allocation8 + $0x16d0] sm:$0xff] }
 0x39b   :  { %4075 = vmatprep.subr.mxu1 %v2477_v22  ;;  %4021 = vmatpush2.msra.mxu0 %v1836_v34  ;;  %v2364_v22 = vld [vmem:[#allocation8 + $0x38c0] sm:$0xff]  ;;  %v622_v41 = vld [vmem:[#allocation8 + $0x250] sm:$0xff] }
 0x39c   :  { %4076 = vmatpush2.msra.mxu1 %v2476_v37  ;;  %4023 = vmatmul.mubr.f32.vlgmr.msra.gmra.mxu0 %v6630_v39  ;;  %v702_v37 = vld [vmem:[#allocation8 + $0x4d0] sm:$0xff] }
 0x39d   :  { %4077 = vmatprep.subr.mxu1 %v2461_v30  ;;  %4100 = vmatprep.subr.mxu0 %v799_v43  ;;  %v2349_v30 = vld [vmem:[#allocation8 + $0x3848] sm:$0xff] }
 0x39e   :  { %4078 = vmatpush2.msra.mxu1 %v2460_v45  ;;  %4101 = vmatpush1.msra.mxu0 %v798_v49  ;;  %v687_v45 = vld [vmem:[#allocation8 + $0x458] sm:$0xff]  ;;  %v2348_v49 = vld [vmem:[#allocation8 + $0x3840] sm:$0xff] }
 0x39f   :  { %4164 = vmatprep.mubr.f32.mxu0 %v6592_v15  ;;  %4079 = vmatprep.subr.mxu1 %v2445_v50  ;;  %v686_v50 = vld [vmem:[#allocation8 + $0x450] sm:$0xff] }
 0x3a0   :  { %4102 = vmatprep.subr.mxu0 %v783_v52  ;;  %4080 = vmatpush2.msra.mxu1 %v2444_v56  ;;  %v671_v52 = vld [vmem:[#allocation8 + $0x3d8] sm:$0xff] }
 0x3a1   :  { %4103 = vmatpush1.msra.mxu0 %v782_v59  ;;  %4081 = vmatprep.subr.mxu1 %v2429_v60  ;;  %v1311_v56 = vld [vmem:[#allocation8 + $0x17d8] sm:$0xff]  ;;  %v670_v59 = vld [vmem:[#allocation8 + $0x3d0] sm:$0xff] }
 0x3a2   :  { %4104 = vmatprep.subr.mxu0 %v767_v62  ;;  %4082 = vmatpush2.msra.mxu1 %v2428_v1  ;;  %v1310_v60 = vld [vmem:[#allocation8 + $0x17d0] sm:$0xff]  ;;  %v655_v62 = vld [vmem:[#allocation8 + $0x358] sm:$0xff] }
 0x3a3   :  { %4105 = vmatpush1.msra.mxu0 %v766_v63  ;;  %4083 = vmatprep.subr.mxu1 %v2413_v2  ;;  %v1295_v1 = vld [vmem:[#allocation8 + $0x1758] sm:$0xff]  ;;  %v654_v63 = vld [vmem:[#allocation8 + $0x350] sm:$0xff] }
 0x3a4   :  { %4106 = vmatprep.subr.mxu0 %v751_v3  ;;  %4084 = vmatpush2.msra.mxu1 %v2412_v11  ;;  %v1294_v2 = vld [vmem:[#allocation8 + $0x1750] sm:$0xff]  ;;  %v639_v3 = vld [vmem:[#allocation8 + $0x2d8] sm:$0xff] }
 0x3a5   :  { %4107 = vmatpush1.msra.mxu0 %v750_v4  ;;  %4085 = vmatprep.subr.mxu1 %v2397_v10  ;;  %v1279_v11 = vld [vmem:[#allocation8 + $0x16d8] sm:$0xff] }
 0x3a6   :  { %4108 = vmatprep.subr.mxu0 %v735_v12  ;;  %4086 = vmatpush2.msra.mxu1 %v2396_v13  ;;  %v623_v4 = vld [vmem:[#allocation8 + $0x258] sm:$0xff]  ;;  %v1262_v12 = vld [vmem:[#allocation8 + $0x1650] sm:$0xff] }
 0x3a7   :  { %4109 = vmatpush1.msra.mxu0 %v734_v14  ;;  %4087 = vmatprep.subr.mxu1 %v2381_v17  ;;  %v3669_v34 = vpop.f32.mrf.mxu1  ;;  %v1263_v10 = vld [vmem:[#allocation8 + $0x1658] sm:$0xff]  ;;  %v606_v17 = vld [vmem:[#allocation8 + $0x1d0] sm:$0xff] }
 0x3a8   :  { %4110 = vmatprep.subr.mxu0 %v719_v19  ;;  %4088 = vmatpush2.msra.mxu1 %v2380_v7  ;;  %v6733_v43 = vadd.f32 %v3669_v34, %v3599_v23  ;;  %v607_v13 = vld [vmem:[#allocation8 + $0x1d8] sm:$0xff]  ;;  %v1246_v19 = vld [vmem:[#allocation8 + $0x15d0] sm:$0xff] }
 0x3a9   :  { %4111 = vmatpush1.msra.mxu0 %v718_v25  ;;  %4089 = vmatprep.subr.mxu1 %v2365_v28  ;;  %v1247_v14 = vld [vmem:[#allocation8 + $0x15d8] sm:$0xff]  ;;  %v590_v25 = vld [vmem:[#allocation8 + $0x150] sm:$0xff] }
 0x3aa   :  { %4112 = vmatprep.subr.mxu0 %v703_v32  ;;  %4090 = vmatpush2.msra.mxu1 %v2364_v22  ;;  %v591_v7 = vld [vmem:[#allocation8 + $0x158] sm:$0xff]  ;;  %v1230_v28 = vld [vmem:[#allocation8 + $0x1550] sm:$0xff] }
 0x3ab   :  { %4113 = vmatpush1.msra.mxu0 %v702_v37  ;;  %4091 = vmatprep.subr.mxu1 %v2349_v30  ;;  %v1231_v23 = vld [vmem:[#allocation8 + $0x1558] sm:$0xff]  ;;  %v574_v34 = vld [vmem:[#allocation8 + $0xd0] sm:$0xff] }
 0x3ac   :  { %4114 = vmatprep.subr.mxu0 %v687_v45  ;;  %4092 = vmatpush2.msra.mxu1 %v2348_v49  ;;  %v575_v32 = vld [vmem:[#allocation8 + $0xd8] sm:$0xff]  ;;  %v1214_v37 = vld [vmem:[#allocation8 + $0x14d0] sm:$0xff] }
 0x3ad   :  { %4115 = vmatpush1.msra.mxu0 %v686_v50  ;;  %4094 = vmatmul.mubr.f32.vlgmr.msra.gmra.mxu1 %v6646_v31  ;;  %v1215_v22 = vld [vmem:[#allocation8 + $0x14d8] sm:$0xff]  ;;  %v558_v49 = vld [vmem:[#allocation8 + $0x50] sm:$0xff] }
 0x3ae   :  { %4116 = vmatprep.subr.mxu0 %v671_v52  ;;  %4171 = vmatprep.subr.mxu1 %v1311_v56  ;;  %v559_v30 = vld [vmem:[#allocation8 + $0x58] sm:$0xff]  ;;  %v1198_v50 = vld [vmem:[#allocation8 + $0x1450] sm:$0xff] }
 0x3af   :  { %4117 = vmatpush1.msra.mxu0 %v670_v59  ;;  %4172 = vmatpush1.msra.mxu1 %v1310_v60  ;;  %v1199_v45 = vld [vmem:[#allocation8 + $0x1458] sm:$0xff]  ;;  %v1054_v59 = vld [vmem:[#allocation8 + $0xfd0] sm:$0xff] }
 0x3b0   :  { %4235 = vmatprep.mubr.f32.mxu1 %v6618_v46  ;;  %4118 = vmatprep.subr.mxu0 %v655_v62  ;;  %v1055_v52 = vld [vmem:[#allocation8 + $0xfd8] sm:$0xff]  ;;  %v1182_v60 = vld [vmem:[#allocation8 + $0x13d0] sm:$0xff] }
 0x3b1   :  { %4173 = vmatprep.subr.mxu1 %v1295_v1  ;;  %4119 = vmatpush1.msra.mxu0 %v654_v63  ;;  %v1183_v56 = vld [vmem:[#allocation8 + $0x13d8] sm:$0xff]  ;;  %v1038_v63 = vld [vmem:[#allocation8 + $0xf50] sm:$0xff] }
 0x3b2   :  { %4174 = vmatpush1.msra.mxu1 %v1294_v2  ;;  %4120 = vmatprep.subr.mxu0 %v639_v3  ;;  %v1039_v62 = vld [vmem:[#allocation8 + $0xf58] sm:$0xff]  ;;  %v1166_v2 = vld [vmem:[#allocation8 + $0x1350] sm:$0xff] }
 0x3b3   :  { %4175 = vmatprep.subr.mxu1 %v1279_v11  ;;  %4121 = vmatpush1.msra.mxu0 %v638_v55  ;;  %v1167_v1 = vld [vmem:[#allocation8 + $0x1358] sm:$0xff]  ;;  %v1022_v55 = vld [vmem:[#allocation8 + $0xed0] sm:$0xff] }
 0x3b4   :  { %4176 = vmatpush1.msra.mxu1 %v1278_v0  ;;  %4122 = vmatprep.subr.mxu0 %v623_v4  ;;  %v1023_v3 = vld [vmem:[#allocation8 + $0xed8] sm:$0xff]  ;;  %v1150_v0 = vld [vmem:[#allocation8 + $0x12d0] sm:$0xff] }
 0x3b5   :  { %4177 = vmatprep.subr.mxu1 %v1263_v10  ;;  %4123 = vmatpush1.msra.mxu0 %v622_v41  ;;  %v1151_v11 = vld [vmem:[#allocation8 + $0x12d8] sm:$0xff]  ;;  %v1006_v41 = vld [vmem:[#allocation8 + $0xe50] sm:$0xff] }
 0x3b6   :  { %4178 = vmatpush1.msra.mxu1 %v1262_v12  ;;  %4124 = vmatprep.subr.mxu0 %v607_v13  ;;  %v1007_v4 = vld [vmem:[#allocation8 + $0xe58] sm:$0xff]  ;;  %v1134_v12 = vld [vmem:[#allocation8 + $0x1250] sm:$0xff] }
 0x3b7   :  { %4179 = vmatprep.subr.mxu1 %v1247_v14  ;;  %4125 = vmatpush1.msra.mxu0 %v606_v17  ;;  %v1135_v10 = vld [vmem:[#allocation8 + $0x1258] sm:$0xff]  ;;  %v990_v17 = vld [vmem:[#allocation8 + $0xdd0] sm:$0xff] }
 0x3b8   :  { %4180 = vmatpush1.msra.mxu1 %v1246_v19  ;;  %4126 = vmatprep.subr.mxu0 %v591_v7  ;;  %v991_v13 = vld [vmem:[#allocation8 + $0xdd8] sm:$0xff]  ;;  %v1118_v19 = vld [vmem:[#allocation8 + $0x11d0] sm:$0xff] }
 0x3b9   :  { %4181 = vmatprep.subr.mxu1 %v1231_v23  ;;  %4127 = vmatpush1.msra.mxu0 %v590_v25  ;;  %v1119_v14 = vld [vmem:[#allocation8 + $0x11d8] sm:$0xff]  ;;  %v974_v25 = vld [vmem:[#allocation8 + $0xd50] sm:$0xff] }
 0x3ba   :  { %4182 = vmatpush1.msra.mxu1 %v1230_v28  ;;  %4128 = vmatprep.subr.mxu0 %v575_v32  ;;  %v975_v7 = vld [vmem:[#allocation8 + $0xd58] sm:$0xff]  ;;  %v1102_v28 = vld [vmem:[#allocation8 + $0x1150] sm:$0xff] }
 0x3bb   :  { %4183 = vmatprep.subr.mxu1 %v1215_v22  ;;  %4129 = vmatpush1.msra.mxu0 %v574_v34  ;;  %v1103_v23 = vld [vmem:[#allocation8 + $0x1158] sm:$0xff]  ;;  %v958_v34 = vld [vmem:[#allocation8 + $0xcd0] sm:$0xff] }
 0x3bc   :  { %4184 = vmatpush1.msra.mxu1 %v1214_v37  ;;  %4130 = vmatprep.subr.mxu0 %v559_v30  ;;  %v959_v32 = vld [vmem:[#allocation8 + $0xcd8] sm:$0xff]  ;;  %v1086_v37 = vld [vmem:[#allocation8 + $0x10d0] sm:$0xff] }
 0x3bd   :  { %4185 = vmatprep.subr.mxu1 %v1199_v45  ;;  %4131 = vmatpush1.msra.mxu0 %v558_v49  ;;  %v1087_v22 = vld [vmem:[#allocation8 + $0x10d8] sm:$0xff]  ;;  %v942_v49 = vld [vmem:[#allocation8 + $0xc50] sm:$0xff] }
 0x3be   :  { %4186 = vmatpush1.msra.mxu1 %v1198_v50  ;;  %4132 = vmatprep.subr.mxu0 %v1055_v52  ;;  %v943_v30 = vld [vmem:[#allocation8 + $0xc58] sm:$0xff]  ;;  %v1070_v50 = vld [vmem:[#allocation8 + $0x1050] sm:$0xff] }
 0x3bf   :  { %4187 = vmatprep.subr.mxu1 %v1183_v56  ;;  %4133 = vmatpush2.msra.mxu0 %v1054_v59  ;;  %v1071_v45 = vld [vmem:[#allocation8 + $0x1058] sm:$0xff]  ;;  %v926_v59 = vld [vmem:[#allocation8 + $0xbd0] sm:$0xff] }
 0x3c0   :  { %4188 = vmatpush1.msra.mxu1 %v1182_v60  ;;  %4134 = vmatprep.subr.mxu0 %v1039_v62  ;;  %v927_v52 = vld [vmem:[#allocation8 + $0xbd8] sm:$0xff]  ;;  %v1566_v60 = vld [vmem:[#allocation8 + $0x1fd0] sm:$0xff] }
 0x3c1   :  { %4189 = vmatprep.subr.mxu1 %v1167_v1  ;;  %4135 = vmatpush2.msra.mxu0 %v1038_v63  ;;  %v1567_v56 = vld [vmem:[#allocation8 + $0x1fd8] sm:$0xff]  ;;  %v910_v63 = vld [vmem:[#allocation8 + $0xb50] sm:$0xff] }
 0x3c2   :  { %4190 = vmatpush1.msra.mxu1 %v1166_v2  ;;  %4136 = vmatprep.subr.mxu0 %v1023_v3  ;;  %v911_v62 = vld [vmem:[#allocation8 + $0xb58] sm:$0xff]  ;;  %v1550_v2 = vld [vmem:[#allocation8 + $0x1f50] sm:$0xff] }
 0x3c3   :  { %4191 = vmatprep.subr.mxu1 %v1151_v11  ;;  %4137 = vmatpush2.msra.mxu0 %v1022_v55  ;;  %v1551_v1 = vld [vmem:[#allocation8 + $0x1f58] sm:$0xff]  ;;  %v894_v55 = vld [vmem:[#allocation8 + $0xad0] sm:$0xff] }
 0x3c4   :  { %4192 = vmatpush1.msra.mxu1 %v1150_v0  ;;  %4138 = vmatprep.subr.mxu0 %v1007_v4  ;;  %v895_v3 = vld [vmem:[#allocation8 + $0xad8] sm:$0xff]  ;;  %v1534_v0 = vld [vmem:[#allocation8 + $0x1ed0] sm:$0xff] }
 0x3c5   :  { %4193 = vmatprep.subr.mxu1 %v1135_v10  ;;  %4139 = vmatpush2.msra.mxu0 %v1006_v41  ;;  %v1535_v11 = vld [vmem:[#allocation8 + $0x1ed8] sm:$0xff]  ;;  %v878_v41 = vld [vmem:[#allocation8 + $0xa50] sm:$0xff] }
 0x3c6   :  { %4194 = vmatpush1.msra.mxu1 %v1134_v12  ;;  %4140 = vmatprep.subr.mxu0 %v991_v13  ;;  %v879_v4 = vld [vmem:[#allocation8 + $0xa58] sm:$0xff]  ;;  %v1518_v12 = vld [vmem:[#allocation8 + $0x1e50] sm:$0xff] }
 0x3c7   :  { %4195 = vmatprep.subr.mxu1 %v1119_v14  ;;  %4141 = vmatpush2.msra.mxu0 %v990_v17  ;;  %v1519_v10 = vld [vmem:[#allocation8 + $0x1e58] sm:$0xff]  ;;  %v862_v17 = vld [vmem:[#allocation8 + $0x9d0] sm:$0xff] }
 0x3c8   :  { %4196 = vmatpush1.msra.mxu1 %v1118_v19  ;;  %4142 = vmatprep.subr.mxu0 %v975_v7  ;;  %v863_v13 = vld [vmem:[#allocation8 + $0x9d8] sm:$0xff]  ;;  %v1502_v19 = vld [vmem:[#allocation8 + $0x1dd0] sm:$0xff] }
 0x3c9   :  { %4197 = vmatprep.subr.mxu1 %v1103_v23  ;;  %4143 = vmatpush2.msra.mxu0 %v974_v25  ;;  %v1503_v14 = vld [vmem:[#allocation8 + $0x1dd8] sm:$0xff]  ;;  %v6737_v23 = vpop.f32.mrf.mxu0 }
 0x3ca   :  { %4198 = vmatpush1.msra.mxu1 %v1102_v28  ;;  %4144 = vmatprep.subr.mxu0 %v959_v32  ;;  %v847_v7 = vld [vmem:[#allocation8 + $0x958] sm:$0xff]  ;;  %v846_v28 = vld [vmem:[#allocation8 + $0x950] sm:$0xff] }
 0x3cb   :  { %4199 = vmatprep.subr.mxu1 %v1087_v22  ;;  %4145 = vmatpush2.msra.mxu0 %v958_v34  ;;  %v1487_v25 = vld [vmem:[#allocation8 + $0x1d58] sm:$0xff]  ;;  %v1486_v32 = vld [vmem:[#allocation8 + $0x1d50] sm:$0xff] }
 0x3cc   :  { %4200 = vmatpush1.msra.mxu1 %v1086_v37  ;;  %4146 = vmatprep.subr.mxu0 %v943_v30  ;;  %v831_v22 = vld [vmem:[#allocation8 + $0x8d8] sm:$0xff]  ;;  %v830_v37 = vld [vmem:[#allocation8 + $0x8d0] sm:$0xff] }
 0x3cd   :  { %4201 = vmatprep.subr.mxu1 %v1071_v45  ;;  %4147 = vmatpush2.msra.mxu0 %v942_v49  ;;  %v1471_v34 = vld [vmem:[#allocation8 + $0x1cd8] sm:$0xff]  ;;  %v1470_v45 = vld [vmem:[#allocation8 + $0x1cd0] sm:$0xff] }
 0x3ce   :  { %4202 = vmatpush1.msra.mxu1 %v1070_v50  ;;  %4148 = vmatprep.subr.mxu0 %v927_v52  ;;  %v815_v49 = vld [vmem:[#allocation8 + $0x858] sm:$0xff] }
 0x3cf   :  { %4203 = vmatprep.subr.mxu1 %v1567_v56  ;;  %4149 = vmatpush2.msra.mxu0 %v926_v59  ;;  %v1455_v52 = vld [vmem:[#allocation8 + $0x1c58] sm:$0xff]  ;;  %v814_v56 = vld [vmem:[#allocation8 + $0x850] sm:$0xff] }
 0x3d0   :  { %4204 = vmatpush2.msra.mxu1 %v1566_v60  ;;  %4150 = vmatprep.subr.mxu0 %v911_v62  ;;  %v1454_v59 = vld [vmem:[#allocation8 + $0x1c50] sm:$0xff]  ;;  %v1439_v60 = vld [vmem:[#allocation8 + $0x1bd8] sm:$0xff] }
 0x3d1   :  { %4205 = vmatprep.subr.mxu1 %v1551_v1  ;;  %4151 = vmatpush2.msra.mxu0 %v910_v63  ;;  %v1823_v62 = vld [vmem:[#allocation8 + $0x27d8] sm:$0xff]  ;;  %v1438_v1 = vld [vmem:[#allocation8 + $0x1bd0] sm:$0xff] }
 0x3d2   :  { %4206 = vmatpush2.msra.mxu1 %v1550_v2  ;;  %4152 = vmatprep.subr.mxu0 %v895_v3  ;;  %v1822_v63 = vld [vmem:[#allocation8 + $0x27d0] sm:$0xff]  ;;  %v1807_v2 = vld [vmem:[#allocation8 + $0x2758] sm:$0xff] }
 0x3d3   :  { %4207 = vmatprep.subr.mxu1 %v1535_v11  ;;  %4153 = vmatpush2.msra.mxu0 %v894_v55  ;;  %v1422_v3 = vld [vmem:[#allocation8 + $0x1b50] sm:$0xff]  ;;  %v1407_v55 = vld [vmem:[#allocation8 + $0x1ad8] sm:$0xff] }
 0x3d4   :  { %4208 = vmatpush2.msra.mxu1 %v1534_v0  ;;  %4154 = vmatprep.subr.mxu0 %v879_v4  ;;  %v1806_v11 = vld [vmem:[#allocation8 + $0x2750] sm:$0xff]  ;;  %v1791_v0 = vld [vmem:[#allocation8 + $0x26d8] sm:$0xff] }
 0x3d5   :  { %4209 = vmatprep.subr.mxu1 %v1519_v10  ;;  %4155 = vmatpush2.msra.mxu0 %v878_v41  ;;  %v1406_v4 = vld [vmem:[#allocation8 + $0x1ad0] sm:$0xff]  ;;  %v1391_v41 = vld [vmem:[#allocation8 + $0x1a58] sm:$0xff] }
 0x3d6   :  { %4210 = vmatpush2.msra.mxu1 %v1518_v12  ;;  %4156 = vmatprep.subr.mxu0 %v863_v13  ;;  %v1790_v10 = vld [vmem:[#allocation8 + $0x26d0] sm:$0xff]  ;;  %v1775_v12 = vld [vmem:[#allocation8 + $0x2658] sm:$0xff] }
 0x3d7   :  { %4211 = vmatprep.subr.mxu1 %v1503_v14  ;;  %4157 = vmatpush2.msra.mxu0 %v862_v17  ;;  %v1390_v13 = vld [vmem:[#allocation8 + $0x1a50] sm:$0xff]  ;;  %v1375_v17 = vld [vmem:[#allocation8 + $0x19d8] sm:$0xff] }
 0x3d8   :  { %4212 = vmatpush2.msra.mxu1 %v1502_v19  ;;  %4158 = vmatprep.subr.mxu0 %v847_v7  ;;  %v3740_v30 = vpop.f32.mrf.mxu0  ;;  %v1774_v14 = vld [vmem:[#allocation8 + $0x2650] sm:$0xff]  ;;  %v1759_v19 = vld [vmem:[#allocation8 + $0x25d8] sm:$0xff] }
 0x3d9   :  { %4213 = vmatprep.subr.mxu1 %v1487_v25  ;;  %4159 = vmatpush2.msra.mxu0 %v846_v28  ;;  %v6740_v50 = vadd.f32 %v3740_v30, %v6733_v43  ;;  %v1423_v43 = vld [vmem:[#allocation8 + $0x1b58] sm:$0xff]  ;;  %v1374_v7 = vld [vmem:[#allocation8 + $0x19d0] sm:$0xff] }
 0x3da   :  { %4214 = vmatpush2.msra.mxu1 %v1486_v32  ;;  %4160 = vmatprep.subr.mxu0 %v831_v22  ;;  %v1758_v25 = vld [vmem:[#allocation8 + $0x25d0] sm:$0xff]  ;;  %v1359_v28 = vld [vmem:[#allocation8 + $0x1958] sm:$0xff]  ;;  %v6744_v32 = vpop.f32.mrf.mxu1 }
 0x3db   :  { %4215 = vmatprep.subr.mxu1 %v1471_v34  ;;  %4161 = vmatpush2.msra.mxu0 %v830_v37  ;;  %v1743_v22 = vld [vmem:[#allocation8 + $0x2558] sm:$0xff]  ;;  %v1358_v34 = vld [vmem:[#allocation8 + $0x1950] sm:$0xff] }
 0x3dc   :  { %4216 = vmatpush2.msra.mxu1 %v1470_v45  ;;  %4162 = vmatprep.subr.mxu0 %v815_v49  ;;  %v1742_v37 = vld [vmem:[#allocation8 + $0x2550] sm:$0xff]  ;;  %v1343_v30 = vld [vmem:[#allocation8 + $0x18d8] sm:$0xff] }
 0x3dd   :  { %4217 = vmatprep.subr.mxu1 %v1455_v52  ;;  %4163 = vmatpush2.msra.mxu0 %v814_v56  ;;  %v1727_v45 = vld [vmem:[#allocation8 + $0x24d8] sm:$0xff]  ;;  %v1342_v49 = vld [vmem:[#allocation8 + $0x18d0] sm:$0xff] }
 0x3de   :  { %4218 = vmatpush2.msra.mxu1 %v1454_v59  ;;  %4165 = vmatmul.mubr.f32.vlgmr.msra.gmra.mxu0 %v6594_v16  ;;  %v1726_v56 = vld [vmem:[#allocation8 + $0x24d0] sm:$0xff]  ;;  %v1327_v59 = vld [vmem:[#allocation8 + $0x1858] sm:$0xff] }
 0x3df   :  { %4219 = vmatprep.subr.mxu1 %v1439_v60  ;;  %4242 = vmatprep.subr.mxu0 %v1823_v62  ;;  %v1711_v62 = vld [vmem:[#allocation8 + $0x2458] sm:$0xff] }
 0x3e0   :  { %4220 = vmatpush2.msra.mxu1 %v1438_v1  ;;  %4243 = vmatpush1.msra.mxu0 %v1822_v63  ;;  %v1326_v1 = vld [vmem:[#allocation8 + $0x1850] sm:$0xff] }
 0x3e1   :  { %4306 = vmatprep.mubr.f32.mxu0 %v6615_v42  ;;  %4221 = vmatprep.subr.mxu1 %v1423_v43  ;;  %v1710_v63 = vld [vmem:[#allocation8 + $0x2450] sm:$0xff]  ;;  %v1695_v43 = vld [vmem:[#allocation8 + $0x23d8] sm:$0xff] }
 0x3e2   :  { %4244 = vmatprep.subr.mxu0 %v1807_v2  ;;  %4222 = vmatpush2.msra.mxu1 %v1422_v3  ;;  %v2335_v2 = vld [vmem:[#allocation8 + $0x37d8] sm:$0xff]  ;;  %v1694_v3 = vld [vmem:[#allocation8 + $0x23d0] sm:$0xff] }
 0x3e3   :  { %4245 = vmatpush1.msra.mxu0 %v1806_v11  ;;  %4223 = vmatprep.subr.mxu1 %v1407_v55  ;;  %v2334_v11 = vld [vmem:[#allocation8 + $0x37d0] sm:$0xff]  ;;  %v2319_v55 = vld [vmem:[#allocation8 + $0x3758] sm:$0xff] }
 0x3e4   :  { %4246 = vmatprep.subr.mxu0 %v1791_v0  ;;  %4224 = vmatpush2.msra.mxu1 %v1406_v4  ;;  %v1678_v0 = vld [vmem:[#allocation8 + $0x2350] sm:$0xff] }
 0x3e5   :  { %4247 = vmatpush1.msra.mxu0 %v1790_v10  ;;  %4225 = vmatprep.subr.mxu1 %v1391_v41  ;;  %v2318_v4 = vld [vmem:[#allocation8 + $0x3750] sm:$0xff]  ;;  %v1663_v10 = vld [vmem:[#allocation8 + $0x22d8] sm:$0xff] }
 0x3e6   :  { %4248 = vmatprep.subr.mxu0 %v1775_v12  ;;  %4226 = vmatpush2.msra.mxu1 %v1390_v13  ;;  %v2303_v41 = vld [vmem:[#allocation8 + $0x36d8] sm:$0xff]  ;;  %v1662_v12 = vld [vmem:[#allocation8 + $0x22d0] sm:$0xff] }
 0x3e7   :  { %4249 = vmatpush1.msra.mxu0 %v1774_v14  ;;  %4227 = vmatprep.subr.mxu1 %v1375_v17  ;;  %v2302_v13 = vld [vmem:[#allocation8 + $0x36d0] sm:$0xff]  ;;  %v1647_v14 = vld [vmem:[#allocation8 + $0x2258] sm:$0xff] }
 0x3e8   :  { %4250 = vmatprep.subr.mxu0 %v1759_v19  ;;  %4228 = vmatpush2.msra.mxu1 %v1374_v7  ;;  %v2287_v17 = vld [vmem:[#allocation8 + $0x3658] sm:$0xff]  ;;  %v1646_v19 = vld [vmem:[#allocation8 + $0x2250] sm:$0xff] }
 0x3e9   :  { %4251 = vmatpush1.msra.mxu0 %v1758_v25  ;;  %4229 = vmatprep.subr.mxu1 %v1359_v28  ;;  %v3811_v52 = vpop.f32.mrf.mxu1  ;;  %v2286_v7 = vld [vmem:[#allocation8 + $0x3650] sm:$0xff]  ;;  %v1631_v25 = vld [vmem:[#allocation8 + $0x21d8] sm:$0xff] }
 0x3ea   :  { %4252 = vmatprep.subr.mxu0 %v1743_v22  ;;  %4230 = vmatpush2.msra.mxu1 %v1358_v34  ;;  %v6747_v60 = vadd.f32 %v3811_v52, %v6740_v50  ;;  %v1679_v50 = vld [vmem:[#allocation8 + $0x2358] sm:$0xff]  ;;  %v1630_v22 = vld [vmem:[#allocation8 + $0x21d0] sm:$0xff] }
 0x3eb   :  { %4253 = vmatpush1.msra.mxu0 %v1742_v37  ;;  %4231 = vmatprep.subr.mxu1 %v1343_v30  ;;  %v2271_v28 = vld [vmem:[#allocation8 + $0x35d8] sm:$0xff]  ;;  %v2270_v34 = vld [vmem:[#allocation8 + $0x35d0] sm:$0xff] }
 0x3ec   :  { %4254 = vmatprep.subr.mxu0 %v1727_v45  ;;  %4232 = vmatpush2.msra.mxu1 %v1342_v49  ;;  %v1615_v37 = vld [vmem:[#allocation8 + $0x2158] sm:$0xff]  ;;  %v1614_v45 = vld [vmem:[#allocation8 + $0x2150] sm:$0xff] }
 0x3ed   :  { %4255 = vmatpush1.msra.mxu0 %v1726_v56  ;;  %4233 = vmatprep.subr.mxu1 %v1327_v59  ;;  %v2255_v30 = vld [vmem:[#allocation8 + $0x3558] sm:$0xff]  ;;  %v2254_v49 = vld [vmem:[#allocation8 + $0x3550] sm:$0xff] }
 0x3ee   :  { %4256 = vmatprep.subr.mxu0 %v1711_v62  ;;  %4234 = vmatpush2.msra.mxu1 %v1326_v1  ;;  %v1599_v52 = vld [vmem:[#allocation8 + $0x20d8] sm:$0xff]  ;;  %v1598_v59 = vld [vmem:[#allocation8 + $0x20d0] sm:$0xff] }
 0x3ef   :  { %4257 = vmatpush1.msra.mxu0 %v1710_v63  ;;  %4236 = vmatmul.mubr.f32.vlgmr.msra.gmra.mxu1 %v6620_v48  ;;  %v2239_v56 = vld [vmem:[#allocation8 + $0x34d8] sm:$0xff]  ;;  %v2238_v62 = vld [vmem:[#allocation8 + $0x34d0] sm:$0xff] }
 0x3f0   :  { %4258 = vmatprep.subr.mxu0 %v1695_v43  ;;  %4313 = vmatprep.subr.mxu1 %v2335_v2  ;;  %v1583_v1 = vld [vmem:[#allocation8 + $0x2058] sm:$0xff]  ;;  %v1582_v43 = vld [vmem:[#allocation8 + $0x2050] sm:$0xff] }
 0x3f1   :  { %4259 = vmatpush1.msra.mxu0 %v1694_v3  ;;  %4314 = vmatpush1.msra.mxu1 %v2334_v11  ;;  %v2223_v63 = vld [vmem:[#allocation8 + $0x3458] sm:$0xff]  ;;  %v2222_v2 = vld [vmem:[#allocation8 + $0x3450] sm:$0xff] }
 0x3f2   :  { %4377 = vmatprep.mubr.f32.mxu1 %v6644_v21  ;;  %4260 = vmatprep.subr.mxu0 %v1679_v50  ;;  %v2079_v3 = vld [vmem:[#allocation8 + $0x2fd8] sm:$0xff]  ;;  %v2078_v50 = vld [vmem:[#allocation8 + $0x2fd0] sm:$0xff] }
 0x3f3   :  { %4315 = vmatprep.subr.mxu1 %v2319_v55  ;;  %4261 = vmatpush1.msra.mxu0 %v1678_v0  ;;  %v2207_v11 = vld [vmem:[#allocation8 + $0x33d8] sm:$0xff]  ;;  %v2206_v55 = vld [vmem:[#allocation8 + $0x33d0] sm:$0xff] }
 0x3f4   :  { %4316 = vmatpush1.msra.mxu1 %v2318_v4  ;;  %4262 = vmatprep.subr.mxu0 %v1663_v10  ;;  %v2063_v0 = vld [vmem:[#allocation8 + $0x2f58] sm:$0xff]  ;;  %v2062_v10 = vld [vmem:[#allocation8 + $0x2f50] sm:$0xff] }
 0x3f5   :  { %4317 = vmatprep.subr.mxu1 %v2303_v41  ;;  %4263 = vmatpush1.msra.mxu0 %v1662_v12  ;;  %v2191_v4 = vld [vmem:[#allocation8 + $0x3358] sm:$0xff]  ;;  %v2190_v41 = vld [vmem:[#allocation8 + $0x3350] sm:$0xff] }
 0x3f6   :  { %4318 = vmatpush1.msra.mxu1 %v2302_v13  ;;  %4264 = vmatprep.subr.mxu0 %v1647_v14  ;;  %v2047_v12 = vld [vmem:[#allocation8 + $0x2ed8] sm:$0xff]  ;;  %v2046_v14 = vld [vmem:[#allocation8 + $0x2ed0] sm:$0xff] }
 0x3f7   :  { %4319 = vmatprep.subr.mxu1 %v2287_v17  ;;  %4265 = vmatpush1.msra.mxu0 %v1646_v19  ;;  %v2175_v13 = vld [vmem:[#allocation8 + $0x32d8] sm:$0xff]  ;;  %v2174_v17 = vld [vmem:[#allocation8 + $0x32d0] sm:$0xff] }
 0x3f8   :  { %4320 = vmatpush1.msra.mxu1 %v2286_v7  ;;  %4266 = vmatprep.subr.mxu0 %v1631_v25  ;;  %v2031_v19 = vld [vmem:[#allocation8 + $0x2e58] sm:$0xff]  ;;  %v2030_v25 = vld [vmem:[#allocation8 + $0x2e50] sm:$0xff] }
 0x3f9   :  { %4321 = vmatprep.subr.mxu1 %v2271_v28  ;;  %4267 = vmatpush1.msra.mxu0 %v1630_v22  ;;  %v2159_v7 = vld [vmem:[#allocation8 + $0x3258] sm:$0xff]  ;;  %v2158_v28 = vld [vmem:[#allocation8 + $0x3250] sm:$0xff] }
 0x3fa   :  { %4322 = vmatpush1.msra.mxu1 %v2270_v34  ;;  %4268 = vmatprep.subr.mxu0 %v1615_v37  ;;  %v2015_v22 = vld [vmem:[#allocation8 + $0x2dd8] sm:$0xff]  ;;  %v2014_v37 = vld [vmem:[#allocation8 + $0x2dd0] sm:$0xff] }
 0x3fb   :  { %4323 = vmatprep.subr.mxu1 %v2255_v30  ;;  %4269 = vmatpush1.msra.mxu0 %v1614_v45  ;;  %v2143_v34 = vld [vmem:[#allocation8 + $0x31d8] sm:$0xff]  ;;  %v2142_v30 = vld [vmem:[#allocation8 + $0x31d0] sm:$0xff] }
 0x3fc   :  { %4324 = vmatpush1.msra.mxu1 %v2254_v49  ;;  %4270 = vmatprep.subr.mxu0 %v1599_v52  ;;  %v1999_v45 = vld [vmem:[#allocation8 + $0x2d58] sm:$0xff]  ;;  %v1998_v52 = vld [vmem:[#allocation8 + $0x2d50] sm:$0xff] }
 0x3fd   :  { %4325 = vmatprep.subr.mxu1 %v2239_v56  ;;  %4271 = vmatpush1.msra.mxu0 %v1598_v59  ;;  %v2127_v49 = vld [vmem:[#allocation8 + $0x3158] sm:$0xff]  ;;  %v2126_v56 = vld [vmem:[#allocation8 + $0x3150] sm:$0xff] }
 0x3fe   :  { %4326 = vmatpush1.msra.mxu1 %v2238_v62  ;;  %4272 = vmatprep.subr.mxu0 %v1583_v1  ;;  %v1983_v59 = vld [vmem:[#allocation8 + $0x2cd8] sm:$0xff]  ;;  %v1982_v1 = vld [vmem:[#allocation8 + $0x2cd0] sm:$0xff] }
 0x3ff   :  { %4327 = vmatprep.subr.mxu1 %v2223_v63  ;;  %4273 = vmatpush1.msra.mxu0 %v1582_v43  ;;  %v2111_v62 = vld [vmem:[#allocation8 + $0x30d8] sm:$0xff]  ;;  %v2110_v63 = vld [vmem:[#allocation8 + $0x30d0] sm:$0xff] }
 0x400   :  { %4328 = vmatpush1.msra.mxu1 %v2222_v2  ;;  %4274 = vmatprep.subr.mxu0 %v2079_v3  ;;  %v1967_v43 = vld [vmem:[#allocation8 + $0x2c58] sm:$0xff]  ;;  %v1966_v3 = vld [vmem:[#allocation8 + $0x2c50] sm:$0xff] }
 0x401   :  { %4329 = vmatprep.subr.mxu1 %v2207_v11  ;;  %4275 = vmatpush2.msra.mxu0 %v2078_v50  ;;  %v2095_v2 = vld [vmem:[#allocation8 + $0x3058] sm:$0xff]  ;;  %v2094_v11 = vld [vmem:[#allocation8 + $0x3050] sm:$0xff] }
 0x402   :  { %4330 = vmatpush1.msra.mxu1 %v2206_v55  ;;  %4276 = vmatprep.subr.mxu0 %v2063_v0  ;;  %v1951_v50 = vld [vmem:[#allocation8 + $0x2bd8] sm:$0xff]  ;;  %v1950_v0 = vld [vmem:[#allocation8 + $0x2bd0] sm:$0xff] }
 0x403   :  { %4331 = vmatprep.subr.mxu1 %v2191_v4  ;;  %4277 = vmatpush2.msra.mxu0 %v2062_v10  ;;  %v2591_v55 = vld [vmem:[#allocation8 + $0x3fd8] sm:$0xff]  ;;  %v2590_v4 = vld [vmem:[#allocation8 + $0x3fd0] sm:$0xff] }
 0x404   :  { %4332 = vmatpush1.msra.mxu1 %v2190_v41  ;;  %4278 = vmatprep.subr.mxu0 %v2047_v12  ;;  %v1935_v10 = vld [vmem:[#allocation8 + $0x2b58] sm:$0xff]  ;;  %v1934_v12 = vld [vmem:[#allocation8 + $0x2b50] sm:$0xff] }
 0x405   :  { %4333 = vmatprep.subr.mxu1 %v2175_v13  ;;  %4279 = vmatpush2.msra.mxu0 %v2046_v14  ;;  %v2575_v41 = vld [vmem:[#allocation8 + $0x3f58] sm:$0xff]  ;;  %v2574_v13 = vld [vmem:[#allocation8 + $0x3f50] sm:$0xff] }
 0x406   :  { %4334 = vmatpush1.msra.mxu1 %v2174_v17  ;;  %4280 = vmatprep.subr.mxu0 %v2031_v19  ;;  %v1919_v14 = vld [vmem:[#allocation8 + $0x2ad8] sm:$0xff]  ;;  %v1918_v19 = vld [vmem:[#allocation8 + $0x2ad0] sm:$0xff] }
 0x407   :  { %4335 = vmatprep.subr.mxu1 %v2159_v7  ;;  %4281 = vmatpush2.msra.mxu0 %v2030_v25  ;;  %v2559_v17 = vld [vmem:[#allocation8 + $0x3ed8] sm:$0xff]  ;;  %v2558_v7 = vld [vmem:[#allocation8 + $0x3ed0] sm:$0xff] }
 0x408   :  { %4336 = vmatpush1.msra.mxu1 %v2158_v28  ;;  %4282 = vmatprep.subr.mxu0 %v2015_v22  ;;  %v1903_v25 = vld [vmem:[#allocation8 + $0x2a58] sm:$0xff]  ;;  %v1902_v22 = vld [vmem:[#allocation8 + $0x2a50] sm:$0xff] }
 0x409   :  { %4337 = vmatprep.subr.mxu1 %v2143_v34  ;;  %4283 = vmatpush2.msra.mxu0 %v2014_v37  ;;  %v2543_v28 = vld [vmem:[#allocation8 + $0x3e58] sm:$0xff]  ;;  %v2542_v34 = vld [vmem:[#allocation8 + $0x3e50] sm:$0xff] }
 0x40a   :  { %4338 = vmatpush1.msra.mxu1 %v2142_v30  ;;  %4284 = vmatprep.subr.mxu0 %v1999_v45  ;;  %v1887_v37 = vld [vmem:[#allocation8 + $0x29d8] sm:$0xff]  ;;  %v1886_v45 = vld [vmem:[#allocation8 + $0x29d0] sm:$0xff] }
 0x40b   :  { %4339 = vmatprep.subr.mxu1 %v2127_v49  ;;  %4285 = vmatpush2.msra.mxu0 %v1998_v52  ;;  %v2527_v30 = vld [vmem:[#allocation8 + $0x3dd8] sm:$0xff]  ;;  %v2526_v49 = vld [vmem:[#allocation8 + $0x3dd0] sm:$0xff] }
 0x40c   :  { %4340 = vmatpush1.msra.mxu1 %v2126_v56  ;;  %4286 = vmatprep.subr.mxu0 %v1983_v59  ;;  %v1871_v52 = vld [vmem:[#allocation8 + $0x2958] sm:$0xff]  ;;  %v1870_v59 = vld [vmem:[#allocation8 + $0x2950] sm:$0xff] }
 0x40d   :  { %4341 = vmatprep.subr.mxu1 %v2111_v62  ;;  %4287 = vmatpush2.msra.mxu0 %v1982_v1  ;;  %v2511_v56 = vld [vmem:[#allocation8 + $0x3d58] sm:$0xff]  ;;  %v2510_v62 = vld [vmem:[#allocation8 + $0x3d50] sm:$0xff] }
 0x40e   :  { %4342 = vmatpush1.msra.mxu1 %v2110_v63  ;;  %4288 = vmatprep.subr.mxu0 %v1967_v43  ;;  %v1855_v1 = vld [vmem:[#allocation8 + $0x28d8] sm:$0xff]  ;;  %v1854_v43 = vld [vmem:[#allocation8 + $0x28d0] sm:$0xff] }
 0x40f   :  { %4343 = vmatprep.subr.mxu1 %v2095_v2  ;;  %4289 = vmatpush2.msra.mxu0 %v1966_v3  ;;  %v2495_v63 = vld [vmem:[#allocation8 + $0x3cd8] sm:$0xff]  ;;  %v2494_v2 = vld [vmem:[#allocation8 + $0x3cd0] sm:$0xff] }
 0x410   :  { %4344 = vmatpush1.msra.mxu1 %v2094_v11  ;;  %4290 = vmatprep.subr.mxu0 %v1951_v50  ;;  %v1839_v3 = vld [vmem:[#allocation8 + $0x2858] sm:$0xff]  ;;  %v1838_v50 = vld [vmem:[#allocation8 + $0x2850] sm:$0xff] }
 0x411   :  { %4345 = vmatprep.subr.mxu1 %v2591_v55  ;;  %4291 = vmatpush2.msra.mxu0 %v1950_v0  ;;  %v2479_v11 = vld [vmem:[#allocation8 + $0x3c58] sm:$0xff]  ;;  %v2478_v55 = vld [vmem:[#allocation8 + $0x3c50] sm:$0xff] }
 0x412   :  { %4346 = vmatpush2.msra.mxu1 %v2590_v4  ;;  %4292 = vmatprep.subr.mxu0 %v1935_v10  ;;  %v2463_v0 = vld [vmem:[#allocation8 + $0x3bd8] sm:$0xff]  ;;  %v801_v4 = vld [vmem:[#allocation8 + $0x7e8] sm:$0xff]  ;;  %v2462_v10 = vld [vmem:[#allocation8 + $0x3bd0] sm:$0xff] }
 0x413   :  { %4347 = vmatprep.subr.mxu1 %v2575_v41  ;;  %4293 = vmatpush2.msra.mxu0 %v1934_v12  ;;  %v800_v41 = vld [vmem:[#allocation8 + $0x7e0] sm:$0xff]  ;;  %v2447_v12 = vld [vmem:[#allocation8 + $0x3b58] sm:$0xff] }
 0x414   :  { %4348 = vmatpush2.msra.mxu1 %v2574_v13  ;;  %4294 = vmatprep.subr.mxu0 %v1919_v14  ;;  %v785_v13 = vld [vmem:[#allocation8 + $0x768] sm:$0xff]  ;;  %v2446_v14 = vld [vmem:[#allocation8 + $0x3b50] sm:$0xff] }
 0x415   :  { %4349 = vmatprep.subr.mxu1 %v2559_v17  ;;  %4295 = vmatpush2.msra.mxu0 %v1918_v19  ;;  %v784_v17 = vld [vmem:[#allocation8 + $0x760] sm:$0xff]  ;;  %v2431_v19 = vld [vmem:[#allocation8 + $0x3ad8] sm:$0xff] }
 0x416   :  { %4350 = vmatpush2.msra.mxu1 %v2558_v7  ;;  %4296 = vmatprep.subr.mxu0 %v1903_v25  ;;  %v2597_v7 = vld [vmem:[#allocation10 + $0x8] sm:$0xff] }
 0x417   :  { %4351 = vmatprep.subr.mxu1 %v2543_v28  ;;  %4297 = vmatpush2.msra.mxu0 %v1902_v22  ;;  %v769_v25 = vld [vmem:[#allocation8 + $0x6e8] sm:$0xff]  ;;  %v2430_v28 = vld [vmem:[#allocation8 + $0x3ad0] sm:$0xff]  ;;  %v768_v22 = vld [vmem:[#allocation8 + $0x6e0] sm:$0xff] }
 0x418   :  { %4352 = vmatpush2.msra.mxu1 %v2542_v34  ;;  %4298 = vmatprep.subr.mxu0 %v1887_v37  ;;  %v2415_v34 = vld [vmem:[#allocation8 + $0x3a58] sm:$0xff]  ;;  %v6753_v37 = vpop.f32.mrf.mxu0 }
 0x419   :  { %4353 = vmatprep.subr.mxu1 %v2527_v30  ;;  %4299 = vmatpush2.msra.mxu0 %v1886_v45  ;;  %v753_v30 = vld [vmem:[#allocation8 + $0x668] sm:$0xff]  ;;  %v2414_v45 = vld [vmem:[#allocation8 + $0x3a50] sm:$0xff] }
 0x41a   :  { %4354 = vmatpush2.msra.mxu1 %v2526_v49  ;;  %4300 = vmatprep.subr.mxu0 %v1871_v52  ;;  %v2635_v49 = vrot.slane %v2597_v7, %v6581_v6  ;;  %v752_v52 = vld [vmem:[#allocation8 + $0x660] sm:$0xff] }
 0x41b   :  { %4355 = vmatprep.subr.mxu1 %v2511_v56  ;;  %4301 = vmatpush2.msra.mxu0 %v1870_v59  ;;  %v2399_v56 = vld [vmem:[#allocation8 + $0x39d8] sm:$0xff]  ;;  %v3882_v59 = vpop.f32.mrf.mxu0  ;;  %v688_v7 = vld [vmem:[#allocation8 + $0x460] sm:$0xff] }
 0x41c   :  { %4356 = vmatpush2.msra.mxu1 %v2510_v62  ;;  %4302 = vmatprep.subr.mxu0 %v1855_v1  ;;  %v737_v62 = vld [vmem:[#allocation8 + $0x5e8] sm:$0xff]  ;;  %v2398_v1 = vld [vmem:[#allocation8 + $0x39d0] sm:$0xff] }
 0x41d   :  { %4357 = vmatprep.subr.mxu1 %v2495_v63  ;;  %4303 = vmatpush2.msra.mxu0 %v1854_v43  ;;  %v736_v63 = vld [vmem:[#allocation8 + $0x5e0] sm:$0xff]  ;;  %v2383_v43 = vld [vmem:[#allocation8 + $0x3958] sm:$0xff] }
 0x41e   :  { %4358 = vmatpush2.msra.mxu1 %v2494_v2  ;;  %4304 = vmatprep.subr.mxu0 %v1839_v3  ;;  %v6756_v2 = vpop.f32.mrf.mxu1  ;;  %v721_v3 = vld [vmem:[#allocation8 + $0x568] sm:$0xff] }
 0x41f   :  { %4359 = vmatprep.subr.mxu1 %v2479_v11  ;;  %4305 = vmatpush2.msra.mxu0 %v1838_v50  ;;  %v2382_v11 = vld [vmem:[#allocation8 + $0x3950] sm:$0xff]  ;;  %v3883_v50 = vadd.f32 %v3882_v59, %v2635_v49  ;;  %v656_v49 = vld [vmem:[#allocation8 + $0x360] sm:$0xff]  ;;  %v1281_v59 = vld [vmem:[#allocation8 + $0x16e8] sm:$0xff] }
 0x420   :  { %4360 = vmatpush2.msra.mxu1 %v2478_v55  ;;  %4307 = vmatmul.mubr.f32.vlgmr.msra.gmra.mxu0 %v6630_v39  ;;  %v720_v55 = vld [vmem:[#allocation8 + $0x560] sm:$0xff] }
 0x421   :  { %4361 = vmatprep.subr.mxu1 %v2463_v0  ;;  %4384 = vmatprep.subr.mxu0 %v801_v4  ;;  %v2367_v0 = vld [vmem:[#allocation8 + $0x38d8] sm:$0xff]  ;;  %v705_v4 = vld [vmem:[#allocation8 + $0x4e8] sm:$0xff] }
 0x422   :  { %4362 = vmatpush2.msra.mxu1 %v2462_v10  ;;  %4385 = vmatpush1.msra.mxu0 %v800_v41  ;;  %v2366_v10 = vld [vmem:[#allocation8 + $0x38d0] sm:$0xff] }
 0x423   :  { %4448 = vmatprep.mubr.f32.mxu0 %v6592_v15  ;;  %4363 = vmatprep.subr.mxu1 %v2447_v12  ;;  %v704_v12 = vld [vmem:[#allocation8 + $0x4e0] sm:$0xff] }
 0x424   :  { %4386 = vmatprep.subr.mxu0 %v785_v13  ;;  %4364 = vmatpush2.msra.mxu1 %v2446_v14  ;;  %v2351_v13 = vld [vmem:[#allocation8 + $0x3858] sm:$0xff] }
 0x425   :  { %4387 = vmatpush1.msra.mxu0 %v784_v17  ;;  %4365 = vmatprep.subr.mxu1 %v2431_v19  ;;  %v689_v17 = vld [vmem:[#allocation8 + $0x468] sm:$0xff]  ;;  %v2350_v19 = vld [vmem:[#allocation8 + $0x3850] sm:$0xff] }
 0x426   :  { %4388 = vmatprep.subr.mxu0 %v769_v25  ;;  %4366 = vmatpush2.msra.mxu1 %v2430_v28  ;;  %v673_v25 = vld [vmem:[#allocation8 + $0x3e8] sm:$0xff] }
 0x427   :  { %4389 = vmatpush1.msra.mxu0 %v768_v22  ;;  %4367 = vmatprep.subr.mxu1 %v2415_v34  ;;  %v1313_v28 = vld [vmem:[#allocation8 + $0x17e8] sm:$0xff]  ;;  %v672_v22 = vld [vmem:[#allocation8 + $0x3e0] sm:$0xff] }
 0x428   :  { %4390 = vmatprep.subr.mxu0 %v753_v30  ;;  %4368 = vmatpush2.msra.mxu1 %v2414_v45  ;;  %v1312_v34 = vld [vmem:[#allocation8 + $0x17e0] sm:$0xff]  ;;  %v657_v30 = vld [vmem:[#allocation8 + $0x368] sm:$0xff] }
 0x429   :  { %4391 = vmatpush1.msra.mxu0 %v752_v52  ;;  %4369 = vmatprep.subr.mxu1 %v2399_v56  ;;  %v1297_v45 = vld [vmem:[#allocation8 + $0x1768] sm:$0xff]  ;;  %v1296_v52 = vld [vmem:[#allocation8 + $0x1760] sm:$0xff] }
 0x42a   :  { %4392 = vmatprep.subr.mxu0 %v737_v62  ;;  %4370 = vmatpush2.msra.mxu1 %v2398_v1  ;;  %v641_v56 = vld [vmem:[#allocation8 + $0x2e8] sm:$0xff]  ;;  %v640_v62 = vld [vmem:[#allocation8 + $0x2e0] sm:$0xff] }
 0x42b   :  { %4393 = vmatpush1.msra.mxu0 %v736_v63  ;;  %4371 = vmatprep.subr.mxu1 %v2383_v43  ;;  %v3953_v41 = vpop.f32.mrf.mxu1  ;;  %v1280_v1 = vld [vmem:[#allocation8 + $0x16e0] sm:$0xff]  ;;  %v625_v63 = vld [vmem:[#allocation8 + $0x268] sm:$0xff] }
 0x42c   :  { %4394 = vmatprep.subr.mxu0 %v721_v3  ;;  %4372 = vmatpush2.msra.mxu1 %v2382_v11  ;;  %v6758_v14 = vadd.f32 %v3953_v41, %v3883_v50  ;;  %v1265_v43 = vld [vmem:[#allocation8 + $0x1668] sm:$0xff]  ;;  %v624_v3 = vld [vmem:[#allocation8 + $0x260] sm:$0xff] }
 0x42d   :  { %4395 = vmatpush1.msra.mxu0 %v720_v55  ;;  %4373 = vmatprep.subr.mxu1 %v2367_v0  ;;  %v1264_v11 = vld [vmem:[#allocation8 + $0x1660] sm:$0xff]  ;;  %v609_v50 = vld [vmem:[#allocation8 + $0x1e8] sm:$0xff] }
 0x42e   :  { %4396 = vmatprep.subr.mxu0 %v705_v4  ;;  %4374 = vmatpush2.msra.mxu1 %v2366_v10  ;;  %v1249_v55 = vld [vmem:[#allocation8 + $0x15e8] sm:$0xff]  ;;  %v608_v0 = vld [vmem:[#allocation8 + $0x1e0] sm:$0xff] }
 0x42f   :  { %4397 = vmatpush1.msra.mxu0 %v704_v12  ;;  %4375 = vmatprep.subr.mxu1 %v2351_v13  ;;  %v1248_v4 = vld [vmem:[#allocation8 + $0x15e0] sm:$0xff]  ;;  %v593_v10 = vld [vmem:[#allocation8 + $0x168] sm:$0xff] }
 0x430   :  { %4398 = vmatprep.subr.mxu0 %v689_v17  ;;  %4376 = vmatpush2.msra.mxu1 %v2350_v19  ;;  %v1233_v41 = vld [vmem:[#allocation8 + $0x1568] sm:$0xff]  ;;  %v592_v12 = vld [vmem:[#allocation8 + $0x160] sm:$0xff] }
 0x431   :  { %4399 = vmatpush1.msra.mxu0 %v688_v7  ;;  %4378 = vmatmul.mubr.f32.vlgmr.msra.gmra.mxu1 %v6646_v31  ;;  %v1232_v13 = vld [vmem:[#allocation8 + $0x1560] sm:$0xff]  ;;  %v577_v17 = vld [vmem:[#allocation8 + $0xe8] sm:$0xff] }
 0x432   :  { %4400 = vmatprep.subr.mxu0 %v673_v25  ;;  %4455 = vmatprep.subr.mxu1 %v1313_v28  ;;  %v1217_v19 = vld [vmem:[#allocation8 + $0x14e8] sm:$0xff]  ;;  %v576_v7 = vld [vmem:[#allocation8 + $0xe0] sm:$0xff] }
 0x433   :  { %4401 = vmatpush1.msra.mxu0 %v672_v22  ;;  %4456 = vmatpush1.msra.mxu1 %v1312_v34  ;;  %v1216_v25 = vld [vmem:[#allocation8 + $0x14e0] sm:$0xff]  ;;  %v561_v28 = vld [vmem:[#allocation8 + $0x68] sm:$0xff] }
 0x434   :  { %4519 = vmatprep.mubr.f32.mxu1 %v6618_v46  ;;  %4402 = vmatprep.subr.mxu0 %v657_v30  ;;  %v1201_v22 = vld [vmem:[#allocation8 + $0x1468] sm:$0xff]  ;;  %v560_v34 = vld [vmem:[#allocation8 + $0x60] sm:$0xff] }
 0x435   :  { %4457 = vmatprep.subr.mxu1 %v1297_v45  ;;  %4403 = vmatpush1.msra.mxu0 %v656_v49  ;;  %v1200_v30 = vld [vmem:[#allocation8 + $0x1460] sm:$0xff]  ;;  %v1057_v45 = vld [vmem:[#allocation8 + $0xfe8] sm:$0xff] }
 0x436   :  { %4458 = vmatpush1.msra.mxu1 %v1296_v52  ;;  %4404 = vmatprep.subr.mxu0 %v641_v56  ;;  %v1185_v49 = vld [vmem:[#allocation8 + $0x13e8] sm:$0xff]  ;;  %v1056_v52 = vld [vmem:[#allocation8 + $0xfe0] sm:$0xff] }
 0x437   :  { %4459 = vmatprep.subr.mxu1 %v1281_v59  ;;  %4405 = vmatpush1.msra.mxu0 %v640_v62  ;;  %v1184_v56 = vld [vmem:[#allocation8 + $0x13e0] sm:$0xff]  ;;  %v1041_v59 = vld [vmem:[#allocation8 + $0xf68] sm:$0xff] }
 0x438   :  { %4460 = vmatpush1.msra.mxu1 %v1280_v1  ;;  %4406 = vmatprep.subr.mxu0 %v625_v63  ;;  %v1169_v62 = vld [vmem:[#allocation8 + $0x1368] sm:$0xff]  ;;  %v1040_v1 = vld [vmem:[#allocation8 + $0xf60] sm:$0xff] }
 0x439   :  { %4461 = vmatprep.subr.mxu1 %v1265_v43  ;;  %4407 = vmatpush1.msra.mxu0 %v624_v3  ;;  %v1168_v63 = vld [vmem:[#allocation8 + $0x1360] sm:$0xff]  ;;  %v1025_v43 = vld [vmem:[#allocation8 + $0xee8] sm:$0xff] }
 0x43a   :  { %4462 = vmatpush1.msra.mxu1 %v1264_v11  ;;  %4408 = vmatprep.subr.mxu0 %v609_v50  ;;  %v1153_v3 = vld [vmem:[#allocation8 + $0x12e8] sm:$0xff]  ;;  %v1024_v11 = vld [vmem:[#allocation8 + $0xee0] sm:$0xff] }
 0x43b   :  { %4463 = vmatprep.subr.mxu1 %v1249_v55  ;;  %4409 = vmatpush1.msra.mxu0 %v608_v0  ;;  %v1152_v50 = vld [vmem:[#allocation8 + $0x12e0] sm:$0xff]  ;;  %v1009_v55 = vld [vmem:[#allocation8 + $0xe68] sm:$0xff] }
 0x43c   :  { %4464 = vmatpush1.msra.mxu1 %v1248_v4  ;;  %4410 = vmatprep.subr.mxu0 %v593_v10  ;;  %v1137_v0 = vld [vmem:[#allocation8 + $0x1268] sm:$0xff]  ;;  %v1008_v4 = vld [vmem:[#allocation8 + $0xe60] sm:$0xff] }
 0x43d   :  { %4465 = vmatprep.subr.mxu1 %v1233_v41  ;;  %4411 = vmatpush1.msra.mxu0 %v592_v12  ;;  %v1136_v10 = vld [vmem:[#allocation8 + $0x1260] sm:$0xff]  ;;  %v993_v41 = vld [vmem:[#allocation8 + $0xde8] sm:$0xff] }
 0x43e   :  { %4466 = vmatpush1.msra.mxu1 %v1232_v13  ;;  %4412 = vmatprep.subr.mxu0 %v577_v17  ;;  %v1121_v12 = vld [vmem:[#allocation8 + $0x11e8] sm:$0xff]  ;;  %v992_v13 = vld [vmem:[#allocation8 + $0xde0] sm:$0xff] }
 0x43f   :  { %4467 = vmatprep.subr.mxu1 %v1217_v19  ;;  %4413 = vmatpush1.msra.mxu0 %v576_v7  ;;  %v1120_v17 = vld [vmem:[#allocation8 + $0x11e0] sm:$0xff]  ;;  %v977_v19 = vld [vmem:[#allocation8 + $0xd68] sm:$0xff] }
 0x440   :  { %4468 = vmatpush1.msra.mxu1 %v1216_v25  ;;  %4414 = vmatprep.subr.mxu0 %v561_v28  ;;  %v1105_v7 = vld [vmem:[#allocation8 + $0x1168] sm:$0xff]  ;;  %v976_v25 = vld [vmem:[#allocation8 + $0xd60] sm:$0xff] }
 0x441   :  { %4469 = vmatprep.subr.mxu1 %v1201_v22  ;;  %4415 = vmatpush1.msra.mxu0 %v560_v34  ;;  %v1104_v28 = vld [vmem:[#allocation8 + $0x1160] sm:$0xff]  ;;  %v961_v22 = vld [vmem:[#allocation8 + $0xce8] sm:$0xff] }
 0x442   :  { %4470 = vmatpush1.msra.mxu1 %v1200_v30  ;;  %4416 = vmatprep.subr.mxu0 %v1057_v45  ;;  %v1089_v34 = vld [vmem:[#allocation8 + $0x10e8] sm:$0xff]  ;;  %v960_v30 = vld [vmem:[#allocation8 + $0xce0] sm:$0xff] }
 0x443   :  { %4471 = vmatprep.subr.mxu1 %v1185_v49  ;;  %4417 = vmatpush2.msra.mxu0 %v1056_v52  ;;  %v1088_v45 = vld [vmem:[#allocation8 + $0x10e0] sm:$0xff]  ;;  %v945_v49 = vld [vmem:[#allocation8 + $0xc68] sm:$0xff] }
 0x444   :  { %4472 = vmatpush1.msra.mxu1 %v1184_v56  ;;  %4418 = vmatprep.subr.mxu0 %v1041_v59  ;;  %v1073_v52 = vld [vmem:[#allocation8 + $0x1068] sm:$0xff]  ;;  %v944_v56 = vld [vmem:[#allocation8 + $0xc60] sm:$0xff] }
 0x445   :  { %4473 = vmatprep.subr.mxu1 %v1169_v62  ;;  %4419 = vmatpush2.msra.mxu0 %v1040_v1  ;;  %v1072_v59 = vld [vmem:[#allocation8 + $0x1060] sm:$0xff]  ;;  %v929_v62 = vld [vmem:[#allocation8 + $0xbe8] sm:$0xff] }
 0x446   :  { %4474 = vmatpush1.msra.mxu1 %v1168_v63  ;;  %4420 = vmatprep.subr.mxu0 %v1025_v43  ;;  %v1569_v1 = vld [vmem:[#allocation8 + $0x1fe8] sm:$0xff]  ;;  %v928_v63 = vld [vmem:[#allocation8 + $0xbe0] sm:$0xff] }
 0x447   :  { %4475 = vmatprep.subr.mxu1 %v1153_v3  ;;  %4421 = vmatpush2.msra.mxu0 %v1024_v11  ;;  %v1568_v43 = vld [vmem:[#allocation8 + $0x1fe0] sm:$0xff]  ;;  %v913_v3 = vld [vmem:[#allocation8 + $0xb68] sm:$0xff] }
 0x448   :  { %4476 = vmatpush1.msra.mxu1 %v1152_v50  ;;  %4422 = vmatprep.subr.mxu0 %v1009_v55  ;;  %v1553_v11 = vld [vmem:[#allocation8 + $0x1f68] sm:$0xff]  ;;  %v912_v50 = vld [vmem:[#allocation8 + $0xb60] sm:$0xff] }
 0x449   :  { %4477 = vmatprep.subr.mxu1 %v1137_v0  ;;  %4423 = vmatpush2.msra.mxu0 %v1008_v4  ;;  %v1552_v55 = vld [vmem:[#allocation8 + $0x1f60] sm:$0xff]  ;;  %v897_v0 = vld [vmem:[#allocation8 + $0xae8] sm:$0xff] }
 0x44a   :  { %4478 = vmatpush1.msra.mxu1 %v1136_v10  ;;  %4424 = vmatprep.subr.mxu0 %v993_v41  ;;  %v1537_v4 = vld [vmem:[#allocation8 + $0x1ee8] sm:$0xff]  ;;  %v896_v10 = vld [vmem:[#allocation8 + $0xae0] sm:$0xff] }
 0x44b   :  { %4479 = vmatprep.subr.mxu1 %v1121_v12  ;;  %4425 = vmatpush2.msra.mxu0 %v992_v13  ;;  %v1536_v41 = vld [vmem:[#allocation8 + $0x1ee0] sm:$0xff]  ;;  %v881_v12 = vld [vmem:[#allocation8 + $0xa68] sm:$0xff] }
 0x44c   :  { %4480 = vmatpush1.msra.mxu1 %v1120_v17  ;;  %4426 = vmatprep.subr.mxu0 %v977_v19  ;;  %v1521_v13 = vld [vmem:[#allocation8 + $0x1e68] sm:$0xff]  ;;  %v880_v17 = vld [vmem:[#allocation8 + $0xa60] sm:$0xff] }
 0x44d   :  { %4481 = vmatprep.subr.mxu1 %v1105_v7  ;;  %4427 = vmatpush2.msra.mxu0 %v976_v25  ;;  %v1520_v19 = vld [vmem:[#allocation8 + $0x1e60] sm:$0xff]  ;;  %v865_v7 = vld [vmem:[#allocation8 + $0x9e8] sm:$0xff] }
 0x44e   :  { %4482 = vmatpush1.msra.mxu1 %v1104_v28  ;;  %4428 = vmatprep.subr.mxu0 %v961_v22  ;;  %v1505_v25 = vld [vmem:[#allocation8 + $0x1de8] sm:$0xff]  ;;  %v864_v28 = vld [vmem:[#allocation8 + $0x9e0] sm:$0xff] }
 0x44f   :  { %4483 = vmatprep.subr.mxu1 %v1089_v34  ;;  %4429 = vmatpush2.msra.mxu0 %v960_v30  ;;  %v1504_v22 = vld [vmem:[#allocation8 + $0x1de0] sm:$0xff]  ;;  %v849_v34 = vld [vmem:[#allocation8 + $0x968] sm:$0xff]  ;;  %v6762_v30 = vpop.f32.mrf.mxu0 }
 0x450   :  { %4484 = vmatpush1.msra.mxu1 %v1088_v45  ;;  %4430 = vmatprep.subr.mxu0 %v945_v49  ;;  %v1489_v45 = vld [vmem:[#allocation8 + $0x1d68] sm:$0xff]  ;;  %v848_v49 = vld [vmem:[#allocation8 + $0x960] sm:$0xff] }
 0x451   :  { %4485 = vmatprep.subr.mxu1 %v1073_v52  ;;  %4431 = vmatpush2.msra.mxu0 %v944_v56  ;;  %v1488_v52 = vld [vmem:[#allocation8 + $0x1d60] sm:$0xff]  ;;  %v833_v56 = vld [vmem:[#allocation8 + $0x8e8] sm:$0xff] }
 0x452   :  { %4486 = vmatpush1.msra.mxu1 %v1072_v59  ;;  %4432 = vmatprep.subr.mxu0 %v929_v62  ;;  %v1473_v59 = vld [vmem:[#allocation8 + $0x1ce8] sm:$0xff]  ;;  %v832_v62 = vld [vmem:[#allocation8 + $0x8e0] sm:$0xff] }
 0x453   :  { %4487 = vmatprep.subr.mxu1 %v1569_v1  ;;  %4433 = vmatpush2.msra.mxu0 %v928_v63  ;;  %v1472_v63 = vld [vmem:[#allocation8 + $0x1ce0] sm:$0xff] }
 0x454   :  { %4488 = vmatpush2.msra.mxu1 %v1568_v43  ;;  %4434 = vmatprep.subr.mxu0 %v913_v3  ;;  %v817_v43 = vld [vmem:[#allocation8 + $0x868] sm:$0xff] }
 0x455   :  { %4489 = vmatprep.subr.mxu1 %v1553_v11  ;;  %4435 = vmatpush2.msra.mxu0 %v912_v50  ;;  %v1457_v11 = vld [vmem:[#allocation8 + $0x1c68] sm:$0xff]  ;;  %v816_v50 = vld [vmem:[#allocation8 + $0x860] sm:$0xff] }
 0x456   :  { %4490 = vmatpush2.msra.mxu1 %v1552_v55  ;;  %4436 = vmatprep.subr.mxu0 %v897_v0  ;;  %v1456_v55 = vld [vmem:[#allocation8 + $0x1c60] sm:$0xff]  ;;  %v1441_v0 = vld [vmem:[#allocation8 + $0x1be8] sm:$0xff] }
 0x457   :  { %4491 = vmatprep.subr.mxu1 %v1537_v4  ;;  %4437 = vmatpush2.msra.mxu0 %v896_v10  ;;  %v1825_v4 = vld [vmem:[#allocation8 + $0x27e8] sm:$0xff]  ;;  %v1440_v10 = vld [vmem:[#allocation8 + $0x1be0] sm:$0xff] }
 0x458   :  { %4492 = vmatpush2.msra.mxu1 %v1536_v41  ;;  %4438 = vmatprep.subr.mxu0 %v881_v12  ;;  %v1824_v41 = vld [vmem:[#allocation8 + $0x27e0] sm:$0xff]  ;;  %v1809_v12 = vld [vmem:[#allocation8 + $0x2768] sm:$0xff] }
 0x459   :  { %4493 = vmatprep.subr.mxu1 %v1521_v13  ;;  %4439 = vmatpush2.msra.mxu0 %v880_v17  ;;  %v1424_v13 = vld [vmem:[#allocation8 + $0x1b60] sm:$0xff] }
 0x45a   :  { %4494 = vmatpush2.msra.mxu1 %v1520_v19  ;;  %4440 = vmatprep.subr.mxu0 %v865_v7  ;;  %v1808_v17 = vld [vmem:[#allocation8 + $0x2760] sm:$0xff]  ;;  %v1409_v19 = vld [vmem:[#allocation8 + $0x1ae8] sm:$0xff] }
 0x45b   :  { %4495 = vmatprep.subr.mxu1 %v1505_v25  ;;  %4441 = vmatpush2.msra.mxu0 %v864_v28  ;;  %v1793_v7 = vld [vmem:[#allocation8 + $0x26e8] sm:$0xff]  ;;  %v1408_v25 = vld [vmem:[#allocation8 + $0x1ae0] sm:$0xff] }
 0x45c   :  { %4496 = vmatpush2.msra.mxu1 %v1504_v22  ;;  %4442 = vmatprep.subr.mxu0 %v849_v34  ;;  %v4024_v1 = vpop.f32.mrf.mxu0  ;;  %v1792_v28 = vld [vmem:[#allocation8 + $0x26e0] sm:$0xff]  ;;  %v1393_v22 = vld [vmem:[#allocation8 + $0x1a68] sm:$0xff] }
 0x45d   :  { %4497 = vmatprep.subr.mxu1 %v1489_v45  ;;  %4443 = vmatpush2.msra.mxu0 %v848_v49  ;;  %v6765_v3 = vadd.f32 %v4024_v1, %v6758_v14  ;;  %v1425_v14 = vld [vmem:[#allocation8 + $0x1b68] sm:$0xff]  ;;  %v1392_v45 = vld [vmem:[#allocation8 + $0x1a60] sm:$0xff] }
 0x45e   :  { %4498 = vmatpush2.msra.mxu1 %v1488_v52  ;;  %4444 = vmatprep.subr.mxu0 %v833_v56  ;;  %v1777_v34 = vld [vmem:[#allocation8 + $0x2668] sm:$0xff]  ;;  %v1776_v49 = vld [vmem:[#allocation8 + $0x2660] sm:$0xff] }
 0x45f   :  { %4499 = vmatprep.subr.mxu1 %v1473_v59  ;;  %4445 = vmatpush2.msra.mxu0 %v832_v62  ;;  %v1377_v52 = vld [vmem:[#allocation8 + $0x19e8] sm:$0xff]  ;;  %v1376_v59 = vld [vmem:[#allocation8 + $0x19e0] sm:$0xff] }
 0x460   :  { %4500 = vmatpush2.msra.mxu1 %v1472_v63  ;;  %4446 = vmatprep.subr.mxu0 %v817_v43  ;;  %v1761_v56 = vld [vmem:[#allocation8 + $0x25e8] sm:$0xff]  ;;  %v1760_v62 = vld [vmem:[#allocation8 + $0x25e0] sm:$0xff]  ;;  %v6769_v63 = vpop.f32.mrf.mxu1 }
 0x461   :  { %4501 = vmatprep.subr.mxu1 %v1457_v11  ;;  %4447 = vmatpush2.msra.mxu0 %v816_v50  ;;  %v1361_v1 = vld [vmem:[#allocation8 + $0x1968] sm:$0xff]  ;;  %v1360_v11 = vld [vmem:[#allocation8 + $0x1960] sm:$0xff] }
 0x462   :  { %4502 = vmatpush2.msra.mxu1 %v1456_v55  ;;  %4449 = vmatmul.mubr.f32.vlgmr.msra.gmra.mxu0 %v6594_v16  ;;  %v1745_v43 = vld [vmem:[#allocation8 + $0x2568] sm:$0xff]  ;;  %v1744_v50 = vld [vmem:[#allocation8 + $0x2560] sm:$0xff] }
 0x463   :  { %4503 = vmatprep.subr.mxu1 %v1441_v0  ;;  %4526 = vmatprep.subr.mxu0 %v1825_v4  ;;  %v1345_v55 = vld [vmem:[#allocation8 + $0x18e8] sm:$0xff]  ;;  %v1344_v4 = vld [vmem:[#allocation8 + $0x18e0] sm:$0xff] }
 0x464   :  { %4504 = vmatpush2.msra.mxu1 %v1440_v10  ;;  %4527 = vmatpush1.msra.mxu0 %v1824_v41  ;;  %v1729_v0 = vld [vmem:[#allocation8 + $0x24e8] sm:$0xff]  ;;  %v1728_v41 = vld [vmem:[#allocation8 + $0x24e0] sm:$0xff] }
 0x465   :  { %4590 = vmatprep.mubr.f32.mxu0 %v6615_v42  ;;  %4505 = vmatprep.subr.mxu1 %v1425_v14  ;;  %v1329_v14 = vld [vmem:[#allocation8 + $0x1868] sm:$0xff] }
 0x466   :  { %4528 = vmatprep.subr.mxu0 %v1809_v12  ;;  %4506 = vmatpush2.msra.mxu1 %v1424_v13  ;;  %v1713_v13 = vld [vmem:[#allocation8 + $0x2468] sm:$0xff] }
 0x467   :  { %4529 = vmatpush1.msra.mxu0 %v1808_v17  ;;  %4507 = vmatprep.subr.mxu1 %v1409_v19  ;;  %v1328_v17 = vld [vmem:[#allocation8 + $0x1860] sm:$0xff] }
 0x468   :  { %4530 = vmatprep.subr.mxu0 %v1793_v7  ;;  %4508 = vmatpush2.msra.mxu1 %v1408_v25  ;;  %v1712_v19 = vld [vmem:[#allocation8 + $0x2460] sm:$0xff]  ;;  %v1697_v7 = vld [vmem:[#allocation8 + $0x23e8] sm:$0xff] }
 0x469   :  { %4531 = vmatpush1.msra.mxu0 %v1792_v28  ;;  %4509 = vmatprep.subr.mxu1 %v1393_v22  ;;  %v2337_v25 = vld [vmem:[#allocation8 + $0x37e8] sm:$0xff]  ;;  %v1696_v28 = vld [vmem:[#allocation8 + $0x23e0] sm:$0xff] }
 0x46a   :  { %4532 = vmatprep.subr.mxu0 %v1777_v34  ;;  %4510 = vmatpush2.msra.mxu1 %v1392_v45  ;;  %v2336_v22 = vld [vmem:[#allocation8 + $0x37e0] sm:$0xff]  ;;  %v2321_v34 = vld [vmem:[#allocation8 + $0x3768] sm:$0xff] }
 0x46b   :  { %4533 = vmatpush1.msra.mxu0 %v1776_v49  ;;  %4511 = vmatprep.subr.mxu1 %v1377_v52  ;;  %v1680_v45 = vld [vmem:[#allocation8 + $0x2360] sm:$0xff]  ;;  %v1665_v52 = vld [vmem:[#allocation8 + $0x22e8] sm:$0xff] }
 0x46c   :  { %4534 = vmatprep.subr.mxu0 %v1761_v56  ;;  %4512 = vmatpush2.msra.mxu1 %v1376_v59  ;;  %v2320_v49 = vld [vmem:[#allocation8 + $0x3760] sm:$0xff]  ;;  %v2305_v56 = vld [vmem:[#allocation8 + $0x36e8] sm:$0xff] }
 0x46d   :  { %4535 = vmatpush1.msra.mxu0 %v1760_v62  ;;  %4513 = vmatprep.subr.mxu1 %v1361_v1  ;;  %v4095_v10 = vpop.f32.mrf.mxu1  ;;  %v1664_v59 = vld [vmem:[#allocation8 + $0x22e0] sm:$0xff]  ;;  %v1649_v1 = vld [vmem:[#allocation8 + $0x2268] sm:$0xff] }
 0x46e   :  { %4536 = vmatprep.subr.mxu0 %v1745_v43  ;;  %4514 = vmatpush2.msra.mxu1 %v1360_v11  ;;  %v6772_v12 = vadd.f32 %v4095_v10, %v6765_v3  ;;  %v1681_v3 = vld [vmem:[#allocation8 + $0x2368] sm:$0xff]  ;;  %v2304_v62 = vld [vmem:[#allocation8 + $0x36e0] sm:$0xff] }
 0x46f   :  { %4537 = vmatpush1.msra.mxu0 %v1744_v50  ;;  %4515 = vmatprep.subr.mxu1 %v1345_v55  ;;  %v2289_v43 = vld [vmem:[#allocation8 + $0x3668] sm:$0xff]  ;;  %v1648_v11 = vld [vmem:[#allocation8 + $0x2260] sm:$0xff] }
 0x470   :  { %4538 = vmatprep.subr.mxu0 %v1729_v0  ;;  %4516 = vmatpush2.msra.mxu1 %v1344_v4  ;;  %v2288_v50 = vld [vmem:[#allocation8 + $0x3660] sm:$0xff]  ;;  %v1633_v55 = vld [vmem:[#allocation8 + $0x21e8] sm:$0xff] }
 0x471   :  { %4539 = vmatpush1.msra.mxu0 %v1728_v41  ;;  %4517 = vmatprep.subr.mxu1 %v1329_v14  ;;  %v2273_v0 = vld [vmem:[#allocation8 + $0x35e8] sm:$0xff]  ;;  %v1632_v4 = vld [vmem:[#allocation8 + $0x21e0] sm:$0xff] }
 0x472   :  { %4540 = vmatprep.subr.mxu0 %v1713_v13  ;;  %4518 = vmatpush2.msra.mxu1 %v1328_v17  ;;  %v2272_v10 = vld [vmem:[#allocation8 + $0x35e0] sm:$0xff]  ;;  %v1617_v41 = vld [vmem:[#allocation8 + $0x2168] sm:$0xff] }
 0x473   :  { %4541 = vmatpush1.msra.mxu0 %v1712_v19  ;;  %4520 = vmatmul.mubr.f32.vlgmr.msra.gmra.mxu1 %v6620_v48  ;;  %v2257_v14 = vld [vmem:[#allocation8 + $0x3568] sm:$0xff]  ;;  %v1616_v13 = vld [vmem:[#allocation8 + $0x2160] sm:$0xff] }
 0x474   :  { %4542 = vmatprep.subr.mxu0 %v1697_v7  ;;  %4597 = vmatprep.subr.mxu1 %v2337_v25  ;;  %v2256_v17 = vld [vmem:[#allocation8 + $0x3560] sm:$0xff]  ;;  %v1601_v19 = vld [vmem:[#allocation8 + $0x20e8] sm:$0xff] }
 0x475   :  { %4543 = vmatpush1.msra.mxu0 %v1696_v28  ;;  %4598 = vmatpush1.msra.mxu1 %v2336_v22  ;;  %v2241_v7 = vld [vmem:[#allocation8 + $0x34e8] sm:$0xff]  ;;  %v1600_v25 = vld [vmem:[#allocation8 + $0x20e0] sm:$0xff] }
 0x476   :  { %4661 = vmatprep.mubr.f32.mxu1 %v6644_v21  ;;  %4544 = vmatprep.subr.mxu0 %v1681_v3  ;;  %v2240_v28 = vld [vmem:[#allocation8 + $0x34e0] sm:$0xff]  ;;  %v1585_v22 = vld [vmem:[#allocation8 + $0x2068] sm:$0xff] }
 0x477   :  { %4599 = vmatprep.subr.mxu1 %v2321_v34  ;;  %4545 = vmatpush1.msra.mxu0 %v1680_v45  ;;  %v2225_v3 = vld [vmem:[#allocation8 + $0x3468] sm:$0xff]  ;;  %v1584_v34 = vld [vmem:[#allocation8 + $0x2060] sm:$0xff] }
 0x478   :  { %4600 = vmatpush1.msra.mxu1 %v2320_v49  ;;  %4546 = vmatprep.subr.mxu0 %v1665_v52  ;;  %v2224_v45 = vld [vmem:[#allocation8 + $0x3460] sm:$0xff]  ;;  %v2081_v49 = vld [vmem:[#allocation8 + $0x2fe8] sm:$0xff] }
 0x479   :  { %4601 = vmatprep.subr.mxu1 %v2305_v56  ;;  %4547 = vmatpush1.msra.mxu0 %v1664_v59  ;;  %v2209_v52 = vld [vmem:[#allocation8 + $0x33e8] sm:$0xff]  ;;  %v2080_v56 = vld [vmem:[#allocation8 + $0x2fe0] sm:$0xff] }
 0x47a   :  { %4602 = vmatpush1.msra.mxu1 %v2304_v62  ;;  %4548 = vmatprep.subr.mxu0 %v1649_v1  ;;  %v2208_v59 = vld [vmem:[#allocation8 + $0x33e0] sm:$0xff]  ;;  %v2065_v62 = vld [vmem:[#allocation8 + $0x2f68] sm:$0xff] }
 0x47b   :  { %4603 = vmatprep.subr.mxu1 %v2289_v43  ;;  %4549 = vmatpush1.msra.mxu0 %v1648_v11  ;;  %v2193_v1 = vld [vmem:[#allocation8 + $0x3368] sm:$0xff]  ;;  %v2064_v43 = vld [vmem:[#allocation8 + $0x2f60] sm:$0xff] }
 0x47c   :  { %4604 = vmatpush1.msra.mxu1 %v2288_v50  ;;  %4550 = vmatprep.subr.mxu0 %v1633_v55  ;;  %v2192_v11 = vld [vmem:[#allocation8 + $0x3360] sm:$0xff]  ;;  %v2049_v50 = vld [vmem:[#allocation8 + $0x2ee8] sm:$0xff] }
 0x47d   :  { %4605 = vmatprep.subr.mxu1 %v2273_v0  ;;  %4551 = vmatpush1.msra.mxu0 %v1632_v4  ;;  %v2177_v55 = vld [vmem:[#allocation8 + $0x32e8] sm:$0xff]  ;;  %v2048_v0 = vld [vmem:[#allocation8 + $0x2ee0] sm:$0xff] }
 0x47e   :  { %4606 = vmatpush1.msra.mxu1 %v2272_v10  ;;  %4552 = vmatprep.subr.mxu0 %v1617_v41  ;;  %v2176_v4 = vld [vmem:[#allocation8 + $0x32e0] sm:$0xff]  ;;  %v2033_v10 = vld [vmem:[#allocation8 + $0x2e68] sm:$0xff] }
 0x47f   :  { %4607 = vmatprep.subr.mxu1 %v2257_v14  ;;  %4553 = vmatpush1.msra.mxu0 %v1616_v13  ;;  %v2161_v41 = vld [vmem:[#allocation8 + $0x3268] sm:$0xff]  ;;  %v2032_v14 = vld [vmem:[#allocation8 + $0x2e60] sm:$0xff] }
 0x480   :  { %4608 = vmatpush1.msra.mxu1 %v2256_v17  ;;  %4554 = vmatprep.subr.mxu0 %v1601_v19  ;;  %v2160_v13 = vld [vmem:[#allocation8 + $0x3260] sm:$0xff]  ;;  %v2017_v17 = vld [vmem:[#allocation8 + $0x2de8] sm:$0xff] }
 0x481   :  { %4609 = vmatprep.subr.mxu1 %v2241_v7  ;;  %4555 = vmatpush1.msra.mxu0 %v1600_v25  ;;  %v2145_v19 = vld [vmem:[#allocation8 + $0x31e8] sm:$0xff]  ;;  %v2016_v7 = vld [vmem:[#allocation8 + $0x2de0] sm:$0xff] }
 0x482   :  { %4610 = vmatpush1.msra.mxu1 %v2240_v28  ;;  %4556 = vmatprep.subr.mxu0 %v1585_v22  ;;  %v2144_v25 = vld [vmem:[#allocation8 + $0x31e0] sm:$0xff]  ;;  %v2001_v28 = vld [vmem:[#allocation8 + $0x2d68] sm:$0xff] }
 0x483   :  { %4611 = vmatprep.subr.mxu1 %v2225_v3  ;;  %4557 = vmatpush1.msra.mxu0 %v1584_v34  ;;  %v2129_v22 = vld [vmem:[#allocation8 + $0x3168] sm:$0xff]  ;;  %v2000_v3 = vld [vmem:[#allocation8 + $0x2d60] sm:$0xff] }
 0x484   :  { %4612 = vmatpush1.msra.mxu1 %v2224_v45  ;;  %4558 = vmatprep.subr.mxu0 %v2081_v49  ;;  %v2128_v34 = vld [vmem:[#allocation8 + $0x3160] sm:$0xff]  ;;  %v1985_v45 = vld [vmem:[#allocation8 + $0x2ce8] sm:$0xff] }
 0x485   :  { %4613 = vmatprep.subr.mxu1 %v2209_v52  ;;  %4559 = vmatpush2.msra.mxu0 %v2080_v56  ;;  %v2113_v49 = vld [vmem:[#allocation8 + $0x30e8] sm:$0xff]  ;;  %v1984_v52 = vld [vmem:[#allocation8 + $0x2ce0] sm:$0xff] }
 0x486   :  { %4614 = vmatpush1.msra.mxu1 %v2208_v59  ;;  %4560 = vmatprep.subr.mxu0 %v2065_v62  ;;  %v2112_v56 = vld [vmem:[#allocation8 + $0x30e0] sm:$0xff]  ;;  %v1969_v59 = vld [vmem:[#allocation8 + $0x2c68] sm:$0xff] }
 0x487   :  { %4615 = vmatprep.subr.mxu1 %v2193_v1  ;;  %4561 = vmatpush2.msra.mxu0 %v2064_v43  ;;  %v2097_v62 = vld [vmem:[#allocation8 + $0x3068] sm:$0xff]  ;;  %v1968_v1 = vld [vmem:[#allocation8 + $0x2c60] sm:$0xff] }
 0x488   :  { %4616 = vmatpush1.msra.mxu1 %v2192_v11  ;;  %4562 = vmatprep.subr.mxu0 %v2049_v50  ;;  %v2096_v43 = vld [vmem:[#allocation8 + $0x3060] sm:$0xff]  ;;  %v1953_v11 = vld [vmem:[#allocation8 + $0x2be8] sm:$0xff] }
 0x489   :  { %4617 = vmatprep.subr.mxu1 %v2177_v55  ;;  %4563 = vmatpush2.msra.mxu0 %v2048_v0  ;;  %v2593_v50 = vld [vmem:[#allocation8 + $0x3fe8] sm:$0xff]  ;;  %v1952_v55 = vld [vmem:[#allocation8 + $0x2be0] sm:$0xff] }
 0x48a   :  { %4618 = vmatpush1.msra.mxu1 %v2176_v4  ;;  %4564 = vmatprep.subr.mxu0 %v2033_v10  ;;  %v2592_v0 = vld [vmem:[#allocation8 + $0x3fe0] sm:$0xff]  ;;  %v1937_v4 = vld [vmem:[#allocation8 + $0x2b68] sm:$0xff] }
 0x48b   :  { %4619 = vmatprep.subr.mxu1 %v2161_v41  ;;  %4565 = vmatpush2.msra.mxu0 %v2032_v14  ;;  %v2577_v10 = vld [vmem:[#allocation8 + $0x3f68] sm:$0xff]  ;;  %v1936_v41 = vld [vmem:[#allocation8 + $0x2b60] sm:$0xff] }
 0x48c   :  { %4620 = vmatpush1.msra.mxu1 %v2160_v13  ;;  %4566 = vmatprep.subr.mxu0 %v2017_v17  ;;  %v2576_v14 = vld [vmem:[#allocation8 + $0x3f60] sm:$0xff]  ;;  %v1921_v13 = vld [vmem:[#allocation8 + $0x2ae8] sm:$0xff] }
 0x48d   :  { %4621 = vmatprep.subr.mxu1 %v2145_v19  ;;  %4567 = vmatpush2.msra.mxu0 %v2016_v7  ;;  %v2561_v17 = vld [vmem:[#allocation8 + $0x3ee8] sm:$0xff]  ;;  %v1920_v19 = vld [vmem:[#allocation8 + $0x2ae0] sm:$0xff] }
 0x48e   :  { %4622 = vmatpush1.msra.mxu1 %v2144_v25  ;;  %4568 = vmatprep.subr.mxu0 %v2001_v28  ;;  %v2560_v7 = vld [vmem:[#allocation8 + $0x3ee0] sm:$0xff]  ;;  %v1905_v25 = vld [vmem:[#allocation8 + $0x2a68] sm:$0xff] }
 0x48f   :  { %4623 = vmatprep.subr.mxu1 %v2129_v22  ;;  %4569 = vmatpush2.msra.mxu0 %v2000_v3  ;;  %v2545_v28 = vld [vmem:[#allocation8 + $0x3e68] sm:$0xff]  ;;  %v1904_v22 = vld [vmem:[#allocation8 + $0x2a60] sm:$0xff] }
 0x490   :  { %4624 = vmatpush1.msra.mxu1 %v2128_v34  ;;  %4570 = vmatprep.subr.mxu0 %v1985_v45  ;;  %v2544_v3 = vld [vmem:[#allocation8 + $0x3e60] sm:$0xff]  ;;  %v1889_v34 = vld [vmem:[#allocation8 + $0x29e8] sm:$0xff] }
 0x491   :  { %4625 = vmatprep.subr.mxu1 %v2113_v49  ;;  %4571 = vmatpush2.msra.mxu0 %v1984_v52  ;;  %v2529_v45 = vld [vmem:[#allocation8 + $0x3de8] sm:$0xff]  ;;  %v1888_v49 = vld [vmem:[#allocation8 + $0x29e0] sm:$0xff] }
 0x492   :  { %4626 = vmatpush1.msra.mxu1 %v2112_v56  ;;  %4572 = vmatprep.subr.mxu0 %v1969_v59  ;;  %v2528_v52 = vld [vmem:[#allocation8 + $0x3de0] sm:$0xff]  ;;  %v1873_v56 = vld [vmem:[#allocation8 + $0x2968] sm:$0xff] }
 0x493   :  { %4627 = vmatprep.subr.mxu1 %v2097_v62  ;;  %4573 = vmatpush2.msra.mxu0 %v1968_v1  ;;  %v2513_v59 = vld [vmem:[#allocation8 + $0x3d68] sm:$0xff]  ;;  %v1872_v62 = vld [vmem:[#allocation8 + $0x2960] sm:$0xff] }
 0x494   :  { %4628 = vmatpush1.msra.mxu1 %v2096_v43  ;;  %4574 = vmatprep.subr.mxu0 %v1953_v11  ;;  %v2512_v1 = vld [vmem:[#allocation8 + $0x3d60] sm:$0xff]  ;;  %v1857_v43 = vld [vmem:[#allocation8 + $0x28e8] sm:$0xff] }
 0x495   :  { %4629 = vmatprep.subr.mxu1 %v2593_v50  ;;  %4575 = vmatpush2.msra.mxu0 %v1952_v55  ;;  %v2497_v11 = vld [vmem:[#allocation8 + $0x3ce8] sm:$0xff]  ;;  %v1856_v50 = vld [vmem:[#allocation8 + $0x28e0] sm:$0xff] }
 0x496   :  { %4630 = vmatpush2.msra.mxu1 %v2592_v0  ;;  %4576 = vmatprep.subr.mxu0 %v1937_v4  ;;  %v2496_v55 = vld [vmem:[#allocation8 + $0x3ce0] sm:$0xff]  ;;  %v1841_v0 = vld [vmem:[#allocation8 + $0x2868] sm:$0xff] }
 0x497   :  { %4631 = vmatprep.subr.mxu1 %v2577_v10  ;;  %4577 = vmatpush2.msra.mxu0 %v1936_v41  ;;  %v2481_v4 = vld [vmem:[#allocation8 + $0x3c68] sm:$0xff]  ;;  %v1840_v10 = vld [vmem:[#allocation8 + $0x2860] sm:$0xff] }
 0x498   :  { %4632 = vmatpush2.msra.mxu1 %v2576_v14  ;;  %4578 = vmatprep.subr.mxu0 %v1921_v13  ;;  %v2480_v41 = vld [vmem:[#allocation8 + $0x3c60] sm:$0xff]  ;;  %v2465_v14 = vld [vmem:[#allocation8 + $0x3be8] sm:$0xff]  ;;  %v803_v13 = vld [vmem:[#allocation8 + $0x7f8] sm:$0xff] }
 0x499   :  { %4633 = vmatprep.subr.mxu1 %v2561_v17  ;;  %4579 = vmatpush2.msra.mxu0 %v1920_v19  ;;  %v2464_v17 = vld [vmem:[#allocation8 + $0x3be0] sm:$0xff]  ;;  %v802_v19 = vld [vmem:[#allocation8 + $0x7f0] sm:$0xff] }
 0x49a   :  { %4634 = vmatpush2.msra.mxu1 %v2560_v7  ;;  %4580 = vmatprep.subr.mxu0 %v1905_v25  ;;  %v2449_v7 = vld [vmem:[#allocation8 + $0x3b68] sm:$0xff]  ;;  %v787_v25 = vld [vmem:[#allocation8 + $0x778] sm:$0xff] }
 0x49b   :  { %4635 = vmatprep.subr.mxu1 %v2545_v28  ;;  %4581 = vmatpush2.msra.mxu0 %v1904_v22  ;;  %v2448_v28 = vld [vmem:[#allocation8 + $0x3b60] sm:$0xff]  ;;  %v786_v22 = vld [vmem:[#allocation8 + $0x770] sm:$0xff] }
 0x49c   :  { %4636 = vmatpush2.msra.mxu1 %v2544_v3  ;;  %4582 = vmatprep.subr.mxu0 %v1889_v34  ;;  %v2433_v3 = vld [vmem:[#allocation8 + $0x3ae8] sm:$0xff]  ;;  %v771_v34 = vld [vmem:[#allocation8 + $0x6f8] sm:$0xff] }
 0x49d   :  { %4637 = vmatprep.subr.mxu1 %v2529_v45  ;;  %4583 = vmatpush2.msra.mxu0 %v1888_v49  ;;  %v2432_v45 = vld [vmem:[#allocation8 + $0x3ae0] sm:$0xff]  ;;  %v770_v49 = vld [vmem:[#allocation8 + $0x6f0] sm:$0xff] }
 0x49e   :  { %4638 = vmatpush2.msra.mxu1 %v2528_v52  ;;  %4584 = vmatprep.subr.mxu0 %v1873_v56  ;;  %v2417_v52 = vld [vmem:[#allocation8 + $0x3a68] sm:$0xff]  ;;  %v6778_v56 = vpop.f32.mrf.mxu0 }
 0x49f   :  { %4639 = vmatprep.subr.mxu1 %v2513_v59  ;;  %4585 = vmatpush2.msra.mxu0 %v1872_v62  ;;  %v755_v59 = vld [vmem:[#allocation8 + $0x678] sm:$0xff]  ;;  %v2416_v62 = vld [vmem:[#allocation8 + $0x3a60] sm:$0xff] }
 0x4a0   :  { %4640 = vmatpush2.msra.mxu1 %v2512_v1  ;;  %4586 = vmatprep.subr.mxu0 %v1857_v43  ;;  %v6252_v1 = vld [vmem:[#allocation10 + $0x8] sm:$0xff] }
 0x4a1   :  { %4641 = vmatprep.subr.mxu1 %v2497_v11  ;;  %4587 = vmatpush2.msra.mxu0 %v1856_v50  ;;  %v2643_v43 = vrot.slane %v6252_v1, %v6602_v24  ;;  %v754_v11 = vld [vmem:[#allocation8 + $0x670] sm:$0xff]  ;;  %v4166_v50 = vpop.f32.mrf.mxu0 }
 0x4a2   :  { %4642 = vmatpush2.msra.mxu1 %v2496_v55  ;;  %4588 = vmatprep.subr.mxu0 %v1841_v0  ;;  %v739_v55 = vld [vmem:[#allocation8 + $0x5f8] sm:$0xff]  ;;  %v2400_v0 = vld [vmem:[#allocation8 + $0x39e0] sm:$0xff]  ;;  %v674_v1 = vld [vmem:[#allocation8 + $0x3f0] sm:$0xff] }
 0x4a3   :  { %4643 = vmatprep.subr.mxu1 %v2481_v4  ;;  %4589 = vmatpush2.msra.mxu0 %v1840_v10  ;;  %v738_v4 = vld [vmem:[#allocation8 + $0x5f0] sm:$0xff]  ;;  %v2385_v10 = vld [vmem:[#allocation8 + $0x3968] sm:$0xff]  ;;  %v4167_v24 = vadd.f32 %v4166_v50, %v2643_v43 }
 0x4a4   :  { %4644 = vmatpush2.msra.mxu1 %v2480_v41  ;;  %4591 = vmatmul.mubr.f32.vlgmr.msra.gmra.mxu0 %v6630_v39  ;;  %v6781_v41 = vpop.f32.mrf.mxu1  ;;  %v1314_v43 = vld [vmem:[#allocation8 + $0x17f0] sm:$0xff] }
 0x4a5   :  { %4645 = vmatprep.subr.mxu1 %v2465_v14  ;;  %4668 = vmatprep.subr.mxu0 %v803_v13  ;;  %v723_v14 = vld [vmem:[#allocation8 + $0x578] sm:$0xff]  ;;  %v2384_v13 = vld [vmem:[#allocation8 + $0x3960] sm:$0xff]  ;;  %v658_v50 = vld [vmem:[#allocation8 + $0x370] sm:$0xff] }
 0x4a6   :  { %4646 = vmatpush2.msra.mxu1 %v2464_v17  ;;  %4669 = vmatpush1.msra.mxu0 %v802_v19  ;;  %v722_v17 = vld [vmem:[#allocation8 + $0x570] sm:$0xff]  ;;  %v2369_v19 = vld [vmem:[#allocation8 + $0x38e8] sm:$0xff] }
 0x4a7   :  { %4732 = vmatprep.mubr.f32.mxu0 %v6592_v15  ;;  %4647 = vmatprep.subr.mxu1 %v2449_v7  ;;  %v2401_v15 = vld [vmem:[#allocation8 + $0x39e8] sm:$0xff]  ;;  %v707_v7 = vld [vmem:[#allocation8 + $0x4f8] sm:$0xff] }
 0x4a8   :  { %4670 = vmatprep.subr.mxu0 %v787_v25  ;;  %4648 = vmatpush2.msra.mxu1 %v2448_v28  ;;  %v2368_v25 = vld [vmem:[#allocation8 + $0x38e0] sm:$0xff] }
 0x4a9   :  { %4671 = vmatpush1.msra.mxu0 %v786_v22  ;;  %4649 = vmatprep.subr.mxu1 %v2433_v3  ;;  %v706_v22 = vld [vmem:[#allocation8 + $0x4f0] sm:$0xff]  ;;  %v2353_v3 = vld [vmem:[#allocation8 + $0x3868] sm:$0xff] }
 0x4aa   :  { %4672 = vmatprep.subr.mxu0 %v771_v34  ;;  %4650 = vmatpush2.msra.mxu1 %v2432_v45  ;;  %v691_v45 = vld [vmem:[#allocation8 + $0x478] sm:$0xff] }
 0x4ab   :  { %4673 = vmatpush1.msra.mxu0 %v770_v49  ;;  %4651 = vmatprep.subr.mxu1 %v2417_v52  ;;  %v2352_v49 = vld [vmem:[#allocation8 + $0x3860] sm:$0xff]  ;;  %v690_v52 = vld [vmem:[#allocation8 + $0x470] sm:$0xff] }
 0x4ac   :  { %4674 = vmatprep.subr.mxu0 %v755_v59  ;;  %4652 = vmatpush2.msra.mxu1 %v2416_v62  ;;  %v675_v59 = vld [vmem:[#allocation8 + $0x3f8] sm:$0xff] }
 0x4ad   :  { %4675 = vmatpush1.msra.mxu0 %v754_v11  ;;  %4653 = vmatprep.subr.mxu1 %v2401_v15  ;;  %v1315_v62 = vld [vmem:[#allocation8 + $0x17f8] sm:$0xff] }
 0x4ae   :  { %4676 = vmatprep.subr.mxu0 %v739_v55  ;;  %4654 = vmatpush2.msra.mxu1 %v2400_v0  ;;  %v659_v11 = vld [vmem:[#allocation8 + $0x378] sm:$0xff]  ;;  %v1298_v55 = vld [vmem:[#allocation8 + $0x1770] sm:$0xff] }
 0x4af   :  { %4677 = vmatpush1.msra.mxu0 %v738_v4  ;;  %4655 = vmatprep.subr.mxu1 %v2385_v10  ;;  %v4237_v28 = vpop.f32.mrf.mxu1  ;;  %v1299_v15 = vld [vmem:[#allocation8 + $0x1778] sm:$0xff]  ;;  %v642_v10 = vld [vmem:[#allocation8 + $0x2f0] sm:$0xff] }
 0x4b0   :  { %4678 = vmatprep.subr.mxu0 %v723_v14  ;;  %4656 = vmatpush2.msra.mxu1 %v2384_v13  ;;  %v6783_v34 = vadd.f32 %v4237_v28, %v4167_v24  ;;  %v643_v0 = vld [vmem:[#allocation8 + $0x2f8] sm:$0xff]  ;;  %v1282_v14 = vld [vmem:[#allocation8 + $0x16f0] sm:$0xff] }
 0x4b1   :  { %4679 = vmatpush1.msra.mxu0 %v722_v17  ;;  %4657 = vmatprep.subr.mxu1 %v2369_v19  ;;  %v1283_v4 = vld [vmem:[#allocation8 + $0x16f8] sm:$0xff]  ;;  %v626_v17 = vld [vmem:[#allocation8 + $0x270] sm:$0xff] }
 0x4b2   :  { %4680 = vmatprep.subr.mxu0 %v707_v7  ;;  %4658 = vmatpush2.msra.mxu1 %v2368_v25  ;;  %v627_v13 = vld [vmem:[#allocation8 + $0x278] sm:$0xff]  ;;  %v1266_v19 = vld [vmem:[#allocation8 + $0x1670] sm:$0xff] }
 0x4b3   :  { %4681 = vmatpush1.msra.mxu0 %v706_v22  ;;  %4659 = vmatprep.subr.mxu1 %v2353_v3  ;;  %v1267_v24 = vld [vmem:[#allocation8 + $0x1678] sm:$0xff]  ;;  %v610_v28 = vld [vmem:[#allocation8 + $0x1f0] sm:$0xff] }
 0x4b4   :  { %4682 = vmatprep.subr.mxu0 %v691_v45  ;;  %4660 = vmatpush2.msra.mxu1 %v2352_v49  ;;  %v611_v7 = vld [vmem:[#allocation8 + $0x1f8] sm:$0xff]  ;;  %v594_v45 = vld [vmem:[#allocation8 + $0x170] sm:$0xff] }
 0x4b5   :  { %4683 = vmatpush1.msra.mxu0 %v690_v52  ;;  %4662 = vmatmul.mubr.f32.vlgmr.msra.gmra.mxu1 %v6646_v31  ;;  %v1251_v25 = vld [vmem:[#allocation8 + $0x15f8] sm:$0xff]  ;;  %v1234_v49 = vld [vmem:[#allocation8 + $0x1570] sm:$0xff] }
 0x4b6   :  { %4684 = vmatprep.subr.mxu0 %v675_v59  ;;  %4739 = vmatprep.subr.mxu1 %v1315_v62  ;;  %v595_v22 = vld [vmem:[#allocation8 + $0x178] sm:$0xff]  ;;  %v578_v62 = vld [vmem:[#allocation8 + $0xf0] sm:$0xff] }
 0x4b7   :  { %4685 = vmatpush1.msra.mxu0 %v674_v1  ;;  %4740 = vmatpush1.msra.mxu1 %v1314_v43  ;;  %v1235_v3 = vld [vmem:[#allocation8 + $0x1578] sm:$0xff]  ;;  %v1218_v1 = vld [vmem:[#allocation8 + $0x14f0] sm:$0xff] }
 0x4b8   :  { %4803 = vmatprep.mubr.f32.mxu1 %v6618_v46  ;;  %4686 = vmatprep.subr.mxu0 %v659_v11  ;;  %v1250_v46 = vld [vmem:[#allocation8 + $0x15f0] sm:$0xff]  ;;  %v579_v52 = vld [vmem:[#allocation8 + $0xf8] sm:$0xff] }
 0x4b9   :  { %4741 = vmatprep.subr.mxu1 %v1299_v15  ;;  %4687 = vmatpush1.msra.mxu0 %v658_v50  ;;  %v1219_v59 = vld [vmem:[#allocation8 + $0x14f8] sm:$0xff]  ;;  %v562_v15 = vld [vmem:[#allocation8 + $0x70] sm:$0xff] }
 0x4ba   :  { %4742 = vmatpush1.msra.mxu1 %v1298_v55  ;;  %4688 = vmatprep.subr.mxu0 %v643_v0  ;;  %v563_v43 = vld [vmem:[#allocation8 + $0x78] sm:$0xff]  ;;  %v1202_v50 = vld [vmem:[#allocation8 + $0x1470] sm:$0xff] }
 0x4bb   :  { %4743 = vmatprep.subr.mxu1 %v1283_v4  ;;  %4689 = vmatpush1.msra.mxu0 %v642_v10  ;;  %v1203_v11 = vld [vmem:[#allocation8 + $0x1478] sm:$0xff]  ;;  %v1058_v4 = vld [vmem:[#allocation8 + $0xff0] sm:$0xff] }
 0x4bc   :  { %4744 = vmatpush1.msra.mxu1 %v1282_v14  ;;  %4690 = vmatprep.subr.mxu0 %v627_v13  ;;  %v1059_v55 = vld [vmem:[#allocation8 + $0xff8] sm:$0xff]  ;;  %v1186_v10 = vld [vmem:[#allocation8 + $0x13f0] sm:$0xff] }
 0x4bd   :  { %4745 = vmatprep.subr.mxu1 %v1267_v24  ;;  %4691 = vmatpush1.msra.mxu0 %v626_v17  ;;  %v1187_v0 = vld [vmem:[#allocation8 + $0x13f8] sm:$0xff]  ;;  %v1042_v24 = vld [vmem:[#allocation8 + $0xf70] sm:$0xff] }
 0x4be   :  { %4746 = vmatpush1.msra.mxu1 %v1266_v19  ;;  %4692 = vmatprep.subr.mxu0 %v611_v7  ;;  %v1043_v14 = vld [vmem:[#allocation8 + $0xf78] sm:$0xff]  ;;  %v1170_v17 = vld [vmem:[#allocation8 + $0x1370] sm:$0xff] }
 0x4bf   :  { %4747 = vmatprep.subr.mxu1 %v1251_v25  ;;  %4693 = vmatpush1.msra.mxu0 %v610_v28  ;;  %v1171_v13 = vld [vmem:[#allocation8 + $0x1378] sm:$0xff]  ;;  %v1026_v25 = vld [vmem:[#allocation8 + $0xef0] sm:$0xff] }
 0x4c0   :  { %4748 = vmatpush1.msra.mxu1 %v1250_v46  ;;  %4694 = vmatprep.subr.mxu0 %v595_v22  ;;  %v1027_v19 = vld [vmem:[#allocation8 + $0xef8] sm:$0xff]  ;;  %v1154_v28 = vld [vmem:[#allocation8 + $0x12f0] sm:$0xff] }
 0x4c1   :  { %4749 = vmatprep.subr.mxu1 %v1235_v3  ;;  %4695 = vmatpush1.msra.mxu0 %v594_v45  ;;  %v1155_v7 = vld [vmem:[#allocation8 + $0x12f8] sm:$0xff]  ;;  %v1010_v3 = vld [vmem:[#allocation8 + $0xe70] sm:$0xff] }
 0x4c2   :  { %4750 = vmatpush1.msra.mxu1 %v1234_v49  ;;  %4696 = vmatprep.subr.mxu0 %v579_v52  ;;  %v1011_v46 = vld [vmem:[#allocation8 + $0xe78] sm:$0xff]  ;;  %v1138_v45 = vld [vmem:[#allocation8 + $0x1270] sm:$0xff] }
 0x4c3   :  { %4751 = vmatprep.subr.mxu1 %v1219_v59  ;;  %4697 = vmatpush1.msra.mxu0 %v578_v62  ;;  %v1139_v22 = vld [vmem:[#allocation8 + $0x1278] sm:$0xff]  ;;  %v994_v59 = vld [vmem:[#allocation8 + $0xdf0] sm:$0xff] }
 0x4c4   :  { %4752 = vmatpush1.msra.mxu1 %v1218_v1  ;;  %4698 = vmatprep.subr.mxu0 %v563_v43  ;;  %v995_v49 = vld [vmem:[#allocation8 + $0xdf8] sm:$0xff]  ;;  %v1122_v62 = vld [vmem:[#allocation8 + $0x11f0] sm:$0xff] }
 0x4c5   :  { %4753 = vmatprep.subr.mxu1 %v1203_v11  ;;  %4699 = vmatpush1.msra.mxu0 %v562_v15  ;;  %v1123_v52 = vld [vmem:[#allocation8 + $0x11f8] sm:$0xff]  ;;  %v978_v11 = vld [vmem:[#allocation8 + $0xd70] sm:$0xff] }
 0x4c6   :  { %4754 = vmatpush1.msra.mxu1 %v1202_v50  ;;  %4700 = vmatprep.subr.mxu0 %v1059_v55  ;;  %v979_v1 = vld [vmem:[#allocation8 + $0xd78] sm:$0xff]  ;;  %v1106_v15 = vld [vmem:[#allocation8 + $0x1170] sm:$0xff] }
 0x4c7   :  { %4755 = vmatprep.subr.mxu1 %v1187_v0  ;;  %4701 = vmatpush2.msra.mxu0 %v1058_v4  ;;  %v1107_v43 = vld [vmem:[#allocation8 + $0x1178] sm:$0xff]  ;;  %v962_v0 = vld [vmem:[#allocation8 + $0xcf0] sm:$0xff] }
 0x4c8   :  { %4756 = vmatpush1.msra.mxu1 %v1186_v10  ;;  %4702 = vmatprep.subr.mxu0 %v1043_v14  ;;  %v963_v50 = vld [vmem:[#allocation8 + $0xcf8] sm:$0xff]  ;;  %v1090_v4 = vld [vmem:[#allocation8 + $0x10f0] sm:$0xff] }
 0x4c9   :  { %4757 = vmatprep.subr.mxu1 %v1171_v13  ;;  %4703 = vmatpush2.msra.mxu0 %v1042_v24  ;;  %v1091_v55 = vld [vmem:[#allocation8 + $0x10f8] sm:$0xff]  ;;  %v946_v13 = vld [vmem:[#allocation8 + $0xc70] sm:$0xff] }
 0x4ca   :  { %4758 = vmatpush1.msra.mxu1 %v1170_v17  ;;  %4704 = vmatprep.subr.mxu0 %v1027_v19  ;;  %v947_v10 = vld [vmem:[#allocation8 + $0xc78] sm:$0xff]  ;;  %v1074_v24 = vld [vmem:[#allocation8 + $0x1070] sm:$0xff] }
 0x4cb   :  { %4759 = vmatprep.subr.mxu1 %v1155_v7  ;;  %4705 = vmatpush2.msra.mxu0 %v1026_v25  ;;  %v1075_v14 = vld [vmem:[#allocation8 + $0x1078] sm:$0xff]  ;;  %v930_v7 = vld [vmem:[#allocation8 + $0xbf0] sm:$0xff] }
 0x4cc   :  { %4760 = vmatpush1.msra.mxu1 %v1154_v28  ;;  %4706 = vmatprep.subr.mxu0 %v1011_v46  ;;  %v931_v17 = vld [vmem:[#allocation8 + $0xbf8] sm:$0xff]  ;;  %v1570_v25 = vld [vmem:[#allocation8 + $0x1ff0] sm:$0xff] }
 0x4cd   :  { %4761 = vmatprep.subr.mxu1 %v1139_v22  ;;  %4707 = vmatpush2.msra.mxu0 %v1010_v3  ;;  %v1571_v19 = vld [vmem:[#allocation8 + $0x1ff8] sm:$0xff]  ;;  %v914_v22 = vld [vmem:[#allocation8 + $0xb70] sm:$0xff] }
 0x4ce   :  { %4762 = vmatpush1.msra.mxu1 %v1138_v45  ;;  %4708 = vmatprep.subr.mxu0 %v995_v49  ;;  %v915_v28 = vld [vmem:[#allocation8 + $0xb78] sm:$0xff]  ;;  %v1554_v3 = vld [vmem:[#allocation8 + $0x1f70] sm:$0xff] }
 0x4cf   :  { %4763 = vmatprep.subr.mxu1 %v1123_v52  ;;  %4709 = vmatpush2.msra.mxu0 %v994_v59  ;;  %v1555_v46 = vld [vmem:[#allocation8 + $0x1f78] sm:$0xff]  ;;  %v898_v52 = vld [vmem:[#allocation8 + $0xaf0] sm:$0xff] }
 0x4d0   :  { %4764 = vmatpush1.msra.mxu1 %v1122_v62  ;;  %4710 = vmatprep.subr.mxu0 %v979_v1  ;;  %v899_v45 = vld [vmem:[#allocation8 + $0xaf8] sm:$0xff]  ;;  %v1538_v59 = vld [vmem:[#allocation8 + $0x1ef0] sm:$0xff] }
 0x4d1   :  { %4765 = vmatprep.subr.mxu1 %v1107_v43  ;;  %4711 = vmatpush2.msra.mxu0 %v978_v11  ;;  %v1539_v49 = vld [vmem:[#allocation8 + $0x1ef8] sm:$0xff]  ;;  %v882_v43 = vld [vmem:[#allocation8 + $0xa70] sm:$0xff] }
 0x4d2   :  { %4766 = vmatpush1.msra.mxu1 %v1106_v15  ;;  %4712 = vmatprep.subr.mxu0 %v963_v50  ;;  %v883_v62 = vld [vmem:[#allocation8 + $0xa78] sm:$0xff]  ;;  %v1522_v11 = vld [vmem:[#allocation8 + $0x1e70] sm:$0xff] }
 0x4d3   :  { %4767 = vmatprep.subr.mxu1 %v1091_v55  ;;  %4713 = vmatpush2.msra.mxu0 %v962_v0  ;;  %v1523_v1 = vld [vmem:[#allocation8 + $0x1e78] sm:$0xff]  ;;  %v866_v55 = vld [vmem:[#allocation8 + $0x9f0] sm:$0xff] }
 0x4d4   :  { %4768 = vmatpush1.msra.mxu1 %v1090_v4  ;;  %4714 = vmatprep.subr.mxu0 %v947_v10  ;;  %v867_v15 = vld [vmem:[#allocation8 + $0x9f8] sm:$0xff]  ;;  %v1506_v0 = vld [vmem:[#allocation8 + $0x1df0] sm:$0xff]  ;;  %v6787_v10 = vpop.f32.mrf.mxu0 }
 0x4d5   :  { %4769 = vmatprep.subr.mxu1 %v1075_v14  ;;  %4715 = vmatpush2.msra.mxu0 %v946_v13  ;;  %v1507_v50 = vld [vmem:[#allocation8 + $0x1df8] sm:$0xff]  ;;  %v850_v13 = vld [vmem:[#allocation8 + $0x970] sm:$0xff] }
 0x4d6   :  { %4770 = vmatpush1.msra.mxu1 %v1074_v24  ;;  %4716 = vmatprep.subr.mxu0 %v931_v17  ;;  %v851_v4 = vld [vmem:[#allocation8 + $0x978] sm:$0xff]  ;;  %v1490_v24 = vld [vmem:[#allocation8 + $0x1d70] sm:$0xff] }
 0x4d7   :  { %4771 = vmatprep.subr.mxu1 %v1571_v19  ;;  %4717 = vmatpush2.msra.mxu0 %v930_v7  ;;  %v1491_v14 = vld [vmem:[#allocation8 + $0x1d78] sm:$0xff]  ;;  %v834_v7 = vld [vmem:[#allocation8 + $0x8f0] sm:$0xff] }
 0x4d8   :  { %4772 = vmatpush2.msra.mxu1 %v1570_v25  ;;  %4718 = vmatprep.subr.mxu0 %v915_v28  ;;  %v835_v17 = vld [vmem:[#allocation8 + $0x8f8] sm:$0xff]  ;;  %v1474_v28 = vld [vmem:[#allocation8 + $0x1cf0] sm:$0xff] }
 0x4d9   :  { %4773 = vmatprep.subr.mxu1 %v1555_v46  ;;  %4719 = vmatpush2.msra.mxu0 %v914_v22  ;;  %v1475_v19 = vld [vmem:[#allocation8 + $0x1cf8] sm:$0xff] }
 0x4da   :  { %4774 = vmatpush2.msra.mxu1 %v1554_v3  ;;  %4720 = vmatprep.subr.mxu0 %v899_v45  ;;  %v819_v46 = vld [vmem:[#allocation8 + $0x878] sm:$0xff]  ;;  %v818_v45 = vld [vmem:[#allocation8 + $0x870] sm:$0xff] }
 0x4db   :  { %4775 = vmatprep.subr.mxu1 %v1539_v49  ;;  %4721 = vmatpush2.msra.mxu0 %v898_v52  ;;  %v1459_v3 = vld [vmem:[#allocation8 + $0x1c78] sm:$0xff]  ;;  %v1458_v49 = vld [vmem:[#allocation8 + $0x1c70] sm:$0xff] }
 0x4dc   :  { %4776 = vmatpush2.msra.mxu1 %v1538_v59  ;;  %4722 = vmatprep.subr.mxu0 %v883_v62  ;;  %v1443_v52 = vld [vmem:[#allocation8 + $0x1bf8] sm:$0xff]  ;;  %v1442_v62 = vld [vmem:[#allocation8 + $0x1bf0] sm:$0xff] }
 0x4dd   :  { %4777 = vmatprep.subr.mxu1 %v1523_v1  ;;  %4723 = vmatpush2.msra.mxu0 %v882_v43  ;;  %v1827_v59 = vld [vmem:[#allocation8 + $0x27f8] sm:$0xff]  ;;  %v1826_v1 = vld [vmem:[#allocation8 + $0x27f0] sm:$0xff] }
 0x4de   :  { %4778 = vmatpush2.msra.mxu1 %v1522_v11  ;;  %4724 = vmatprep.subr.mxu0 %v867_v15  ;;  %v1811_v43 = vld [vmem:[#allocation8 + $0x2778] sm:$0xff]  ;;  %v1426_v11 = vld [vmem:[#allocation8 + $0x1b70] sm:$0xff] }
 0x4df   :  { %4779 = vmatprep.subr.mxu1 %v1507_v50  ;;  %4725 = vmatpush2.msra.mxu0 %v866_v55  ;;  %v1810_v15 = vld [vmem:[#allocation8 + $0x2770] sm:$0xff]  ;;  %v1411_v50 = vld [vmem:[#allocation8 + $0x1af8] sm:$0xff] }
 0x4e0   :  { %4780 = vmatpush2.msra.mxu1 %v1506_v0  ;;  %4726 = vmatprep.subr.mxu0 %v851_v4  ;;  %v4308_v25 = vpop.f32.mrf.mxu0  ;;  %v1795_v55 = vld [vmem:[#allocation8 + $0x26f8] sm:$0xff]  ;;  %v1410_v0 = vld [vmem:[#allocation8 + $0x1af0] sm:$0xff] }
 0x4e1   :  { %4781 = vmatprep.subr.mxu1 %v1491_v14  ;;  %4727 = vmatpush2.msra.mxu0 %v850_v13  ;;  %v6790_v22 = vadd.f32 %v4308_v25, %v6783_v34  ;;  %v1427_v34 = vld [vmem:[#allocation8 + $0x1b78] sm:$0xff]  ;;  %v1794_v4 = vld [vmem:[#allocation8 + $0x26f0] sm:$0xff] }
 0x4e2   :  { %4782 = vmatpush2.msra.mxu1 %v1490_v24  ;;  %4728 = vmatprep.subr.mxu0 %v835_v17  ;;  %v1395_v14 = vld [vmem:[#allocation8 + $0x1a78] sm:$0xff]  ;;  %v1394_v13 = vld [vmem:[#allocation8 + $0x1a70] sm:$0xff] }
 0x4e3   :  { %4783 = vmatprep.subr.mxu1 %v1475_v19  ;;  %4729 = vmatpush2.msra.mxu0 %v834_v7  ;;  %v1778_v24 = vld [vmem:[#allocation8 + $0x2670] sm:$0xff]  ;;  %v1379_v17 = vld [vmem:[#allocation8 + $0x19f8] sm:$0xff] }
 0x4e4   :  { %4784 = vmatpush2.msra.mxu1 %v1474_v28  ;;  %4730 = vmatprep.subr.mxu0 %v819_v46  ;;  %v1763_v19 = vld [vmem:[#allocation8 + $0x25f8] sm:$0xff]  ;;  %v1378_v7 = vld [vmem:[#allocation8 + $0x19f0] sm:$0xff]  ;;  %v6794_v28 = vpop.f32.mrf.mxu1 }
 0x4e5   :  { %4785 = vmatprep.subr.mxu1 %v1459_v3  ;;  %4731 = vmatpush2.msra.mxu0 %v818_v45  ;;  %v1363_v25 = vld [vmem:[#allocation8 + $0x1978] sm:$0xff]  ;;  %v1362_v3 = vld [vmem:[#allocation8 + $0x1970] sm:$0xff] }
 0x4e6   :  { %4786 = vmatpush2.msra.mxu1 %v1458_v49  ;;  %4733 = vmatmul.mubr.f32.vlgmr.msra.gmra.mxu0 %v6594_v16  ;;  %v1779_v16 = vld [vmem:[#allocation8 + $0x2678] sm:$0xff]  ;;  %v1746_v45 = vld [vmem:[#allocation8 + $0x2570] sm:$0xff] }
 0x4e7   :  { %4787 = vmatprep.subr.mxu1 %v1443_v52  ;;  %4810 = vmatprep.subr.mxu0 %v1827_v59  ;;  %v1747_v46 = vld [vmem:[#allocation8 + $0x2578] sm:$0xff]  ;;  %v1346_v59 = vld [vmem:[#allocation8 + $0x18f0] sm:$0xff] }
 0x4e8   :  { %4788 = vmatpush2.msra.mxu1 %v1442_v62  ;;  %4811 = vmatpush1.msra.mxu0 %v1826_v1  ;;  %v1347_v49 = vld [vmem:[#allocation8 + $0x18f8] sm:$0xff]  ;;  %v1730_v1 = vld [vmem:[#allocation8 + $0x24f0] sm:$0xff] }
 0x4e9   :  { %4874 = vmatprep.mubr.f32.mxu0 %v6615_v42  ;;  %4789 = vmatprep.subr.mxu1 %v1427_v34  ;;  %v1762_v42 = vld [vmem:[#allocation8 + $0x25f0] sm:$0xff]  ;;  %v1731_v52 = vld [vmem:[#allocation8 + $0x24f8] sm:$0xff] }
 0x4ea   :  { %4812 = vmatprep.subr.mxu0 %v1811_v43  ;;  %4790 = vmatpush2.msra.mxu1 %v1426_v11  ;;  %v1331_v34 = vld [vmem:[#allocation8 + $0x1878] sm:$0xff] }
 0x4eb   :  { %4813 = vmatpush1.msra.mxu0 %v1810_v15  ;;  %4791 = vmatprep.subr.mxu1 %v1411_v50  ;;  %v1715_v11 = vld [vmem:[#allocation8 + $0x2478] sm:$0xff]  ;;  %v1330_v15 = vld [vmem:[#allocation8 + $0x1870] sm:$0xff] }
 0x4ec   :  { %4814 = vmatprep.subr.mxu0 %v1795_v55  ;;  %4792 = vmatpush2.msra.mxu1 %v1410_v0  ;;  %v1714_v50 = vld [vmem:[#allocation8 + $0x2470] sm:$0xff]  ;;  %v1699_v55 = vld [vmem:[#allocation8 + $0x23f8] sm:$0xff] }
 0x4ed   :  { %4815 = vmatpush1.msra.mxu0 %v1794_v4  ;;  %4793 = vmatprep.subr.mxu1 %v1395_v14  ;;  %v2339_v0 = vld [vmem:[#allocation8 + $0x37f8] sm:$0xff]  ;;  %v1698_v4 = vld [vmem:[#allocation8 + $0x23f0] sm:$0xff] }
 0x4ee   :  { %4816 = vmatprep.subr.mxu0 %v1779_v16  ;;  %4794 = vmatpush2.msra.mxu1 %v1394_v13  ;;  %v2338_v14 = vld [vmem:[#allocation8 + $0x37f0] sm:$0xff]  ;;  %v2323_v16 = vld [vmem:[#allocation8 + $0x3778] sm:$0xff] }
 0x4ef   :  { %4817 = vmatpush1.msra.mxu0 %v1778_v24  ;;  %4795 = vmatprep.subr.mxu1 %v1379_v17  ;;  %v1682_v13 = vld [vmem:[#allocation8 + $0x2370] sm:$0xff]  ;;  %v1667_v17 = vld [vmem:[#allocation8 + $0x22f8] sm:$0xff] }
 0x4f0   :  { %4818 = vmatprep.subr.mxu0 %v1763_v19  ;;  %4796 = vmatpush2.msra.mxu1 %v1378_v7  ;;  %v2322_v24 = vld [vmem:[#allocation8 + $0x3770] sm:$0xff]  ;;  %v2307_v19 = vld [vmem:[#allocation8 + $0x36f8] sm:$0xff] }
 0x4f1   :  { %4819 = vmatpush1.msra.mxu0 %v1762_v42  ;;  %4797 = vmatprep.subr.mxu1 %v1363_v25  ;;  %v4379_v62 = vpop.f32.mrf.mxu1  ;;  %v1666_v7 = vld [vmem:[#allocation8 + $0x22f0] sm:$0xff]  ;;  %v1651_v25 = vld [vmem:[#allocation8 + $0x2278] sm:$0xff] }
 0x4f2   :  { %4820 = vmatprep.subr.mxu0 %v1747_v46  ;;  %4798 = vmatpush2.msra.mxu1 %v1362_v3  ;;  %v6797_v43 = vadd.f32 %v4379_v62, %v6790_v22  ;;  %v1683_v22 = vld [vmem:[#allocation8 + $0x2378] sm:$0xff]  ;;  %v2306_v42 = vld [vmem:[#allocation8 + $0x36f0] sm:$0xff] }
 0x4f3   :  { %4821 = vmatpush1.msra.mxu0 %v1746_v45  ;;  %4799 = vmatprep.subr.mxu1 %v1347_v49  ;;  %v1650_v46 = vld [vmem:[#allocation8 + $0x2270] sm:$0xff]  ;;  %v1635_v45 = vld [vmem:[#allocation8 + $0x21f8] sm:$0xff] }
 0x4f4   :  { %4822 = vmatprep.subr.mxu0 %v1731_v52  ;;  %4800 = vmatpush2.msra.mxu1 %v1346_v59  ;;  %v2290_v3 = vld [vmem:[#allocation8 + $0x3670] sm:$0xff]  ;;  %v2275_v49 = vld [vmem:[#allocation8 + $0x35f8] sm:$0xff] }
 0x4f5   :  { %4823 = vmatpush1.msra.mxu0 %v1730_v1  ;;  %4801 = vmatprep.subr.mxu1 %v1331_v34  ;;  %v1634_v52 = vld [vmem:[#allocation8 + $0x21f0] sm:$0xff]  ;;  %v1619_v59 = vld [vmem:[#allocation8 + $0x2178] sm:$0xff] }
 0x4f6   :  { %4824 = vmatprep.subr.mxu0 %v1715_v11  ;;  %4802 = vmatpush2.msra.mxu1 %v1330_v15  ;;  %v2259_v62 = vld [vmem:[#allocation8 + $0x3578] sm:$0xff]  ;;  %v1618_v1 = vld [vmem:[#allocation8 + $0x2170] sm:$0xff] }
 0x4f7   :  { %4825 = vmatpush1.msra.mxu0 %v1714_v50  ;;  %4804 = vmatmul.mubr.f32.vlgmr.msra.gmra.mxu1 %v6620_v48  ;;  %v2291_v48 = vld [vmem:[#allocation8 + $0x3678] sm:$0xff]  ;;  %v2258_v34 = vld [vmem:[#allocation8 + $0x3570] sm:$0xff] }
 0x4f8   :  { %4826 = vmatprep.subr.mxu0 %v1699_v55  ;;  %4881 = vmatprep.subr.mxu1 %v2339_v0  ;;  %v1603_v11 = vld [vmem:[#allocation8 + $0x20f8] sm:$0xff]  ;;  %v1602_v50 = vld [vmem:[#allocation8 + $0x20f0] sm:$0xff] }
 0x4f9   :  { %4827 = vmatpush1.msra.mxu0 %v1698_v4  ;;  %4882 = vmatpush1.msra.mxu1 %v2338_v14  ;;  %v2243_v15 = vld [vmem:[#allocation8 + $0x34f8] sm:$0xff]  ;;  %v2242_v55 = vld [vmem:[#allocation8 + $0x34f0] sm:$0xff] }
 0x4fa   :  { %4945 = vmatprep.mubr.f32.mxu1 %v6644_v21  ;;  %4828 = vmatprep.subr.mxu0 %v1683_v22  ;;  %v2274_v21 = vld [vmem:[#allocation8 + $0x35f0] sm:$0xff]  ;;  %v1587_v0 = vld [vmem:[#allocation8 + $0x2078] sm:$0xff] }
 0x4fb   :  { %4883 = vmatprep.subr.mxu1 %v2323_v16  ;;  %4829 = vmatpush1.msra.mxu0 %v1682_v13  ;;  %v2227_v4 = vld [vmem:[#allocation8 + $0x3478] sm:$0xff]  ;;  %v1586_v14 = vld [vmem:[#allocation8 + $0x2070] sm:$0xff] }
 0x4fc   :  { %4884 = vmatpush1.msra.mxu1 %v2322_v24  ;;  %4830 = vmatprep.subr.mxu0 %v1667_v17  ;;  %v2226_v22 = vld [vmem:[#allocation8 + $0x3470] sm:$0xff]  ;;  %v2083_v16 = vld [vmem:[#allocation8 + $0x2ff8] sm:$0xff] }
 0x4fd   :  { %4885 = vmatprep.subr.mxu1 %v2307_v19  ;;  %4831 = vmatpush1.msra.mxu0 %v1666_v7  ;;  %v2211_v13 = vld [vmem:[#allocation8 + $0x33f8] sm:$0xff]  ;;  %v2082_v24 = vld [vmem:[#allocation8 + $0x2ff0] sm:$0xff] }
 0x4fe   :  { %4886 = vmatpush1.msra.mxu1 %v2306_v42  ;;  %4832 = vmatprep.subr.mxu0 %v1651_v25  ;;  %v2210_v17 = vld [vmem:[#allocation8 + $0x33f0] sm:$0xff]  ;;  %v2067_v19 = vld [vmem:[#allocation8 + $0x2f78] sm:$0xff] }
 0x4ff   :  { %4887 = vmatprep.subr.mxu1 %v2291_v48  ;;  %4833 = vmatpush1.msra.mxu0 %v1650_v46  ;;  %v2195_v7 = vld [vmem:[#allocation8 + $0x3378] sm:$0xff]  ;;  %v2066_v42 = vld [vmem:[#allocation8 + $0x2f70] sm:$0xff] }
 0x500   :  { %4888 = vmatpush1.msra.mxu1 %v2290_v3  ;;  %4834 = vmatprep.subr.mxu0 %v1635_v45  ;;  %v2194_v25 = vld [vmem:[#allocation8 + $0x3370] sm:$0xff]  ;;  %v2051_v48 = vld [vmem:[#allocation8 + $0x2ef8] sm:$0xff] }
 0x501   :  { %4889 = vmatprep.subr.mxu1 %v2275_v49  ;;  %4835 = vmatpush1.msra.mxu0 %v1634_v52  ;;  %v2179_v46 = vld [vmem:[#allocation8 + $0x32f8] sm:$0xff]  ;;  %v2050_v3 = vld [vmem:[#allocation8 + $0x2ef0] sm:$0xff] }
 0x502   :  { %4890 = vmatpush1.msra.mxu1 %v2274_v21  ;;  %4836 = vmatprep.subr.mxu0 %v1619_v59  ;;  %v2178_v45 = vld [vmem:[#allocation8 + $0x32f0] sm:$0xff]  ;;  %v2035_v49 = vld [vmem:[#allocation8 + $0x2e78] sm:$0xff] }
 0x503   :  { %4891 = vmatprep.subr.mxu1 %v2259_v62  ;;  %4837 = vmatpush1.msra.mxu0 %v1618_v1  ;;  %v2163_v52 = vld [vmem:[#allocation8 + $0x3278] sm:$0xff]  ;;  %v2034_v21 = vld [vmem:[#allocation8 + $0x2e70] sm:$0xff] }
 0x504   :  { %4892 = vmatpush1.msra.mxu1 %v2258_v34  ;;  %4838 = vmatprep.subr.mxu0 %v1603_v11  ;;  %v2162_v59 = vld [vmem:[#allocation8 + $0x3270] sm:$0xff]  ;;  %v2019_v62 = vld [vmem:[#allocation8 + $0x2df8] sm:$0xff] }
 0x505   :  { %4893 = vmatprep.subr.mxu1 %v2243_v15  ;;  %4839 = vmatpush1.msra.mxu0 %v1602_v50  ;;  %v2147_v1 = vld [vmem:[#allocation8 + $0x31f8] sm:$0xff]  ;;  %v2018_v34 = vld [vmem:[#allocation8 + $0x2df0] sm:$0xff] }
 0x506   :  { %4894 = vmatpush1.msra.mxu1 %v2242_v55  ;;  %4840 = vmatprep.subr.mxu0 %v1587_v0  ;;  %v2146_v11 = vld [vmem:[#allocation8 + $0x31f0] sm:$0xff]  ;;  %v2003_v15 = vld [vmem:[#allocation8 + $0x2d78] sm:$0xff] }
 0x507   :  { %4895 = vmatprep.subr.mxu1 %v2227_v4  ;;  %4841 = vmatpush1.msra.mxu0 %v1586_v14  ;;  %v2131_v50 = vld [vmem:[#allocation8 + $0x3178] sm:$0xff]  ;;  %v2002_v55 = vld [vmem:[#allocation8 + $0x2d70] sm:$0xff] }
 0x508   :  { %4896 = vmatpush1.msra.mxu1 %v2226_v22  ;;  %4842 = vmatprep.subr.mxu0 %v2083_v16  ;;  %v2130_v0 = vld [vmem:[#allocation8 + $0x3170] sm:$0xff]  ;;  %v1987_v4 = vld [vmem:[#allocation8 + $0x2cf8] sm:$0xff] }
 0x509   :  { %4897 = vmatprep.subr.mxu1 %v2211_v13  ;;  %4843 = vmatpush2.msra.mxu0 %v2082_v24  ;;  %v2115_v14 = vld [vmem:[#allocation8 + $0x30f8] sm:$0xff]  ;;  %v1986_v22 = vld [vmem:[#allocation8 + $0x2cf0] sm:$0xff] }
 0x50a   :  { %4898 = vmatpush1.msra.mxu1 %v2210_v17  ;;  %4844 = vmatprep.subr.mxu0 %v2067_v19  ;;  %v2114_v16 = vld [vmem:[#allocation8 + $0x30f0] sm:$0xff]  ;;  %v1971_v13 = vld [vmem:[#allocation8 + $0x2c78] sm:$0xff] }
 0x50b   :  { %4899 = vmatprep.subr.mxu1 %v2195_v7  ;;  %4845 = vmatpush2.msra.mxu0 %v2066_v42  ;;  %v2099_v24 = vld [vmem:[#allocation8 + $0x3078] sm:$0xff]  ;;  %v1970_v17 = vld [vmem:[#allocation8 + $0x2c70] sm:$0xff] }
 0x50c   :  { %4900 = vmatpush1.msra.mxu1 %v2194_v25  ;;  %4846 = vmatprep.subr.mxu0 %v2051_v48  ;;  %v2098_v19 = vld [vmem:[#allocation8 + $0x3070] sm:$0xff]  ;;  %v1955_v7 = vld [vmem:[#allocation8 + $0x2bf8] sm:$0xff] }
 0x50d   :  { %4901 = vmatprep.subr.mxu1 %v2179_v46  ;;  %4847 = vmatpush2.msra.mxu0 %v2050_v3  ;;  %v2595_v42 = vld [vmem:[#allocation8 + $0x3ff8] sm:$0xff]  ;;  %v1954_v25 = vld [vmem:[#allocation8 + $0x2bf0] sm:$0xff] }
 0x50e   :  { %4902 = vmatpush1.msra.mxu1 %v2178_v45  ;;  %4848 = vmatprep.subr.mxu0 %v2035_v49  ;;  %v2594_v48 = vld [vmem:[#allocation8 + $0x3ff0] sm:$0xff]  ;;  %v1939_v46 = vld [vmem:[#allocation8 + $0x2b78] sm:$0xff] }
 0x50f   :  { %4903 = vmatprep.subr.mxu1 %v2163_v52  ;;  %4849 = vmatpush2.msra.mxu0 %v2034_v21  ;;  %v2579_v3 = vld [vmem:[#allocation8 + $0x3f78] sm:$0xff]  ;;  %v1938_v45 = vld [vmem:[#allocation8 + $0x2b70] sm:$0xff] }
 0x510   :  { %4904 = vmatpush1.msra.mxu1 %v2162_v59  ;;  %4850 = vmatprep.subr.mxu0 %v2019_v62  ;;  %v2578_v49 = vld [vmem:[#allocation8 + $0x3f70] sm:$0xff]  ;;  %v1923_v52 = vld [vmem:[#allocation8 + $0x2af8] sm:$0xff]  ;;  %v6801_v62 = vld [vmem:[#allocation10] sm:$0xff] }
 0x511   :  { %4905 = vmatprep.subr.mxu1 %v2147_v1  ;;  %4851 = vmatpush2.msra.mxu0 %v2018_v34  ;;  %v2563_v21 = vld [vmem:[#allocation8 + $0x3ef8] sm:$0xff]  ;;  %v1922_v59 = vld [vmem:[#allocation8 + $0x2af0] sm:$0xff]  ;;  %v2607_v1 = vrot.slane %v6801_v62, %v6586_v8 }
 0x512   :  { %4906 = vmatpush1.msra.mxu1 %v2146_v11  ;;  %4852 = vmatprep.subr.mxu0 %v2003_v15  ;;  %v2562_v34 = vld [vmem:[#allocation8 + $0x3ef0] sm:$0xff]  ;;  %v1907_v11 = vld [vmem:[#allocation8 + $0x2a78] sm:$0xff] }
 0x513   :  { %4907 = vmatprep.subr.mxu1 %v2131_v50  ;;  %4853 = vmatpush2.msra.mxu0 %v2002_v55  ;;  %v2547_v15 = vld [vmem:[#allocation8 + $0x3e78] sm:$0xff]  ;;  %v1906_v50 = vld [vmem:[#allocation8 + $0x2a70] sm:$0xff] }
 0x514   :  { %4908 = vmatpush1.msra.mxu1 %v2130_v0  ;;  %4854 = vmatprep.subr.mxu0 %v1987_v4  ;;  %v2546_v55 = vld [vmem:[#allocation8 + $0x3e70] sm:$0xff]  ;;  %v1891_v0 = vld [vmem:[#allocation8 + $0x29f8] sm:$0xff] }
 0x515   :  { %4909 = vmatprep.subr.mxu1 %v2115_v14  ;;  %4855 = vmatpush2.msra.mxu0 %v1986_v22  ;;  %v2531_v4 = vld [vmem:[#allocation8 + $0x3df8] sm:$0xff]  ;;  %v1890_v14 = vld [vmem:[#allocation8 + $0x29f0] sm:$0xff]  ;;  %v2749_v22 = vadd.f32 %v6662_v44, %v2607_v1  ;;  %v4998_v1 = vld [vmem:[#allocation11 + $0xf0] sm:$0xff] }
 0x516   :  { %4910 = vmatpush1.msra.mxu1 %v2114_v16  ;;  %4856 = vmatprep.subr.mxu0 %v1971_v13  ;;  %v2530_v16 = vld [vmem:[#allocation8 + $0x3df0] sm:$0xff]  ;;  %v1875_v13 = vld [vmem:[#allocation8 + $0x2978] sm:$0xff] }
 0x517   :  { %4911 = vmatprep.subr.mxu1 %v2099_v24  ;;  %4857 = vmatpush2.msra.mxu0 %v1970_v17  ;;  %v2515_v24 = vld [vmem:[#allocation8 + $0x3d78] sm:$0xff]  ;;  %v1874_v17 = vld [vmem:[#allocation8 + $0x2970] sm:$0xff] }
 0x518   :  { %4912 = vmatpush1.msra.mxu1 %v2098_v19  ;;  %4858 = vmatprep.subr.mxu0 %v1955_v7  ;;  %v2820_v19 = vadd.f32 %v6669_v29, %v2749_v22  ;;  %v2514_v7 = vld [vmem:[#allocation8 + $0x3d70] sm:$0xff]  ;;  %v2419_v22 = vld [vmem:[#allocation8 + $0x3a78] sm:$0xff] }
 0x519   :  { %4913 = vmatprep.subr.mxu1 %v2595_v42  ;;  %4859 = vmatpush2.msra.mxu0 %v1954_v25  ;;  %v1859_v42 = vld [vmem:[#allocation8 + $0x28f8] sm:$0xff] }
 0x51a   :  { %4914 = vmatpush2.msra.mxu1 %v2594_v48  ;;  %4860 = vmatprep.subr.mxu0 %v1939_v46  ;;  %v2499_v25 = vld [vmem:[#allocation8 + $0x3cf8] sm:$0xff]  ;;  %v1858_v48 = vld [vmem:[#allocation8 + $0x28f0] sm:$0xff]  ;;  %v2891_v44 = vadd.f32 %v6678_v9, %v2820_v19 }
 0x51b   :  { %4915 = vmatprep.subr.mxu1 %v2579_v3  ;;  %4861 = vmatpush2.msra.mxu0 %v1938_v45  ;;  %v2498_v46 = vld [vmem:[#allocation8 + $0x3cf0] sm:$0xff]  ;;  %v1843_v3 = vld [vmem:[#allocation8 + $0x2878] sm:$0xff] }
 0x51c   :  { %4916 = vmatpush2.msra.mxu1 %v2578_v49  ;;  %4862 = vmatprep.subr.mxu0 %v1923_v52  ;;  %v2483_v45 = vld [vmem:[#allocation8 + $0x3c78] sm:$0xff]  ;;  %v1842_v49 = vld [vmem:[#allocation8 + $0x2870] sm:$0xff]  ;;  %v2962_v29 = vadd.f32 %v6681_v27, %v2891_v44 }
 0x51d   :  { %4917 = vmatprep.subr.mxu1 %v2563_v21  ;;  %4863 = vmatpush2.msra.mxu0 %v1922_v59  ;;  %v2482_v52 = vld [vmem:[#allocation8 + $0x3c70] sm:$0xff]  ;;  %v2467_v21 = vld [vmem:[#allocation8 + $0x3bf8] sm:$0xff]  ;;  %v4999_v59 = vld [vmem:[#allocation11 + $0xf8] sm:$0xff] }
 0x51e   :  { %4918 = vmatpush2.msra.mxu1 %v2562_v34  ;;  %4864 = vmatprep.subr.mxu0 %v1907_v11  ;;  %v2466_v9 = vld [vmem:[#allocation8 + $0x3bf0] sm:$0xff]  ;;  %v2451_v34 = vld [vmem:[#allocation8 + $0x3b78] sm:$0xff]  ;;  %v4953_v11 = vmax.f32 %v2962_v29, 0.0 }
 0x51f   :  { %4919 = vmatprep.subr.mxu1 %v2547_v15  ;;  %4865 = vmatpush2.msra.mxu0 %v1906_v50  ;;  %v4997_v15 = vld [vmem:[#allocation11 + $0xe8] sm:$0xff]  ;;  %v2450_v27 = vld [vmem:[#allocation8 + $0x3b70] sm:$0xff] }
 0x520   :  { %4920 = vmatpush2.msra.mxu1 %v2546_v55  ;;  %4866 = vmatprep.subr.mxu0 %v1891_v0  ;;  %v4996_v50 = vld [vmem:[#allocation11 + $0xe0] sm:$0xff]  ;;  %v2435_v55 = vld [vmem:[#allocation8 + $0x3af8] sm:$0xff]  ;;  %v4995_v0 = vld [vmem:[#allocation11 + $0xd8] sm:$0xff] }
 0x521   :  { %4921 = vmatprep.subr.mxu1 %v2531_v4  ;;  %4867 = vmatpush2.msra.mxu0 %v1890_v14  ;;  %v2434_v4 = vld [vmem:[#allocation8 + $0x3af0] sm:$0xff]  ;;  %v2615_v14 = vrot.slane %v6801_v62, %v6605_v26 }
 0x522   :  { %4922 = vmatpush2.msra.mxu1 %v2530_v16  ;;  %4868 = vmatprep.subr.mxu0 %v1875_v13  ;;  %v6812_v16 = vpop.f32.mrf.mxu0  ;;  %v4993_v13 = vld [vmem:[#allocation11 + $0xc8] sm:$0xff]  ;;  %v2402_v44 = vld [vmem:[#allocation8 + $0x39f0] sm:$0xff] }
 0x523   :  { %4923 = vmatprep.subr.mxu1 %v2515_v24  ;;  %4869 = vmatpush2.msra.mxu0 %v1874_v17  ;;  %v2418_v24 = vld [vmem:[#allocation8 + $0x3a70] sm:$0xff]  ;;  %v6814_v17 = vld [vmem:[#allocation10 + $0x8] sm:$0xff] }
 0x524   :  { %4924 = vmatpush2.msra.mxu1 %v2514_v7  ;;  %4870 = vmatprep.subr.mxu0 %v1859_v42  ;;  %v2651_v19 = vrot.slane %v6814_v17, %v6625_v5  ;;  %v4992_v7 = vld [vmem:[#allocation11 + $0xc0] sm:$0xff]  ;;  %v2403_v42 = vld [vmem:[#allocation8 + $0x39f8] sm:$0xff] }
 0x525   :  { %4925 = vmatprep.subr.mxu1 %v2499_v25  ;;  %4871 = vmatpush2.msra.mxu0 %v1858_v48  ;;  %v4450_v25 = vpop.f32.mrf.mxu0  ;;  %v4991_v48 = vld [vmem:[#allocation11 + $0xb8] sm:$0xff]  ;;  %v4989_v5 = vld [vmem:[#allocation11 + $0xa8] sm:$0xff]  ;;  %v2386_v29 = vld [vmem:[#allocation8 + $0x3970] sm:$0xff] }
 0x526   :  { %4926 = vmatpush2.msra.mxu1 %v2498_v46  ;;  %4872 = vmatprep.subr.mxu0 %v1843_v3  ;;  %v3033_v46 = vadd.f32 %v6687_v51, %v2615_v14  ;;  %v4990_v3 = vld [vmem:[#allocation11 + $0xb0] sm:$0xff]  ;;  %v4987_v51 = vld [vmem:[#allocation11 + $0x98] sm:$0xff] }
 0x527   :  { %4927 = vmatprep.subr.mxu1 %v2483_v45  ;;  %4873 = vmatpush2.msra.mxu0 %v1842_v49  ;;  %v2387_v45 = vld [vmem:[#allocation8 + $0x3978] sm:$0xff]  ;;  %v6819_v49 = vpop.f32.mrf.mxu1  ;;  %v4983_v14 = vld [vmem:[#allocation11 + $0x78] sm:$0xff] }
 0x528   :  { %4928 = vmatpush2.msra.mxu1 %v2482_v52  ;;  %4875 = vmatmul.mubr.f32.vlgmr.msra.gmra.mxu0 %v6630_v39  ;;  %v4994_v39 = vld [vmem:[#allocation11 + $0xd0] sm:$0xff]  ;;  %v3104_v52 = vadd.f32 %v6694_v36, %v3033_v46  ;;  %v4985_v36 = vld [vmem:[#allocation11 + $0x88] sm:$0xff] }
 0x529   :  { %4929 = vmatprep.subr.mxu1 %v2467_v21  ;;  %5492 = vmatprep.subr.mxu0 %v4999_v59  ;;  %v4451_v21 = vadd.f32 %v4450_v25, %v2651_v19  ;;  %v4988_v59 = vld [vmem:[#allocation11 + $0xa0] sm:$0xff]  ;;  %v5061_v19 = vld [vmem:[#allocation11 + $0x2e8] sm:$0xff]  ;;  %v5059_v25 = vld [vmem:[#allocation11 + $0x2d8] sm:$0xff] }
 0x52a   :  { %4930 = vmatpush2.msra.mxu1 %v2466_v9  ;;  %5493 = vmatpush1.msra.mxu0 %v4998_v1  ;;  %v2371_v9 = vld [vmem:[#allocation8 + $0x38f8] sm:$0xff]  ;;  %v2370_v1 = vld [vmem:[#allocation8 + $0x38f0] sm:$0xff] }
 0x52b   :  { %5556 = vmatprep.mubr.f32.mxu0 %v4953_v11  ;;  %4931 = vmatprep.subr.mxu1 %v2451_v34  ;;  %v3175_v11 = vadd.f32 %v6703_v38, %v3104_v52  ;;  %v4982_v38 = vld [vmem:[#allocation11 + $0x70] sm:$0xff]  ;;  %v4977_v46 = vld [vmem:[#allocation11 + $0x48] sm:$0xff] }
 0x52c   :  { %5494 = vmatprep.subr.mxu0 %v4997_v15  ;;  %4932 = vmatpush2.msra.mxu1 %v2450_v27  ;;  %v4986_v15 = vld [vmem:[#allocation11 + $0x90] sm:$0xff]  ;;  %v2355_v27 = vld [vmem:[#allocation8 + $0x3878] sm:$0xff] }
 0x52d   :  { %5495 = vmatpush1.msra.mxu0 %v4996_v50  ;;  %4933 = vmatprep.subr.mxu1 %v2435_v55  ;;  %v2354_v55 = vld [vmem:[#allocation8 + $0x3870] sm:$0xff]  ;;  %v4974_v52 = vld [vmem:[#allocation11 + $0x30] sm:$0xff] }
 0x52e   :  { %5496 = vmatprep.subr.mxu0 %v4995_v0  ;;  %4934 = vmatpush2.msra.mxu1 %v2434_v4  ;;  %v3246_v0 = vadd.f32 %v6706_v61, %v3175_v11  ;;  %v4984_v4 = vld [vmem:[#allocation11 + $0x80] sm:$0xff]  ;;  %v5051_v11 = vld [vmem:[#allocation11 + $0x298] sm:$0xff] }
 0x52f   :  { %5497 = vmatpush1.msra.mxu0 %v4994_v39  ;;  %4935 = vmatprep.subr.mxu1 %v2419_v22  ;;  %v5063_v39 = vld [vmem:[#allocation11 + $0x2f8] sm:$0xff]  ;;  %v5062_v22 = vld [vmem:[#allocation11 + $0x2f0] sm:$0xff]  ;;  %v4980_v61 = vld [vmem:[#allocation11 + $0x60] sm:$0xff] }
 0x530   :  { %5498 = vmatprep.subr.mxu0 %v4993_v13  ;;  %4936 = vmatpush2.msra.mxu1 %v2418_v24  ;;  %v4981_v13 = vld [vmem:[#allocation11 + $0x68] sm:$0xff]  ;;  %v4955_v24 = vmax.f32 %v3246_v0, 0.0  ;;  %v4968_v0 = vld [vmem:[#allocation11] sm:$0xff] }
 0x531   :  { %5499 = vmatpush1.msra.mxu0 %v4992_v7  ;;  %4937 = vmatprep.subr.mxu1 %v2403_v42  ;;  %v5060_v7 = vld [vmem:[#allocation11 + $0x2e0] sm:$0xff]  ;;  %v4979_v42 = vld [vmem:[#allocation11 + $0x58] sm:$0xff] }
 0x532   :  { %5500 = vmatprep.subr.mxu0 %v4991_v48  ;;  %4938 = vmatpush2.msra.mxu1 %v2402_v44  ;;  %v4978_v48 = vld [vmem:[#allocation11 + $0x50] sm:$0xff] }
 0x533   :  { %5501 = vmatpush1.msra.mxu0 %v4990_v3  ;;  %4939 = vmatprep.subr.mxu1 %v2387_v45  ;;  %v4521_v34 = vpop.f32.mrf.mxu1  ;;  %v5058_v44 = vld [vmem:[#allocation11 + $0x2d0] sm:$0xff]  ;;  %v4976_v3 = vld [vmem:[#allocation11 + $0x40] sm:$0xff] }
 0x534   :  { %5502 = vmatprep.subr.mxu0 %v4989_v5  ;;  %4940 = vmatpush2.msra.mxu1 %v2386_v29  ;;  %v6823_v50 = vadd.f32 %v4521_v34, %v4451_v21  ;;  %v5056_v45 = vld [vmem:[#allocation11 + $0x2c0] sm:$0xff]  ;;  %v4975_v5 = vld [vmem:[#allocation11 + $0x38] sm:$0xff]  ;;  %v5054_v21 = vld [vmem:[#allocation11 + $0x2b0] sm:$0xff] }
 0x535   :  { %5503 = vmatpush1.msra.mxu0 %v4988_v59  ;;  %4941 = vmatprep.subr.mxu1 %v2371_v9  ;;  %v5055_v29 = vld [vmem:[#allocation11 + $0x2b8] sm:$0xff]  ;;  %v4973_v59 = vld [vmem:[#allocation11 + $0x28] sm:$0xff] }
 0x536   :  { %5504 = vmatprep.subr.mxu0 %v4987_v51  ;;  %4942 = vmatpush2.msra.mxu1 %v2370_v1  ;;  %v5053_v9 = vld [vmem:[#allocation11 + $0x2a8] sm:$0xff]  ;;  %v4972_v51 = vld [vmem:[#allocation11 + $0x20] sm:$0xff]  ;;  %v4971_v34 = vld [vmem:[#allocation11 + $0x18] sm:$0xff] }
 0x537   :  { %5505 = vmatpush1.msra.mxu0 %v4986_v15  ;;  %4943 = vmatprep.subr.mxu1 %v2355_v27  ;;  %v5052_v1 = vld [vmem:[#allocation11 + $0x2a0] sm:$0xff]  ;;  %v4970_v15 = vld [vmem:[#allocation11 + $0x10] sm:$0xff] }
 0x538   :  { %5506 = vmatprep.subr.mxu0 %v4985_v36  ;;  %4944 = vmatpush2.msra.mxu1 %v2354_v55  ;;  %v5050_v27 = vld [vmem:[#allocation11 + $0x290] sm:$0xff]  ;;  %v4969_v36 = vld [vmem:[#allocation11 + $0x8] sm:$0xff] }
 0x539   :  { %5507 = vmatpush1.msra.mxu0 %v4984_v4  ;;  %4946 = vmatmul.mubr.f32.vlgmr.msra.gmra.mxu1 %v6646_v31  ;;  %v5057_v31 = vld [vmem:[#allocation11 + $0x2c8] sm:$0xff]  ;;  %v5048_v4 = vld [vmem:[#allocation11 + $0x280] sm:$0xff] }
 0x53a   :  { %5508 = vmatprep.subr.mxu0 %v4983_v14  ;;  %5563 = vmatprep.subr.mxu1 %v5063_v39  ;;  %v5049_v55 = vld [vmem:[#allocation11 + $0x288] sm:$0xff]  ;;  %v5031_v14 = vld [vmem:[#allocation11 + $0x1f8] sm:$0xff] }
 0x53b   :  { %5509 = vmatpush1.msra.mxu0 %v4982_v38  ;;  %5564 = vmatpush1.msra.mxu1 %v5062_v22  ;;  %v5047_v39 = vld [vmem:[#allocation11 + $0x278] sm:$0xff]  ;;  %v5030_v38 = vld [vmem:[#allocation11 + $0x1f0] sm:$0xff] }
 0x53c   :  { %5627 = vmatprep.mubr.f32.mxu1 %v4955_v24  ;;  %5510 = vmatprep.subr.mxu0 %v4981_v13  ;;  %v5046_v22 = vld [vmem:[#allocation11 + $0x270] sm:$0xff]  ;;  %v5029_v13 = vld [vmem:[#allocation11 + $0x1e8] sm:$0xff] }
 0x53d   :  { %5565 = vmatprep.subr.mxu1 %v5061_v19  ;;  %5511 = vmatpush1.msra.mxu0 %v4980_v61  ;;  %v5045_v24 = vld [vmem:[#allocation11 + $0x268] sm:$0xff]  ;;  %v5028_v19 = vld [vmem:[#allocation11 + $0x1e0] sm:$0xff] }
 0x53e   :  { %5566 = vmatpush1.msra.mxu1 %v5060_v7  ;;  %5512 = vmatprep.subr.mxu0 %v4979_v42  ;;  %v5044_v61 = vld [vmem:[#allocation11 + $0x260] sm:$0xff]  ;;  %v5027_v7 = vld [vmem:[#allocation11 + $0x1d8] sm:$0xff] }
 0x53f   :  { %5567 = vmatprep.subr.mxu1 %v5059_v25  ;;  %5513 = vmatpush1.msra.mxu0 %v4978_v48  ;;  %v5043_v42 = vld [vmem:[#allocation11 + $0x258] sm:$0xff]  ;;  %v5026_v25 = vld [vmem:[#allocation11 + $0x1d0] sm:$0xff] }
 0x540   :  { %5568 = vmatpush1.msra.mxu1 %v5058_v44  ;;  %5514 = vmatprep.subr.mxu0 %v4977_v46  ;;  %v5042_v48 = vld [vmem:[#allocation11 + $0x250] sm:$0xff]  ;;  %v5025_v44 = vld [vmem:[#allocation11 + $0x1c8] sm:$0xff] }
 0x541   :  { %5569 = vmatprep.subr.mxu1 %v5057_v31  ;;  %5515 = vmatpush1.msra.mxu0 %v4976_v3  ;;  %v5041_v46 = vld [vmem:[#allocation11 + $0x248] sm:$0xff]  ;;  %v5024_v31 = vld [vmem:[#allocation11 + $0x1c0] sm:$0xff] }
 0x542   :  { %5570 = vmatpush1.msra.mxu1 %v5056_v45  ;;  %5516 = vmatprep.subr.mxu0 %v4975_v5  ;;  %v5040_v3 = vld [vmem:[#allocation11 + $0x240] sm:$0xff]  ;;  %v5023_v45 = vld [vmem:[#allocation11 + $0x1b8] sm:$0xff] }
 0x543   :  { %5571 = vmatprep.subr.mxu1 %v5055_v29  ;;  %5517 = vmatpush1.msra.mxu0 %v4974_v52  ;;  %v5039_v5 = vld [vmem:[#allocation11 + $0x238] sm:$0xff]  ;;  %v5022_v29 = vld [vmem:[#allocation11 + $0x1b0] sm:$0xff] }
 0x544   :  { %5572 = vmatpush1.msra.mxu1 %v5054_v21  ;;  %5518 = vmatprep.subr.mxu0 %v4973_v59  ;;  %v5038_v52 = vld [vmem:[#allocation11 + $0x230] sm:$0xff]  ;;  %v5021_v21 = vld [vmem:[#allocation11 + $0x1a8] sm:$0xff] }
 0x545   :  { %5573 = vmatprep.subr.mxu1 %v5053_v9  ;;  %5519 = vmatpush1.msra.mxu0 %v4972_v51  ;;  %v5037_v59 = vld [vmem:[#allocation11 + $0x228] sm:$0xff]  ;;  %v5020_v9 = vld [vmem:[#allocation11 + $0x1a0] sm:$0xff] }
 0x546   :  { %5574 = vmatpush1.msra.mxu1 %v5052_v1  ;;  %5520 = vmatprep.subr.mxu0 %v4971_v34  ;;  %v5036_v51 = vld [vmem:[#allocation11 + $0x220] sm:$0xff]  ;;  %v5019_v1 = vld [vmem:[#allocation11 + $0x198] sm:$0xff] }
 0x547   :  { %5575 = vmatprep.subr.mxu1 %v5051_v11  ;;  %5521 = vmatpush1.msra.mxu0 %v4970_v15  ;;  %v5035_v34 = vld [vmem:[#allocation11 + $0x218] sm:$0xff]  ;;  %v5018_v11 = vld [vmem:[#allocation11 + $0x190] sm:$0xff] }
 0x548   :  { %5576 = vmatpush1.msra.mxu1 %v5050_v27  ;;  %5522 = vmatprep.subr.mxu0 %v4969_v36  ;;  %v5034_v15 = vld [vmem:[#allocation11 + $0x210] sm:$0xff]  ;;  %v5017_v27 = vld [vmem:[#allocation11 + $0x188] sm:$0xff] }
 0x549   :  { %5577 = vmatprep.subr.mxu1 %v5049_v55  ;;  %5523 = vmatpush1.msra.mxu0 %v4968_v0  ;;  %v5033_v36 = vld [vmem:[#allocation11 + $0x208] sm:$0xff]  ;;  %v5016_v55 = vld [vmem:[#allocation11 + $0x180] sm:$0xff] }
 0x54a   :  { %5578 = vmatpush1.msra.mxu1 %v5048_v4  ;;  %5524 = vmatprep.subr.mxu0 %v5031_v14  ;;  %v5032_v0 = vld [vmem:[#allocation11 + $0x200] sm:$0xff]  ;;  %v5015_v4 = vld [vmem:[#allocation11 + $0x178] sm:$0xff] }
 0x54b   :  { %5579 = vmatprep.subr.mxu1 %v5047_v39  ;;  %5525 = vmatpush2.msra.mxu0 %v5030_v38  ;;  %v5095_v14 = vld [vmem:[#allocation11 + $0x3f8] sm:$0xff]  ;;  %v5014_v39 = vld [vmem:[#allocation11 + $0x170] sm:$0xff] }
 0x54c   :  { %5580 = vmatpush1.msra.mxu1 %v5046_v22  ;;  %5526 = vmatprep.subr.mxu0 %v5029_v13  ;;  %v5094_v38 = vld [vmem:[#allocation11 + $0x3f0] sm:$0xff]  ;;  %v5013_v22 = vld [vmem:[#allocation11 + $0x168] sm:$0xff] }
 0x54d   :  { %5581 = vmatprep.subr.mxu1 %v5045_v24  ;;  %5527 = vmatpush2.msra.mxu0 %v5028_v19  ;;  %v5093_v13 = vld [vmem:[#allocation11 + $0x3e8] sm:$0xff]  ;;  %v5012_v24 = vld [vmem:[#allocation11 + $0x160] sm:$0xff] }
 0x54e   :  { %5582 = vmatpush1.msra.mxu1 %v5044_v61  ;;  %5528 = vmatprep.subr.mxu0 %v5027_v7  ;;  %v5092_v19 = vld [vmem:[#allocation11 + $0x3e0] sm:$0xff]  ;;  %v5011_v61 = vld [vmem:[#allocation11 + $0x158] sm:$0xff] }
 0x54f   :  { %5583 = vmatprep.subr.mxu1 %v5043_v42  ;;  %5529 = vmatpush2.msra.mxu0 %v5026_v25  ;;  %v5091_v7 = vld [vmem:[#allocation11 + $0x3d8] sm:$0xff]  ;;  %v5010_v42 = vld [vmem:[#allocation11 + $0x150] sm:$0xff]  ;;  %v2623_v25 = vrot.slane %v6801_v62, %v6599_v20 }
 0x550   :  { %5584 = vmatpush1.msra.mxu1 %v5042_v48  ;;  %5530 = vmatprep.subr.mxu0 %v5025_v44  ;;  %v5090_v48 = vld [vmem:[#allocation11 + $0x3d0] sm:$0xff]  ;;  %v5009_v44 = vld [vmem:[#allocation11 + $0x148] sm:$0xff] }
 0x551   :  { %5585 = vmatprep.subr.mxu1 %v5041_v46  ;;  %5531 = vmatpush2.msra.mxu0 %v5024_v31  ;;  %v5089_v46 = vld [vmem:[#allocation11 + $0x3c8] sm:$0xff]  ;;  %v5008_v31 = vld [vmem:[#allocation11 + $0x140] sm:$0xff] }
 0x552   :  { %5586 = vmatpush1.msra.mxu1 %v5040_v3  ;;  %5532 = vmatprep.subr.mxu0 %v5023_v45  ;;  %v5088_v3 = vld [vmem:[#allocation11 + $0x3c0] sm:$0xff]  ;;  %v5007_v45 = vld [vmem:[#allocation11 + $0x138] sm:$0xff] }
 0x553   :  { %5587 = vmatprep.subr.mxu1 %v5039_v5  ;;  %5533 = vmatpush2.msra.mxu0 %v5022_v29  ;;  %v5087_v5 = vld [vmem:[#allocation11 + $0x3b8] sm:$0xff]  ;;  %v5006_v29 = vld [vmem:[#allocation11 + $0x130] sm:$0xff] }
 0x554   :  { %5588 = vmatpush1.msra.mxu1 %v5038_v52  ;;  %5534 = vmatprep.subr.mxu0 %v5021_v21  ;;  %v3317_v52 = vadd.f32 %v6712_v35, %v2623_v25  ;;  %v5086_v21 = vld [vmem:[#allocation11 + $0x3b0] sm:$0xff]  ;;  %v5124_v25 = vld [vmem:[#allocation11 + $0x4e0] sm:$0xff] }
 0x555   :  { %5589 = vmatprep.subr.mxu1 %v5037_v59  ;;  %5535 = vmatpush2.msra.mxu0 %v5020_v9  ;;  %v5005_v59 = vld [vmem:[#allocation11 + $0x128] sm:$0xff]  ;;  %v6830_v9 = vpop.f32.mrf.mxu0  ;;  %v5002_v35 = vld [vmem:[#allocation11 + $0x110] sm:$0xff] }
 0x556   :  { %5590 = vmatpush1.msra.mxu1 %v5036_v51  ;;  %5536 = vmatprep.subr.mxu0 %v5019_v1  ;;  %v5085_v51 = vld [vmem:[#allocation11 + $0x3a8] sm:$0xff]  ;;  %v5004_v1 = vld [vmem:[#allocation11 + $0x120] sm:$0xff] }
 0x557   :  { %5591 = vmatprep.subr.mxu1 %v5035_v34  ;;  %5537 = vmatpush2.msra.mxu0 %v5018_v11  ;;  %v3388_v34 = vadd.f32 %v6719_v33, %v3317_v52  ;;  %v5084_v11 = vld [vmem:[#allocation11 + $0x3a0] sm:$0xff]  ;;  %v5081_v33 = vld [vmem:[#allocation11 + $0x388] sm:$0xff]  ;;  %v5071_v52 = vld [vmem:[#allocation11 + $0x338] sm:$0xff] }
 0x558   :  { %5592 = vmatpush1.msra.mxu1 %v5034_v15  ;;  %5538 = vmatprep.subr.mxu0 %v5017_v27  ;;  %v5003_v15 = vld [vmem:[#allocation11 + $0x118] sm:$0xff] }
 0x559   :  { %5593 = vmatprep.subr.mxu1 %v5033_v36  ;;  %5539 = vmatpush2.msra.mxu0 %v5016_v55  ;;  %v5083_v27 = vld [vmem:[#allocation11 + $0x398] sm:$0xff]  ;;  %v3459_v55 = vadd.f32 %v6728_v57, %v3388_v34  ;;  %v6842_v34 = vpop.f32.mrf.mxu1 }
 0x55a   :  { %5594 = vmatpush1.msra.mxu1 %v5032_v0  ;;  %5540 = vmatprep.subr.mxu0 %v5015_v4  ;;  %v5082_v0 = vld [vmem:[#allocation11 + $0x390] sm:$0xff]  ;;  %v5001_v4 = vld [vmem:[#allocation11 + $0x108] sm:$0xff]  ;;  %v5079_v57 = vld [vmem:[#allocation11 + $0x378] sm:$0xff] }
 0x55b   :  { %5595 = vmatprep.subr.mxu1 %v5095_v14  ;;  %5541 = vmatpush2.msra.mxu0 %v5014_v39  ;;  %v5000_v39 = vld [vmem:[#allocation11 + $0x100] sm:$0xff] }
 0x55c   :  { %5596 = vmatpush2.msra.mxu1 %v5094_v38  ;;  %5542 = vmatprep.subr.mxu0 %v5013_v22  ;;  %v3530_v38 = vadd.f32 %v6731_v18, %v3459_v55  ;;  %v5080_v22 = vld [vmem:[#allocation11 + $0x380] sm:$0xff]  ;;  %v5125_v18 = vld [vmem:[#allocation11 + $0x4e8] sm:$0xff]  ;;  %v5115_v55 = vld [vmem:[#allocation11 + $0x498] sm:$0xff] }
 0x55d   :  { %5597 = vmatprep.subr.mxu1 %v5093_v13  ;;  %5543 = vmatpush2.msra.mxu0 %v5012_v24  ;;  %v4952_v13 = vmax.f32 %v6672_v40, 0.0  ;;  %v5127_v24 = vld [vmem:[#allocation11 + $0x4f8] sm:$0xff] }
 0x55e   :  { %5598 = vmatpush2.msra.mxu1 %v5092_v19  ;;  %5544 = vmatprep.subr.mxu0 %v5011_v61  ;;  %v5078_v19 = vld [vmem:[#allocation11 + $0x370] sm:$0xff]  ;;  %v5077_v61 = vld [vmem:[#allocation11 + $0x368] sm:$0xff]  ;;  %v5075_v40 = vld [vmem:[#allocation11 + $0x358] sm:$0xff] }
 0x55f   :  { %5599 = vmatprep.subr.mxu1 %v5091_v7  ;;  %5545 = vmatpush2.msra.mxu0 %v5010_v42  ;;  %v4957_v7 = vmax.f32 %v3530_v38, 0.0  ;;  %v5076_v42 = vld [vmem:[#allocation11 + $0x360] sm:$0xff] }
 0x560   :  { %5600 = vmatpush2.msra.mxu1 %v5090_v48  ;;  %5546 = vmatprep.subr.mxu0 %v5009_v44  ;;  %v5123_v48 = vld [vmem:[#allocation11 + $0x4d8] sm:$0xff]  ;;  %v5074_v44 = vld [vmem:[#allocation11 + $0x350] sm:$0xff] }
 0x561   :  { %5601 = vmatprep.subr.mxu1 %v5089_v46  ;;  %5547 = vmatpush2.msra.mxu0 %v5008_v31  ;;  %v2631_v46 = vrot.slane %v6801_v62, %v6633_v47  ;;  %v5122_v31 = vld [vmem:[#allocation11 + $0x4d0] sm:$0xff] }
 0x562   :  { %5602 = vmatpush2.msra.mxu1 %v5088_v3  ;;  %5548 = vmatprep.subr.mxu0 %v5007_v45  ;;  %v5073_v3 = vld [vmem:[#allocation11 + $0x348] sm:$0xff]  ;;  %v5118_v62 = vld [vmem:[#allocation11 + $0x4b0] sm:$0xff] }
 0x563   :  { %5603 = vmatprep.subr.mxu1 %v5087_v5  ;;  %5549 = vmatpush2.msra.mxu0 %v5006_v29  ;;  %v5121_v45 = vld [vmem:[#allocation11 + $0x4c8] sm:$0xff]  ;;  %v5072_v5 = vld [vmem:[#allocation11 + $0x340] sm:$0xff] }
 0x564   :  { %5604 = vmatpush2.msra.mxu1 %v5086_v21  ;;  %5550 = vmatprep.subr.mxu0 %v5005_v59  ;;  %v4592_v36 = vpop.f32.mrf.mxu0  ;;  %v5120_v29 = vld [vmem:[#allocation11 + $0x4c0] sm:$0xff]  ;;  %v5119_v21 = vld [vmem:[#allocation11 + $0x4b8] sm:$0xff]  ;;  %v5070_v59 = vld [vmem:[#allocation11 + $0x330] sm:$0xff] }
 0x565   :  { %5605 = vmatprep.subr.mxu1 %v5085_v51  ;;  %5551 = vmatpush2.msra.mxu0 %v5004_v1  ;;  %v6835_v14 = vadd.f32 %v4592_v36, %v6823_v50  ;;  %v5126_v50 = vld [vmem:[#allocation11 + $0x4f0] sm:$0xff]  ;;  %v3601_v51 = vadd.f32 %v6737_v23, %v2631_v46  ;;  %v5069_v1 = vld [vmem:[#allocation11 + $0x328] sm:$0xff]  ;;  %v5067_v36 = vld [vmem:[#allocation11 + $0x318] sm:$0xff] }
 0x566   :  { %5606 = vmatpush2.msra.mxu1 %v5084_v11  ;;  %5552 = vmatprep.subr.mxu0 %v5003_v15  ;;  %v5117_v11 = vld [vmem:[#allocation11 + $0x4a8] sm:$0xff]  ;;  %v5068_v15 = vld [vmem:[#allocation11 + $0x320] sm:$0xff]  ;;  %v5066_v23 = vld [vmem:[#allocation11 + $0x310] sm:$0xff] }
 0x567   :  { %5607 = vmatprep.subr.mxu1 %v5083_v27  ;;  %5553 = vmatpush2.msra.mxu0 %v5002_v35  ;;  %v3672_v27 = vadd.f32 %v6744_v32, %v3601_v51  ;;  %v5116_v35 = vld [vmem:[#allocation11 + $0x4a0] sm:$0xff]  ;;  %v5113_v32 = vld [vmem:[#allocation11 + $0x488] sm:$0xff] }
 0x568   :  { %5608 = vmatpush2.msra.mxu1 %v5082_v0  ;;  %5554 = vmatprep.subr.mxu0 %v5001_v4  ;;  %v5185_v46 = vld [vmem:[#allocation11 + $0x6c8] sm:$0xff]  ;;  %v5100_v51 = vld [vmem:[#allocation11 + $0x420] sm:$0xff] }
 0x569   :  { %5609 = vmatprep.subr.mxu1 %v5081_v33  ;;  %5555 = vmatpush2.msra.mxu0 %v5000_v39  ;;  %v3743_v4 = vadd.f32 %v6753_v37, %v3672_v27  ;;  %v5114_v33 = vld [vmem:[#allocation11 + $0x490] sm:$0xff]  ;;  %v5065_v39 = vld [vmem:[#allocation11 + $0x308] sm:$0xff]  ;;  %v5111_v37 = vld [vmem:[#allocation11 + $0x478] sm:$0xff] }
 0x56a   :  { %5610 = vmatpush2.msra.mxu1 %v5080_v22  ;;  %5557 = vmatmul.mubr.f32.vlgmr.msra.gmra.mxu0 %v4952_v13  ;;  %v5064_v22 = vld [vmem:[#allocation11 + $0x300] sm:$0xff]  ;;  %v5178_v27 = vld [vmem:[#allocation11 + $0x690] sm:$0xff] }
 0x56b   :  { %5611 = vmatprep.subr.mxu1 %v5079_v57  ;;  %5634 = vmatprep.subr.mxu0 %v5127_v24  ;;  %v3814_v13 = vadd.f32 %v6756_v2, %v3743_v4  ;;  %v5112_v57 = vld [vmem:[#allocation11 + $0x480] sm:$0xff]  ;;  %v4954_v24 = vmax.f32 %v6697_v54, 0.0  ;;  %v5189_v2 = vld [vmem:[#allocation11 + $0x6e8] sm:$0xff]  ;;  %v5107_v54 = vld [vmem:[#allocation11 + $0x458] sm:$0xff] }
 0x56c   :  { %5612 = vmatpush2.msra.mxu1 %v5078_v19  ;;  %5635 = vmatpush1.msra.mxu0 %v5126_v50  ;;  %v5191_v19 = vld [vmem:[#allocation11 + $0x6f8] sm:$0xff]  ;;  %v5110_v50 = vld [vmem:[#allocation11 + $0x470] sm:$0xff] }
 0x56d   :  { %5698 = vmatprep.mubr.f32.mxu0 %v4957_v7  ;;  %5613 = vmatprep.subr.mxu1 %v5077_v61  ;;  %v5109_v61 = vld [vmem:[#allocation11 + $0x468] sm:$0xff]  ;;  %v4959_v7 = vmax.f32 %v3814_v13, 0.0  ;;  %v5175_v4 = vld [vmem:[#allocation11 + $0x678] sm:$0xff]  ;;  %v5156_v13 = vld [vmem:[#allocation11 + $0x5e0] sm:$0xff] }
 0x56e   :  { %5636 = vmatprep.subr.mxu0 %v5125_v18  ;;  %5614 = vmatpush2.msra.mxu1 %v5076_v42  ;;  %v5108_v18 = vld [vmem:[#allocation11 + $0x460] sm:$0xff] }
 0x56f   :  { %5637 = vmatpush1.msra.mxu0 %v5124_v25  ;;  %5615 = vmatprep.subr.mxu1 %v5075_v40  ;;  %v5188_v42 = vld [vmem:[#allocation11 + $0x6e0] sm:$0xff]  ;;  %v5187_v25 = vld [vmem:[#allocation11 + $0x6d8] sm:$0xff]  ;;  %v5106_v40 = vld [vmem:[#allocation11 + $0x450] sm:$0xff] }
 0x570   :  { %5638 = vmatprep.subr.mxu0 %v5123_v48  ;;  %5616 = vmatpush2.msra.mxu1 %v5074_v44  ;;  %v5186_v48 = vld [vmem:[#allocation11 + $0x6d0] sm:$0xff]  ;;  %v5105_v44 = vld [vmem:[#allocation11 + $0x448] sm:$0xff] }
 0x571   :  { %5639 = vmatpush1.msra.mxu0 %v5122_v31  ;;  %5617 = vmatprep.subr.mxu1 %v5073_v3  ;;  %v5104_v31 = vld [vmem:[#allocation11 + $0x440] sm:$0xff] }
 0x572   :  { %5640 = vmatprep.subr.mxu0 %v5121_v45  ;;  %5618 = vmatpush2.msra.mxu1 %v5072_v5  ;;  %v5184_v3 = vld [vmem:[#allocation11 + $0x6c0] sm:$0xff]  ;;  %v5103_v45 = vld [vmem:[#allocation11 + $0x438] sm:$0xff] }
 0x573   :  { %5641 = vmatpush1.msra.mxu0 %v5120_v29  ;;  %5619 = vmatprep.subr.mxu1 %v5071_v52  ;;  %v5183_v5 = vld [vmem:[#allocation11 + $0x6b8] sm:$0xff]  ;;  %v5102_v29 = vld [vmem:[#allocation11 + $0x430] sm:$0xff] }
 0x574   :  { %5642 = vmatprep.subr.mxu0 %v5119_v21  ;;  %5620 = vmatpush2.msra.mxu1 %v5070_v59  ;;  %v5182_v52 = vld [vmem:[#allocation11 + $0x6b0] sm:$0xff]  ;;  %v5101_v21 = vld [vmem:[#allocation11 + $0x428] sm:$0xff] }
 0x575   :  { %5643 = vmatpush1.msra.mxu0 %v5118_v62  ;;  %5621 = vmatprep.subr.mxu1 %v5069_v1  ;;  %v4663_v0 = vpop.f32.mrf.mxu1  ;;  %v5181_v59 = vld [vmem:[#allocation11 + $0x6a8] sm:$0xff]  ;;  %v5180_v62 = vld [vmem:[#allocation11 + $0x6a0] sm:$0xff]  ;;  %v5099_v1 = vld [vmem:[#allocation11 + $0x418] sm:$0xff] }
 0x576   :  { %5644 = vmatprep.subr.mxu0 %v5117_v11  ;;  %5622 = vmatpush2.msra.mxu1 %v5068_v15  ;;  %v6847_v38 = vadd.f32 %v4663_v0, %v6835_v14  ;;  %v5190_v14 = vld [vmem:[#allocation11 + $0x6f0] sm:$0xff]  ;;  %v5179_v11 = vld [vmem:[#allocation11 + $0x698] sm:$0xff] }
 0x577   :  { %5645 = vmatpush1.msra.mxu0 %v5116_v35  ;;  %5623 = vmatprep.subr.mxu1 %v5067_v36  ;;  %v5098_v15 = vld [vmem:[#allocation11 + $0x410] sm:$0xff]  ;;  %v5097_v35 = vld [vmem:[#allocation11 + $0x408] sm:$0xff]  ;;  %v5159_v0 = vld [vmem:[#allocation11 + $0x5f8] sm:$0xff] }
 0x578   :  { %5646 = vmatprep.subr.mxu0 %v5115_v55  ;;  %5624 = vmatpush2.msra.mxu1 %v5066_v23  ;;  %v5177_v36 = vld [vmem:[#allocation11 + $0x688] sm:$0xff]  ;;  %v5096_v55 = vld [vmem:[#allocation11 + $0x400] sm:$0xff] }
 0x579   :  { %5647 = vmatpush1.msra.mxu0 %v5114_v33  ;;  %5625 = vmatprep.subr.mxu1 %v5065_v39  ;;  %v5176_v23 = vld [vmem:[#allocation11 + $0x680] sm:$0xff]  ;;  %v5158_v33 = vld [vmem:[#allocation11 + $0x5f0] sm:$0xff] }
 0x57a   :  { %5648 = vmatprep.subr.mxu0 %v5113_v32  ;;  %5626 = vmatpush2.msra.mxu1 %v5064_v22  ;;  %v5174_v39 = vld [vmem:[#allocation11 + $0x670] sm:$0xff]  ;;  %v5157_v32 = vld [vmem:[#allocation11 + $0x5e8] sm:$0xff] }
 0x57b   :  { %5649 = vmatpush1.msra.mxu0 %v5112_v57  ;;  %5628 = vmatmul.mubr.f32.vlgmr.msra.gmra.mxu1 %v4954_v24  ;;  %v5173_v22 = vld [vmem:[#allocation11 + $0x668] sm:$0xff]  ;;  %v5172_v57 = vld [vmem:[#allocation11 + $0x660] sm:$0xff]  ;;  %v5155_v24 = vld [vmem:[#allocation11 + $0x5d8] sm:$0xff] }
 0x57c   :  { %5650 = vmatprep.subr.mxu0 %v5111_v37  ;;  %5705 = vmatprep.subr.mxu1 %v5191_v19  ;;  %v5171_v37 = vld [vmem:[#allocation11 + $0x658] sm:$0xff]  ;;  %v5154_v19 = vld [vmem:[#allocation11 + $0x5d0] sm:$0xff] }
 0x57d   :  { %5651 = vmatpush1.msra.mxu0 %v5110_v50  ;;  %5706 = vmatpush1.msra.mxu1 %v5190_v14  ;;  %v5170_v50 = vld [vmem:[#allocation11 + $0x650] sm:$0xff]  ;;  %v5153_v14 = vld [vmem:[#allocation11 + $0x5c8] sm:$0xff] }
 0x57e   :  { %5769 = vmatprep.mubr.f32.mxu1 %v4959_v7  ;;  %5652 = vmatprep.subr.mxu0 %v5109_v61  ;;  %v5169_v61 = vld [vmem:[#allocation11 + $0x648] sm:$0xff]  ;;  %v5152_v7 = vld [vmem:[#allocation11 + $0x5c0] sm:$0xff] }
 0x57f   :  { %5707 = vmatprep.subr.mxu1 %v5189_v2  ;;  %5653 = vmatpush1.msra.mxu0 %v5108_v18  ;;  %v5168_v2 = vld [vmem:[#allocation11 + $0x640] sm:$0xff]  ;;  %v5151_v18 = vld [vmem:[#allocation11 + $0x5b8] sm:$0xff] }
 0x580   :  { %5708 = vmatpush1.msra.mxu1 %v5188_v42  ;;  %5654 = vmatprep.subr.mxu0 %v5107_v54  ;;  %v5167_v42 = vld [vmem:[#allocation11 + $0x638] sm:$0xff]  ;;  %v5150_v54 = vld [vmem:[#allocation11 + $0x5b0] sm:$0xff] }
 0x581   :  { %5709 = vmatprep.subr.mxu1 %v5187_v25  ;;  %5655 = vmatpush1.msra.mxu0 %v5106_v40  ;;  %v5166_v25 = vld [vmem:[#allocation11 + $0x630] sm:$0xff]  ;;  %v5149_v40 = vld [vmem:[#allocation11 + $0x5a8] sm:$0xff] }
 0x582   :  { %5710 = vmatpush1.msra.mxu1 %v5186_v48  ;;  %5656 = vmatprep.subr.mxu0 %v5105_v44  ;;  %v5165_v48 = vld [vmem:[#allocation11 + $0x628] sm:$0xff]  ;;  %v5148_v44 = vld [vmem:[#allocation11 + $0x5a0] sm:$0xff] }
 0x583   :  { %5711 = vmatprep.subr.mxu1 %v5185_v46  ;;  %5657 = vmatpush1.msra.mxu0 %v5104_v31  ;;  %v5164_v46 = vld [vmem:[#allocation11 + $0x620] sm:$0xff]  ;;  %v5147_v31 = vld [vmem:[#allocation11 + $0x598] sm:$0xff] }
 0x584   :  { %5712 = vmatpush1.msra.mxu1 %v5184_v3  ;;  %5658 = vmatprep.subr.mxu0 %v5103_v45  ;;  %v5163_v3 = vld [vmem:[#allocation11 + $0x618] sm:$0xff]  ;;  %v5146_v45 = vld [vmem:[#allocation11 + $0x590] sm:$0xff] }
 0x585   :  { %5713 = vmatprep.subr.mxu1 %v5183_v5  ;;  %5659 = vmatpush1.msra.mxu0 %v5102_v29  ;;  %v5162_v5 = vld [vmem:[#allocation11 + $0x610] sm:$0xff]  ;;  %v5145_v29 = vld [vmem:[#allocation11 + $0x588] sm:$0xff] }
 0x586   :  { %5714 = vmatpush1.msra.mxu1 %v5182_v52  ;;  %5660 = vmatprep.subr.mxu0 %v5101_v21  ;;  %v5161_v52 = vld [vmem:[#allocation11 + $0x608] sm:$0xff]  ;;  %v5144_v21 = vld [vmem:[#allocation11 + $0x580] sm:$0xff] }
 0x587   :  { %5715 = vmatprep.subr.mxu1 %v5181_v59  ;;  %5661 = vmatpush1.msra.mxu0 %v5100_v51  ;;  %v5160_v59 = vld [vmem:[#allocation11 + $0x600] sm:$0xff]  ;;  %v5143_v51 = vld [vmem:[#allocation11 + $0x578] sm:$0xff] }
 0x588   :  { %5716 = vmatpush1.msra.mxu1 %v5180_v62  ;;  %5662 = vmatprep.subr.mxu0 %v5099_v1  ;;  %v5223_v62 = vld [vmem:[#allocation11 + $0x7f8] sm:$0xff]  ;;  %v5142_v1 = vld [vmem:[#allocation11 + $0x570] sm:$0xff] }
 0x589   :  { %5717 = vmatprep.subr.mxu1 %v5179_v11  ;;  %5663 = vmatpush1.msra.mxu0 %v5098_v15  ;;  %v5222_v11 = vld [vmem:[#allocation11 + $0x7f0] sm:$0xff]  ;;  %v5141_v15 = vld [vmem:[#allocation11 + $0x568] sm:$0xff] }
 0x58a   :  { %5718 = vmatpush1.msra.mxu1 %v5178_v27  ;;  %5664 = vmatprep.subr.mxu0 %v5097_v35  ;;  %v5221_v27 = vld [vmem:[#allocation11 + $0x7e8] sm:$0xff]  ;;  %v5140_v35 = vld [vmem:[#allocation11 + $0x560] sm:$0xff] }
 0x58b   :  { %5719 = vmatprep.subr.mxu1 %v5177_v36  ;;  %5665 = vmatpush1.msra.mxu0 %v5096_v55  ;;  %v5220_v36 = vld [vmem:[#allocation11 + $0x7e0] sm:$0xff]  ;;  %v5139_v55 = vld [vmem:[#allocation11 + $0x558] sm:$0xff] }
 0x58c   :  { %5720 = vmatpush1.msra.mxu1 %v5176_v23  ;;  %5666 = vmatprep.subr.mxu0 %v5159_v0  ;;  %v5219_v23 = vld [vmem:[#allocation11 + $0x7d8] sm:$0xff]  ;;  %v5138_v0 = vld [vmem:[#allocation11 + $0x550] sm:$0xff] }
 0x58d   :  { %5721 = vmatprep.subr.mxu1 %v5175_v4  ;;  %5667 = vmatpush2.msra.mxu0 %v5158_v33  ;;  %v2639_v4 = vrot.slane %v6814_v17, %v6586_v8  ;;  %v5218_v33 = vld [vmem:[#allocation11 + $0x7d0] sm:$0xff] }
 0x58e   :  { %5722 = vmatpush1.msra.mxu1 %v5174_v39  ;;  %5668 = vmatprep.subr.mxu0 %v5157_v32  ;;  %v5137_v39 = vld [vmem:[#allocation11 + $0x548] sm:$0xff]  ;;  %v5214_v17 = vld [vmem:[#allocation11 + $0x7b0] sm:$0xff] }
 0x58f   :  { %5723 = vmatprep.subr.mxu1 %v5173_v22  ;;  %5669 = vmatpush2.msra.mxu0 %v5156_v13  ;;  %v5217_v32 = vld [vmem:[#allocation11 + $0x7c8] sm:$0xff]  ;;  %v5136_v22 = vld [vmem:[#allocation11 + $0x540] sm:$0xff] }
 0x590   :  { %5724 = vmatpush1.msra.mxu1 %v5172_v57  ;;  %5670 = vmatprep.subr.mxu0 %v5155_v24  ;;  %v5216_v13 = vld [vmem:[#allocation11 + $0x7c0] sm:$0xff]  ;;  %v5135_v57 = vld [vmem:[#allocation11 + $0x538] sm:$0xff] }
 0x591   :  { %5725 = vmatprep.subr.mxu1 %v5171_v37  ;;  %5671 = vmatpush2.msra.mxu0 %v5154_v19  ;;  %v5215_v24 = vld [vmem:[#allocation11 + $0x7b8] sm:$0xff]  ;;  %v5134_v37 = vld [vmem:[#allocation11 + $0x530] sm:$0xff]  ;;  %v3885_v19 = vadd.f32 %v6762_v30, %v2639_v4 }
 0x592   :  { %5726 = vmatpush1.msra.mxu1 %v5170_v50  ;;  %5672 = vmatprep.subr.mxu0 %v5153_v14  ;;  %v5133_v50 = vld [vmem:[#allocation11 + $0x528] sm:$0xff]  ;;  %v5198_v4 = vld [vmem:[#allocation11 + $0x730] sm:$0xff] }
 0x593   :  { %5727 = vmatprep.subr.mxu1 %v5169_v61  ;;  %5673 = vmatpush2.msra.mxu0 %v5152_v7  ;;  %v5213_v14 = vld [vmem:[#allocation11 + $0x7a8] sm:$0xff]  ;;  %v5132_v61 = vld [vmem:[#allocation11 + $0x520] sm:$0xff]  ;;  %v3956_v7 = vadd.f32 %v6769_v63, %v3885_v19  ;;  %v5194_v19 = vld [vmem:[#allocation11 + $0x710] sm:$0xff] }
 0x594   :  { %5728 = vmatpush1.msra.mxu1 %v5168_v2  ;;  %5674 = vmatprep.subr.mxu0 %v5151_v18  ;;  %v5212_v2 = vld [vmem:[#allocation11 + $0x7a0] sm:$0xff]  ;;  %v5131_v18 = vld [vmem:[#allocation11 + $0x518] sm:$0xff] }
 0x595   :  { %5729 = vmatprep.subr.mxu1 %v5167_v42  ;;  %5675 = vmatpush2.msra.mxu0 %v5150_v54  ;;  %v5211_v42 = vld [vmem:[#allocation11 + $0x798] sm:$0xff]  ;;  %v5130_v54 = vld [vmem:[#allocation11 + $0x510] sm:$0xff]  ;;  %v4027_v30 = vadd.f32 %v6778_v56, %v3956_v7  ;;  %v5240_v7 = vld [vmem:[#allocation11 + $0x880] sm:$0xff] }
 0x596   :  { %5730 = vmatpush1.msra.mxu1 %v5166_v25  ;;  %5676 = vmatprep.subr.mxu0 %v5149_v40  ;;  %v5210_v25 = vld [vmem:[#allocation11 + $0x790] sm:$0xff]  ;;  %v5129_v40 = vld [vmem:[#allocation11 + $0x508] sm:$0xff] }
 0x597   :  { %5731 = vmatprep.subr.mxu1 %v5165_v48  ;;  %5677 = vmatpush2.msra.mxu0 %v5148_v44  ;;  %v5209_v48 = vld [vmem:[#allocation11 + $0x788] sm:$0xff]  ;;  %v5128_v44 = vld [vmem:[#allocation11 + $0x500] sm:$0xff]  ;;  %v4098_v63 = vadd.f32 %v6781_v41, %v4027_v30  ;;  %v5206_v56 = vld [vmem:[#allocation11 + $0x770] sm:$0xff] }
 0x598   :  { %5732 = vmatpush1.msra.mxu1 %v5164_v46  ;;  %5678 = vmatprep.subr.mxu0 %v5147_v31  ;;  %v5208_v46 = vld [vmem:[#allocation11 + $0x780] sm:$0xff]  ;;  %v4956_v31 = vmax.f32 %v6722_v53, 0.0  ;;  %v5253_v41 = vld [vmem:[#allocation11 + $0x8e8] sm:$0xff]  ;;  %v5203_v53 = vld [vmem:[#allocation11 + $0x758] sm:$0xff] }
 0x599   :  { %5733 = vmatprep.subr.mxu1 %v5163_v3  ;;  %5679 = vmatpush2.msra.mxu0 %v5146_v45  ;;  %v5207_v3 = vld [vmem:[#allocation11 + $0x778] sm:$0xff]  ;;  %v5237_v30 = vld [vmem:[#allocation11 + $0x868] sm:$0xff] }
 0x59a   :  { %5734 = vmatpush1.msra.mxu1 %v5162_v5  ;;  %5680 = vmatprep.subr.mxu0 %v5145_v29  ;;  %v5255_v45 = vld [vmem:[#allocation11 + $0x8f8] sm:$0xff]  ;;  %v5254_v5 = vld [vmem:[#allocation11 + $0x8f0] sm:$0xff]  ;;  %v5205_v29 = vld [vmem:[#allocation11 + $0x768] sm:$0xff] }
 0x59b   :  { %5735 = vmatprep.subr.mxu1 %v5161_v52  ;;  %5681 = vmatpush2.msra.mxu0 %v5144_v21  ;;  %v4961_v52 = vmax.f32 %v4098_v63, 0.0  ;;  %v5204_v21 = vld [vmem:[#allocation11 + $0x760] sm:$0xff]  ;;  %v5234_v63 = vld [vmem:[#allocation11 + $0x850] sm:$0xff] }
 0x59c   :  { %5736 = vmatpush1.msra.mxu1 %v5160_v59  ;;  %5682 = vmatprep.subr.mxu0 %v5143_v51  ;;  %v5252_v59 = vld [vmem:[#allocation11 + $0x8e0] sm:$0xff]  ;;  %v5251_v51 = vld [vmem:[#allocation11 + $0x8d8] sm:$0xff] }
 0x59d   :  { %5737 = vmatprep.subr.mxu1 %v5223_v62  ;;  %5683 = vmatpush2.msra.mxu0 %v5142_v1  ;;  %v5202_v62 = vld [vmem:[#allocation11 + $0x750] sm:$0xff]  ;;  %v6858_v1 = vld [vmem:[#allocation10 + $0x8] sm:$0xff] }
 0x59e   :  { %5738 = vmatpush2.msra.mxu1 %v5222_v11  ;;  %5684 = vmatprep.subr.mxu0 %v5141_v15  ;;  %v2647_v11 = vrot.slane %v6858_v1, %v6605_v26  ;;  %v5250_v15 = vld [vmem:[#allocation11 + $0x8d0] sm:$0xff] }
 0x59f   :  { %5739 = vmatprep.subr.mxu1 %v5221_v27  ;;  %5685 = vmatpush2.msra.mxu0 %v5140_v35  ;;  %v5201_v27 = vld [vmem:[#allocation11 + $0x748] sm:$0xff]  ;;  %v5246_v26 = vld [vmem:[#allocation11 + $0x8b0] sm:$0xff] }
 0x5a0   :  { %5740 = vmatpush2.msra.mxu1 %v5220_v36  ;;  %5686 = vmatprep.subr.mxu0 %v5139_v55  ;;  %v5249_v35 = vld [vmem:[#allocation11 + $0x8c8] sm:$0xff]  ;;  %v5200_v36 = vld [vmem:[#allocation11 + $0x740] sm:$0xff] }
 0x5a1   :  { %5741 = vmatprep.subr.mxu1 %v5219_v23  ;;  %5687 = vmatpush2.msra.mxu0 %v5138_v0  ;;  %v5248_v55 = vld [vmem:[#allocation11 + $0x8c0] sm:$0xff]  ;;  %v5199_v23 = vld [vmem:[#allocation11 + $0x738] sm:$0xff] }
 0x5a2   :  { %5742 = vmatpush2.msra.mxu1 %v5218_v33  ;;  %5688 = vmatprep.subr.mxu0 %v5137_v39  ;;  %v5247_v0 = vld [vmem:[#allocation11 + $0x8b8] sm:$0xff]  ;;  %v4169_v33 = vadd.f32 %v6787_v10, %v2647_v11  ;;  %v5197_v39 = vld [vmem:[#allocation11 + $0x728] sm:$0xff] }
 0x5a3   :  { %5743 = vmatprep.subr.mxu1 %v5217_v32  ;;  %5689 = vmatpush2.msra.mxu0 %v5136_v22  ;;  %v5245_v32 = vld [vmem:[#allocation11 + $0x8a8] sm:$0xff]  ;;  %v5196_v22 = vld [vmem:[#allocation11 + $0x720] sm:$0xff]  ;;  %v5307_v11 = vld [vmem:[#allocation11 + $0xa98] sm:$0xff] }
 0x5a4   :  { %5744 = vmatpush2.msra.mxu1 %v5216_v13  ;;  %5690 = vmatprep.subr.mxu0 %v5135_v57  ;;  %v4240_v13 = vadd.f32 %v6794_v28, %v4169_v33  ;;  %v5244_v57 = vld [vmem:[#allocation11 + $0x8a0] sm:$0xff]  ;;  %v5286_v33 = vld [vmem:[#allocation11 + $0x9f0] sm:$0xff] }
 0x5a5   :  { %5745 = vmatprep.subr.mxu1 %v5215_v24  ;;  %5691 = vmatpush2.msra.mxu0 %v5134_v37  ;;  %v5195_v24 = vld [vmem:[#allocation11 + $0x718] sm:$0xff] }
 0x5a6   :  { %5746 = vmatpush2.msra.mxu1 %v5214_v17  ;;  %5692 = vmatprep.subr.mxu0 %v5133_v50  ;;  %v5243_v37 = vld [vmem:[#allocation11 + $0x898] sm:$0xff]  ;;  %v4311_v10 = vadd.f32 %v6812_v16, %v4240_v13  ;;  %v5242_v17 = vld [vmem:[#allocation11 + $0x890] sm:$0xff]  ;;  %v5193_v50 = vld [vmem:[#allocation11 + $0x708] sm:$0xff] }
 0x5a7   :  { %5747 = vmatprep.subr.mxu1 %v5213_v14  ;;  %5693 = vmatpush2.msra.mxu0 %v5132_v61  ;;  %v5241_v14 = vld [vmem:[#allocation11 + $0x888] sm:$0xff]  ;;  %v5192_v61 = vld [vmem:[#allocation11 + $0x700] sm:$0xff]  ;;  %v5238_v16 = vld [vmem:[#allocation11 + $0x870] sm:$0xff] }
 0x5a8   :  { %5748 = vmatpush2.msra.mxu1 %v5212_v2  ;;  %5694 = vmatprep.subr.mxu0 %v5131_v18  ;;  %v4382_v28 = vadd.f32 %v6819_v49, %v4311_v10  ;;  %v4958_v2 = vmax.f32 %v6747_v60, 0.0  ;;  %v5239_v18 = vld [vmem:[#allocation11 + $0x878] sm:$0xff]  ;;  %v5317_v49 = vld [vmem:[#allocation11 + $0xae8] sm:$0xff]  ;;  %v5300_v13 = vld [vmem:[#allocation11 + $0xa60] sm:$0xff] }
 0x5a9   :  { %5749 = vmatprep.subr.mxu1 %v5211_v42  ;;  %5695 = vmatpush2.msra.mxu0 %v5130_v54  ;;  %v5319_v42 = vld [vmem:[#allocation11 + $0xaf8] sm:$0xff]  ;;  %v5318_v54 = vld [vmem:[#allocation11 + $0xaf0] sm:$0xff]  ;;  %v5281_v10 = vld [vmem:[#allocation11 + $0x9c8] sm:$0xff] }
 0x5aa   :  { %5750 = vmatpush2.msra.mxu1 %v5210_v25  ;;  %5696 = vmatprep.subr.mxu0 %v5129_v40  ;;  %v4963_v25 = vmax.f32 %v4382_v28, 0.0  ;;  %v5236_v40 = vld [vmem:[#allocation11 + $0x860] sm:$0xff]  ;;  %v5235_v60 = vld [vmem:[#allocation11 + $0x858] sm:$0xff] }
 0x5ab   :  { %5751 = vmatprep.subr.mxu1 %v5209_v48  ;;  %5697 = vmatpush2.msra.mxu0 %v5128_v44  ;;  %v5316_v48 = vld [vmem:[#allocation11 + $0xae0] sm:$0xff]  ;;  %v5315_v44 = vld [vmem:[#allocation11 + $0xad8] sm:$0xff] }
 0x5ac   :  { %5752 = vmatpush2.msra.mxu1 %v5208_v46  ;;  %5699 = vmatmul.mubr.f32.vlgmr.msra.gmra.mxu0 %v4956_v31  ;;  %v5314_v46 = vld [vmem:[#allocation11 + $0xad0] sm:$0xff]  ;;  %v5233_v31 = vld [vmem:[#allocation11 + $0x848] sm:$0xff]  ;;  %v5295_v28 = vld [vmem:[#allocation11 + $0xa38] sm:$0xff] }
 0x5ad   :  { %5753 = vmatprep.subr.mxu1 %v5207_v3  ;;  %5776 = vmatprep.subr.mxu0 %v5255_v45  ;;  %v5313_v3 = vld [vmem:[#allocation11 + $0xac8] sm:$0xff]  ;;  %v5232_v45 = vld [vmem:[#allocation11 + $0x840] sm:$0xff] }
 0x5ae   :  { %5754 = vmatpush2.msra.mxu1 %v5206_v56  ;;  %5777 = vmatpush1.msra.mxu0 %v5254_v5  ;;  %v5312_v56 = vld [vmem:[#allocation11 + $0xac0] sm:$0xff]  ;;  %v5231_v5 = vld [vmem:[#allocation11 + $0x838] sm:$0xff] }
 0x5af   :  { %5840 = vmatprep.mubr.f32.mxu0 %v4961_v52  ;;  %5755 = vmatprep.subr.mxu1 %v5205_v29  ;;  %v5311_v29 = vld [vmem:[#allocation11 + $0xab8] sm:$0xff]  ;;  %v5230_v52 = vld [vmem:[#allocation11 + $0x830] sm:$0xff] }
 0x5b0   :  { %5778 = vmatprep.subr.mxu0 %v5253_v41  ;;  %5756 = vmatpush2.msra.mxu1 %v5204_v21  ;;  %v5310_v41 = vld [vmem:[#allocation11 + $0xab0] sm:$0xff]  ;;  %v5229_v21 = vld [vmem:[#allocation11 + $0x828] sm:$0xff] }
 0x5b1   :  { %5779 = vmatpush1.msra.mxu0 %v5252_v59  ;;  %5757 = vmatprep.subr.mxu1 %v5203_v53  ;;  %v5309_v59 = vld [vmem:[#allocation11 + $0xaa8] sm:$0xff]  ;;  %v5228_v53 = vld [vmem:[#allocation11 + $0x820] sm:$0xff] }
 0x5b2   :  { %5780 = vmatprep.subr.mxu0 %v5251_v51  ;;  %5758 = vmatpush2.msra.mxu1 %v5202_v62  ;;  %v5308_v51 = vld [vmem:[#allocation11 + $0xaa0] sm:$0xff]  ;;  %v5227_v62 = vld [vmem:[#allocation11 + $0x818] sm:$0xff] }
 0x5b3   :  { %5781 = vmatpush1.msra.mxu0 %v5250_v15  ;;  %5759 = vmatprep.subr.mxu1 %v5201_v27  ;;  %v5226_v15 = vld [vmem:[#allocation11 + $0x810] sm:$0xff] }
 0x5b4   :  { %5782 = vmatprep.subr.mxu0 %v5249_v35  ;;  %5760 = vmatpush2.msra.mxu1 %v5200_v36  ;;  %v5306_v27 = vld [vmem:[#allocation11 + $0xa90] sm:$0xff]  ;;  %v5225_v35 = vld [vmem:[#allocation11 + $0x808] sm:$0xff] }
 0x5b5   :  { %5783 = vmatpush1.msra.mxu0 %v5248_v55  ;;  %5761 = vmatprep.subr.mxu1 %v5199_v23  ;;  %v5305_v36 = vld [vmem:[#allocation11 + $0xa88] sm:$0xff]  ;;  %v5224_v55 = vld [vmem:[#allocation11 + $0x800] sm:$0xff] }
 0x5b6   :  { %5784 = vmatprep.subr.mxu0 %v5247_v0  ;;  %5762 = vmatpush2.msra.mxu1 %v5198_v4  ;;  %v5304_v23 = vld [vmem:[#allocation11 + $0xa80] sm:$0xff]  ;;  %v5287_v0 = vld [vmem:[#allocation11 + $0x9f8] sm:$0xff] }
 0x5b7   :  { %5785 = vmatpush1.msra.mxu0 %v5246_v26  ;;  %5763 = vmatprep.subr.mxu1 %v5197_v39  ;;  %v5303_v4 = vld [vmem:[#allocation11 + $0xa78] sm:$0xff]  ;;  %v5302_v26 = vld [vmem:[#allocation11 + $0xa70] sm:$0xff]  ;;  %v5285_v39 = vld [vmem:[#allocation11 + $0x9e8] sm:$0xff] }
 0x5b8   :  { %5786 = vmatprep.subr.mxu0 %v5245_v32  ;;  %5764 = vmatpush2.msra.mxu1 %v5196_v22  ;;  %v5301_v32 = vld [vmem:[#allocation11 + $0xa68] sm:$0xff]  ;;  %v5284_v22 = vld [vmem:[#allocation11 + $0x9e0] sm:$0xff] }
 0x5b9   :  { %5787 = vmatpush1.msra.mxu0 %v5244_v57  ;;  %5765 = vmatprep.subr.mxu1 %v5195_v24  ;;  %v5283_v57 = vld [vmem:[#allocation11 + $0x9d8] sm:$0xff] }
 0x5ba   :  { %5788 = vmatprep.subr.mxu0 %v5243_v37  ;;  %5766 = vmatpush2.msra.mxu1 %v5194_v19  ;;  %v5299_v24 = vld [vmem:[#allocation11 + $0xa58] sm:$0xff]  ;;  %v5282_v37 = vld [vmem:[#allocation11 + $0x9d0] sm:$0xff] }
 0x5bb   :  { %5789 = vmatpush1.msra.mxu0 %v5242_v17  ;;  %5767 = vmatprep.subr.mxu1 %v5193_v50  ;;  %v5298_v19 = vld [vmem:[#allocation11 + $0xa50] sm:$0xff]  ;;  %v5297_v17 = vld [vmem:[#allocation11 + $0xa48] sm:$0xff]  ;;  %v5280_v50 = vld [vmem:[#allocation11 + $0x9c0] sm:$0xff] }
 0x5bc   :  { %5790 = vmatprep.subr.mxu0 %v5241_v14  ;;  %5768 = vmatpush2.msra.mxu1 %v5192_v61  ;;  %v5296_v14 = vld [vmem:[#allocation11 + $0xa40] sm:$0xff]  ;;  %v5279_v61 = vld [vmem:[#allocation11 + $0x9b8] sm:$0xff] }
 0x5bd   :  { %5791 = vmatpush1.msra.mxu0 %v5240_v7  ;;  %5770 = vmatmul.mubr.f32.vlgmr.msra.gmra.mxu1 %v4958_v2  ;;  %v5278_v7 = vld [vmem:[#allocation11 + $0x9b0] sm:$0xff] }
 0x5be   :  { %5792 = vmatprep.subr.mxu0 %v5239_v18  ;;  %5847 = vmatprep.subr.mxu1 %v5319_v42  ;;  %v5294_v2 = vld [vmem:[#allocation11 + $0xa30] sm:$0xff]  ;;  %v5277_v18 = vld [vmem:[#allocation11 + $0x9a8] sm:$0xff] }
 0x5bf   :  { %5793 = vmatpush1.msra.mxu0 %v5238_v16  ;;  %5848 = vmatpush1.msra.mxu1 %v5318_v54  ;;  %v5293_v42 = vld [vmem:[#allocation11 + $0xa28] sm:$0xff]  ;;  %v5276_v16 = vld [vmem:[#allocation11 + $0x9a0] sm:$0xff] }
 0x5c0   :  { %5911 = vmatprep.mubr.f32.mxu1 %v4963_v25  ;;  %5794 = vmatprep.subr.mxu0 %v5237_v30  ;;  %v5292_v54 = vld [vmem:[#allocation11 + $0xa20] sm:$0xff]  ;;  %v5275_v30 = vld [vmem:[#allocation11 + $0x998] sm:$0xff] }
 0x5c1   :  { %5849 = vmatprep.subr.mxu1 %v5317_v49  ;;  %5795 = vmatpush1.msra.mxu0 %v5236_v40  ;;  %v5291_v25 = vld [vmem:[#allocation11 + $0xa18] sm:$0xff]  ;;  %v5274_v49 = vld [vmem:[#allocation11 + $0x990] sm:$0xff] }
 0x5c2   :  { %5850 = vmatpush1.msra.mxu1 %v5316_v48  ;;  %5796 = vmatprep.subr.mxu0 %v5235_v60  ;;  %v5290_v40 = vld [vmem:[#allocation11 + $0xa10] sm:$0xff]  ;;  %v5273_v48 = vld [vmem:[#allocation11 + $0x988] sm:$0xff] }
 0x5c3   :  { %5851 = vmatprep.subr.mxu1 %v5315_v44  ;;  %5797 = vmatpush1.msra.mxu0 %v5234_v63  ;;  %v5289_v60 = vld [vmem:[#allocation11 + $0xa08] sm:$0xff]  ;;  %v5272_v44 = vld [vmem:[#allocation11 + $0x980] sm:$0xff] }
 0x5c4   :  { %5852 = vmatpush1.msra.mxu1 %v5314_v46  ;;  %5798 = vmatprep.subr.mxu0 %v5233_v31  ;;  %v5288_v63 = vld [vmem:[#allocation11 + $0xa00] sm:$0xff]  ;;  %v5271_v46 = vld [vmem:[#allocation11 + $0x978] sm:$0xff] }
 0x5c5   :  { %5853 = vmatprep.subr.mxu1 %v5313_v3  ;;  %5799 = vmatpush1.msra.mxu0 %v5232_v45  ;;  %v5351_v31 = vld [vmem:[#allocation11 + $0xbf8] sm:$0xff]  ;;  %v5270_v3 = vld [vmem:[#allocation11 + $0x970] sm:$0xff] }
 0x5c6   :  { %5854 = vmatpush1.msra.mxu1 %v5312_v56  ;;  %5800 = vmatprep.subr.mxu0 %v5231_v5  ;;  %v5350_v45 = vld [vmem:[#allocation11 + $0xbf0] sm:$0xff]  ;;  %v5269_v56 = vld [vmem:[#allocation11 + $0x968] sm:$0xff] }
 0x5c7   :  { %5855 = vmatprep.subr.mxu1 %v5311_v29  ;;  %5801 = vmatpush1.msra.mxu0 %v5230_v52  ;;  %v5349_v5 = vld [vmem:[#allocation11 + $0xbe8] sm:$0xff]  ;;  %v5268_v29 = vld [vmem:[#allocation11 + $0x960] sm:$0xff] }
 0x5c8   :  { %5856 = vmatpush1.msra.mxu1 %v5310_v41  ;;  %5802 = vmatprep.subr.mxu0 %v5229_v21  ;;  %v5348_v52 = vld [vmem:[#allocation11 + $0xbe0] sm:$0xff]  ;;  %v5267_v41 = vld [vmem:[#allocation11 + $0x958] sm:$0xff] }
 0x5c9   :  { %5857 = vmatprep.subr.mxu1 %v5309_v59  ;;  %5803 = vmatpush1.msra.mxu0 %v5228_v53  ;;  %v5347_v21 = vld [vmem:[#allocation11 + $0xbd8] sm:$0xff]  ;;  %v5266_v59 = vld [vmem:[#allocation11 + $0x950] sm:$0xff]  ;;  %v2655_v53 = vrot.slane %v6858_v1, %v6599_v20 }
 0x5ca   :  { %5858 = vmatpush1.msra.mxu1 %v5308_v51  ;;  %5804 = vmatprep.subr.mxu0 %v5227_v62  ;;  %v5346_v51 = vld [vmem:[#allocation11 + $0xbd0] sm:$0xff]  ;;  %v5265_v62 = vld [vmem:[#allocation11 + $0x948] sm:$0xff] }
 0x5cb   :  { %5859 = vmatprep.subr.mxu1 %v5307_v11  ;;  %5805 = vmatpush1.msra.mxu0 %v5226_v15  ;;  %v5345_v11 = vld [vmem:[#allocation11 + $0xbc8] sm:$0xff]  ;;  %v5264_v15 = vld [vmem:[#allocation11 + $0x940] sm:$0xff]  ;;  %v5342_v20 = vld [vmem:[#allocation11 + $0xbb0] sm:$0xff] }
 0x5cc   :  { %5860 = vmatpush1.msra.mxu1 %v5306_v27  ;;  %5806 = vmatprep.subr.mxu0 %v5225_v35  ;;  %v5344_v27 = vld [vmem:[#allocation11 + $0xbc0] sm:$0xff]  ;;  %v5263_v35 = vld [vmem:[#allocation11 + $0x938] sm:$0xff] }
 0x5cd   :  { %5861 = vmatprep.subr.mxu1 %v5305_v36  ;;  %5807 = vmatpush1.msra.mxu0 %v5224_v55  ;;  %v5343_v36 = vld [vmem:[#allocation11 + $0xbb8] sm:$0xff]  ;;  %v5262_v55 = vld [vmem:[#allocation11 + $0x930] sm:$0xff] }
 0x5ce   :  { %5862 = vmatpush1.msra.mxu1 %v5304_v23  ;;  %5808 = vmatprep.subr.mxu0 %v5287_v0  ;;  %v4453_v23 = vadd.f32 %v6830_v9, %v2655_v53  ;;  %v5261_v0 = vld [vmem:[#allocation11 + $0x928] sm:$0xff]  ;;  %v5258_v9 = vld [vmem:[#allocation11 + $0x910] sm:$0xff] }
 0x5cf   :  { %5863 = vmatprep.subr.mxu1 %v5303_v4  ;;  %5809 = vmatpush2.msra.mxu0 %v5286_v33  ;;  %v4594_v4 = vpop.f32.mrf.mxu0  ;;  %v5341_v33 = vld [vmem:[#allocation11 + $0xba8] sm:$0xff] }
 0x5d0   :  { %5864 = vmatpush1.msra.mxu1 %v5302_v26  ;;  %5810 = vmatprep.subr.mxu0 %v5285_v39  ;;  %v5260_v26 = vld [vmem:[#allocation11 + $0x920] sm:$0xff]  ;;  %v4524_v39 = vadd.f32 %v6842_v34, %v4453_v23  ;;  %v5373_v53 = vld [vmem:[#allocation11 + $0xca8] sm:$0xff] }
 0x5d1   :  { %5865 = vmatprep.subr.mxu1 %v5301_v32  ;;  %5811 = vmatpush2.msra.mxu0 %v5284_v22  ;;  %v5340_v32 = vld [vmem:[#allocation11 + $0xba0] sm:$0xff]  ;;  %v5259_v22 = vld [vmem:[#allocation11 + $0x918] sm:$0xff]  ;;  %v5369_v23 = vld [vmem:[#allocation11 + $0xc88] sm:$0xff] }
 0x5d2   :  { %5866 = vmatpush1.msra.mxu1 %v5300_v13  ;;  %5812 = vmatprep.subr.mxu0 %v5283_v57  ;;  %v4665_v13 = vpop.f32.mrf.mxu1  ;;  %v5339_v57 = vld [vmem:[#allocation11 + $0xb98] sm:$0xff]  ;;  %v5336_v34 = vld [vmem:[#allocation11 + $0xb80] sm:$0xff] }
 0x5d3   :  { %5867 = vmatprep.subr.mxu1 %v5299_v24  ;;  %5813 = vmatpush2.msra.mxu0 %v5282_v37  ;;  %v4595_v24 = vadd.f32 %v4594_v4, %v4524_v39  ;;  %v5338_v37 = vld [vmem:[#allocation11 + $0xb90] sm:$0xff]  ;;  %v5368_v4 = vld [vmem:[#allocation11 + $0xc80] sm:$0xff]  ;;  %v5447_v39 = vld [vmem:[#allocation11 + $0xef8] sm:$0xff] }
 0x5d4   :  { %5868 = vmatpush1.msra.mxu1 %v5298_v19  ;;  %5814 = vmatprep.subr.mxu0 %v5281_v10  ;;  %v5257_v19 = vld [vmem:[#allocation11 + $0x908] sm:$0xff] }
 0x5d5   :  { %5869 = vmatprep.subr.mxu1 %v5297_v17  ;;  %5815 = vmatpush2.msra.mxu0 %v5280_v50  ;;  %v5337_v10 = vld [vmem:[#allocation11 + $0xb88] sm:$0xff]  ;;  %v5256_v17 = vld [vmem:[#allocation11 + $0x900] sm:$0xff]  ;;  %v4666_v50 = vadd.f32 %v4665_v13, %v4595_v24  ;;  %v5366_v13 = vld [vmem:[#allocation11 + $0xc70] sm:$0xff] }
 0x5d6   :  { %5870 = vmatpush1.msra.mxu1 %v5296_v14  ;;  %5816 = vmatprep.subr.mxu0 %v5279_v61  ;;  %v4960_v14 = vmax.f32 %v6772_v12, 0.0  ;;  %v5335_v61 = vld [vmem:[#allocation11 + $0xb78] sm:$0xff]  ;;  %v5445_v24 = vld [vmem:[#allocation11 + $0xee8] sm:$0xff] }
 0x5d7   :  { %5871 = vmatprep.subr.mxu1 %v5295_v28  ;;  %5817 = vmatpush2.msra.mxu0 %v5278_v7  ;;  %v5383_v28 = vld [vmem:[#allocation11 + $0xcf8] sm:$0xff]  ;;  %v5334_v7 = vld [vmem:[#allocation11 + $0xb70] sm:$0xff] }
 0x5d8   :  { %5872 = vmatpush1.msra.mxu1 %v5294_v2  ;;  %5818 = vmatprep.subr.mxu0 %v5277_v18  ;;  %v5382_v2 = vld [vmem:[#allocation11 + $0xcf0] sm:$0xff]  ;;  %v5333_v18 = vld [vmem:[#allocation11 + $0xb68] sm:$0xff]  ;;  %v5331_v12 = vld [vmem:[#allocation11 + $0xb58] sm:$0xff] }
 0x5d9   :  { %5873 = vmatprep.subr.mxu1 %v5293_v42  ;;  %5819 = vmatpush2.msra.mxu0 %v5276_v16  ;;  %v4965_v42 = vmax.f32 %v4666_v50, 0.0  ;;  %v5381_v16 = vld [vmem:[#allocation11 + $0xce8] sm:$0xff]  ;;  %v5362_v50 = vld [vmem:[#allocation11 + $0xc50] sm:$0xff] }
 0x5da   :  { %5874 = vmatpush1.msra.mxu1 %v5292_v54  ;;  %5820 = vmatprep.subr.mxu0 %v5275_v30  ;;  %v5332_v54 = vld [vmem:[#allocation11 + $0xb60] sm:$0xff] }
 0x5db   :  { %5875 = vmatprep.subr.mxu1 %v5291_v25  ;;  %5821 = vmatpush2.msra.mxu0 %v5274_v49  ;;  %v5380_v30 = vld [vmem:[#allocation11 + $0xce0] sm:$0xff]  ;;  %v6872_v25 = vpop.f32.mrf.mxu0  ;;  %v5379_v49 = vld [vmem:[#allocation11 + $0xcd8] sm:$0xff] }
 0x5dc   :  { %5876 = vmatpush1.msra.mxu1 %v5290_v40  ;;  %5822 = vmatprep.subr.mxu0 %v5273_v48  ;;  %v5330_v40 = vld [vmem:[#allocation11 + $0xb50] sm:$0xff] }
 0x5dd   :  { %5877 = vmatprep.subr.mxu1 %v5289_v60  ;;  %5823 = vmatpush2.msra.mxu0 %v5272_v44  ;;  %v5378_v48 = vld [vmem:[#allocation11 + $0xcd0] sm:$0xff]  ;;  %v5329_v60 = vld [vmem:[#allocation11 + $0xb48] sm:$0xff]  ;;  %v6874_v44 = vpop.f32.mrf.mxu1 }
 0x5de   :  { %5878 = vmatpush1.msra.mxu1 %v5288_v63  ;;  %5824 = vmatprep.subr.mxu0 %v5271_v46  ;;  %v5377_v63 = vld [vmem:[#allocation11 + $0xcc8] sm:$0xff]  ;;  %v5328_v46 = vld [vmem:[#allocation11 + $0xb40] sm:$0xff] }
 0x5df   :  { %5879 = vmatprep.subr.mxu1 %v5351_v31  ;;  %5825 = vmatpush2.msra.mxu0 %v5270_v3  ;;  %v5376_v31 = vld [vmem:[#allocation11 + $0xcc0] sm:$0xff]  ;;  %v5327_v3 = vld [vmem:[#allocation11 + $0xb38] sm:$0xff] }
 0x5e0   :  { %5880 = vmatpush2.msra.mxu1 %v5350_v45  ;;  %5826 = vmatprep.subr.mxu0 %v5269_v56  ;;  %v4736_v45 = vpop.f32.mrf.mxu0  ;;  %v5375_v56 = vld [vmem:[#allocation11 + $0xcb8] sm:$0xff] }
 0x5e1   :  { %5881 = vmatprep.subr.mxu1 %v5349_v5  ;;  %5827 = vmatpush2.msra.mxu0 %v5268_v29  ;;  %v5326_v5 = vld [vmem:[#allocation11 + $0xb30] sm:$0xff]  ;;  %v2663_v29 = vrot.slane %v6858_v1, %v6633_v47 }
 0x5e2   :  { %5882 = vmatpush2.msra.mxu1 %v5348_v52  ;;  %5828 = vmatprep.subr.mxu0 %v5267_v41  ;;  %v5374_v52 = vld [vmem:[#allocation11 + $0xcb0] sm:$0xff]  ;;  %v5325_v41 = vld [vmem:[#allocation11 + $0xb28] sm:$0xff] }
 0x5e3   :  { %5883 = vmatprep.subr.mxu1 %v5347_v21  ;;  %5829 = vmatpush2.msra.mxu0 %v5266_v59  ;;  %v4807_v21 = vpop.f32.mrf.mxu1  ;;  %v4737_v1 = vadd.f32 %v4736_v45, %v2663_v29  ;;  %v5352_v45 = vld [vmem:[#allocation11 + $0xc00] sm:$0xff]  ;;  %v5431_v29 = vld [vmem:[#allocation11 + $0xe78] sm:$0xff] }
 0x5e4   :  { %5884 = vmatpush2.msra.mxu1 %v5346_v51  ;;  %5830 = vmatprep.subr.mxu0 %v5265_v62  ;;  %v5324_v51 = vld [vmem:[#allocation11 + $0xb20] sm:$0xff] }
 0x5e5   :  { %5885 = vmatprep.subr.mxu1 %v5345_v11  ;;  %5831 = vmatpush2.msra.mxu0 %v5264_v15  ;;  %v5372_v62 = vld [vmem:[#allocation11 + $0xca0] sm:$0xff]  ;;  %v5323_v11 = vld [vmem:[#allocation11 + $0xb18] sm:$0xff] }
 0x5e6   :  { %5886 = vmatpush2.msra.mxu1 %v5344_v27  ;;  %5832 = vmatprep.subr.mxu0 %v5263_v35  ;;  %v5371_v15 = vld [vmem:[#allocation11 + $0xc98] sm:$0xff]  ;;  %v5322_v27 = vld [vmem:[#allocation11 + $0xb10] sm:$0xff] }
 0x5e7   :  { %5887 = vmatprep.subr.mxu1 %v5343_v36  ;;  %5833 = vmatpush2.msra.mxu0 %v5262_v55  ;;  %v5370_v35 = vld [vmem:[#allocation11 + $0xc90] sm:$0xff]  ;;  %v5321_v36 = vld [vmem:[#allocation11 + $0xb08] sm:$0xff] }
 0x5e8   :  { %5888 = vmatpush2.msra.mxu1 %v5342_v20  ;;  %5834 = vmatprep.subr.mxu0 %v5261_v0  ;;  %v6878_v59 = vpop.f32.mrf.mxu0  ;;  %v5320_v20 = vld [vmem:[#allocation11 + $0xb00] sm:$0xff]  ;;  %v4808_v0 = vadd.f32 %v4807_v21, %v4737_v1  ;;  %v5413_v21 = vld [vmem:[#allocation11 + $0xde8] sm:$0xff]  ;;  %v5426_v1 = vld [vmem:[#allocation11 + $0xe50] sm:$0xff] }
 0x5e9   :  { %5889 = vmatprep.subr.mxu1 %v5341_v33  ;;  %5835 = vmatpush2.msra.mxu0 %v5260_v26  ;;  %v4962_v33 = vmax.f32 %v6797_v43, 0.0  ;;  %v5367_v26 = vld [vmem:[#allocation11 + $0xc78] sm:$0xff] }
 0x5ea   :  { %5890 = vmatpush2.msra.mxu1 %v5340_v32  ;;  %5836 = vmatprep.subr.mxu0 %v5259_v22  ;;  %v4878_v55 = vpop.f32.mrf.mxu0  ;;  %v5363_v43 = vld [vmem:[#allocation11 + $0xc58] sm:$0xff] }
 0x5eb   :  { %5891 = vmatprep.subr.mxu1 %v5339_v57  ;;  %5837 = vmatpush2.msra.mxu0 %v5258_v9  ;;  %v4879_v22 = vadd.f32 %v4878_v55, %v4808_v0  ;;  %v5446_v57 = vld [vmem:[#allocation11 + $0xef0] sm:$0xff]  ;;  %v5365_v9 = vld [vmem:[#allocation11 + $0xc68] sm:$0xff]  ;;  %v5408_v55 = vld [vmem:[#allocation11 + $0xdc0] sm:$0xff] }
 0x5ec   :  { %5892 = vmatpush2.msra.mxu1 %v5338_v37  ;;  %5838 = vmatprep.subr.mxu0 %v5257_v19  ;;  %v5364_v19 = vld [vmem:[#allocation11 + $0xc60] sm:$0xff]  ;;  %v5423_v0 = vld [vmem:[#allocation11 + $0xe38] sm:$0xff] }
 0x5ed   :  { %5893 = vmatprep.subr.mxu1 %v5337_v10  ;;  %5839 = vmatpush2.msra.mxu0 %v5256_v17  ;;  %v5444_v10 = vld [vmem:[#allocation11 + $0xee0] sm:$0xff]  ;;  %v5443_v17 = vld [vmem:[#allocation11 + $0xed8] sm:$0xff] }
 0x5ee   :  { %5894 = vmatpush2.msra.mxu1 %v5336_v34  ;;  %5841 = vmatmul.mubr.f32.vlgmr.msra.gmra.mxu0 %v4960_v14  ;;  %v5442_v34 = vld [vmem:[#allocation11 + $0xed0] sm:$0xff]  ;;  %v5361_v14 = vld [vmem:[#allocation11 + $0xc48] sm:$0xff] }
 0x5ef   :  { %5895 = vmatprep.subr.mxu1 %v5335_v61  ;;  %5918 = vmatprep.subr.mxu0 %v5383_v28  ;;  %v5441_v61 = vld [vmem:[#allocation11 + $0xec8] sm:$0xff] }
 0x5f0   :  { %5896 = vmatpush2.msra.mxu1 %v5334_v7  ;;  %5919 = vmatpush1.msra.mxu0 %v5382_v2  ;;  %v5360_v7 = vld [vmem:[#allocation11 + $0xc40] sm:$0xff] }
 0x5f1   :  { %5982 = vmatprep.mubr.f32.mxu0 %v4965_v42  ;;  %5897 = vmatprep.subr.mxu1 %v5333_v18  ;;  %v5440_v2 = vld [vmem:[#allocation11 + $0xec0] sm:$0xff]  ;;  %v5359_v18 = vld [vmem:[#allocation11 + $0xc38] sm:$0xff] }
 0x5f2   :  { %5920 = vmatprep.subr.mxu0 %v5381_v16  ;;  %5898 = vmatpush2.msra.mxu1 %v5332_v54  ;;  %v5439_v42 = vld [vmem:[#allocation11 + $0xeb8] sm:$0xff]  ;;  %v5358_v16 = vld [vmem:[#allocation11 + $0xc30] sm:$0xff] }
 0x5f3   :  { %5921 = vmatpush1.msra.mxu0 %v5380_v30  ;;  %5899 = vmatprep.subr.mxu1 %v5331_v12  ;;  %v5438_v54 = vld [vmem:[#allocation11 + $0xeb0] sm:$0xff]  ;;  %v5357_v30 = vld [vmem:[#allocation11 + $0xc28] sm:$0xff] }
 0x5f4   :  { %5922 = vmatprep.subr.mxu0 %v5379_v49  ;;  %5900 = vmatpush2.msra.mxu1 %v5330_v40  ;;  %v5437_v12 = vld [vmem:[#allocation11 + $0xea8] sm:$0xff]  ;;  %v5356_v49 = vld [vmem:[#allocation11 + $0xc20] sm:$0xff] }
 0x5f5   :  { %5923 = vmatpush1.msra.mxu0 %v5378_v48  ;;  %5901 = vmatprep.subr.mxu1 %v5329_v60  ;;  %v5436_v40 = vld [vmem:[#allocation11 + $0xea0] sm:$0xff]  ;;  %v5355_v48 = vld [vmem:[#allocation11 + $0xc18] sm:$0xff] }
 0x5f6   :  { %5924 = vmatprep.subr.mxu0 %v5377_v63  ;;  %5902 = vmatpush2.msra.mxu1 %v5328_v46  ;;  %v5435_v60 = vld [vmem:[#allocation11 + $0xe98] sm:$0xff]  ;;  %v5354_v63 = vld [vmem:[#allocation11 + $0xc10] sm:$0xff] }
 0x5f7   :  { %5925 = vmatpush1.msra.mxu0 %v5376_v31  ;;  %5903 = vmatprep.subr.mxu1 %v5327_v3  ;;  %v5434_v46 = vld [vmem:[#allocation11 + $0xe90] sm:$0xff]  ;;  %v5353_v31 = vld [vmem:[#allocation11 + $0xc08] sm:$0xff] }
 0x5f8   :  { %5926 = vmatprep.subr.mxu0 %v5375_v56  ;;  %5904 = vmatpush2.msra.mxu1 %v5326_v5  ;;  %v5433_v3 = vld [vmem:[#allocation11 + $0xe88] sm:$0xff]  ;;  %v5432_v56 = vld [vmem:[#allocation11 + $0xe80] sm:$0xff]  ;;  %v5415_v5 = vld [vmem:[#allocation11 + $0xdf8] sm:$0xff] }
 0x5f9   :  { %5927 = vmatpush1.msra.mxu0 %v5374_v52  ;;  %5905 = vmatprep.subr.mxu1 %v5325_v41  ;;  %v6880_v47 = vpop.f32.mrf.mxu1  ;;  %v5414_v52 = vld [vmem:[#allocation11 + $0xdf0] sm:$0xff] }
 0x5fa   :  { %5928 = vmatprep.subr.mxu0 %v5373_v53  ;;  %5906 = vmatpush2.msra.mxu1 %v5324_v51  ;;  %v5430_v41 = vld [vmem:[#allocation11 + $0xe70] sm:$0xff]  ;;  %v5429_v53 = vld [vmem:[#allocation11 + $0xe68] sm:$0xff]  ;;  %v5412_v51 = vld [vmem:[#allocation11 + $0xde0] sm:$0xff] }
 0x5fb   :  { %5929 = vmatpush1.msra.mxu0 %v5372_v62  ;;  %5907 = vmatprep.subr.mxu1 %v5323_v11  ;;  %v4949_v32 = vpop.f32.mrf.mxu1  ;;  %v5428_v62 = vld [vmem:[#allocation11 + $0xe60] sm:$0xff]  ;;  %v5411_v11 = vld [vmem:[#allocation11 + $0xdd8] sm:$0xff] }
 0x5fc   :  { %5930 = vmatprep.subr.mxu0 %v5371_v15  ;;  %5908 = vmatpush2.msra.mxu1 %v5322_v27  ;;  %v4950_v37 = vadd.f32 %v4949_v32, %v4879_v22  ;;  %v5427_v15 = vld [vmem:[#allocation11 + $0xe58] sm:$0xff]  ;;  %v5410_v27 = vld [vmem:[#allocation11 + $0xdd0] sm:$0xff]  ;;  %v5404_v32 = vld [vmem:[#allocation11 + $0xda0] sm:$0xff] }
 0x5fd   :  { %5931 = vmatpush1.msra.mxu0 %v5370_v35  ;;  %5909 = vmatprep.subr.mxu1 %v5321_v36  ;;  %v5409_v35 = vld [vmem:[#allocation11 + $0xdc8] sm:$0xff]  ;;  %v5420_v22 = vld [vmem:[#allocation11 + $0xe20] sm:$0xff] }
 0x5fe   :  { %5932 = vmatprep.subr.mxu0 %v5369_v23  ;;  %5910 = vmatpush2.msra.mxu1 %v5320_v20  ;;  %v4967_v28 = vmax.f32 %v4950_v37, 0.0  ;;  %v5425_v36 = vld [vmem:[#allocation11 + $0xe48] sm:$0xff]  ;;  %v5424_v23 = vld [vmem:[#allocation11 + $0xe40] sm:$0xff]  ;;  %v5407_v20 = vld [vmem:[#allocation11 + $0xdb8] sm:$0xff] }
 0x5ff   :  { %5933 = vmatpush1.msra.mxu0 %v5368_v4  ;;  %5912 = vmatmul.mubr.f32.vlgmr.msra.gmra.mxu1 %v4962_v33  ;;  %v5406_v4 = vld [vmem:[#allocation11 + $0xdb0] sm:$0xff]  ;;  %v5401_v37 = vld [vmem:[#allocation11 + $0xd88] sm:$0xff] }
 0x600   :  { %5934 = vmatprep.subr.mxu0 %v5367_v26  ;;  %5989 = vmatprep.subr.mxu1 %v5447_v39  ;;  %v5422_v33 = vld [vmem:[#allocation11 + $0xe30] sm:$0xff]  ;;  %v5405_v26 = vld [vmem:[#allocation11 + $0xda8] sm:$0xff] }
 0x601   :  { %5935 = vmatpush1.msra.mxu0 %v5366_v13  ;;  %5990 = vmatpush1.msra.mxu1 %v5446_v57  ;;  %v5421_v39 = vld [vmem:[#allocation11 + $0xe28] sm:$0xff]  ;;  %v5403_v13 = vld [vmem:[#allocation11 + $0xd98] sm:$0xff] }
 0x602   :  { %5936 = vmatprep.subr.mxu0 %v5365_v9  ;;  %5991 = vmatprep.subr.mxu1 %v5445_v24  ;;  %v5419_v57 = vld [vmem:[#allocation11 + $0xe18] sm:$0xff]  ;;  %v5402_v9 = vld [vmem:[#allocation11 + $0xd90] sm:$0xff] }
 0x603   :  { %5937 = vmatpush1.msra.mxu0 %v5364_v19  ;;  %5992 = vmatpush1.msra.mxu1 %v5444_v10  ;;  %v5418_v24 = vld [vmem:[#allocation11 + $0xe10] sm:$0xff]  ;;  %v5417_v19 = vld [vmem:[#allocation11 + $0xe08] sm:$0xff]  ;;  %v5400_v10 = vld [vmem:[#allocation11 + $0xd80] sm:$0xff] }
 0x604   :  { %5938 = vmatprep.subr.mxu0 %v5363_v43  ;;  %5993 = vmatprep.subr.mxu1 %v5443_v17  ;;  %v5416_v43 = vld [vmem:[#allocation11 + $0xe00] sm:$0xff]  ;;  %v5399_v17 = vld [vmem:[#allocation11 + $0xd78] sm:$0xff] }
 0x605   :  { %5939 = vmatpush1.msra.mxu0 %v5362_v50  ;;  %5994 = vmatpush1.msra.mxu1 %v5442_v34  ;;  %v5479_v50 = vld [vmem:[#allocation11 + $0xff8] sm:$0xff]  ;;  %v5398_v34 = vld [vmem:[#allocation11 + $0xd70] sm:$0xff] }
 0x606   :  { %5940 = vmatprep.subr.mxu0 %v5361_v14  ;;  %5995 = vmatprep.subr.mxu1 %v5441_v61  ;;  %v5478_v14 = vld [vmem:[#allocation11 + $0xff0] sm:$0xff]  ;;  %v5397_v61 = vld [vmem:[#allocation11 + $0xd68] sm:$0xff] }
 0x607   :  { %5941 = vmatpush1.msra.mxu0 %v5360_v7  ;;  %5996 = vmatpush1.msra.mxu1 %v5440_v2  ;;  %v5396_v7 = vld [vmem:[#allocation11 + $0xd60] sm:$0xff] }
 0x608   :  { %6053 = vmatprep.mubr.f32.mxu1 %v4967_v28  ;;  %5942 = vmatprep.subr.mxu0 %v5359_v18  ;;  %v5477_v28 = vld [vmem:[#allocation11 + $0xfe8] sm:$0xff]  ;;  %v5476_v2 = vld [vmem:[#allocation11 + $0xfe0] sm:$0xff]  ;;  %v5395_v18 = vld [vmem:[#allocation11 + $0xd58] sm:$0xff] }
 0x609   :  { %5997 = vmatprep.subr.mxu1 %v5439_v42  ;;  %5943 = vmatpush1.msra.mxu0 %v5358_v16  ;;  %v5475_v42 = vld [vmem:[#allocation11 + $0xfd8] sm:$0xff]  ;;  %v5394_v16 = vld [vmem:[#allocation11 + $0xd50] sm:$0xff] }
 0x60a   :  { %5998 = vmatpush1.msra.mxu1 %v5438_v54  ;;  %5944 = vmatprep.subr.mxu0 %v5357_v30  ;;  %v5474_v54 = vld [vmem:[#allocation11 + $0xfd0] sm:$0xff]  ;;  %v5393_v30 = vld [vmem:[#allocation11 + $0xd48] sm:$0xff] }
 0x60b   :  { %5999 = vmatprep.subr.mxu1 %v5437_v12  ;;  %5945 = vmatpush1.msra.mxu0 %v5356_v49  ;;  %v5473_v12 = vld [vmem:[#allocation11 + $0xfc8] sm:$0xff]  ;;  %v5392_v49 = vld [vmem:[#allocation11 + $0xd40] sm:$0xff] }
 0x60c   :  { %6000 = vmatpush1.msra.mxu1 %v5436_v40  ;;  %5946 = vmatprep.subr.mxu0 %v5355_v48  ;;  %v5472_v40 = vld [vmem:[#allocation11 + $0xfc0] sm:$0xff]  ;;  %v5391_v48 = vld [vmem:[#allocation11 + $0xd38] sm:$0xff] }
 0x60d   :  { %6001 = vmatprep.subr.mxu1 %v5435_v60  ;;  %5947 = vmatpush1.msra.mxu0 %v5354_v63  ;;  %v5471_v60 = vld [vmem:[#allocation11 + $0xfb8] sm:$0xff]  ;;  %v5390_v63 = vld [vmem:[#allocation11 + $0xd30] sm:$0xff] }
 0x60e   :  { %6002 = vmatpush1.msra.mxu1 %v5434_v46  ;;  %5948 = vmatprep.subr.mxu0 %v5353_v31  ;;  %v5470_v46 = vld [vmem:[#allocation11 + $0xfb0] sm:$0xff]  ;;  %v5389_v31 = vld [vmem:[#allocation11 + $0xd28] sm:$0xff] }
 0x60f   :  { %6003 = vmatprep.subr.mxu1 %v5433_v3  ;;  %5949 = vmatpush1.msra.mxu0 %v5352_v45  ;;  %v5469_v3 = vld [vmem:[#allocation11 + $0xfa8] sm:$0xff]  ;;  %v5388_v45 = vld [vmem:[#allocation11 + $0xd20] sm:$0xff] }
 0x610   :  { %6004 = vmatpush1.msra.mxu1 %v5432_v56  ;;  %5950 = vmatprep.subr.mxu0 %v5415_v5  ;;  %v5468_v56 = vld [vmem:[#allocation11 + $0xfa0] sm:$0xff]  ;;  %v5387_v5 = vld [vmem:[#allocation11 + $0xd18] sm:$0xff] }
 0x611   :  { %6005 = vmatprep.subr.mxu1 %v5431_v29  ;;  %5951 = vmatpush2.msra.mxu0 %v5414_v52  ;;  %v5467_v29 = vld [vmem:[#allocation11 + $0xf98] sm:$0xff]  ;;  %v5386_v52 = vld [vmem:[#allocation11 + $0xd10] sm:$0xff] }
 0x612   :  { %6006 = vmatpush1.msra.mxu1 %v5430_v41  ;;  %5952 = vmatprep.subr.mxu0 %v5413_v21  ;;  %v5466_v41 = vld [vmem:[#allocation11 + $0xf90] sm:$0xff]  ;;  %v5385_v21 = vld [vmem:[#allocation11 + $0xd08] sm:$0xff] }
 0x613   :  { %6007 = vmatprep.subr.mxu1 %v5429_v53  ;;  %5953 = vmatpush2.msra.mxu0 %v5412_v51  ;;  %v5465_v53 = vld [vmem:[#allocation11 + $0xf88] sm:$0xff]  ;;  %v5384_v51 = vld [vmem:[#allocation11 + $0xd00] sm:$0xff] }
 0x614   :  { %6008 = vmatpush1.msra.mxu1 %v5428_v62  ;;  %5954 = vmatprep.subr.mxu0 %v5411_v11  ;;  %v5464_v62 = vld [vmem:[#allocation11 + $0xf80] sm:$0xff]  ;;  %v4964_v11 = vmax.f32 %v6847_v38, 0.0  ;;  %v5457_v38 = vld [vmem:[#allocation11 + $0xf48] sm:$0xff] }
 0x615   :  { %6009 = vmatprep.subr.mxu1 %v5427_v15  ;;  %5955 = vmatpush2.msra.mxu0 %v5410_v27  ;;  %v5463_v15 = vld [vmem:[#allocation11 + $0xf78] sm:$0xff]  ;;  %v5462_v27 = vld [vmem:[#allocation11 + $0xf70] sm:$0xff] }
 0x616   :  { %6010 = vmatpush1.msra.mxu1 %v5426_v1  ;;  %5956 = vmatprep.subr.mxu0 %v5409_v35  ;;  %v5461_v1 = vld [vmem:[#allocation11 + $0xf68] sm:$0xff]  ;;  %v6256_v35 = vld [vmem:[#allocation10 + $0x8] sm:$0xff] }
 0x617   :  { %6011 = vmatprep.subr.mxu1 %v5425_v36  ;;  %5957 = vmatpush2.msra.mxu0 %v5408_v55  ;;  %v2659_v36 = vrot.slane %v6256_v35, %v6638_v58  ;;  %v5460_v55 = vld [vmem:[#allocation11 + $0xf60] sm:$0xff]  ;;  %v5453_v58 = vld [vmem:[#allocation11 + $0xf28] sm:$0xff] }
 0x618   :  { %6012 = vmatpush1.msra.mxu1 %v5424_v23  ;;  %5958 = vmatprep.subr.mxu0 %v5407_v20  ;;  %v5459_v23 = vld [vmem:[#allocation11 + $0xf58] sm:$0xff]  ;;  %v5458_v20 = vld [vmem:[#allocation11 + $0xf50] sm:$0xff] }
 0x619   :  { %6013 = vmatprep.subr.mxu1 %v5423_v0  ;;  %5959 = vmatpush2.msra.mxu0 %v5406_v4  ;;  %v4735_v0 = vadd.f32 %v6872_v25, %v2659_v36  ;;  %v5456_v4 = vld [vmem:[#allocation11 + $0xf40] sm:$0xff]  ;;  %v5450_v25 = vld [vmem:[#allocation11 + $0xf10] sm:$0xff] }
 0x61a   :  { %6014 = vmatpush1.msra.mxu1 %v5422_v33  ;;  %5960 = vmatprep.subr.mxu0 %v5405_v26  ;;  %v5455_v33 = vld [vmem:[#allocation11 + $0xf38] sm:$0xff] }
 0x61b   :  { %6015 = vmatprep.subr.mxu1 %v5421_v39  ;;  %5961 = vmatpush2.msra.mxu0 %v5404_v32  ;;  %v4806_v26 = vadd.f32 %v6874_v44, %v4735_v0  ;;  %v5454_v39 = vld [vmem:[#allocation11 + $0xf30] sm:$0xff] }
 0x61c   :  { %6016 = vmatpush1.msra.mxu1 %v5420_v22  ;;  %5962 = vmatprep.subr.mxu0 %v5403_v13  ;;  %v5452_v22 = vld [vmem:[#allocation11 + $0xf20] sm:$0xff]  ;;  %v5451_v13 = vld [vmem:[#allocation11 + $0xf18] sm:$0xff] }
 0x61d   :  { %6017 = vmatprep.subr.mxu1 %v5419_v57  ;;  %5963 = vmatpush2.msra.mxu0 %v5402_v9  ;;  %v4877_v32 = vadd.f32 %v6878_v59, %v4806_v26  ;;  %v5449_v9 = vld [vmem:[#allocation11 + $0xf08] sm:$0xff]  ;;  %v6092_v59 = vld [vmem:[#allocation14 + $0xf0] sm:$0xff] }
 0x61e   :  { %6018 = vmatpush1.msra.mxu1 %v5418_v24  ;;  %5964 = vmatprep.subr.mxu0 %v5401_v37  ;;  %v5448_v24 = vld [vmem:[#allocation11 + $0xf00] sm:$0xff] }
 0x61f   :  { %6019 = vmatprep.subr.mxu1 %v5417_v19  ;;  %5965 = vmatpush2.msra.mxu0 %v5400_v10  ;;  %v4948_v57 = vadd.f32 %v6880_v47, %v4877_v32  ;;  %v6093_v37 = vld [vmem:[#allocation14 + $0xf8] sm:$0xff]  ;;  %v6076_v10 = vld [vmem:[#allocation14 + $0x70] sm:$0xff]  ;;  %v6075_v47 = vld [vmem:[#allocation14 + $0x68] sm:$0xff] }
 0x620   :  { %6020 = vmatpush1.msra.mxu1 %v5416_v43  ;;  %5966 = vmatprep.subr.mxu0 %v5399_v17  ;;  %v6077_v19 = vld [vmem:[#allocation14 + $0x78] sm:$0xff]  ;;  %v6091_v43 = vld [vmem:[#allocation14 + $0xe8] sm:$0xff]  ;;  %v6090_v17 = vld [vmem:[#allocation14 + $0xe0] sm:$0xff] }
 0x621   :  { %6021 = vmatprep.subr.mxu1 %v5479_v50  ;;  %5967 = vmatpush2.msra.mxu0 %v5398_v34  ;;  %v4966_v44 = vmax.f32 %v4948_v57, 0.0  ;;  %v6074_v50 = vld [vmem:[#allocation14 + $0x60] sm:$0xff]  ;;  %v6089_v34 = vld [vmem:[#allocation14 + $0xd8] sm:$0xff] }
 0x622   :  { %6022 = vmatpush2.msra.mxu1 %v5478_v14  ;;  %5968 = vmatprep.subr.mxu0 %v5397_v61  ;;  %v6073_v14 = vld [vmem:[#allocation14 + $0x58] sm:$0xff]  ;;  %v6088_v61 = vld [vmem:[#allocation14 + $0xd0] sm:$0xff] }
 0x623   :  { %6023 = vmatprep.subr.mxu1 %v5477_v28  ;;  %5969 = vmatpush2.msra.mxu0 %v5396_v7  ;;  %v6072_v28 = vld [vmem:[#allocation14 + $0x50] sm:$0xff]  ;;  %v6087_v7 = vld [vmem:[#allocation14 + $0xc8] sm:$0xff] }
 0x624   :  { %6024 = vmatpush2.msra.mxu1 %v5476_v2  ;;  %5970 = vmatprep.subr.mxu0 %v5395_v18  ;;  %v6071_v2 = vld [vmem:[#allocation14 + $0x48] sm:$0xff]  ;;  %v6086_v18 = vld [vmem:[#allocation14 + $0xc0] sm:$0xff] }
 0x625   :  { %6025 = vmatprep.subr.mxu1 %v5475_v42  ;;  %5971 = vmatpush2.msra.mxu0 %v5394_v16  ;;  %v6070_v42 = vld [vmem:[#allocation14 + $0x40] sm:$0xff]  ;;  %v6085_v16 = vld [vmem:[#allocation14 + $0xb8] sm:$0xff] }
 0x626   :  { %6026 = vmatpush2.msra.mxu1 %v5474_v54  ;;  %5972 = vmatprep.subr.mxu0 %v5393_v30  ;;  %v6069_v54 = vld [vmem:[#allocation14 + $0x38] sm:$0xff]  ;;  %v6084_v30 = vld [vmem:[#allocation14 + $0xb0] sm:$0xff] }
 0x627   :  { %6027 = vmatprep.subr.mxu1 %v5473_v12  ;;  %5973 = vmatpush2.msra.mxu0 %v5392_v49  ;;  %v6068_v12 = vld [vmem:[#allocation14 + $0x30] sm:$0xff]  ;;  %v6083_v49 = vld [vmem:[#allocation14 + $0xa8] sm:$0xff] }
 0x628   :  { %6028 = vmatpush2.msra.mxu1 %v5472_v40  ;;  %5974 = vmatprep.subr.mxu0 %v5391_v48  ;;  %v6067_v40 = vld [vmem:[#allocation14 + $0x28] sm:$0xff]  ;;  %v6082_v48 = vld [vmem:[#allocation14 + $0xa0] sm:$0xff] }
 0x629   :  { %6029 = vmatprep.subr.mxu1 %v5471_v60  ;;  %5975 = vmatpush2.msra.mxu0 %v5390_v63  ;;  %v6066_v60 = vld [vmem:[#allocation14 + $0x20] sm:$0xff]  ;;  %v6081_v63 = vld [vmem:[#allocation14 + $0x98] sm:$0xff] }
 0x62a   :  { %6030 = vmatpush2.msra.mxu1 %v5470_v46  ;;  %5976 = vmatprep.subr.mxu0 %v5389_v31  ;;  %v6065_v46 = vld [vmem:[#allocation14 + $0x18] sm:$0xff]  ;;  %v6080_v31 = vld [vmem:[#allocation14 + $0x90] sm:$0xff] }
 0x62b   :  { %6031 = vmatprep.subr.mxu1 %v5469_v3  ;;  %5977 = vmatpush2.msra.mxu0 %v5388_v45  ;;  %v6064_v3 = vld [vmem:[#allocation14 + $0x10] sm:$0xff]  ;;  %v6079_v45 = vld [vmem:[#allocation14 + $0x88] sm:$0xff] }
 0x62c   :  { %6032 = vmatpush2.msra.mxu1 %v5468_v56  ;;  %5978 = vmatprep.subr.mxu0 %v5387_v5  ;;  %v6063_v56 = vld [vmem:[#allocation14 + $0x8] sm:$0xff]  ;;  %v6078_v5 = vld [vmem:[#allocation14 + $0x80] sm:$0xff] }
 0x62d   :  { %6033 = vmatprep.subr.mxu1 %v5467_v29  ;;  %5979 = vmatpush2.msra.mxu0 %v5386_v52  ;;  %v6062_v29 = vld [vmem:[#allocation14] sm:$0xff]  ;;  %v5558_v52 = vpop.f32.mrf.mxu0 }
 0x62e   :  { %6034 = vmatpush2.msra.mxu1 %v5466_v41  ;;  %5980 = vmatprep.subr.mxu0 %v5385_v21 }
 0x62f   :  { %6035 = vmatprep.subr.mxu1 %v5465_v53  ;;  %5981 = vmatpush2.msra.mxu0 %v5384_v51  ;;  %v5560_v41 = vpop.f32.mrf.mxu0  ;;  %v5480_v53 = vld [vmem:[#allocation13] sm:$0x3] }
 0x630   :  { %6036 = vmatpush2.msra.mxu1 %v5464_v62  ;;  %5983 = vmatmul.mubr.f32.vlgmr.msra.gmra.mxu0 %v4964_v11  ;;  %v5485_v62 = vrot.slane %v5480_v53, %v6581_v6 }
 0x631   :  { %6037 = vmatprep.subr.mxu1 %v5463_v15  ;;  %6196 = vmatprep.subr.mxu0 %v6093_v37  ;;  %v5489_v15 = vrot.slane %v5480_v53, %v6586_v8 }
 0x632   :  { %6038 = vmatpush2.msra.mxu1 %v5462_v27  ;;  %6197 = vmatpush3.msra.mxu0 %v6077_v19  ;;  %v5559_v35 = vadd.f32 %v5558_v52, %v5485_v62 }
 0x633   :  { %6039 = vmatprep.subr.mxu1 %v5461_v1  ;;  %6198 = vmatprep.subr.mxu0 %v6092_v59 }
 0x634   :  { %6040 = vmatpush2.msra.mxu1 %v5460_v55  ;;  %6199 = vmatpush3.msra.mxu0 %v6076_v10  ;;  %v5561_v55 = vadd.f32 %v5560_v41, %v5489_v15 }
 0x635   :  { %6041 = vmatprep.subr.mxu1 %v5459_v23  ;;  %6200 = vmatprep.subr.mxu0 %v6091_v43 }
 0x636   :  { %6042 = vmatpush2.msra.mxu1 %v5458_v20  ;;  %6201 = vmatpush3.msra.mxu0 %v6075_v47 }
 0x637   :  { %6043 = vmatprep.subr.mxu1 %v5457_v38  ;;  %6202 = vmatprep.subr.mxu0 %v6090_v17  ;;  %v6195_v17 = vld [vmem:[#allocation16] ss:$0 sm:$0xff] }
 0x638   :  { %6044 = vmatpush2.msra.mxu1 %v5456_v4  ;;  %6203 = vmatpush3.msra.mxu0 %v6074_v50 }
 0x639   :  { %6045 = vmatprep.subr.mxu1 %v5455_v33  ;;  %6204 = vmatprep.subr.mxu0 %v6089_v34 }
 0x63a   :  { %6046 = vmatpush2.msra.mxu1 %v5454_v39  ;;  %6205 = vmatpush3.msra.mxu0 %v6073_v14 }
 0x63b   :  { %6047 = vmatprep.subr.mxu1 %v5453_v58  ;;  %6206 = vmatprep.subr.mxu0 %v6088_v61  ;;  %v5629_v21 = vpop.f32.mrf.mxu1 }
 0x63c   :  { %6048 = vmatpush2.msra.mxu1 %v5452_v22  ;;  %6207 = vmatpush3.msra.mxu0 %v6072_v28  ;;  %v5630_v23 = vadd.f32 %v5629_v21, %v5559_v35 }
 0x63d   :  { %6049 = vmatprep.subr.mxu1 %v5451_v13  ;;  %6208 = vmatprep.subr.mxu0 %v6087_v7  ;;  %v5631_v11 = vpop.f32.mrf.mxu1 }
 0x63e   :  { %6050 = vmatpush2.msra.mxu1 %v5450_v25  ;;  %6209 = vmatpush3.msra.mxu0 %v6071_v2  ;;  %v5632_v38 = vadd.f32 %v5631_v11, %v5561_v55 }
 0x63f   :  { %6051 = vmatprep.subr.mxu1 %v5449_v9  ;;  %6210 = vmatprep.subr.mxu0 %v6086_v18 }
 0x640   :  { %6052 = vmatpush2.msra.mxu1 %v5448_v24  ;;  %6211 = vmatpush3.msra.mxu0 %v6070_v42 }
 0x641   :  { %6054 = vmatmul.mubr.f32.vlgmr.msra.gmra.mxu1 %v4966_v44  ;;  %6212 = vmatprep.subr.mxu0 %v6085_v16 }
 0x642   :  { %6213 = vmatpush3.msra.mxu0 %v6069_v54 }
 0x643   :  { %6214 = vmatprep.subr.mxu0 %v6084_v30 }
 0x644   :  { %6215 = vmatpush3.msra.mxu0 %v6068_v12 }
 0x645   :  { %6216 = vmatprep.subr.mxu0 %v6083_v49 }
 0x646   :  { %6217 = vmatpush3.msra.mxu0 %v6067_v40 }
 0x647   :  { %6218 = vmatprep.subr.mxu0 %v6082_v48 }
 0x648   :  { %6219 = vmatpush3.msra.mxu0 %v6066_v60 }
 0x649   :  { %6220 = vmatprep.subr.mxu0 %v6081_v63 }
 0x64a   :  { %6221 = vmatpush3.msra.mxu0 %v6065_v46 }
 0x64b   :  { %6222 = vmatprep.subr.mxu0 %v6080_v31 }
 0x64c   :  { %6223 = vmatpush3.msra.mxu0 %v6064_v3 }
 0x64d   :  { %6224 = vmatprep.subr.mxu0 %v6079_v45 }
 0x64e   :  { %6225 = vmatpush3.msra.mxu0 %v6063_v56 }
 0x64f   :  { %6226 = vmatprep.subr.mxu0 %v6078_v5 }
 0x650   :  { %6227 = vmatpush3.msra.mxu0 %v6062_v29 }
 0x66c   :  { %v5700_v51 = vpop.f32.mrf.mxu0 }
 0x66d   :  { %v5701_v0 = vadd.f32 %v5700_v51, %v5630_v23 }
 0x66e   :  { %v5702_v27 = vpop.f32.mrf.mxu0 }
 0x66f   :  { %v5703_v26 = vadd.f32 %v5702_v27, %v5632_v38 }
 0x67d   :  { %v5771_v1 = vpop.f32.mrf.mxu1 }
 0x67e   :  { %v5772_v39 = vadd.f32 %v5771_v1, %v5701_v0 }
 0x67f   :  { %v5773_v20 = vpop.f32.mrf.mxu1 }
 0x680   :  { %v5774_v32 = vadd.f32 %v5773_v20, %v5703_v26 }
 0x6ae   :  { %v5842_v36 = vpop.f32.mrf.mxu0 }
 0x6af   :  { %v5843_v22 = vadd.f32 %v5842_v36, %v5772_v39 }
 0x6b0   :  { %v5844_v4 = vpop.f32.mrf.mxu0 }
 0x6b1   :  { %v5845_v13 = vadd.f32 %v5844_v4, %v5774_v32 }
 0x6bf   :  { %v5913_v33 = vpop.f32.mrf.mxu1 }
 0x6c0   :  { %v5914_v57 = vadd.f32 %v5913_v33, %v5843_v22 }
 0x6c1   :  { %v5915_v6 = vpop.f32.mrf.mxu1 }
 0x6c2   :  { %v5916_v25 = vadd.f32 %v5915_v6, %v5845_v13 }
 0x6f0   :  { %v5984_v58 = vpop.f32.mrf.mxu0 }
 0x6f1   :  { %v5985_v9 = vadd.f32 %v5984_v58, %v5914_v57 }
 0x6f2   :  { %v5986_v8 = vpop.f32.mrf.mxu0 }
 0x6f3   :  { %v5987_v44 = vadd.f32 %v5986_v8, %v5916_v25 }
 0x701   :  { %v6055_v24 = vpop.f32.mrf.mxu1 }
 0x702   :  { %v6056_v37 = vadd.f32 %v6055_v24, %v5985_v9 }
 0x703   :  { %v6057_v19 = vpop.f32.mrf.mxu1 }
 0x704   :  { %v6058_v59 = vadd.f32 %v6057_v19, %v5987_v44  ;;  %v6060_v43 = vmax.f32 %v6056_v37, 0.0 }
 0x706   :  { %v6061_v10 = vmax.f32 %v6058_v59, 0.0 }
 0x708   :  { %6165 = vmatprep.mubr.f32.mxu0 %v6061_v10 }
 0x709   :  { %6166 = vmatmul.mubr.f32.vlgmr.msra.gmra.mxu0 %v6060_v43 }
 0x7c9   :  { %v6228_v47 = vpop.f32.mrf.mxu0 }
 0x7cb   :  { %v6229_v50 = vpop.f32.mrf.mxu0 }
 0x7cc   :  { %v6230_v34 = vadd.f32 %v6229_v50, %v6228_v47 }
 0x7ce   :  { %v6168_v14 = vadd.f32 %v6230_v34, %v6195_v17 }
 0x7d0   :  { %6171 = vst [vmem:[#allocation17] sm:$0xff] %v6168_v14 }
 0x7d1   :  { %6448 = shalt.err (!%p6445_p7)
}
 0x7d2   :  { %6181 = dma.vmem_to_hbm [thread:$0]  %s6179_s8, 128, %s6903_s9, [#allocation4]  }
 0x7d3   :  { %6467 = dma.done.wait [#allocation4], 128  }
 0x7d4   :  { %6468 = vsyncadd [#allocation4], 4294967168 }
 0x7d5   :  { %6185 = vsyncpa [#allocation3], 1 }
 0x7d6   :  { %6186 = vsyncpa [#allocation6], 1 }
 0x7d7   :  { %6187 = vsyncpa [#allocation9], 1 }
 0x7d8   :  { %6188 = vsyncpa [#allocation12], 1 }
 0x7d9   :  { %6189 = vsyncpa [#allocation15], 1 }
 0x7da   :  { %6190 = vsyncpa [#allocation4], 1 }

</bundles_post_ra>
